<compile_context>
chip_gen: v6e
topology: v6e:2x2x1
jax: 0.10.0
libtpu: 0.0.40
codegen_flags: <defaults>
</compile_context>

<pallas_src>
import functools

import jax
import jax.numpy as jnp
from jax.experimental import pallas as pl
from jax.experimental.pallas import tpu as pltpu


# bf16 conv-matmul inputs by default (native MXU rate on all three generations);
# set to jnp.float32 for bit-close matching of the f32 PyTorch reference.
MATMUL_DTYPE = jnp.bfloat16


# ----------------------------------------------------------------------------
# In-kernel building blocks (operate on a VMEM-resident (H*W, C) sample)
# ----------------------------------------------------------------------------
def _norm_relu(x, g, b, *, norm, eps):
    """Per-sample normalization + ReLU on an (H*W, C) float32 tile.

    One-pass statistics: sum and sum-of-squares in a single sweep over the
    data (half the cross-lane reduction passes of the centered two-pass form).
    """
    if norm == "LN":
        # Custom LayerNorm of the reference: scalar mean/std over C*H*W,
        # UNBIASED std (n-1), eps added to the std (not inside the sqrt),
        # per-channel affine.  (Intentionally different from nn.LayerNorm.)
        n = x.shape[0] * x.shape[1]
        s = jnp.sum(x)
        ss = jnp.sum(x * x)
        mean = s / n
        var = jnp.maximum((ss - s * mean) / (n - 1), 0.0)
        y = (x - mean) * (1.0 / (jnp.sqrt(var) + eps))
        y = y * g + b
    elif norm == "IN":
        # nn.InstanceNorm2d(affine=False): per-channel stats over H*W,
        # biased variance, eps inside the sqrt.  gamma/beta are ignored.
        hw = x.shape[0]
        s = jnp.sum(x, axis=0, keepdims=True)
        ss = jnp.sum(x * x, axis=0, keepdims=True)
        mean = s / hw
        var = jnp.maximum(ss / hw - mean * mean, 0.0)
        y = (x - mean) * jax.lax.rsqrt(var + eps)
    else:
        raise NotImplementedError(f"norm_layer={norm!r} not supported")
    return jnp.maximum(y, 0.0)


def _conv3x3_reflect(h, w_ref, cb_ref, *, H, W, compute_dtype, fuse_kw):
    """ReflectionPad2d(1) + Conv2d(k=3, s=1) on a VMEM-resident sample.

    h: (H*W, C) float32 (row-major flattened NHWC sample).
    w_ref: (3, 3*C, Cout) ref -- kh major, (kw, Cin) merged on the K axis.
    cb_ref: (1, Cout) ref.

    Row (H) reflection is an aligned sublane concatenate (one guard row per
    side); column (W) reflection uses two hoisted +/-1 flat shifts of the
    whole padded buffer plus one edge-select each.  The taps accumulate in f32
    through the MXU, either as 3 fused K=3C dots (C % 128 == 0) or 9 K=C dots.
    """
    HW, C = h.shape
    L = HW + 2 * W                                   # rows -1 .. H of padded image

    h = h.astype(compute_dtype)                      # cast ONCE, before padded copies
    row_top = h[W:2 * W]                             # row 1   (reflection of row -1)
    row_bot = h[(H - 2) * W:(H - 1) * W]             # row H-2 (reflection of row H)
    # [guard, row_top, h, row_bot, guard]: guards keep the +/-1 flat shifts
    # in-bounds; their values are never selected (masked by the edge selects).
    hp_g = jnp.concatenate([row_top, row_top, h, row_bot, row_bot], axis=0)

    # Hoisted column shifts: 2 misaligned-sublane copies per conv, not 6.
    center_full = hp_g[W:W + L]                      # column j   (aligned slice)
    minus1_full = hp_g[W - 1:W - 1 + L]              # column j-1
    plus1_full = hp_g[W + 1:W + 1 + L]               # column j+1

    # Left/right border reflection, applied once on the full-length buffers.
    col = jax.lax.broadcasted_iota(jnp.int32, (L, 1), 0)
    col = (col & (W - 1)) if (W & (W - 1)) == 0 else (col % W)
    left_full = jnp.where(col == 0, plus1_full, minus1_full)       # kw = 0 tap
    right_full = jnp.where(col == W - 1, minus1_full, plus1_full)  # kw = 2 tap

    acc = None
    if fuse_kw:
        # K = 3*C per dot: fills the 256-wide v6e/v7x MXU (K=C=128 only
        # half-fills it) and cuts MXU pushes / f32 accumulate adds 3x.
        big = jnp.concatenate([left_full, center_full, right_full], axis=-1)
        for kh in range(3):
            d = jnp.dot(big[kh * W:kh * W + HW], w_ref[kh],
                        preferred_element_type=jnp.float32)
            acc = d + cb_ref[...] if acc is None else acc + d
    else:
        taps_full = (left_full, center_full, right_full)
        for kh in range(3):
            wk = w_ref[kh]                           # (3*C, Cout), compute dtype
            for kw in range(3):
                tap = taps_full[kw][kh * W:kh * W + HW]
                d = jnp.dot(tap, wk[kw * C:(kw + 1) * C, :],
                            preferred_element_type=jnp.float32)
                acc = d + cb_ref[...] if acc is None else acc + d
    return acc


def _resblock_kernel(x_ref, g1_ref, b1_ref, w1_ref, cb1_ref,
                     g2_ref, b2_ref, w2_ref, cb2_ref, o_ref,
                     *, H, W, eps, norm, compute_dtype, fuse_kw, block_b):
    """Whole ResBlock for `block_b` batch elements, fully fused in VMEM."""
    for b in range(block_b):                                    # static unroll
        x = x_ref[b].astype(jnp.float32)                        # (H*W, C)
        h = _norm_relu(x, g1_ref[...], b1_ref[...], norm=norm, eps=eps)
        h = _conv3x3_reflect(h, w1_ref, cb1_ref, H=H, W=W,
                             compute_dtype=compute_dtype, fuse_kw=fuse_kw)
        h = _norm_relu(h, g2_ref[...], b2_ref[...], norm=norm, eps=eps)
        h = _conv3x3_reflect(h, w2_ref, cb2_ref, H=H, W=W,
                             compute_dtype=compute_dtype, fuse_kw=fuse_kw)
        o_ref[b] = (x + h).astype(o_ref.dtype)                  # fused residual


# ----------------------------------------------------------------------------
# Host-side wrapper
# ----------------------------------------------------------------------------
def _vmem_limit_bytes(H, W, C, block_b, compute_itemsize):
    """Generation-aware VMEM request (v5e/v6e: 128 MiB, v7x: 64 MiB per TC)."""
    def pad8(n):
        return -(-n // 8) * 8

    def pad128(n):
        return -(-n // 128) * 128

    lanes = pad128(C)
    rows = pad8(H * W)
    rows_pad = pad8(H * W + 4 * W)               # padded working copy incl. guards
    io_tile = rows * lanes * 4                   # one (HW, C) f32 tile
    io = 2 * 2 * block_b * io_tile               # in + out, double-buffered
    wgt = 2 * 2 * 3 * pad8(3 * C) * lanes * compute_itemsize   # 2 weights, 2 bufs
    work = (4 * io_tile                          # x, h, acc, misc f32 temps
            + 6 * rows_pad * lanes * compute_itemsize          # hp_g + shifts + selects
            + rows_pad * pad128(3 * C) * compute_itemsize)     # fused (L, 3C) operand
    est = io + wgt + block_b * work + (1 << 20)  # + 1 MiB slack for params/misc

    try:
        phys = int(pltpu.get_tpu_info().vmem_capacity_bytes)
    except Exception:                            # unknown target: assume v7x (64 MiB)
        phys = 64 * 1024 * 1024
    budget = (phys * 3) // 4                     # leave compiler headroom
    if est > budget:
        raise NotImplementedError(
            "TODO(synk): per-block working set (~%d MiB) exceeds this "
            "generation's VMEM budget (~%d MiB); needs a two-pass norm with "
            "spatial tiling." % (est >> 20, budget >> 20))
    return int(min(budget, max(32 * 1024 * 1024, 2 * est)))


def resblock_forward(x, params, *, norm="LN", eps=1e-5,
                     compute_dtype=MATMUL_DTYPE, block_b=1):
    """ResBlock forward.  x: (B, H, W, C) NHWC."""
    B, H, W, C = x.shape
    assert H >= 2 and W >= 2, "ReflectionPad2d(1) needs spatial dims >= 2"
    assert B % block_b == 0, "batch must be divisible by block_b"
    # kw-tap fusion only when the lane axis is 128-aligned (v6e/v7x MXU fill);
    # for small C the unfused K=C path avoids unaligned lane concatenation.
    fuse_kw = (C % 128 == 0)

    xf = x.reshape(B, H * W, C)                  # trailing-dim merge: free for row-major

    g1 = params["norm1"]["gamma"].reshape(1, C).astype(jnp.float32)
    b1 = params["norm1"]["beta"].reshape(1, C).astype(jnp.float32)
    g2 = params["norm2"]["gamma"].reshape(1, C).astype(jnp.float32)
    b2 = params["norm2"]["beta"].reshape(1, C).astype(jnp.float32)
    # HWIO (3,3,C,Cout) -> (3, 3*C, Cout): kh major, (kw, Cin) merged on the K axis.
    w1 = params["conv1"]["w"].reshape(3, 3 * C, C).astype(compute_dtype)
    w2 = params["conv2"]["w"].reshape(3, 3 * C, C).astype(compute_dtype)
    cb1 = params["conv1"]["b"].reshape(1, C).astype(jnp.float32)
    cb2 = params["conv2"]["b"].reshape(1, C).astype(jnp.float32)

    act_spec = pl.BlockSpec((block_b, H * W, C), lambda i: (i, 0, 0))
    vec_spec = pl.BlockSpec((1, C), lambda i: (0, 0))
    w_spec = pl.BlockSpec((3, 3 * C, C), lambda i: (0, 0, 0))

    kernel = functools.partial(
        _resblock_kernel, H=H, W=W, eps=eps, norm=norm,
        compute_dtype=compute_dtype, fuse_kw=fuse_kw, block_b=block_b)
    out = pl.pallas_call(
        kernel,
        out_shape=jax.ShapeDtypeStruct((B, H * W, C), x.dtype),
        grid=(B // block_b,),
        in_specs=[act_spec, vec_spec, vec_spec, w_spec, vec_spec,
                  vec_spec, vec_spec, w_spec, vec_spec],
        out_specs=act_spec,
        compiler_params=pltpu.CompilerParams(
            dimension_semantics=("parallel",),   # B>=2 covers both v7x TCs
            vmem_limit_bytes=_vmem_limit_bytes(
                H, W, C, block_b, jnp.dtype(compute_dtype).itemsize),
        ),
    )(xf, g1, b1, w1, cb1, g2, b2, w2, cb2)
    return out.reshape(B, H, W, C)


# ----------------------------------------------------------------------------
# Pure-JAX reference (for self-validation) and deterministic parameter init
# ----------------------------------------------------------------------------
def _norm_relu_ref(x, gamma, beta, norm, eps=1e-5):
    B = x.shape[0]
    if norm == "LN":
        xf = x.reshape(B, -1)
        mean = xf.mean(axis=1).reshape(B, 1, 1, 1)
        std = jnp.std(xf, axis=1, ddof=1).reshape(B, 1, 1, 1)
        y = (x - mean) / (std + eps)
        y = y * gamma.reshape(1, 1, 1, -1) + beta.reshape(1, 1, 1, -1)
    elif norm == "IN":
        mean = x.mean(axis=(1, 2), keepdims=True)
        var = x.var(axis=(1, 2), keepdims=True)
        y = (x - mean) * jax.lax.rsqrt(var + eps)
    else:
        raise NotImplementedError(norm)
    return jnp.maximum(y, 0.0)


def _conv3x3_ref(x, w_hwio, b):
    xp = jnp.pad(x, ((0, 0), (1, 1), (1, 1), (0, 0)), mode="reflect")
    y = jax.lax.conv_general_dilated(
        xp, w_hwio, window_strides=(1, 1), padding="VALID",
        dimension_numbers=("NHWC", "HWIO", "NHWC"))
    return y + b.reshape(1, 1, 1, -1)


def resblock_reference(x, params, norm, eps=1e-5):
    h = _norm_relu_ref(x, params["norm1"]["gamma"], params["norm1"]["beta"], norm, eps)
    h = _conv3x3_ref(h, params["conv1"]["w"], params["conv1"]["b"])
    h = _norm_relu_ref(h, params["norm2"]["gamma"], params["norm2"]["beta"], norm, eps)
    h = _conv3x3_ref(h, params["conv2"]["w"], params["conv2"]["b"])
    return x + h


def init_resblock_params(key, dim):
    """Deterministic synthetic init (conv: scaled normal + small uniform bias;
    LayerNorm: gamma ~ U[0,1), beta = 0 — matching the custom LayerNorm init).
    The norm params are ignored on the 'IN' (affine=False) path."""
    k1, k2, k3, k4, k5, k6 = jax.random.split(key, 6)
    fan_in = 9 * dim
    wstd = (2.0 / fan_in) ** 0.5
    bb = 1.0 / (fan_in ** 0.5)
    return {
        "norm1": {"gamma": jax.random.uniform(k5, (dim,), jnp.float32),
                  "beta": jnp.zeros((dim,), jnp.float32)},
        "conv1": {"w": jax.random.normal(k1, (3, 3, dim, dim), jnp.float32) * wstd,
                  "b": jax.random.uniform(k2, (dim,), jnp.float32, minval=-bb, maxval=bb)},
        "norm2": {"gamma": jax.random.uniform(k6, (dim,), jnp.float32),
                  "beta": jnp.zeros((dim,), jnp.float32)},
        "conv2": {"w": jax.random.normal(k3, (3, 3, dim, dim), jnp.float32) * wstd,
                  "b": jax.random.uniform(k4, (dim,), jnp.float32, minval=-bb, maxval=bb)},
    }


# ----------------------------------------------------------------------------
if __name__ == "__main__":
    key = jax.random.PRNGKey(0)
    kx, kp = jax.random.split(key)

    # NHWC (2, 16, 16, 8)  ==  PyTorch NCHW (2, 8, 16, 16)
    B, H, W, C = 2, 16, 16, 8
    x = jax.random.normal(kx, (B, H, W, C), jnp.float32)
    params = init_resblock_params(kp, C)

    # --- norm_layer='LN' path, f32 matmuls: bit-close to the PyTorch reference.
    fwd_ln_f32 = jax.jit(functools.partial(resblock_forward, norm="LN",
                                           compute_dtype=jnp.float32))
    out_ln_f32 = fwd_ln_f32(x, params)
    jax.block_until_ready(out_ln_f32)
    assert out_ln_f32.shape == (B, H, W, C), out_ln_f32.shape
    assert bool(jnp.all(jnp.isfinite(out_ln_f32)))
    ref_ln = resblock_reference(x, params, norm="LN")
    err_f32 = float(jnp.max(jnp.abs(out_ln_f32 - ref_ln)))
    assert err_f32 < 1e-3, f"LN/f32 path mismatch vs reference: max abs err = {err_f32}"

    # --- norm_layer='LN' path, default bf16 matmuls (relaxed tolerance).
    fwd_ln_bf16 = jax.jit(functools.partial(resblock_forward, norm="LN",
                                            compute_dtype=jnp.bfloat16))
    out_ln_bf16 = fwd_ln_bf16(x, params)
    jax.block_until_ready(out_ln_bf16)
    err_bf16 = float(jnp.max(jnp.abs(out_ln_bf16 - ref_ln)))
    tol_bf16 = 5e-2 + 5e-2 * float(jnp.max(jnp.abs(ref_ln)))
    assert err_bf16 < tol_bf16, \
        f"LN/bf16 path mismatch vs reference: max abs err = {err_bf16} (tol {tol_bf16})"

    # --- norm_layer='IN' path (nn.InstanceNorm2d, the ResBlock constructor default).
    fwd_in = jax.jit(functools.partial(resblock_forward, norm="IN",
                                       compute_dtype=jnp.float32))
    out_in = fwd_in(x, params)
    jax.block_until_ready(out_in)
    ref_in = resblock_reference(x, params, norm="IN")
    err_in = float(jnp.max(jnp.abs(out_in - ref_in)))
    assert err_in < 1e-3, f"IN path mismatch vs reference: max abs err = {err_in}"

    print("KERNEL_OK")
</pallas_src>

<mosaic_0001>
module attributes {stable_mosaic.version = 11 : i64} {
  func.func @_resblock_kernel(%arg0: i32, %arg1: memref<1x256x8xf32, #tpu.memory_space<vmem>>, %arg2: memref<1x8xf32, #tpu.memory_space<vmem>>, %arg3: memref<1x8xf32, #tpu.memory_space<vmem>>, %arg4: memref<3x24x8xf32, #tpu.memory_space<vmem>>, %arg5: memref<1x8xf32, #tpu.memory_space<vmem>>, %arg6: memref<1x8xf32, #tpu.memory_space<vmem>>, %arg7: memref<1x8xf32, #tpu.memory_space<vmem>>, %arg8: memref<3x24x8xf32, #tpu.memory_space<vmem>>, %arg9: memref<1x8xf32, #tpu.memory_space<vmem>>, %arg10: memref<1x256x8xf32, #tpu.memory_space<vmem>>) attributes {dimension_semantics = [#tpu.dimension_semantics<parallel>], iteration_bounds = array<i64: 2>, scalar_prefetch = 0 : i64, scratch_operands = 0 : i64, tpu.core_type = #tpu.core_type<tc>, window_params = [{transform_indices = @transform_0, window_bounds = array<i64: 1, 256, 8>}, {pipeline_mode = #tpu.pipeline_mode<synchronous>, transform_indices = @transform_1, window_bounds = array<i64: 1, 8>}, {pipeline_mode = #tpu.pipeline_mode<synchronous>, transform_indices = @transform_2, window_bounds = array<i64: 1, 8>}, {pipeline_mode = #tpu.pipeline_mode<synchronous>, transform_indices = @transform_3, window_bounds = array<i64: 3, 24, 8>}, {pipeline_mode = #tpu.pipeline_mode<synchronous>, transform_indices = @transform_4, window_bounds = array<i64: 1, 8>}, {pipeline_mode = #tpu.pipeline_mode<synchronous>, transform_indices = @transform_5, window_bounds = array<i64: 1, 8>}, {pipeline_mode = #tpu.pipeline_mode<synchronous>, transform_indices = @transform_6, window_bounds = array<i64: 1, 8>}, {pipeline_mode = #tpu.pipeline_mode<synchronous>, transform_indices = @transform_7, window_bounds = array<i64: 3, 24, 8>}, {pipeline_mode = #tpu.pipeline_mode<synchronous>, transform_indices = @transform_8, window_bounds = array<i64: 1, 8>}, {transform_indices = @transform_9, window_bounds = array<i64: 1, 256, 8>}]} {
    %c0 = arith.constant 0 : index
    %c0_0 = arith.constant 0 : index
    %c0_1 = arith.constant 0 : index
    %0 = vector.load %arg1[%c0, %c0_0, %c0_1] : memref<1x256x8xf32, #tpu.memory_space<vmem>>, vector<1x256x8xf32>
    %1 = vector.shape_cast %0 : vector<1x256x8xf32> to vector<256x8xf32>
    %c0_2 = arith.constant 0 : index
    %c0_3 = arith.constant 0 : index
    %2 = vector.load %arg2[%c0_2, %c0_3] : memref<1x8xf32, #tpu.memory_space<vmem>>, vector<1x8xf32>
    %c0_4 = arith.constant 0 : index
    %c0_5 = arith.constant 0 : index
    %3 = vector.load %arg3[%c0_4, %c0_5] : memref<1x8xf32, #tpu.memory_space<vmem>>, vector<1x8xf32>
    %4 = vector.shape_cast %1 : vector<256x8xf32> to vector<1x256x8xf32>
    %cst = arith.constant dense<0.000000e+00> : vector<1xf32>
    %5 = vector.multi_reduction <add>, %4, %cst [1, 2] : vector<1x256x8xf32> to vector<1xf32>
    %6 = vector.shape_cast %5 : vector<1xf32> to vector<1x1x1xf32>
    %7 = vector.extract %6[0, 0, 0] : f32 from vector<1x1x1xf32>
    %8 = arith.mulf %1, %1 : vector<256x8xf32>
    %9 = vector.shape_cast %8 : vector<256x8xf32> to vector<1x256x8xf32>
    %cst_6 = arith.constant dense<0.000000e+00> : vector<1xf32>
    %10 = vector.multi_reduction <add>, %9, %cst_6 [1, 2] : vector<1x256x8xf32> to vector<1xf32>
    %11 = vector.shape_cast %10 : vector<1xf32> to vector<1x1x1xf32>
    %12 = vector.extract %11[0, 0, 0] : f32 from vector<1x1x1xf32>
    %cst_7 = arith.constant 2.048000e+03 : f32
    %13 = arith.divf %7, %cst_7 : f32
    %14 = arith.mulf %7, %13 : f32
    %15 = arith.subf %12, %14 : f32
    %cst_8 = arith.constant 2.047000e+03 : f32
    %16 = arith.divf %15, %cst_8 : f32
    %cst_9 = arith.constant 0.000000e+00 : f32
    %17 = arith.maximumf %16, %cst_9 : f32
    %18 = vector.broadcast %13 : f32 to vector<256x8xf32>
    %19 = arith.subf %1, %18 : vector<256x8xf32>
    %20 = math.sqrt %17 : f32
    %cst_10 = arith.constant 9.99999974E-6 : f32
    %21 = arith.addf %20, %cst_10 : f32
    %cst_11 = arith.constant 1.000000e+00 : f32
    %22 = arith.divf %cst_11, %21 : f32
    %23 = vector.broadcast %22 : f32 to vector<256x8xf32>
    %24 = arith.mulf %19, %23 : vector<256x8xf32>
    %25 = vector.broadcast %2 : vector<1x8xf32> to vector<256x8xf32>
    %26 = arith.mulf %24, %25 : vector<256x8xf32>
    %27 = vector.broadcast %3 : vector<1x8xf32> to vector<256x8xf32>
    %28 = arith.addf %26, %27 : vector<256x8xf32>
    %cst_12 = arith.constant 0.000000e+00 : f32
    %29 = vector.broadcast %cst_12 : f32 to vector<256x8xf32>
    %30 = arith.maximumf %28, %29 : vector<256x8xf32>
    %31 = vector.extract_strided_slice %30 {offsets = [16, 0], sizes = [16, 8], strides = [1, 1]} : vector<256x8xf32> to vector<16x8xf32>
    %32 = vector.extract_strided_slice %30 {offsets = [224, 0], sizes = [16, 8], strides = [1, 1]} : vector<256x8xf32> to vector<16x8xf32>
    %33 = tpu.concatenate %31, %31, %30, %32, %32 in 0 : vector<16x8xf32>, vector<16x8xf32>, vector<256x8xf32>, vector<16x8xf32>, vector<16x8xf32> -> vector<320x8xf32>
    %34 = vector.extract_strided_slice %33 {offsets = [16, 0], sizes = [288, 8], strides = [1, 1]} : vector<320x8xf32> to vector<288x8xf32>
    %35 = vector.extract_strided_slice %33 {offsets = [15, 0], sizes = [288, 8], strides = [1, 1]} : vector<320x8xf32> to vector<288x8xf32>
    %36 = vector.extract_strided_slice %33 {offsets = [17, 0], sizes = [288, 8], strides = [1, 1]} : vector<320x8xf32> to vector<288x8xf32>
    %37 = tpu.iota {dimensions = array<i32: 0>} : vector<288x1xi32>
    %c15_i32 = arith.constant 15 : i32
    %38 = vector.broadcast %c15_i32 : i32 to vector<288x1xi32>
    %39 = arith.andi %37, %38 : vector<288x1xi32>
    %c0_i32 = arith.constant 0 : i32
    %40 = vector.broadcast %c0_i32 : i32 to vector<288x1xi32>
    %41 = arith.cmpi eq, %39, %40 : vector<288x1xi32>
    %42 = vector.shape_cast %41 : vector<288x1xi1> to vector<288x1xi1>
    %43 = vector.broadcast %42 : vector<288x1xi1> to vector<288x8xi1>
    %44 = arith.select %43, %36, %35 : vector<288x8xi1>, vector<288x8xf32>
    %c15_i32_13 = arith.constant 15 : i32
    %45 = vector.broadcast %c15_i32_13 : i32 to vector<288x1xi32>
    %46 = arith.cmpi eq, %39, %45 : vector<288x1xi32>
    %47 = vector.shape_cast %46 : vector<288x1xi1> to vector<288x1xi1>
    %48 = vector.broadcast %47 : vector<288x1xi1> to vector<288x8xi1>
    %49 = arith.select %48, %35, %36 : vector<288x8xi1>, vector<288x8xf32>
    %c0_14 = arith.constant 0 : index
    %c0_15 = arith.constant 0 : index
    %c0_16 = arith.constant 0 : index
    %50 = vector.load %arg4[%c0_14, %c0_15, %c0_16] : memref<3x24x8xf32, #tpu.memory_space<vmem>>, vector<1x24x8xf32>
    %51 = vector.shape_cast %50 : vector<1x24x8xf32> to vector<24x8xf32>
    %52 = vector.extract_strided_slice %44 {offsets = [0, 0], sizes = [256, 8], strides = [1, 1]} : vector<288x8xf32> to vector<256x8xf32>
    %53 = vector.extract_strided_slice %51 {offsets = [0, 0], sizes = [8, 8], strides = [1, 1]} : vector<24x8xf32> to vector<8x8xf32>
    %cst_17 = arith.constant dense<0.000000e+00> : vector<256x8xf32>
    %54 = tpu.matmul %52, %53, %cst_17 {dimension_numbers = #tpu.dot_dimension_numbers<[1], [0], [0], [1], [0, 0, 1, 1], [], []>} : vector<256x8xf32>, vector<8x8xf32>, vector<256x8xf32> -> vector<256x8xf32>
    %c0_18 = arith.constant 0 : index
    %c0_19 = arith.constant 0 : index
    %55 = vector.load %arg5[%c0_18, %c0_19] : memref<1x8xf32, #tpu.memory_space<vmem>>, vector<1x8xf32>
    %56 = vector.broadcast %55 : vector<1x8xf32> to vector<256x8xf32>
    %57 = arith.addf %54, %56 : vector<256x8xf32>
    %58 = vector.extract_strided_slice %34 {offsets = [0, 0], sizes = [256, 8], strides = [1, 1]} : vector<288x8xf32> to vector<256x8xf32>
    %59 = vector.extract_strided_slice %51 {offsets = [8, 0], sizes = [8, 8], strides = [1, 1]} : vector<24x8xf32> to vector<8x8xf32>
    %cst_20 = arith.constant dense<0.000000e+00> : vector<256x8xf32>
    %60 = tpu.matmul %58, %59, %cst_20 {dimension_numbers = #tpu.dot_dimension_numbers<[1], [0], [0], [1], [0, 0, 1, 1], [], []>} : vector<256x8xf32>, vector<8x8xf32>, vector<256x8xf32> -> vector<256x8xf32>
    %61 = arith.addf %57, %60 : vector<256x8xf32>
    %62 = vector.extract_strided_slice %49 {offsets = [0, 0], sizes = [256, 8], strides = [1, 1]} : vector<288x8xf32> to vector<256x8xf32>
    %63 = vector.extract_strided_slice %51 {offsets = [16, 0], sizes = [8, 8], strides = [1, 1]} : vector<24x8xf32> to vector<8x8xf32>
    %cst_21 = arith.constant dense<0.000000e+00> : vector<256x8xf32>
    %64 = tpu.matmul %62, %63, %cst_21 {dimension_numbers = #tpu.dot_dimension_numbers<[1], [0], [0], [1], [0, 0, 1, 1], [], []>} : vector<256x8xf32>, vector<8x8xf32>, vector<256x8xf32> -> vector<256x8xf32>
    %65 = arith.addf %61, %64 : vector<256x8xf32>
    %c1 = arith.constant 1 : index
    %c0_22 = arith.constant 0 : index
    %c0_23 = arith.constant 0 : index
    %66 = vector.load %arg4[%c1, %c0_22, %c0_23] : memref<3x24x8xf32, #tpu.memory_space<vmem>>, vector<1x24x8xf32>
    %67 = vector.shape_cast %66 : vector<1x24x8xf32> to vector<24x8xf32>
    %68 = vector.extract_strided_slice %44 {offsets = [16, 0], sizes = [256, 8], strides = [1, 1]} : vector<288x8xf32> to vector<256x8xf32>
    %69 = vector.extract_strided_slice %67 {offsets = [0, 0], sizes = [8, 8], strides = [1, 1]} : vector<24x8xf32> to vector<8x8xf32>
    %cst_24 = arith.constant dense<0.000000e+00> : vector<256x8xf32>
    %70 = tpu.matmul %68, %69, %cst_24 {dimension_numbers = #tpu.dot_dimension_numbers<[1], [0], [0], [1], [0, 0, 1, 1], [], []>} : vector<256x8xf32>, vector<8x8xf32>, vector<256x8xf32> -> vector<256x8xf32>
    %71 = arith.addf %65, %70 : vector<256x8xf32>
    %72 = vector.extract_strided_slice %34 {offsets = [16, 0], sizes = [256, 8], strides = [1, 1]} : vector<288x8xf32> to vector<256x8xf32>
    %73 = vector.extract_strided_slice %67 {offsets = [8, 0], sizes = [8, 8], strides = [1, 1]} : vector<24x8xf32> to vector<8x8xf32>
    %cst_25 = arith.constant dense<0.000000e+00> : vector<256x8xf32>
    %74 = tpu.matmul %72, %73, %cst_25 {dimension_numbers = #tpu.dot_dimension_numbers<[1], [0], [0], [1], [0, 0, 1, 1], [], []>} : vector<256x8xf32>, vector<8x8xf32>, vector<256x8xf32> -> vector<256x8xf32>
    %75 = arith.addf %71, %74 : vector<256x8xf32>
    %76 = vector.extract_strided_slice %49 {offsets = [16, 0], sizes = [256, 8], strides = [1, 1]} : vector<288x8xf32> to vector<256x8xf32>
    %77 = vector.extract_strided_slice %67 {offsets = [16, 0], sizes = [8, 8], strides = [1, 1]} : vector<24x8xf32> to vector<8x8xf32>
    %cst_26 = arith.constant dense<0.000000e+00> : vector<256x8xf32>
    %78 = tpu.matmul %76, %77, %cst_26 {dimension_numbers = #tpu.dot_dimension_numbers<[1], [0], [0], [1], [0, 0, 1, 1], [], []>} : vector<256x8xf32>, vector<8x8xf32>, vector<256x8xf32> -> vector<256x8xf32>
    %79 = arith.addf %75, %78 : vector<256x8xf32>
    %c2 = arith.constant 2 : index
    %c0_27 = arith.constant 0 : index
    %c0_28 = arith.constant 0 : index
    %80 = vector.load %arg4[%c2, %c0_27, %c0_28] : memref<3x24x8xf32, #tpu.memory_space<vmem>>, vector<1x24x8xf32>
    %81 = vector.shape_cast %80 : vector<1x24x8xf32> to vector<24x8xf32>
    %82 = vector.extract_strided_slice %44 {offsets = [32, 0], sizes = [256, 8], strides = [1, 1]} : vector<288x8xf32> to vector<256x8xf32>
    %83 = vector.extract_strided_slice %81 {offsets = [0, 0], sizes = [8, 8], strides = [1, 1]} : vector<24x8xf32> to vector<8x8xf32>
    %cst_29 = arith.constant dense<0.000000e+00> : vector<256x8xf32>
    %84 = tpu.matmul %82, %83, %cst_29 {dimension_numbers = #tpu.dot_dimension_numbers<[1], [0], [0], [1], [0, 0, 1, 1], [], []>} : vector<256x8xf32>, vector<8x8xf32>, vector<256x8xf32> -> vector<256x8xf32>
    %85 = arith.addf %79, %84 : vector<256x8xf32>
    %86 = vector.extract_strided_slice %34 {offsets = [32, 0], sizes = [256, 8], strides = [1, 1]} : vector<288x8xf32> to vector<256x8xf32>
    %87 = vector.extract_strided_slice %81 {offsets = [8, 0], sizes = [8, 8], strides = [1, 1]} : vector<24x8xf32> to vector<8x8xf32>
    %cst_30 = arith.constant dense<0.000000e+00> : vector<256x8xf32>
    %88 = tpu.matmul %86, %87, %cst_30 {dimension_numbers = #tpu.dot_dimension_numbers<[1], [0], [0], [1], [0, 0, 1, 1], [], []>} : vector<256x8xf32>, vector<8x8xf32>, vector<256x8xf32> -> vector<256x8xf32>
    %89 = arith.addf %85, %88 : vector<256x8xf32>
    %90 = vector.extract_strided_slice %49 {offsets = [32, 0], sizes = [256, 8], strides = [1, 1]} : vector<288x8xf32> to vector<256x8xf32>
    %91 = vector.extract_strided_slice %81 {offsets = [16, 0], sizes = [8, 8], strides = [1, 1]} : vector<24x8xf32> to vector<8x8xf32>
    %cst_31 = arith.constant dense<0.000000e+00> : vector<256x8xf32>
    %92 = tpu.matmul %90, %91, %cst_31 {dimension_numbers = #tpu.dot_dimension_numbers<[1], [0], [0], [1], [0, 0, 1, 1], [], []>} : vector<256x8xf32>, vector<8x8xf32>, vector<256x8xf32> -> vector<256x8xf32>
    %93 = arith.addf %89, %92 : vector<256x8xf32>
    %c0_32 = arith.constant 0 : index
    %c0_33 = arith.constant 0 : index
    %94 = vector.load %arg6[%c0_32, %c0_33] : memref<1x8xf32, #tpu.memory_space<vmem>>, vector<1x8xf32>
    %c0_34 = arith.constant 0 : index
    %c0_35 = arith.constant 0 : index
    %95 = vector.load %arg7[%c0_34, %c0_35] : memref<1x8xf32, #tpu.memory_space<vmem>>, vector<1x8xf32>
    %96 = vector.shape_cast %93 : vector<256x8xf32> to vector<1x256x8xf32>
    %cst_36 = arith.constant dense<0.000000e+00> : vector<1xf32>
    %97 = vector.multi_reduction <add>, %96, %cst_36 [1, 2] : vector<1x256x8xf32> to vector<1xf32>
    %98 = vector.shape_cast %97 : vector<1xf32> to vector<1x1x1xf32>
    %99 = vector.extract %98[0, 0, 0] : f32 from vector<1x1x1xf32>
    %100 = arith.mulf %93, %93 : vector<256x8xf32>
    %101 = vector.shape_cast %100 : vector<256x8xf32> to vector<1x256x8xf32>
    %cst_37 = arith.constant dense<0.000000e+00> : vector<1xf32>
    %102 = vector.multi_reduction <add>, %101, %cst_37 [1, 2] : vector<1x256x8xf32> to vector<1xf32>
    %103 = vector.shape_cast %102 : vector<1xf32> to vector<1x1x1xf32>
    %104 = vector.extract %103[0, 0, 0] : f32 from vector<1x1x1xf32>
    %cst_38 = arith.constant 2.048000e+03 : f32
    %105 = arith.divf %99, %cst_38 : f32
    %106 = arith.mulf %99, %105 : f32
    %107 = arith.subf %104, %106 : f32
    %cst_39 = arith.constant 2.047000e+03 : f32
    %108 = arith.divf %107, %cst_39 : f32
    %cst_40 = arith.constant 0.000000e+00 : f32
    %109 = arith.maximumf %108, %cst_40 : f32
    %110 = vector.broadcast %105 : f32 to vector<256x8xf32>
    %111 = arith.subf %93, %110 : vector<256x8xf32>
    %112 = math.sqrt %109 : f32
    %cst_41 = arith.constant 9.99999974E-6 : f32
    %113 = arith.addf %112, %cst_41 : f32
    %cst_42 = arith.constant 1.000000e+00 : f32
    %114 = arith.divf %cst_42, %113 : f32
    %115 = vector.broadcast %114 : f32 to vector<256x8xf32>
    %116 = arith.mulf %111, %115 : vector<256x8xf32>
    %117 = vector.broadcast %94 : vector<1x8xf32> to vector<256x8xf32>
    %118 = arith.mulf %116, %117 : vector<256x8xf32>
    %119 = vector.broadcast %95 : vector<1x8xf32> to vector<256x8xf32>
    %120 = arith.addf %118, %119 : vector<256x8xf32>
    %cst_43 = arith.constant 0.000000e+00 : f32
    %121 = vector.broadcast %cst_43 : f32 to vector<256x8xf32>
    %122 = arith.maximumf %120, %121 : vector<256x8xf32>
    %123 = vector.extract_strided_slice %122 {offsets = [16, 0], sizes = [16, 8], strides = [1, 1]} : vector<256x8xf32> to vector<16x8xf32>
    %124 = vector.extract_strided_slice %122 {offsets = [224, 0], sizes = [16, 8], strides = [1, 1]} : vector<256x8xf32> to vector<16x8xf32>
    %125 = tpu.concatenate %123, %123, %122, %124, %124 in 0 : vector<16x8xf32>, vector<16x8xf32>, vector<256x8xf32>, vector<16x8xf32>, vector<16x8xf32> -> vector<320x8xf32>
    %126 = vector.extract_strided_slice %125 {offsets = [16, 0], sizes = [288, 8], strides = [1, 1]} : vector<320x8xf32> to vector<288x8xf32>
    %127 = vector.extract_strided_slice %125 {offsets = [15, 0], sizes = [288, 8], strides = [1, 1]} : vector<320x8xf32> to vector<288x8xf32>
    %128 = vector.extract_strided_slice %125 {offsets = [17, 0], sizes = [288, 8], strides = [1, 1]} : vector<320x8xf32> to vector<288x8xf32>
    %129 = tpu.iota {dimensions = array<i32: 0>} : vector<288x1xi32>
    %c15_i32_44 = arith.constant 15 : i32
    %130 = vector.broadcast %c15_i32_44 : i32 to vector<288x1xi32>
    %131 = arith.andi %129, %130 : vector<288x1xi32>
    %c0_i32_45 = arith.constant 0 : i32
    %132 = vector.broadcast %c0_i32_45 : i32 to vector<288x1xi32>
    %133 = arith.cmpi eq, %131, %132 : vector<288x1xi32>
    %134 = vector.shape_cast %133 : vector<288x1xi1> to vector<288x1xi1>
    %135 = vector.broadcast %134 : vector<288x1xi1> to vector<288x8xi1>
    %136 = arith.select %135, %128, %127 : vector<288x8xi1>, vector<288x8xf32>
    %c15_i32_46 = arith.constant 15 : i32
    %137 = vector.broadcast %c15_i32_46 : i32 to vector<288x1xi32>
    %138 = arith.cmpi eq, %131, %137 : vector<288x1xi32>
    %139 = vector.shape_cast %138 : vector<288x1xi1> to vector<288x1xi1>
    %140 = vector.broadcast %139 : vector<288x1xi1> to vector<288x8xi1>
    %141 = arith.select %140, %127, %128 : vector<288x8xi1>, vector<288x8xf32>
    %c0_47 = arith.constant 0 : index
    %c0_48 = arith.constant 0 : index
    %c0_49 = arith.constant 0 : index
    %142 = vector.load %arg8[%c0_47, %c0_48, %c0_49] : memref<3x24x8xf32, #tpu.memory_space<vmem>>, vector<1x24x8xf32>
    %143 = vector.shape_cast %142 : vector<1x24x8xf32> to vector<24x8xf32>
    %144 = vector.extract_strided_slice %136 {offsets = [0, 0], sizes = [256, 8], strides = [1, 1]} : vector<288x8xf32> to vector<256x8xf32>
    %145 = vector.extract_strided_slice %143 {offsets = [0, 0], sizes = [8, 8], strides = [1, 1]} : vector<24x8xf32> to vector<8x8xf32>
    %cst_50 = arith.constant dense<0.000000e+00> : vector<256x8xf32>
    %146 = tpu.matmul %144, %145, %cst_50 {dimension_numbers = #tpu.dot_dimension_numbers<[1], [0], [0], [1], [0, 0, 1, 1], [], []>} : vector<256x8xf32>, vector<8x8xf32>, vector<256x8xf32> -> vector<256x8xf32>
    %c0_51 = arith.constant 0 : index
    %c0_52 = arith.constant 0 : index
    %147 = vector.load %arg9[%c0_51, %c0_52] : memref<1x8xf32, #tpu.memory_space<vmem>>, vector<1x8xf32>
    %148 = vector.broadcast %147 : vector<1x8xf32> to vector<256x8xf32>
    %149 = arith.addf %146, %148 : vector<256x8xf32>
    %150 = vector.extract_strided_slice %126 {offsets = [0, 0], sizes = [256, 8], strides = [1, 1]} : vector<288x8xf32> to vector<256x8xf32>
    %151 = vector.extract_strided_slice %143 {offsets = [8, 0], sizes = [8, 8], strides = [1, 1]} : vector<24x8xf32> to vector<8x8xf32>
    %cst_53 = arith.constant dense<0.000000e+00> : vector<256x8xf32>
    %152 = tpu.matmul %150, %151, %cst_53 {dimension_numbers = #tpu.dot_dimension_numbers<[1], [0], [0], [1], [0, 0, 1, 1], [], []>} : vector<256x8xf32>, vector<8x8xf32>, vector<256x8xf32> -> vector<256x8xf32>
    %153 = arith.addf %149, %152 : vector<256x8xf32>
    %154 = vector.extract_strided_slice %141 {offsets = [0, 0], sizes = [256, 8], strides = [1, 1]} : vector<288x8xf32> to vector<256x8xf32>
    %155 = vector.extract_strided_slice %143 {offsets = [16, 0], sizes = [8, 8], strides = [1, 1]} : vector<24x8xf32> to vector<8x8xf32>
    %cst_54 = arith.constant dense<0.000000e+00> : vector<256x8xf32>
    %156 = tpu.matmul %154, %155, %cst_54 {dimension_numbers = #tpu.dot_dimension_numbers<[1], [0], [0], [1], [0, 0, 1, 1], [], []>} : vector<256x8xf32>, vector<8x8xf32>, vector<256x8xf32> -> vector<256x8xf32>
    %157 = arith.addf %153, %156 : vector<256x8xf32>
    %c1_55 = arith.constant 1 : index
    %c0_56 = arith.constant 0 : index
    %c0_57 = arith.constant 0 : index
    %158 = vector.load %arg8[%c1_55, %c0_56, %c0_57] : memref<3x24x8xf32, #tpu.memory_space<vmem>>, vector<1x24x8xf32>
    %159 = vector.shape_cast %158 : vector<1x24x8xf32> to vector<24x8xf32>
    %160 = vector.extract_strided_slice %136 {offsets = [16, 0], sizes = [256, 8], strides = [1, 1]} : vector<288x8xf32> to vector<256x8xf32>
    %161 = vector.extract_strided_slice %159 {offsets = [0, 0], sizes = [8, 8], strides = [1, 1]} : vector<24x8xf32> to vector<8x8xf32>
    %cst_58 = arith.constant dense<0.000000e+00> : vector<256x8xf32>
    %162 = tpu.matmul %160, %161, %cst_58 {dimension_numbers = #tpu.dot_dimension_numbers<[1], [0], [0], [1], [0, 0, 1, 1], [], []>} : vector<256x8xf32>, vector<8x8xf32>, vector<256x8xf32> -> vector<256x8xf32>
    %163 = arith.addf %157, %162 : vector<256x8xf32>
    %164 = vector.extract_strided_slice %126 {offsets = [16, 0], sizes = [256, 8], strides = [1, 1]} : vector<288x8xf32> to vector<256x8xf32>
    %165 = vector.extract_strided_slice %159 {offsets = [8, 0], sizes = [8, 8], strides = [1, 1]} : vector<24x8xf32> to vector<8x8xf32>
    %cst_59 = arith.constant dense<0.000000e+00> : vector<256x8xf32>
    %166 = tpu.matmul %164, %165, %cst_59 {dimension_numbers = #tpu.dot_dimension_numbers<[1], [0], [0], [1], [0, 0, 1, 1], [], []>} : vector<256x8xf32>, vector<8x8xf32>, vector<256x8xf32> -> vector<256x8xf32>
    %167 = arith.addf %163, %166 : vector<256x8xf32>
    %168 = vector.extract_strided_slice %141 {offsets = [16, 0], sizes = [256, 8], strides = [1, 1]} : vector<288x8xf32> to vector<256x8xf32>
    %169 = vector.extract_strided_slice %159 {offsets = [16, 0], sizes = [8, 8], strides = [1, 1]} : vector<24x8xf32> to vector<8x8xf32>
    %cst_60 = arith.constant dense<0.000000e+00> : vector<256x8xf32>
    %170 = tpu.matmul %168, %169, %cst_60 {dimension_numbers = #tpu.dot_dimension_numbers<[1], [0], [0], [1], [0, 0, 1, 1], [], []>} : vector<256x8xf32>, vector<8x8xf32>, vector<256x8xf32> -> vector<256x8xf32>
    %171 = arith.addf %167, %170 : vector<256x8xf32>
    %c2_61 = arith.constant 2 : index
    %c0_62 = arith.constant 0 : index
    %c0_63 = arith.constant 0 : index
    %172 = vector.load %arg8[%c2_61, %c0_62, %c0_63] : memref<3x24x8xf32, #tpu.memory_space<vmem>>, vector<1x24x8xf32>
    %173 = vector.shape_cast %172 : vector<1x24x8xf32> to vector<24x8xf32>
    %174 = vector.extract_strided_slice %136 {offsets = [32, 0], sizes = [256, 8], strides = [1, 1]} : vector<288x8xf32> to vector<256x8xf32>
    %175 = vector.extract_strided_slice %173 {offsets = [0, 0], sizes = [8, 8], strides = [1, 1]} : vector<24x8xf32> to vector<8x8xf32>
    %cst_64 = arith.constant dense<0.000000e+00> : vector<256x8xf32>
    %176 = tpu.matmul %174, %175, %cst_64 {dimension_numbers = #tpu.dot_dimension_numbers<[1], [0], [0], [1], [0, 0, 1, 1], [], []>} : vector<256x8xf32>, vector<8x8xf32>, vector<256x8xf32> -> vector<256x8xf32>
    %177 = arith.addf %171, %176 : vector<256x8xf32>
    %178 = vector.extract_strided_slice %126 {offsets = [32, 0], sizes = [256, 8], strides = [1, 1]} : vector<288x8xf32> to vector<256x8xf32>
    %179 = vector.extract_strided_slice %173 {offsets = [8, 0], sizes = [8, 8], strides = [1, 1]} : vector<24x8xf32> to vector<8x8xf32>
    %cst_65 = arith.constant dense<0.000000e+00> : vector<256x8xf32>
    %180 = tpu.matmul %178, %179, %cst_65 {dimension_numbers = #tpu.dot_dimension_numbers<[1], [0], [0], [1], [0, 0, 1, 1], [], []>} : vector<256x8xf32>, vector<8x8xf32>, vector<256x8xf32> -> vector<256x8xf32>
    %181 = arith.addf %177, %180 : vector<256x8xf32>
    %182 = vector.extract_strided_slice %141 {offsets = [32, 0], sizes = [256, 8], strides = [1, 1]} : vector<288x8xf32> to vector<256x8xf32>
    %183 = vector.extract_strided_slice %173 {offsets = [16, 0], sizes = [8, 8], strides = [1, 1]} : vector<24x8xf32> to vector<8x8xf32>
    %cst_66 = arith.constant dense<0.000000e+00> : vector<256x8xf32>
    %184 = tpu.matmul %182, %183, %cst_66 {dimension_numbers = #tpu.dot_dimension_numbers<[1], [0], [0], [1], [0, 0, 1, 1], [], []>} : vector<256x8xf32>, vector<8x8xf32>, vector<256x8xf32> -> vector<256x8xf32>
    %185 = arith.addf %181, %184 : vector<256x8xf32>
    %186 = arith.addf %1, %185 : vector<256x8xf32>
    %c0_67 = arith.constant 0 : index
    %c0_68 = arith.constant 0 : index
    %c0_69 = arith.constant 0 : index
    %187 = vector.load %arg10[%c0_67, %c0_68, %c0_69] : memref<1x256x8xf32, #tpu.memory_space<vmem>>, vector<1x256x8xf32>
    %188 = vector.shape_cast %187 : vector<1x256x8xf32> to vector<256x8xf32>
    %189 = vector.shape_cast %186 : vector<256x8xf32> to vector<1x256x8xf32>
    tpu.vector_store %arg10[%c0_67, %c0_68, %c0_69], %189 {strides = array<i32>} : memref<1x256x8xf32, #tpu.memory_space<vmem>>, vector<1x256x8xf32>,
    return
  }
  func.func @transform_0(%arg0: i32) -> (i32, i32, i32) {
    %c0_i32 = arith.constant 0 : i32
    %c0_i32_0 = arith.constant 0 : i32
    %c0_i32_1 = arith.constant 0 : i32
    return %arg0, %c0_i32, %c0_i32_0 : i32, i32, i32
  }
  func.func @transform_1(%arg0: i32) -> (i32, i32) {
    %c0_i32 = arith.constant 0 : i32
    %c0_i32_0 = arith.constant 0 : i32
    %c0_i32_1 = arith.constant 0 : i32
    return %c0_i32, %c0_i32_0 : i32, i32
  }
  func.func @transform_2(%arg0: i32) -> (i32, i32) {
    %c0_i32 = arith.constant 0 : i32
    %c0_i32_0 = arith.constant 0 : i32
    %c0_i32_1 = arith.constant 0 : i32
    return %c0_i32, %c0_i32_0 : i32, i32
  }
  func.func @transform_3(%arg0: i32) -> (i32, i32, i32) {
    %c0_i32 = arith.constant 0 : i32
    %c0_i32_0 = arith.constant 0 : i32
    %c0_i32_1 = arith.constant 0 : i32
    %c0_i32_2 = arith.constant 0 : i32
    return %c0_i32, %c0_i32_0, %c0_i32_1 : i32, i32, i32
  }
  func.func @transform_4(%arg0: i32) -> (i32, i32) {
    %c0_i32 = arith.constant 0 : i32
    %c0_i32_0 = arith.constant 0 : i32
    %c0_i32_1 = arith.constant 0 : i32
    return %c0_i32, %c0_i32_0 : i32, i32
  }
  func.func @transform_5(%arg0: i32) -> (i32, i32) {
    %c0_i32 = arith.constant 0 : i32
    %c0_i32_0 = arith.constant 0 : i32
    %c0_i32_1 = arith.constant 0 : i32
    return %c0_i32, %c0_i32_0 : i32, i32
  }
  func.func @transform_6(%arg0: i32) -> (i32, i32) {
    %c0_i32 = arith.constant 0 : i32
    %c0_i32_0 = arith.constant 0 : i32
    %c0_i32_1 = arith.constant 0 : i32
    return %c0_i32, %c0_i32_0 : i32, i32
  }
  func.func @transform_7(%arg0: i32) -> (i32, i32, i32) {
    %c0_i32 = arith.constant 0 : i32
    %c0_i32_0 = arith.constant 0 : i32
    %c0_i32_1 = arith.constant 0 : i32
    %c0_i32_2 = arith.constant 0 : i32
    return %c0_i32, %c0_i32_0, %c0_i32_1 : i32, i32, i32
  }
  func.func @transform_8(%arg0: i32) -> (i32, i32) {
    %c0_i32 = arith.constant 0 : i32
    %c0_i32_0 = arith.constant 0 : i32
    %c0_i32_1 = arith.constant 0 : i32
    return %c0_i32, %c0_i32_0 : i32, i32
  }
  func.func @transform_9(%arg0: i32) -> (i32, i32, i32) {
    %c0_i32 = arith.constant 0 : i32
    %c0_i32_0 = arith.constant 0 : i32
    %c0_i32_1 = arith.constant 0 : i32
    return %arg0, %c0_i32, %c0_i32_0 : i32, i32, i32
  }
}

</mosaic_0001>

<bundles_post_ra>
// kernel: resblock_forward.1
= control target key start
LH: loop header
LB: loop body
LE: loop exit
PB: predicated region body
PF: predicated region fallthrough
CT: control target
= control target key end

     0   :  { %s9515_s30 = smov 0   ;;  %s14557_s0 = inlined_call_operand.vmem [shape: f32[2,256,8], index: 0, kind: input, shape index: {}]   ;;  %s14558_s1 = inlined_call_operand.vmem [shape: f32[1,8], index: 1, kind: input, shape index: {}]   ;;  %s14559_s2 = inlined_call_operand.vmem [shape: f32[1,8], index: 2, kind: input, shape index: {}]   ;;  %s14560_s3 = inlined_call_operand.vmem [shape: f32[3,24,8], index: 3, kind: input, shape index: {}]   ;;  %s14561_s4 = inlined_call_operand.vmem [shape: f32[1,8], index: 4, kind: input, shape index: {}]   ;;  %s14562_s5 = inlined_call_operand.vmem [shape: f32[1,8], index: 5, kind: input, shape index: {}]   ;;  %s14563_s6 = inlined_call_operand.vmem [shape: f32[1,8], index: 6, kind: input, shape index: {}]   ;;  %s14564_s7 = inlined_call_operand.vmem [shape: f32[3,24,8], index: 7, kind: input, shape index: {}]   ;;  %s14565_s8 = inlined_call_operand.vmem [shape: f32[1,8], index: 8, kind: input, shape index: {}]   ;;  %s14566_s9 = inlined_call_operand.vmem [shape: f32[2,256,8], index: 9, kind: output, shape index: {}]  }
   0x1 LB: > { %s7290_s10 = sadd.s32 4294967295, %s9462_s30   ;;  %p7294_p0 = scmp.ge.s32.totalorder %s9462_s30, 1  ;;  %s9462_s30 = sphi %s9515_s30, %s19_s30  }
   0x2   : > { %p287_p1 = scmp.lt.s32.totalorder %s9462_s30, 3 }
   0x4   : > { %p288_p2 = pnand %p7294_p0, %p287_p1 }
   0x6   : > { %291 = sbr.rel (%p288_p2) target bundleno = 1929 (0x789), region = 56 }
   0xb   : > { %p323_p3 = scmp.lt.s32.totalorder %s7290_s10, 1  ;;  %vm14634_vm0 = vcmask 64512   ;;  %s9464_s21 = smov 0.0   ;;  %vm14633_vm3 = vcmask 1046528   ;;  %vm14637_vm4 = vcmask 1040384  }
   0xd   : > { %s16355_s10 = smov (!%p323_p3, %s7290_s10), 1 }
   0xe   : > { %s7895_s11 = sshll.u32 %s16355_s10, 8 }
   0xf   : > { %s9531_s14 = scalar_lea.vmem %s14557_s0, %s7895_s11 }
  0x10   : > { %v9534_v0 = vld [vmem:[%s9531_s14] sm:$0xff]  ;;  %v9537_v1 = vld [vmem:[%s9531_s14 + $0x8] sm:$0xff]  ;;  %v9540_v2 = vld [vmem:[%s9531_s14 + $0x10] sm:$0xff] }
  0x11   : > { %v9543_v3 = vld [vmem:[%s9531_s14 + $0x18] sm:$0xff]  ;;  %v368_v4 = vsel %vm14634_vm0, %v9534_v0, 0.0  ;;  %v369_v5 = vsel %vm14634_vm0, %v9537_v1, 0.0  ;;  %v371_v6 = vsel %vm14634_vm0, %v9540_v2, 0.0  ;;  %v9552_v7 = vld [vmem:[%s9531_s14 + $0x20] sm:$0xff]  ;;  %v9557_v10 = vld [vmem:[%s9531_s14 + $0x28] sm:$0xff]  ;;  %v440_v29 = vmul.f32 %v9534_v0, %v9534_v0 }
  0x12   : > { %v370_v8 = vadd.f32 %v369_v5, %v368_v4  ;;  %v373_v9 = vsel %vm14634_vm0, %v9543_v3, 0.0  ;;  %v375_v12 = vsel %vm14634_vm0, %v9552_v7, 0.0  ;;  %v9562_v13 = vld [vmem:[%s9531_s14 + $0x30] sm:$0xff]  ;;  %v377_v15 = vsel %vm14634_vm0, %v9557_v10, 0.0  ;;  %v9567_v16 = vld [vmem:[%s9531_s14 + $0x38] sm:$0xff]  ;;  %v9572_v19 = vld [vmem:[%s9531_s14 + $0x40] sm:$0xff] }
  0x13   : > { %v379_v18 = vsel %vm14634_vm0, %v9562_v13, 0.0  ;;  %v381_v21 = vsel %vm14634_vm0, %v9567_v16, 0.0  ;;  %v9577_v22 = vld [vmem:[%s9531_s14 + $0x48] sm:$0xff]  ;;  %v383_v24 = vsel %vm14634_vm0, %v9572_v19, 0.0  ;;  %v9582_v25 = vld [vmem:[%s9531_s14 + $0x50] sm:$0xff]  ;;  %v9585_v27 = vld [vmem:[%s9531_s14 + $0x58] sm:$0xff]  ;;  %v441_v30 = vmul.f32 %v9537_v1, %v9537_v1 }
  0x14   : > { %v372_v11 = vadd.f32 %v371_v6, %v370_v8  ;;  %v385_v28 = vsel %vm14634_vm0, %v9577_v22, 0.0  ;;  %v442_v31 = vmul.f32 %v9540_v2, %v9540_v2  ;;  %v387_v33 = vsel %vm14634_vm0, %v9582_v25, 0.0  ;;  %v9600_v35 = vld [vmem:[%s9531_s14 + $0x60] sm:$0xff]  ;;  %v9610_v42 = vld [vmem:[%s9531_s14 + $0x68] sm:$0xff]  ;;  %v9618_v48 = vld [vmem:[%s9531_s14 + $0x70] sm:$0xff] }
  0x15   : > { %v443_v34 = vmul.f32 %v9543_v3, %v9543_v3  ;;  %v389_v37 = vsel %vm14634_vm0, %v9585_v27, 0.0  ;;  %v444_v38 = vmul.f32 %v9552_v7, %v9552_v7  ;;  %v472_v39 = vsel %vm14634_vm0, %v440_v29, 0.0  ;;  %v9626_v54 = vld [vmem:[%s9531_s14 + $0x78] sm:$0xff]  ;;  %v9634_v60 = vld [vmem:[%s9531_s14 + $0x80] sm:$0xff]  ;;  %v9642_v6 = vld [vmem:[%s9531_s14 + $0x88] sm:$0xff] }
  0x16   : > { %v374_v14 = vadd.f32 %v373_v9, %v372_v11  ;;  %v473_v40 = vsel %vm14634_vm0, %v441_v30, 0.0  ;;  %v475_v41 = vsel %vm14634_vm0, %v442_v31, 0.0  ;;  %v391_v45 = vsel %vm14634_vm0, %v9600_v35, 0.0 }
  0x17   : > { %v474_v44 = vadd.f32 %v473_v40, %v472_v39  ;;  %v445_v46 = vmul.f32 %v9557_v10, %v9557_v10  ;;  %v477_v47 = vsel %vm14634_vm0, %v443_v34, 0.0  ;;  %v393_v51 = vsel %vm14634_vm0, %v9610_v42, 0.0  ;;  %v9674_v39 = vld [vmem:[%s9531_s14 + $0xa8] sm:$0xff] }
  0x18   : > { %v376_v17 = vadd.f32 %v375_v12, %v374_v14  ;;  %v446_v52 = vmul.f32 %v9562_v13, %v9562_v13  ;;  %v479_v53 = vsel %vm14634_vm0, %v444_v38, 0.0  ;;  %v395_v57 = vsel %vm14634_vm0, %v9618_v48, 0.0 }
  0x19   : > { %v476_v50 = vadd.f32 %v475_v41, %v474_v44  ;;  %v447_v58 = vmul.f32 %v9567_v16, %v9567_v16  ;;  %v481_v59 = vsel %vm14634_vm0, %v445_v46, 0.0  ;;  %v397_v63 = vsel %vm14634_vm0, %v9626_v54, 0.0  ;;  %v9682_v46 = vld [vmem:[%s9531_s14 + $0xb0] sm:$0xff] }
  0x1a   : > { %v378_v20 = vadd.f32 %v377_v15, %v376_v17  ;;  %v448_v4 = vmul.f32 %v9572_v19, %v9572_v19  ;;  %v483_v5 = vsel %vm14634_vm0, %v446_v52, 0.0  ;;  %v399_v11 = vsel %vm14634_vm0, %v9634_v60, 0.0  ;;  %v9650_v15 = vld [vmem:[%s9531_s14 + $0x90] sm:$0xff] }
  0x1b   : > { %v478_v56 = vadd.f32 %v477_v47, %v476_v50  ;;  %v449_v12 = vmul.f32 %v9577_v22, %v9577_v22  ;;  %v485_v14 = vsel %vm14634_vm0, %v447_v58, 0.0  ;;  %v403_v29 = vsel %vm14634_vm0, %v9650_v15, 0.0 }
  0x1c   : > { %v380_v23 = vadd.f32 %v379_v18, %v378_v20  ;;  %v401_v20 = vsel %vm14634_vm0, %v9642_v6, 0.0  ;;  %v451_v30 = vmul.f32 %v9585_v27, %v9585_v27  ;;  %v453_v44 = vmul.f32 %v9610_v42, %v9610_v42 }
  0x1d   : > { %v480_v62 = vadd.f32 %v479_v53, %v478_v56  ;;  %v489_v31 = vsel %vm14634_vm0, %v449_v12, 0.0  ;;  %v409_v50 = vsel %vm14634_vm0, %v9674_v39, 0.0  ;;  %v9690_v53 = vld [vmem:[%s9531_s14 + $0xb8] sm:$0xff]  ;;  %v455_v58 = vmul.f32 %v9626_v54, %v9626_v54 }
  0x1e   : > { %v382_v26 = vadd.f32 %v381_v21, %v380_v23  ;;  %v450_v21 = vmul.f32 %v9582_v25, %v9582_v25  ;;  %v487_v23 = vsel %vm14634_vm0, %v448_v4, 0.0  ;;  %v413_v4 = vsel %vm14634_vm0, %v9690_v53, 0.0 }
  0x1f   : > { %v482_v9 = vadd.f32 %v481_v59, %v480_v62  ;;  %v497_v59 = vsel %vm14634_vm0, %v453_v44, 0.0 }
  0x20   : > { %v384_v32 = vadd.f32 %v383_v24, %v382_v26  ;;  %v9658_v24 = vld [vmem:[%s9531_s14 + $0x98] sm:$0xff]  ;;  %v491_v38 = vsel %vm14634_vm0, %v450_v21, 0.0 }
  0x21   : > { %v484_v18 = vadd.f32 %v483_v5, %v482_v9  ;;  %v456_v5 = vmul.f32 %v9634_v60, %v9634_v60  ;;  %v9706_v9 = vld [vmem:[%s9531_s14 + $0xc8] sm:$0xff] }
  0x22   : > { %v386_v36 = vadd.f32 %v385_v28, %v384_v32  ;;  %v9666_v32 = vld [vmem:[%s9531_s14 + $0xa0] sm:$0xff] }
  0x23   : > { %v486_v28 = vadd.f32 %v485_v14, %v484_v18  ;;  %v501_v18 = vsel %vm14634_vm0, %v455_v58, 0.0  ;;  %v460_v44 = vmul.f32 %v9666_v32, %v9666_v32 }
  0x24   : > { %v388_v43 = vadd.f32 %v387_v33, %v386_v36  ;;  %v405_v36 = vsel %vm14634_vm0, %v9658_v24, 0.0 }
  0x25   : > { %v488_v34 = vadd.f32 %v487_v23, %v486_v28  ;;  %v458_v28 = vmul.f32 %v9650_v15, %v9650_v15 }
  0x26   : > { %v390_v49 = vadd.f32 %v389_v37, %v388_v43  ;;  %v452_v37 = vmul.f32 %v9600_v35, %v9600_v35  ;;  %v407_v43 = vsel %vm14634_vm0, %v9666_v32, 0.0 }
  0x27   : > { %v490_v41 = vadd.f32 %v489_v31, %v488_v34 }
  0x28   : > { %v392_v55 = vadd.f32 %v391_v45, %v390_v49  ;;  %v493_v45 = vsel %vm14634_vm0, %v451_v30, 0.0  ;;  %v495_v52 = vsel %vm14634_vm0, %v452_v37, 0.0  ;;  %v9722_v30 = vld [vmem:[%s9531_s14 + $0xd8] sm:$0xff] }
  0x29   : > { %v492_v49 = vadd.f32 %v491_v38, %v490_v41  ;;  %14880 = vst [vmem:[#allocation2_spill] sm:$0xff] %v9722_v30  ;;  %v9730_v38 = vld [vmem:[%s9531_s14 + $0xe0] sm:$0xff] }
  0x2a   : > { %v394_v61 = vadd.f32 %v393_v51, %v392_v55  ;;  %v454_v51 = vmul.f32 %v9618_v48, %v9618_v48 }
  0x2b   : > { %v494_v56 = vadd.f32 %v493_v45, %v492_v49  ;;  %v507_v45 = vsel %vm14634_vm0, %v458_v28, 0.0 }
  0x2c   : > { %v396_v8 = vadd.f32 %v395_v57, %v394_v61  ;;  %v411_v57 = vsel %vm14634_vm0, %v9682_v46, 0.0  ;;  %v9698_v61 = vld [vmem:[%s9531_s14 + $0xc0] sm:$0xff] }
  0x2d   : > { %v415_v14 = vsel %vm14634_vm0, %v9698_v61, 0.0 }
  0x2e   : > { %v398_v17 = vadd.f32 %v397_v63, %v396_v8  ;;  %v496_v63 = vadd.f32 %v495_v52, %v494_v56  ;;  %v499_v8 = vsel %vm14634_vm0, %v454_v51, 0.0  ;;  %v423_v51 = vsel %vm14634_vm0, %v9730_v38, 0.0  ;;  %v9746_v56 = vld [vmem:[%s9531_s14 + $0xf0] sm:$0xff] }
  0x2f   : > { %v461_v52 = vmul.f32 %v9674_v39, %v9674_v39 }
  0x30   : > { %v400_v26 = vadd.f32 %v399_v11, %v398_v17  ;;  %v498_v12 = vadd.f32 %v497_v59, %v496_v63  ;;  %v457_v17 = vmul.f32 %v9642_v6, %v9642_v6  ;;  %v511_v63 = vsel %vm14634_vm0, %v460_v44, 0.0 }
  0x32   : > { %v402_v33 = vadd.f32 %v401_v20, %v400_v26  ;;  %v9714_v20 = vld [vmem:[%s9531_s14 + $0xd0] sm:$0xff]  ;;  %v500_v23 = vadd.f32 %v499_v8, %v498_v12  ;;  %v417_v26 = vsel %vm14634_vm0, %v9706_v9, 0.0  ;;  %v505_v37 = vsel %vm14634_vm0, %v457_v17, 0.0 }
  0x33   : > { %v419_v34 = vsel %vm14634_vm0, %v9714_v20, 0.0  ;;  %v463_v12 = vmul.f32 %v9690_v53, %v9690_v53 }
  0x34   : > { %v404_v40 = vadd.f32 %v403_v29, %v402_v33  ;;  %v503_v29 = vsel %vm14634_vm0, %v456_v5, 0.0  ;;  %v502_v33 = vadd.f32 %v501_v18, %v500_v23  ;;  %v464_v23 = vmul.f32 %v9698_v61, %v9698_v61 }
  0x36   : > { %v406_v47 = vadd.f32 %v405_v36, %v404_v40  ;;  %v459_v36 = vmul.f32 %v9658_v24, %v9658_v24  ;;  %v504_v41 = vadd.f32 %v503_v29, %v502_v33  ;;  %v517_v33 = vsel %vm14634_vm0, %v463_v12, 0.0 }
  0x38   : > { %v408_v55 = vadd.f32 %v407_v43, %v406_v47  ;;  %v421_v43 = vsel %vm14634_vm0, %v9722_v30, 0.0  ;;  %v9738_v47 = vld [vmem:[%s9531_s14 + $0xe8] sm:$0xff] }
  0x39   : > { %v425_v59 = vsel %vm14634_vm0, %v9738_v47, 0.0 }
  0x3a   : > { %v410_v62 = vadd.f32 %v409_v50, %v408_v55  ;;  %v506_v50 = vadd.f32 %v505_v37, %v504_v41  ;;  %v509_v55 = vsel %vm14634_vm0, %v459_v36, 0.0  ;;  %v466_v37 = vmul.f32 %v9714_v20, %v9714_v20 }
  0x3c   : > { %v412_v11 = vadd.f32 %v411_v57, %v410_v62  ;;  %v508_v58 = vadd.f32 %v507_v45, %v506_v50  ;;  %v462_v62 = vmul.f32 %v9682_v46, %v9682_v46  ;;  %v523_v50 = vsel %vm14634_vm0, %v466_v37, 0.0 }
  0x3e   : > { %v414_v21 = vadd.f32 %v413_v4, %v412_v11  ;;  %v9754_v4 = vld [vmem:[%s9531_s14 + $0xf8] sm:$0xff]  ;;  %v510_v8 = vadd.f32 %v509_v55, %v508_v58  ;;  %v427_v11 = vsel %vm14634_vm0, %v9746_v56, 0.0  ;;  %v470_v58 = vmul.f32 %v9746_v56, %v9746_v56 }
  0x40   : > { %v416_v31 = vadd.f32 %v415_v14, %v414_v21  ;;  %v513_v14 = vsel %vm14634_vm0, %v461_v52, 0.0  ;;  %v512_v18 = vadd.f32 %v511_v63, %v510_v8  ;;  %v429_v21 = vsel %vm14634_vm0, %v9754_v4, 0.0 }
  0x41   : > { %v469_v52 = vmul.f32 %v9738_v47, %v9738_v47  ;;  %v471_v63 = vmul.f32 %v9754_v4, %v9754_v4 }
  0x42   : > { %v418_v40 = vadd.f32 %v417_v26, %v416_v31  ;;  %v515_v26 = vsel %vm14634_vm0, %v462_v62, 0.0  ;;  %v514_v29 = vadd.f32 %v513_v14, %v512_v18  ;;  %v465_v31 = vmul.f32 %v9706_v9, %v9706_v9 }
  0x43   : > { %v533_v14 = vsel %vm14634_vm0, %v471_v63, 0.0  ;;  %v9811_v63 = vld [vmem:[%s14560_s3 + $0x18] sm:$0xff] }
  0x44   : > { %v420_v49 = vadd.f32 %v419_v34, %v418_v40  ;;  %v516_v36 = vadd.f32 %v515_v26, %v514_v29  ;;  %v519_v40 = vsel %vm14634_vm0, %v464_v23, 0.0  ;;  %v521_v44 = vsel %vm14634_vm0, %v465_v31, 0.0 }
  0x46   : > { %v422_v57 = vadd.f32 %v421_v43, %v420_v49  ;;  %v518_v41 = vadd.f32 %v517_v33, %v516_v36  ;;  %v467_v43 = vmul.f32 %v9722_v30, %v9722_v30  ;;  %v468_v49 = vmul.f32 %v9730_v38, %v9730_v38 }
  0x48   : > { %v424_v5 = vadd.f32 %v423_v51, %v422_v57  ;;  %v520_v45 = vadd.f32 %v519_v40, %v518_v41  ;;  %v525_v55 = vsel %vm14634_vm0, %v467_v43, 0.0 }
  0x4a   : > { %v426_v17 = vadd.f32 %v425_v59, %v424_v5  ;;  %v522_v51 = vadd.f32 %v521_v44, %v520_v45  ;;  %v527_v59 = vsel %vm14634_vm0, %v468_v49, 0.0  ;;  %v529_v5 = vsel %vm14634_vm0, %v469_v52, 0.0  ;;  %v1336_v49 = vld [vmem:[%s14560_s3 + $0x8] sm:$0xff] }
  0x4b   : > { %8541 = vmatprep.subr.mxu1 %v1336_v49 }
  0x4c   : > { %v428_v28 = vadd.f32 %v427_v11, %v426_v17  ;;  %v524_v57 = vadd.f32 %v523_v50, %v522_v51  ;;  %v531_v11 = vsel %vm14634_vm0, %v470_v58, 0.0  ;;  %8542 = vmatpush3.msra.mxu1 %v1336_v49  ;;  %v1335_v58 = vld [vmem:[%s14560_s3] sm:$0xff] }
  0x4d   : > { %8491 = vmatprep.subr.mxu0 %v1335_v58  ;;  %8641 = vmatprep.subr.mxu1 %v9811_v63 }
  0x4e   : > { %v430_v34 = vadd.f32 %v429_v21, %v428_v28  ;;  %v526_v62 = vadd.f32 %v525_v55, %v524_v57  ;;  %8492 = vmatpush3.msra.mxu0 %v1335_v58 }
  0x50   : > { %431 = vadd.xlane.f32.xlu0 %v430_v34  ;;  %v528_v8 = vadd.f32 %v527_v59, %v526_v62  ;;  %v9805_v59 = vld [vmem:[%s14560_s3 + $0x10] sm:$0xff] }
  0x51   : > { %8591 = vmatprep.subr.mxu0 %v9805_v59 }
  0x52   : > { %v530_v12 = vadd.f32 %v529_v5, %v528_v8 }
  0x54   : > { %v532_v17 = vadd.f32 %v531_v11, %v530_v12  ;;  %v740_v11 = vlaneseq }
  0x56   : > { %v534_v18 = vadd.f32 %v533_v14, %v532_v17  ;;  %v9933_v17 = vld [vmem:[%s14559_s2] ss:$0 sm:$0xff] }
  0x58   : > { %535 = vadd.xlane.f32.xlu0 %v534_v18 }
  0xd9   : > { %v432_v21 = vpop.xlane.xlu0 %431 }
  0xda   : > { %v433_v23 = vrot.slane %v432_v21, 4 }
  0xdc   : > { %v434_v26 = vadd.f32 %v433_v23, %v432_v21 }
  0xde   : > { %v435_v28 = vrot.slane %v434_v26, 2 }
  0xe0   : > { %v436_v29 = vadd.f32 %v435_v28, %v434_v26 }
  0xe1   : > { %v536_v34 = vpop.xlane.xlu0 %535 }
  0xe2   : > { %v437_v31 = vrot.slane %v436_v29, 1  ;;  %v537_v36 = vrot.slane %v536_v34, 4 }
  0xe4   : > { %v438_v33 = vadd.f32 %v437_v31, %v436_v29  ;;  %v538_v37 = vadd.f32 %v537_v36, %v536_v34  ;;  %v9836_v31 = vshrl.u32 %v740_v11, 7 }
  0xe6   : > { %9391 = vpush %v438_v33  ;;  %v539_v40 = vrot.slane %v538_v37, 2  ;;  %v743_v49 = vadd.s32 16, %v9836_v31  ;;  %v9888_v11 = vadd.s32 96, %v9836_v31  ;;  %v9891_v12 = vadd.s32 112, %v9836_v31 }
  0xe7   : > { %v9899_v58 = vadd.s32 144, %v9836_v31  ;;  %v9911_v36 = vadd.s32 160, %v9836_v31 }
  0xe8   : > { %v540_v41 = vadd.f32 %v539_v40, %v538_v37 }
  0xea   : > { %v541_v43 = vrot.slane %v540_v41, 1 }
  0xec   : > { %v542_v44 = vadd.f32 %v541_v43, %v540_v41  ;;  %v779_v43 = vand.u32 15, %v743_v49 }
  0xee   : > { %9393 = vpush %v542_v44  ;;  %v777_v44 = vand.u32 15, %v9836_v31  ;;  %vm9945_vm6 = vcmp.eq.s32.totalorder %v779_v43, 0 }
  0xf0   : > { %vm9938_vm5 = vcmp.eq.s32.totalorder %v777_v44, 0 }
 0x117   : > { %s9789_s15 = spop %9391 }
 0x118   : > { %s546_s16 = smul.f32 0.00048828125, %s9789_s15 }
 0x11a   : > { %s547_s17 = smul.f32 %s9789_s15, %s546_s16  ;;  %v9816_v8 = vstv %s546_s16 }
 0x11b   : > { %v584_v18 = vsub.f32 %v9746_v56, %v9816_v8  ;;  %v585_v21 = vsub.f32 %v9754_v4, %v9816_v8  ;;  %v556_v23 = vsub.f32 %v9540_v2, %v9816_v8  ;;  %v557_v26 = vsub.f32 %v9543_v3, %v9816_v8 }
 0x11c   : > { %v554_v28 = vsub.f32 %v9534_v0, %v9816_v8  ;;  %v555_v29 = vsub.f32 %v9537_v1, %v9816_v8  ;;  %v558_v56 = vsub.f32 %v9552_v7, %v9816_v8  ;;  %v559_v4 = vsub.f32 %v9557_v10, %v9816_v8 }
 0x11d   : > { %v560_v2 = vsub.f32 %v9562_v13, %v9816_v8  ;;  %v561_v3 = vsub.f32 %v9567_v16, %v9816_v8  ;;  %v9980_v10 = vadd.s32 192, %v9836_v31  ;;  %v10014_v13 = vld [vmem:[%s14560_s3 + $0x28] sm:$0xff] }
 0x11f   : > { %s9394_s18 = spop %9393 }
 0x120   : > { %s548_s19 = ssub.f32 %s9394_s18, %s547_s17 }
 0x122   : > { %s551_s20 = smul.f32 0.0004885198, %s548_s19 }
 0x124   : > { %s552_s22 = smax.f32 %s9464_s21, %s551_s20 }
 0x125   : > { %v586_v45 = vstv %s552_s22 }
 0x126   : > { %9416 = vrsqrt.f32 %v586_v45  ;;  %vm589_vm1 = vcmp.eq.f32.partialorder %v586_v45, inf  ;;  %v592_v52 = vand.u32 2147483648, %v586_v45  ;;  %vm591_vm2 = vcmp.eq.f32.partialorder %v586_v45, 0.0 }
 0x133   : > { %v9417_v50 = vpop.eup %9416 }
 0x134   : > { %v588_v51 = vmul.f32 %v9417_v50, %v586_v45  ;;  %v745_v50 = vadd.s32 32, %v9836_v31 }
 0x136   : > { %v590_v55 = vsel %vm589_vm1, %v586_v45, %v588_v51  ;;  %v9896_v51 = vadd.s32 128, %v9836_v31  ;;  %v781_v41 = vand.u32 15, %v745_v50  ;;  %v9919_v45 = vld [vmem:[%s14558_s1] ss:$0 sm:$0xff] }
 0x137   : > { %v593_v57 = vsel %vm591_vm2, %v592_v52, %v590_v55  ;;  %v9875_v55 = vadd.s32 48, %v9836_v31  ;;  %v14884_v52 = vmov 0 }
 0x138   : > { %9395 = vpush %v593_v57  ;;  %v9878_v57 = vadd.s32 64, %v9836_v31  ;;  %v14885_v52 = vsel %vm9945_vm6, 4294967295, %v14884_v52  ;;  %vm9973_vm7 = vcmp.eq.s32.totalorder %v781_v41, 0 }
 0x139   : > { %14886 = vst [vmem:[#allocation4_spill] sm:$0xff] %v14885_v52 }
 0x169   : > { %s9396_s29 = spop %9395 }
 0x16a   : > { %s595_s12 = sadd.f32 1e-05, %s9396_s29 }
 0x16c   : > { %v596_v62 = vstv %s595_s12 }
 0x16d   : > { %9418 = vrcp.f32 %v596_v62  ;;  %v9914_v62 = vadd.s32 176, %v9836_v31 }
 0x17a   : > { %v9419_v5 = vpop.eup %9418 }
 0x17b   : > { %9397 = vpush %v9419_v5  ;;  %v9885_v5 = vadd.s32 80, %v9836_v31 }
 0x1ac   : > { %s9398_s15 = spop %9397 }
 0x1ad   : > { %v9921_v49 = vstv %s9398_s15 }
 0x1ae   : > { %v630_v33 = vmul.f32 %v9921_v49, %v584_v18  ;;  %v631_v1 = vmul.f32 %v9921_v49, %v585_v21  ;;  %v602_v50 = vmul.f32 %v9921_v49, %v556_v23  ;;  %v603_v40 = vmul.f32 %v9921_v49, %v557_v26 }
 0x1af   : > { %v600_v34 = vmul.f32 %v9921_v49, %v554_v28  ;;  %v14881_v18 = vmov 0  ;;  %v601_v21 = vmul.f32 %v9921_v49, %v555_v29  ;;  %v604_v43 = vmul.f32 %v9921_v49, %v558_v56 }
 0x1b0   : > { %v14882_v18 = vsel %vm9938_vm5, 4294967295, %v14881_v18  ;;  %v668_v0 = vmul.f32 %v9919_v45, %v630_v33  ;;  %v669_v37 = vmul.f32 %v9919_v45, %v631_v1  ;;  %v640_v28 = vmul.f32 %v9919_v45, %v602_v50 }
 0x1b1   : > { %14883 = vst [vmem:[#allocation3_spill] sm:$0xff] %v14882_v18  ;;  %v641_v44 = vmul.f32 %v9919_v45, %v603_v40  ;;  %v638_v14 = vmul.f32 %v9919_v45, %v600_v34  ;;  %v639_v29 = vmul.f32 %v9919_v45, %v601_v21  ;;  %v605_v40 = vmul.f32 %v9921_v49, %v559_v4 }
 0x1b2   : > { %v9956_v33 = vadd.f32 %v9933_v17, %v668_v0  ;;  %v9959_v1 = vadd.f32 %v9933_v17, %v669_v37  ;;  %v678_v34 = vadd.f32 %v9933_v17, %v640_v28  ;;  %v14889_v37 = vmov 0 }
 0x1b3   : > { %v679_v50 = vadd.f32 %v9933_v17, %v641_v44  ;;  %v676_v0 = vadd.f32 %v9933_v17, %v638_v14  ;;  %v677_v21 = vadd.f32 %v9933_v17, %v639_v29  ;;  %v14890_v37 = vsel %vm9973_vm7, 4294967295, %v14889_v37 }
 0x1b4   : > { %14887 = vst [vmem:[#allocation5_spill] sm:$0xff] %v9956_v33  ;;  %14888 = vst [vmem:[#allocation6_spill] sm:$0xff] %v9959_v1  ;;  %v642_v7 = vmul.f32 %v9919_v45, %v604_v43  ;;  %v643_v56 = vmul.f32 %v9919_v45, %v605_v40  ;;  %v9983_v4 = vadd.s32 208, %v9836_v31  ;;  %v9985_v28 = vmax.f32 %v678_v34, 0.0 }
 0x1b5   : > { %14891 = vst [vmem:[#allocation7_spill] sm:$0xff] %v14890_v37  ;;  %v9987_v44 = vmax.f32 %v679_v50, 0.0  ;;  %v9989_v14 = vmax.f32 %v676_v0, 0.0  ;;  %v9991_v41 = vmax.f32 %v677_v21, 0.0  ;;  %v606_v40 = vmul.f32 %v9921_v49, %v560_v2 }
 0x1b6   : > { %14892 = vst [vmem:[#allocation8_spill] sm:$0xff] %v9985_v28  ;;  %v680_v29 = vadd.f32 %v9933_v17, %v642_v7  ;;  %v681_v43 = vadd.f32 %v9933_v17, %v643_v56  ;;  %v607_v34 = vmul.f32 %v9921_v49, %v561_v3  ;;  %8543 = vmatprep.mubr.msk.f32.mxu1 %vm14634_vm0, %v9985_v28  ;;  %v14568_v50 = vrot.slane %v9985_v28, 1 }
 0x1b7   : > { %14893 = vst [vmem:[#allocation9_spill] sm:$0xff] %v9987_v44  ;;  %14894 = vst [vmem:[#allocation10_spill] sm:$0xff] %v9989_v14  ;;  %v10007_v0 = vrot.slane %v9987_v44, 1  ;;  %v1055_v21 = vrot.slane %v9987_v44, 7  ;;  %v1056_v7 = vrot.slane %v9985_v28, 7  ;;  %8544 = vmatmul.mubr.msk.f32.vlgmr.msra.gmra.mxu1 %vm14634_vm0, %v9987_v44  ;;  %v1059_v3 = vrot.slane %v9989_v14, 7 }
 0x1b8   : > { %14895 = vst [vmem:[#allocation11_spill] sm:$0xff] %v9991_v41  ;;  %v1061_v56 = vrot.slane %v9991_v41, 7  ;;  %v14897_v26 = vsub.f32 %v9730_v38, %v9816_v8  ;;  %8546 = vmatprep.mubr.msk.f32.mxu1 %vm14634_vm0, %v9989_v14  ;;  %v10037_v33 = vmax.f32 %v680_v29, 0.0  ;;  %v14898_v1 = vand.u32 15, %v9875_v55  ;;  %8642 = vmatpush3.msra.mxu1 %v9811_v63 }
 0x1b9   : > { %14896 = vst [vmem:[#allocation12_spill] sm:$0xff] %v10007_v0  ;;  %v10034_v16 = vsel %vm14633_vm3, %v14568_v50, %v10007_v0  ;;  %v1057_v2 = vsel %vm14637_vm4, %v1055_v21, %v1056_v7  ;;  %v14899_v38 = vmov 0  ;;  %v14903_v29 = vrot.slane %v9991_v41, 1  ;;  %8741 = vmatprep.subr.mxu1 %v10014_v13 }
 0x1ba   : > { %v10026_v23 = vmul.f32 %v9921_v49, %v14897_v26  ;;  %vm10041_vm8 = vcmp.eq.s32.totalorder %v14898_v1, 0  ;;  %v14902_v26 = vsub.f32 %v9738_v47, %v9816_v8  ;;  %v1155_v50 = vsel %vm9938_vm5, %v10034_v16, %v1057_v2 }
 0x1bb   : > { %v14900_v38 = vsel %vm10041_vm8, 4294967295, %v14899_v38  ;;  %v14904_v55 = vrot.slane %v9989_v14, 1  ;;  %v1060_v0 = vsel %vm14637_vm4, %v1055_v21, %v1059_v3  ;;  %8493 = vmatprep.mubr.msk.f32.mxu0 %vm14634_vm0, %v1155_v50  ;;  %v10066_v47 = vsel %vm14637_vm4, %v1056_v7, %v1055_v21  ;;  %8547 = vmatmul.mubr.msk.f32.gmra.mxu1 %vm14634_vm0, %v9991_v41 }
 0x1bc   : > { %14901 = vst [vmem:[#allocation13_spill] sm:$0xff] %v14900_v38  ;;  %v10050_v30 = vmul.f32 %v9921_v49, %v14902_v26  ;;  %14906 = vst [vmem:[#allocation15_spill] sm:$0xff] %v10066_v47  ;;  %v1063_v2 = vsel %vm14637_vm4, %v1061_v56, %v1056_v7  ;;  %v10074_v26 = vmax.f32 %v681_v43, 0.0  ;;  %8494 = vmatmul.mubr.msk.f32.vlgmr.msra.gmra.mxu0 %vm14634_vm0, %v10066_v47  ;;  %v14908_v50 = vand.u32 15, %v9878_v57 }
 0x1bd   : > { %v10060_v1 = vsel %vm14633_vm3, %v14904_v55, %v14903_v29  ;;  %v1064_v29 = vrot.slane %v10037_v33, 7  ;;  %v644_v55 = vmul.f32 %v9919_v45, %v606_v40  ;;  %v645_v52 = vmul.f32 %v9919_v45, %v607_v34  ;;  %8592 = vmatpush3.msra.mxu0 %v9805_v59  ;;  %8549 = vmatprep.mubr.msk.f32.mxu1 %vm14634_vm0, %v9985_v28 }
 0x1be   : > { %14905 = vst [vmem:[#allocation14_spill] sm:$0xff] %v10060_v1  ;;  %v10071_v63 = vsel %vm9945_vm6, %v10060_v1, %v1060_v0  ;;  %v10087_v0 = vld [vmem:[%s14560_s3 + $0x20] sm:$0xff]  ;;  %v10093_v43 = vsel %vm14637_vm4, %v1059_v3, %v1061_v56  ;;  %vm10098_vm9 = vcmp.eq.s32.totalorder %v14908_v50, 0  ;;  %v14909_v40 = vmov 0 }
 0x1bf   : > { %14907 = vst [vmem:[#allocation16_spill] sm:$0xff] %v10087_v0  ;;  %8496 = vmatprep.mubr.msk.f32.mxu0 %vm14634_vm0, %v10071_v63  ;;  %v14910_v40 = vsel %vm10098_vm9, 4294967295, %v14909_v40  ;;  %v14912_v34 = vsub.f32 %v9572_v19, %v9816_v8  ;;  %v14913_v59 = vsub.f32 %v9577_v22, %v9816_v8  ;;  %v10115_v57 = vsel %vm9973_vm7, %v10034_v16, %v1063_v2 }
 0x1c0   : > { %14911 = vst [vmem:[#allocation17_spill] sm:$0xff] %v14910_v40  ;;  %14914 = vst [vmem:[#allocation18_spill] sm:$0xff] %v10115_v57  ;;  %v682_v3 = vadd.f32 %v9933_v17, %v644_v55  ;;  %v683_v56 = vadd.f32 %v9933_v17, %v645_v52  ;;  %v14915_v19 = vsub.f32 %v9582_v25, %v9816_v8  ;;  %v14916_v2 = vand.u32 15, %v9885_v5 }
 0x1c1   : > { %v608_v18 = vmul.f32 %v9921_v49, %v14912_v34  ;;  %v609_v1 = vmul.f32 %v9921_v49, %v14913_v59  ;;  %v1065_v22 = vsel %vm14637_vm4, %v1055_v21, %v1064_v29  ;;  %v1066_v34 = vrot.slane %v10074_v26, 7  ;;  %8691 = vmatprep.subr.mxu0 %v10087_v0  ;;  %8497 = vmatmul.mubr.msk.f32.gmra.mxu0 %vm14634_vm0, %v10093_v43 }
 0x1c2   : > { %v610_v50 = vmul.f32 %v9921_v49, %v14915_v19  ;;  %vm10129_vm10 = vcmp.eq.s32.totalorder %v14916_v2, 0  ;;  %v14917_v37 = vmov 0  ;;  %8550 = vmatmul.mubr.msk.f32.gmra.mxu1 %vm14634_vm0, %v9987_v44  ;;  %v14920_v25 = vrot.slane %v10074_v26, 1  ;;  %8499 = vmatprep.mubr.msk.f32.mxu0 %vm14634_vm0, %v10115_v57 }
 0x1c3   : > { %v646_v59 = vmul.f32 %v9919_v45, %v608_v18  ;;  %v647_v7 = vmul.f32 %v9919_v45, %v609_v1  ;;  %v14918_v37 = vsel %vm10129_vm10, 4294967295, %v14917_v37  ;;  %v14921_v52 = vrot.slane %v10037_v33, 1  ;;  %8552 = vmatprep.mubr.msk.f32.mxu1 %vm14634_vm0, %v10037_v33 }
 0x1c4   : > { %14919 = vst [vmem:[#allocation19_spill] sm:$0xff] %v14918_v37  ;;  %v10145_v5 = vmax.f32 %v682_v3, 0.0  ;;  %v10147_v21 = vmax.f32 %v683_v56, 0.0  ;;  %v648_v1 = vmul.f32 %v9919_v45, %v610_v50  ;;  %v14925_v2 = vsub.f32 %v9585_v27, %v9816_v8 }
 0x1c5   : > { %v10143_v18 = vsel %vm14633_vm3, %v14921_v52, %v14920_v25  ;;  %v684_v55 = vadd.f32 %v9933_v17, %v646_v59  ;;  %v685_v19 = vadd.f32 %v9933_v17, %v647_v7  ;;  %v14926_v0 = vand.u32 15, %v9888_v11  ;;  %8500 = vmatmul.mubr.msk.f32.gmra.mxu0 %vm14634_vm0, %v10066_v47 }
 0x1c6   : > { %14922 = vst [vmem:[#allocation20_spill] sm:$0xff] %v10143_v18  ;;  %14923 = vst [vmem:[#allocation21_spill] sm:$0xff] %v10145_v5  ;;  %v611_v3 = vmul.f32 %v9921_v49, %v14925_v2  ;;  %v14581_v25 = vrot.slane %v10145_v5, 1  ;;  %v14580_v50 = vrot.slane %v10147_v21, 1  ;;  %v1068_v52 = vrot.slane %v10145_v5, 7  ;;  %8553 = vmatmul.mubr.msk.f32.gmra.mxu1 %vm14634_vm0, %v10074_v26 }
 0x1c7   : > { %14924 = vst [vmem:[#allocation22_spill] sm:$0xff] %v10147_v21  ;;  %v1070_v44 = vrot.slane %v10147_v21, 7  ;;  %vm10167_vm11 = vcmp.eq.s32.totalorder %v14926_v0, 0  ;;  %v14927_v59 = vmov 0  ;;  %v10171_v7 = vmax.f32 %v684_v55, 0.0  ;;  %8555 = vmatprep.mubr.msk.f32.mxu1 %vm14634_vm0, %v10145_v5 }
 0x1c8   : > { %v14928_v59 = vsel %vm10167_vm11, 4294967295, %v14927_v59  ;;  %v10173_v27 = vmax.f32 %v685_v19, 0.0  ;;  %v686_v2 = vadd.f32 %v9933_v17, %v648_v1  ;;  %v649_v56 = vmul.f32 %v9919_v45, %v611_v3 }
 0x1c9   : > { %14929 = vst [vmem:[#allocation23_spill] sm:$0xff] %v14928_v59  ;;  %14930 = vst [vmem:[#allocation24_spill] sm:$0xff] %v10171_v7  ;;  %v10184_v11 = vsel %vm10041_vm8, %v10143_v18, %v1065_v22  ;;  %v10187_v0 = vsel %vm14637_vm4, %v1064_v29, %v1066_v34  ;;  %v10194_v1 = vsel %vm14633_vm3, %v14581_v25, %v14580_v50  ;;  %v14589_v29 = vrot.slane %v10171_v7, 1 }
 0x1ca   : > { %14931 = vst [vmem:[#allocation25_spill] sm:$0xff] %v10173_v27  ;;  %14932 = vst [vmem:[#allocation26_spill] sm:$0xff] %v10184_v11  ;;  %8502 = vmatprep.mubr.msk.f32.mxu0 %vm14634_vm0, %v10184_v11  ;;  %v1069_v22 = vsel %vm14637_vm4, %v1066_v34, %v1068_v52  ;;  %v14588_v19 = vrot.slane %v10173_v27, 1  ;;  %v1072_v3 = vrot.slane %v10171_v7, 7  ;;  %v10205_v38 = vmax.f32 %v686_v2, 0.0  ;;  %8556 = vmatmul.mubr.msk.f32.gmra.mxu1 %vm14634_vm0, %v10147_v21 }
 0x1cb   : > { %14933 = vst [vmem:[#allocation27_spill] sm:$0xff] %v10187_v0  ;;  %14934 = vst [vmem:[#allocation28_spill] sm:$0xff] %v10194_v1  ;;  %v1074_v50 = vrot.slane %v10173_v27, 7  ;;  %v687_v25 = vadd.f32 %v9933_v17, %v649_v56  ;;  %v14936_v55 = vsub.f32 %v9600_v35, %v9816_v8  ;;  %v14938_v2 = vsub.f32 %v9610_v42, %v9816_v8 }
 0x1cc   : > { %14935 = vst [vmem:[#allocation29_spill] sm:$0xff] %v10205_v38  ;;  %v10218_v34 = vsel %vm14633_vm3, %v14589_v29, %v14588_v19  ;;  %v1073_v11 = vsel %vm14637_vm4, %v1070_v44, %v1072_v3  ;;  %v14939_v56 = vsub.f32 %v9618_v48, %v9816_v8  ;;  %8503 = vmatmul.mubr.msk.f32.gmra.mxu0 %vm14634_vm0, %v10187_v0  ;;  %v14942_v29 = vand.u32 15, %v9891_v12 }
 0x1cd   : > { %v612_v18 = vmul.f32 %v9921_v49, %v14936_v55  ;;  %14937 = vst [vmem:[#allocation30_spill] sm:$0xff] %v10218_v34  ;;  %v613_v47 = vmul.f32 %v9921_v49, %v14938_v2  ;;  %v10236_v55 = vsel %vm10098_vm9, %v10194_v1, %v1069_v22  ;;  %v10239_v42 = vsel %vm14637_vm4, %v1068_v52, %v1070_v44 }
 0x1ce   : > { %v614_v35 = vmul.f32 %v9921_v49, %v14939_v56  ;;  %14940 = vst [vmem:[#allocation31_spill] sm:$0xff] %v10236_v55  ;;  %14941 = vst [vmem:[#allocation32_spill] sm:$0xff] %v10239_v42  ;;  %v10241_v2 = vmax.f32 %v687_v25, 0.0  ;;  %8505 = vmatprep.mubr.msk.f32.mxu0 %vm14634_vm0, %v10236_v55  ;;  %8558 = vmatprep.mubr.msk.f32.mxu1 %vm14634_vm0, %v10171_v7  ;;  %v1076_v56 = vrot.slane %v10205_v38, 7  ;;  %vm10253_vm12 = vcmp.eq.s32.totalorder %v14942_v29, 0 }
 0x1cf   : > { %v650_v19 = vmul.f32 %v9919_v45, %v612_v18  ;;  %v651_v22 = vmul.f32 %v9919_v45, %v613_v47  ;;  %v14943_v44 = vmov 0  ;;  %v10261_v52 = vsel %vm10129_vm10, %v10218_v34, %v1073_v11  ;;  %8559 = vmatmul.mubr.msk.f32.gmra.mxu1 %vm14634_vm0, %v10173_v27 }
 0x1d0   : > { %v14944_v44 = vsel %vm10253_vm12, 4294967295, %v14943_v44  ;;  %v652_v25 = vmul.f32 %v9919_v45, %v614_v35  ;;  %14946 = vst [vmem:[#allocation34_spill] sm:$0xff] %v10261_v52  ;;  %v14947_v18 = vsub.f32 %v9626_v54, %v9816_v8  ;;  %v14948_v12 = vand.u32 15, %v9896_v51  ;;  %8506 = vmatmul.mubr.msk.f32.gmra.mxu0 %vm14634_vm0, %v10239_v42  ;;  %8561 = vmatprep.mubr.msk.f32.mxu1 %vm14634_vm0, %v10205_v38 }
 0x1d1   : > { %14945 = vst [vmem:[#allocation33_spill] sm:$0xff] %v14944_v44  ;;  %v14949_v29 = vmov 0  ;;  %v14952_v35 = vsub.f32 %v9634_v60, %v9816_v8  ;;  %v1077_v11 = vsel %vm14637_vm4, %v1074_v50, %v1076_v56  ;;  %v688_v48 = vadd.f32 %v9933_v17, %v650_v19  ;;  %8508 = vmatprep.mubr.msk.f32.mxu0 %vm14634_vm0, %v10261_v52 }
 0x1d2   : > { %v615_v47 = vmul.f32 %v9921_v49, %v14947_v18  ;;  %vm10270_vm13 = vcmp.eq.s32.totalorder %v14948_v12, 0  ;;  %v689_v40 = vadd.f32 %v9933_v17, %v651_v22  ;;  %v690_v54 = vadd.f32 %v9933_v17, %v652_v25 }
 0x1d3   : > { %v14950_v29 = vsel %vm10270_vm13, 4294967295, %v14949_v29  ;;  %v616_v37 = vmul.f32 %v9921_v49, %v14952_v35  ;;  %v10287_v51 = vsel %vm14637_vm4, %v1072_v3, %v1074_v50  ;;  %v14954_v60 = vrot.slane %v10241_v2, 1  ;;  %8562 = vmatmul.mubr.msk.f32.gmra.mxu1 %vm14634_vm0, %v10241_v2 }
 0x1d4   : > { %14951 = vst [vmem:[#allocation35_spill] sm:$0xff] %v14950_v29  ;;  %14953 = vst [vmem:[#allocation36_spill] sm:$0xff] %v10287_v51  ;;  %v14955_v18 = vrot.slane %v10205_v38, 1  ;;  %v1078_v19 = vrot.slane %v10241_v2, 7  ;;  %v653_v22 = vmul.f32 %v9919_v45, %v615_v47  ;;  %v10307_v3 = vmax.f32 %v688_v48, 0.0  ;;  %8509 = vmatmul.mubr.msk.f32.gmra.mxu0 %vm14634_vm0, %v10287_v51 }
 0x1d5   : > { %v10309_v25 = vmax.f32 %v689_v40, 0.0  ;;  %v10311_v35 = vmax.f32 %v690_v54, 0.0  ;;  %v654_v47 = vmul.f32 %v9919_v45, %v616_v37  ;;  %v14960_v59 = vsub.f32 %v9650_v15, %v9816_v8 }
 0x1d6   : > { %v10294_v12 = vsel %vm14633_vm3, %v14955_v18, %v14954_v60  ;;  %14958 = vst [vmem:[#allocation39_spill] sm:$0xff] %v10307_v3  ;;  %v691_v60 = vadd.f32 %v9933_v17, %v653_v22  ;;  %v14959_v18 = vsub.f32 %v9642_v6, %v9816_v8  ;;  %v14604_v48 = vrot.slane %v10307_v3, 1  ;;  %8564 = vmatprep.mubr.msk.f32.mxu1 %vm14634_vm0, %v10307_v3 }
 0x1d7   : > { %14956 = vst [vmem:[#allocation37_spill] sm:$0xff] %v10294_v12  ;;  %v10305_v50 = vsel %vm10167_vm11, %v10294_v12, %v1077_v11  ;;  %v618_v11 = vmul.f32 %v9921_v49, %v14960_v59  ;;  %v14603_v40 = vrot.slane %v10309_v25, 1  ;;  %v1080_v54 = vrot.slane %v10307_v3, 7  ;;  %8565 = vmatmul.mubr.msk.f32.gmra.mxu1 %vm14634_vm0, %v10309_v25 }
 0x1d8   : > { %14957 = vst [vmem:[#allocation38_spill] sm:$0xff] %v10305_v50  ;;  %v617_v34 = vmul.f32 %v9921_v49, %v14959_v18  ;;  %v1082_v22 = vrot.slane %v10309_v25, 7  ;;  %v10331_v6 = vmax.f32 %v691_v60, 0.0  ;;  %v1084_v37 = vrot.slane %v10311_v35, 7  ;;  %8511 = vmatprep.mubr.msk.f32.mxu0 %vm14634_vm0, %v10305_v50  ;;  %8567 = vmatprep.mubr.msk.f32.mxu1 %vm14634_vm0, %v10311_v35 }
 0x1d9   : > { %v692_v59 = vadd.f32 %v9933_v17, %v654_v47  ;;  %v10338_v18 = vmul.f32 %v9919_v45, %v10026_v23  ;;  %v10349_v60 = vsel %vm14633_vm3, %v14604_v48, %v14603_v40  ;;  %v1081_v15 = vsel %vm14637_vm4, %v1078_v19, %v1080_v54 }
 0x1da   : > { %14961 = vst [vmem:[#allocation40_spill] sm:$0xff] %v10331_v6  ;;  %14962 = vst [vmem:[#allocation41_spill] sm:$0xff] %v10349_v60  ;;  %v14963_v47 = vand.u32 15, %v9899_v58  ;;  %v14964_v23 = vmov 0  ;;  %v10359_v12 = vadd.s32 224, %v9836_v31  ;;  %v10362_v50 = vsel %vm14637_vm4, %v1076_v56, %v1078_v19 }
 0x1db   : > { %14967 = vst [vmem:[#allocation43_spill] sm:$0xff] %v10362_v50  ;;  %v14609_v1 = vrot.slane %v10331_v6, 1  ;;  %v1085_v51 = vsel %vm14637_vm4, %v1082_v22, %v1084_v37  ;;  %v10366_v40 = vmax.f32 %v692_v59, 0.0  ;;  %v1086_v48 = vrot.slane %v10331_v6, 7  ;;  %8512 = vmatmul.mubr.msk.f32.gmra.mxu0 %vm14634_vm0, %v10362_v50  ;;  %8568 = vmatmul.mubr.msk.f32.gmra.mxu1 %vm14634_vm0, %v10331_v6 }
 0x1dc   : > { %vm10354_vm14 = vcmp.eq.s32.totalorder %v14963_v47, 0  ;;  %v655_v58 = vmul.f32 %v9919_v45, %v617_v34  ;;  %v656_v47 = vmul.f32 %v9919_v45, %v618_v11  ;;  %v14969_v52 = vsub.f32 %v9658_v24, %v9816_v8 }
 0x1dd   : > { %v14965_v23 = vsel %vm10354_vm14, 4294967295, %v14964_v23  ;;  %14968 = vst [vmem:[#allocation44_spill] sm:$0xff] %v10366_v40  ;;  %v10382_v56 = vsel %vm10253_vm12, %v10349_v60, %v1081_v15  ;;  %v14971_v34 = vrot.slane %v10311_v35, 1  ;;  %v1088_v24 = vrot.slane %v10366_v40, 7  ;;  %8570 = vmatprep.mubr.msk.f32.mxu1 %vm14634_vm0, %v10366_v40 }
 0x1de   : > { %14966 = vst [vmem:[#allocation42_spill] sm:$0xff] %v14965_v23  ;;  %v619_v42 = vmul.f32 %v9921_v49, %v14969_v52  ;;  %14970 = vst [vmem:[#allocation45_spill] sm:$0xff] %v10382_v56  ;;  %v14973_v52 = vsub.f32 %v9666_v32, %v9816_v8  ;;  %8514 = vmatprep.mubr.msk.f32.mxu0 %vm14634_vm0, %v10382_v56  ;;  %v10401_v15 = vsel %vm14637_vm4, %v1080_v54, %v1082_v22 }
 0x1df   : > { %v10389_v19 = vsel %vm14633_vm3, %v14971_v34, %v14609_v1  ;;  %14974 = vst [vmem:[#allocation47_spill] sm:$0xff] %v10401_v15  ;;  %v693_v34 = vadd.f32 %v9933_v17, %v655_v58  ;;  %v14977_v1 = vmov 0  ;;  %v1089_v44 = vsel %vm14637_vm4, %v1086_v48, %v1088_v24  ;;  %8515 = vmatmul.mubr.msk.f32.gmra.mxu0 %vm14634_vm0, %v10401_v15 }
 0x1e0   : > { %14972 = vst [vmem:[#allocation46_spill] sm:$0xff] %v10389_v19  ;;  %v620_v11 = vmul.f32 %v9921_v49, %v14973_v52  ;;  %v10406_v59 = vsel %vm10270_vm13, %v10389_v19, %v1085_v51  ;;  %v14976_v52 = vand.u32 15, %v9911_v36  ;;  %v694_v54 = vadd.f32 %v9933_v17, %v656_v47 }
 0x1e1   : > { %14975 = vst [vmem:[#allocation48_spill] sm:$0xff] %v10406_v59  ;;  %v657_v22 = vmul.f32 %v9919_v45, %v619_v42  ;;  %v10420_v51 = vmax.f32 %v693_v34, 0.0  ;;  %v14980_v58 = vsub.f32 %v9674_v39, %v9816_v8  ;;  %v14981_v36 = vand.u32 15, %v9914_v62  ;;  %8517 = vmatprep.mubr.msk.f32.mxu0 %vm14634_vm0, %v10406_v59 }
 0x1e2   : > { %vm10412_vm15 = vcmp.eq.s32.totalorder %v14976_v52, 0  ;;  %v658_v29 = vmul.f32 %v9919_v45, %v620_v11  ;;  %v14982_v52 = vmov 0  ;;  %v14985_v47 = vsub.f32 %v9682_v46, %v9816_v8 }
 0x1e3   : > { %v14978_v1 = vsel %vm10412_vm15, 4294967295, %v14977_v1  ;;  %v621_v32 = vmul.f32 %v9921_v49, %v14980_v58  ;;  %vm10428_vm1 = vcmp.eq.s32.totalorder %v14981_v36, 0  ;;  %v14986_v11 = vsub.f32 %v9690_v53, %v9816_v8  ;;  %8571 = vmatmul.mubr.msk.f32.gmra.mxu1 %vm14634_vm0, %v10420_v51 }
 0x1e4   : > { %14979 = vst [vmem:[#allocation49_spill] sm:$0xff] %v14978_v1  ;;  %v14983_v52 = vsel %vm10428_vm1, 4294967295, %v14982_v52  ;;  %v622_v42 = vmul.f32 %v9921_v49, %v14985_v47  ;;  %v10444_v39 = vmax.f32 %v694_v54, 0.0  ;;  %v695_v62 = vadd.f32 %v9933_v17, %v657_v22 }
 0x1e5   : > { %14984 = vst [vmem:[#allocation50_spill] sm:$0xff] %v14983_v52  ;;  %v623_v34 = vmul.f32 %v9921_v49, %v14986_v11  ;;  %v696_v58 = vadd.f32 %v9933_v17, %v658_v29  ;;  %v14987_v46 = vsub.f32 %v9698_v61, %v9816_v8  ;;  %v14618_v53 = vrot.slane %v10420_v51, 1 }
 0x1e6   : > { %v1090_v54 = vrot.slane %v10420_v51, 7  ;;  %v659_v47 = vmul.f32 %v9919_v45, %v621_v32  ;;  %v660_v22 = vmul.f32 %v9919_v45, %v622_v42  ;;  %v10460_v29 = vmax.f32 %v695_v62, 0.0  ;;  %8573 = vmatprep.mubr.msk.f32.mxu1 %vm14634_vm0, %v10444_v39 }
 0x1e7   : > { %v624_v36 = vmul.f32 %v9921_v49, %v14987_v46  ;;  %v1092_v11 = vrot.slane %v10444_v39, 7  ;;  %v10464_v46 = vmax.f32 %v696_v58, 0.0  ;;  %v10467_v19 = vsel %vm14637_vm4, %v1084_v37, %v1086_v48 }
 0x1e8   : > { %14988 = vst [vmem:[#allocation51_spill] sm:$0xff] %v10467_v19  ;;  %v14989_v60 = vrot.slane %v10366_v40, 1  ;;  %v697_v32 = vadd.f32 %v9933_v17, %v659_v47  ;;  %v698_v42 = vadd.f32 %v9933_v17, %v660_v22  ;;  %8518 = vmatmul.mubr.msk.f32.gmra.mxu0 %vm14634_vm0, %v10467_v19  ;;  %v1094_v62 = vrot.slane %v10460_v29, 7  ;;  %8574 = vmatmul.mubr.msk.f32.gmra.mxu1 %vm14634_vm0, %v10460_v29 }
 0x1e9   : > { %v1096_v22 = vrot.slane %v10464_v46, 7  ;;  %v14993_v61 = vmov 0  ;;  %v667_v37 = vmul.f32 %v9919_v45, %v10050_v30  ;;  %v14996_v23 = vrot.slane %v10460_v29, 1  ;;  %8576 = vmatprep.mubr.msk.f32.mxu1 %vm14634_vm0, %v10464_v46 }
 0x1ea   : > { %v10474_v59 = vsel %vm14633_vm3, %v14989_v60, %v14618_v53  ;;  %v1093_v60 = vsel %vm14637_vm4, %v1090_v54, %v1092_v11  ;;  %v10494_v58 = vmax.f32 %v697_v32, 0.0  ;;  %v14992_v53 = vand.u32 15, %v9980_v10 }
 0x1eb   : > { %14990 = vst [vmem:[#allocation52_spill] sm:$0xff] %v10474_v59  ;;  %v10485_v48 = vsel %vm10354_vm14, %v10474_v59, %v1089_v44  ;;  %v10498_v44 = vmax.f32 %v698_v42, 0.0  ;;  %v14997_v32 = vrot.slane %v10444_v39, 1  ;;  %v661_v47 = vmul.f32 %v9919_v45, %v623_v34 }
 0x1ec   : > { %14991 = vst [vmem:[#allocation53_spill] sm:$0xff] %v10485_v48  ;;  %8520 = vmatprep.mubr.msk.f32.mxu0 %vm14634_vm0, %v10485_v48  ;;  %vm10502_vm2 = vcmp.eq.s32.totalorder %v14992_v53, 0  ;;  %v662_v42 = vmul.f32 %v9919_v45, %v624_v36  ;;  %v10518_v10 = vsel %vm14637_vm4, %v1088_v24, %v1090_v54  ;;  %v14629_v53 = vrot.slane %v10494_v58, 1  ;;  %8577 = vmatmul.mubr.msk.f32.gmra.mxu1 %vm14634_vm0, %v10494_v58 }
 0x1ed   : > { %v14994_v61 = vsel %vm10502_vm2, 4294967295, %v14993_v61  ;;  %v10513_v59 = vsel %vm14633_vm3, %v14997_v32, %v14996_v23  ;;  %14999 = vst [vmem:[#allocation56_spill] sm:$0xff] %v10518_v10  ;;  %v1097_v48 = vsel %vm14637_vm4, %v1094_v62, %v1096_v22  ;;  %v1098_v30 = vrot.slane %v10494_v58, 7  ;;  %8521 = vmatmul.mubr.msk.f32.gmra.mxu0 %vm14634_vm0, %v10518_v10  ;;  %v15007_v10 = vld [vmem:[#allocation2_spill] sm:$0xff]  ;;  %8579 = vmatprep.mubr.msk.f32.mxu1 %vm14634_vm0, %v10498_v44 }
 0x1ee   : > { %14995 = vst [vmem:[#allocation54_spill] sm:$0xff] %v14994_v61  ;;  %14998 = vst [vmem:[#allocation55_spill] sm:$0xff] %v10513_v59  ;;  %v10530_v23 = vsel %vm10412_vm15, %v10513_v59, %v1093_v60  ;;  %v699_v24 = vadd.f32 %v9933_v17, %v661_v47  ;;  %v1100_v34 = vrot.slane %v10498_v44, 7  ;;  %v700_v36 = vadd.f32 %v9933_v17, %v662_v42 }
 0x1ef   : > { %15000 = vst [vmem:[#allocation57_spill] sm:$0xff] %v10530_v23  ;;  %8523 = vmatprep.mubr.msk.f32.mxu0 %vm14634_vm0, %v10530_v23  ;;  %v10540_v54 = vsel %vm14637_vm4, %v1092_v11, %v1094_v62  ;;  %v15002_v60 = vrot.slane %v10464_v46, 1  ;;  %v15004_v47 = vsub.f32 %v9706_v9, %v9816_v8  ;;  %v10554_v1 = vadd.s32 240, %v9836_v31 }
 0x1f0   : > { %15001 = vst [vmem:[#allocation58_spill] sm:$0xff] %v10540_v54  ;;  %v10561_v62 = vmax.f32 %v699_v24, 0.0  ;;  %v14641_v59 = vrot.slane %v10498_v44, 1  ;;  %v10564_v23 = vmax.f32 %v700_v36, 0.0  ;;  %v15008_v52 = vsub.f32 %v15007_v10, %v9816_v8 }
 0x1f1   : > { %v10547_v32 = vsel %vm14633_vm3, %v15002_v60, %v14629_v53  ;;  %v625_v42 = vmul.f32 %v9921_v49, %v15004_v47  ;;  %v1101_v60 = vsel %vm14637_vm4, %v1098_v30, %v1100_v34  ;;  %v15006_v47 = vsub.f32 %v9714_v20, %v9816_v8  ;;  %8524 = vmatmul.mubr.msk.f32.gmra.mxu0 %vm14634_vm0, %v10540_v54 }
 0x1f2   : > { %15003 = vst [vmem:[#allocation59_spill] sm:$0xff] %v10547_v32  ;;  %v10559_v11 = vsel %vm10428_vm1, %v10547_v32, %v1097_v48  ;;  %v627_v48 = vmul.f32 %v9921_v49, %v15008_v52  ;;  %v14640_v24 = vrot.slane %v10561_v62, 1  ;;  %v1102_v36 = vrot.slane %v10561_v62, 7 }
 0x1f3   : > { %15005 = vst [vmem:[#allocation60_spill] sm:$0xff] %v10559_v11  ;;  %v663_v9 = vmul.f32 %v9919_v45, %v625_v42  ;;  %v626_v53 = vmul.f32 %v9921_v49, %v15006_v47  ;;  %v1104_v42 = vrot.slane %v10564_v23, 7  ;;  %v704_v20 = vadd.f32 %v9933_v17, %v10338_v18  ;;  %8526 = vmatprep.mubr.msk.f32.mxu0 %vm14634_vm0, %v10559_v11 }
 0x1f4   : > { %v15009_v49 = vand.u32 15, %v9983_v4  ;;  %v15010_v52 = vmov 0  ;;  %v665_v47 = vmul.f32 %v9919_v45, %v627_v48  ;;  %v10599_v18 = vsel %vm14637_vm4, %v1096_v22, %v1098_v30 }
 0x1f5   : > { %v701_v8 = vadd.f32 %v9933_v17, %v663_v9  ;;  %v664_v10 = vmul.f32 %v9919_v45, %v626_v53  ;;  %15013 = vst [vmem:[#allocation61_spill] sm:$0xff] %v10599_v18  ;;  %vm15014_vm0 = vcmask 1046528   ;;  %v805_v4 = vand.u32 15, %v10359_v12 }
 0x1f6   : > { %vm10592_vm3 = vcmp.eq.s32.totalorder %v15009_v49, 0  ;;  %v10606_v32 = vsel %vm15014_vm0, %v14641_v59, %v14640_v24  ;;  %v705_v9 = vadd.f32 %v9933_v17, %v667_v37  ;;  %v703_v22 = vadd.f32 %v9933_v17, %v665_v47 }
 0x1f7   : > { %v15011_v52 = vsel %vm10592_vm3, 4294967295, %v15010_v52  ;;  %15015 = vst [vmem:[#allocation62_spill] sm:$0xff] %v10606_v32  ;;  %v10610_v49 = vmax.f32 %v701_v8, 0.0  ;;  %v702_v45 = vadd.f32 %v9933_v17, %v664_v10  ;;  %vm15017_vm4 = vcmask 64512   ;;  %v15023_v8 = vld [vmem:[#allocation12_spill] sm:$0xff] }
 0x1f8   : > { %15012 = vst [vmem:[#allocation2_spill] sm:$0xff] %v15011_v52  ;;  %8527 = vmatmul.mubr.msk.f32.gmra.mxu0 %vm15017_vm4, %v10599_v18  ;;  %vm15018_vm1 = vmmov %vm15017_vm4  ;;  %v10622_v12 = vsel %vm10502_vm2, %v10606_v32, %v1101_v60  ;;  %vm15020_vm0 = vcmask 1040384   ;;  %v10625_v30 = vmax.f32 %v704_v20, 0.0  ;;  %v15022_v48 = vrot.slane %v9989_v14, 1 }
 0x1f9   : > { %15016 = vst [vmem:[#allocation63_spill] sm:$0xff] %v10610_v49  ;;  %8580 = vmatmul.mubr.msk.f32.gmra.mxu1 %vm15018_vm1, %v10561_v62  ;;  %15019 = vst [vmem:[#allocation64_spill] sm:$0xff] %v10622_v12  ;;  %v1105_v37 = vsel %vm15020_vm0, %v1102_v36, %v1104_v42  ;;  %vm15024_vm15 = vcmask 1046528   ;;  %v1004_v10 = vrot.slane %v10610_v49, 1  ;;  %v10638_v60 = vmax.f32 %v702_v45, 0.0 }
 0x1fa   : > { %15021 = vst [vmem:[#allocation65_spill] sm:$0xff] %v10625_v30  ;;  %v10631_v17 = vsel %vm15024_vm15, %v15023_v8, %v15022_v48  ;;  %vm15025_vm4 = vmmov %vm15018_vm1  ;;  %8582 = vmatprep.mubr.msk.f32.mxu1 %vm15018_vm1, %v10564_v23  ;;  %v10640_v47 = vmax.f32 %v703_v22, 0.0  ;;  %v10642_v20 = vmax.f32 %v705_v9, 0.0  ;;  %v1106_v24 = vrot.slane %v10610_v49, 7 }
 0x1fb   : > { %8529 = vmatprep.mubr.msk.f32.mxu0 %vm15025_vm4, %v10622_v12  ;;  %15026 = vst [vmem:[#allocation12_spill] sm:$0xff] %v10638_v60  ;;  %v807_v59 = vand.u32 15, %v10554_v1  ;;  %v15028_v48 = vrot.slane %v9985_v28, 1  ;;  %v15029_v53 = vrot.slane %v9991_v41, 1  ;;  %v10654_v14 = vsel %vm15020_vm0, %v1100_v34, %v1102_v36  ;;  %vm15032_vm4 = vmmov %vm15024_vm15 }
 0x1fc   : > { %15027 = vst [vmem:[#allocation66_spill] sm:$0xff] %v10640_v47  ;;  %15030 = vst [vmem:[#allocation67_spill] sm:$0xff] %v10654_v14  ;;  %v15031_v45 = vrot.slane %v10564_v23, 1  ;;  %v1006_v9 = vrot.slane %v10638_v60, 1  ;;  %v1008_v32 = vrot.slane %v10640_v47, 1  ;;  %8530 = vmatmul.mubr.msk.f32.gmra.mxu0 %vm15018_vm1, %v10654_v14  ;;  %v15036_v34 = vmov 0 }
 0x1fd   : > { %v10651_v61 = vsel %vm15024_vm15, %v15029_v53, %v15028_v48  ;;  %vm15034_vm2 = vmmov %vm15018_vm1  ;;  %vm10672_vm15 = vcmp.eq.s32.totalorder %v805_v4, 0  ;;  %v1108_v36 = vrot.slane %v10638_v60, 7  ;;  %v1010_v53 = vrot.slane %v10625_v30, 1 }
 0x1fe   : > { %v10659_v22 = vsel %vm15032_vm4, %v15031_v45, %v1004_v10  ;;  %8583 = vmatmul.mubr.msk.f32.gmra.mxu1 %vm15034_vm2, %v10610_v49  ;;  %v15037_v34 = vsel %vm10672_vm15, 4294967295, %v15036_v34  ;;  %vm15039_vm0 = vmmov %vm15018_vm1  ;;  %vm15041_vm2 = vcmask 1046528   ;;  %v10687_v4 = vrot.slane %v10642_v20, 1 }
 0x1ff   : > { %15033 = vst [vmem:[#allocation68_spill] sm:$0xff] %v10659_v22  ;;  %v10670_v1 = vsel %vm10592_vm3, %v10659_v22, %v1105_v37  ;;  %15038 = vst [vmem:[#allocation70_spill] sm:$0xff] %v15037_v34  ;;  %v10683_v48 = vsel %vm15041_vm2, %v1006_v9, %v1008_v32  ;;  %v1110_v37 = vrot.slane %v10640_v47, 7  ;;  %v1112_v45 = vrot.slane %v10625_v30, 7 }
 0x200   : > { %15035 = vst [vmem:[#allocation69_spill] sm:$0xff] %v10670_v1  ;;  %8532 = vmatprep.mubr.msk.f32.mxu0 %vm15039_vm0, %v10670_v1  ;;  %vm15040_vm4 = vmmov %vm15039_vm0  ;;  %vm15043_vm1 = vcmask 1040384   ;;  %v742_v49 = vadd.s32 8, %v9836_v31  ;;  %v15044_v28 = vrot.slane %v10037_v33, 1  ;;  %v15048_v14 = vrot.slane %v10145_v5, 1 }
 0x201   : > { %8585 = vmatprep.mubr.msk.f32.mxu1 %vm15040_vm4, %v10638_v60  ;;  %15042 = vst [vmem:[#allocation71_spill] sm:$0xff] %v10683_v48  ;;  %v1109_v52 = vsel %vm15043_vm1, %v1106_v24, %v1108_v36  ;;  %vm15045_vm0 = vmmov %vm15041_vm2  ;;  %v15046_v60 = vld [vmem:[#allocation6_spill] sm:$0xff]  ;;  %v15049_v12 = vrot.slane %v10074_v26, 1  ;;  %v15065_v34 = vrot.slane %v10307_v3, 1  ;;  %v15074_v3 = vrot.slane %v10444_v39, 1 }
 0x202   : > { %v10696_v41 = vsel %vm15045_vm0, %v15023_v8, %v15044_v28  ;;  %v10699_v22 = vmax.f32 %v15046_v60, 0.0  ;;  %vm15047_vm4 = vmmov %vm15043_vm1  ;;  %vm15051_vm1 = vcmask 64512   ;;  %v10718_v28 = vsel %vm10672_vm15, %v10683_v48, %v1109_v52 }
 0x203   : > { %v10702_v1 = vsel %vm15047_vm4, %v1104_v42, %v1106_v24  ;;  %vm15050_vm2 = vmmov %vm15045_vm0  ;;  %15053 = vst [vmem:[#allocation6_spill] sm:$0xff] %v10718_v28  ;;  %v744_v24 = vadd.s32 24, %v9836_v31  ;;  %v15054_v42 = vrot.slane %v10171_v7, 1  ;;  %v15055_v8 = vrot.slane %v10147_v21, 1 }
 0x204   : > { %v10709_v18 = vsel %vm15050_vm2, %v15049_v12, %v15048_v14  ;;  %8533 = vmatmul.mubr.msk.f32.gmra.mxu0 %vm15051_vm1, %v10702_v1  ;;  %vm15052_vm3 = vmmov %vm15051_vm1  ;;  %v15056_v12 = vrot.slane %v10205_v38, 1  ;;  %v15057_v60 = vrot.slane %v10173_v27, 1  ;;  %v15061_v52 = vmov 0 }
 0x205   : > { %8586 = vmatmul.mubr.msk.f32.gmra.mxu1 %vm15052_vm3, %v10640_v47  ;;  %v10726_v14 = vsel %vm15045_vm0, %v15055_v8, %v15054_v42  ;;  %vm15058_vm4 = vmmov %vm15045_vm0  ;;  %v10745_v42 = vsel %vm15045_vm0, %v1010_v53, %v10687_v4  ;;  %vm15064_vm15 = vcmask 1040384   ;;  %v778_v38 = vand.u32 15, %v742_v49 }
 0x206   : > { %v10733_v47 = vsel %vm15058_vm4, %v15057_v60, %v15056_v12  ;;  %vm15059_vm3 = vmmov %vm15051_vm1  ;;  %v1113_v8 = vsel %vm15064_vm15, %v1110_v37, %v1112_v45  ;;  %v15066_v12 = vrot.slane %v10241_v2, 1  ;;  %v15071_v7 = vrot.slane %v10366_v40, 1 }
 0x207   : > { %8535 = vmatprep.mubr.msk.f32.mxu0 %vm15059_vm3, %v10718_v28  ;;  %vm15060_vm2 = vmmov %vm15051_vm1  ;;  %vm10739_vm1 = vcmp.eq.s32.totalorder %v807_v59, 0  ;;  %v15069_v59 = vrot.slane %v10309_v25, 1  ;;  %v15072_v21 = vrot.slane %v10331_v6, 1  ;;  %v15079_v40 = vrot.slane %v10460_v29, 1 }
 0x208   : > { %8588 = vmatprep.mubr.msk.f32.mxu1 %vm15060_vm2, %v10625_v30  ;;  %v15062_v52 = vsel %vm10739_vm1, 4294967295, %v15061_v52  ;;  %vm15067_vm4 = vmmov %vm15045_vm0  ;;  %v15068_v30 = vrot.slane %v10311_v35, 1 }
 0x209   : > { %15063 = vst [vmem:[#allocation72_spill] sm:$0xff] %v15062_v52  ;;  %v10753_v60 = vsel %vm15067_vm4, %v15066_v12, %v15065_v34  ;;  %vm15070_vm3 = vmmov %vm15045_vm0  ;;  %v15075_v34 = vrot.slane %v10420_v51, 1  ;;  %v15112_v52 = vld [vmem:[#allocation26_spill] sm:$0xff] }
 0x20a   : > { %v10760_v27 = vsel %vm15070_vm3, %v15069_v59, %v15068_v30  ;;  %vm15073_vm15 = vmmov %vm15045_vm0  ;;  %v14689_v30 = vrot.slane %v10642_v20, 7  ;;  %v15078_v59 = vrot.slane %v10464_v46, 1  ;;  %vm15081_vm3 = vcmask 64512  }
 0x20b   : > { %v10767_v5 = vsel %vm15073_vm15, %v15072_v21, %v15071_v7  ;;  %vm15076_vm2 = vmmov %vm15045_vm0  ;;  %vm15077_vm0 = vcmask 1040384   ;;  %v10795_v7 = vsel %vm10739_vm1, %v10745_v42, %v1113_v8  ;;  %v14690_v21 = vrot.slane %v10699_v22, 7 }
 0x20c   : > { %v10774_v49 = vsel %vm15076_vm2, %v15075_v34, %v15074_v3  ;;  %v10777_v12 = vsel %vm15077_vm0, %v1108_v36, %v1110_v37  ;;  %vm15080_vm4 = vmmov %vm15076_vm2  ;;  %v15083_v3 = vrot.slane %v10498_v44, 1  ;;  %v15084_v36 = vrot.slane %v10494_v58, 1 }
 0x20d   : > { %v10785_v6 = vsel %vm15080_vm4, %v15079_v40, %v15078_v59  ;;  %8536 = vmatmul.mubr.msk.f32.gmra.mxu0 %vm15081_vm3, %v10777_v12  ;;  %vm15082_vm15 = vmmov %vm15081_vm3  ;;  %v15085_v37 = vrot.slane %v10564_v23, 1  ;;  %v15086_v34 = vrot.slane %v10561_v62, 1  ;;  %vm15091_vm1 = vcmask 1040384  }
 0x20e   : > { %8589 = vmatmul.mubr.msk.f32.gmra.mxu1 %vm15082_vm15, %v10642_v20  ;;  %v10802_v40 = vsel %vm15076_vm2, %v15084_v36, %v15083_v3  ;;  %vm15087_vm0 = vmmov %vm15076_vm2  ;;  %v10825_v36 = vsel %vm15091_vm1, %v1112_v45, %v14689_v30  ;;  %v10849_v30 = vsel %vm15091_vm1, %v14690_v21, %v1112_v45  ;;  %v10867_v45 = vld [vmem:[%s14560_s3 + $0x30] sm:$0xff]  ;;  %v748_v21 = vadd.s32 56, %v9836_v31 }
 0x20f   : > { %v10809_v59 = vsel %vm15087_vm0, %v15086_v34, %v15085_v37  ;;  %vm15088_vm4 = vmmov %vm15081_vm3  ;;  %8643 = vmatprep.mubr.msk.f32.mxu1 %vm15081_vm3, %v10071_v63  ;;  %v746_v37 = vadd.s32 40, %v9836_v31  ;;  %v15094_v63 = vmov 0  ;;  %v10844_v34 = vld [vmem:[%s14560_s3 + $0x38] sm:$0xff]  ;;  %15100 = vst [vmem:[#allocation75_spill] sm:$0xff] %v10849_v30  ;;  %v15127_v30 = vld [vmem:[#allocation34_spill] sm:$0xff] }
 0x210   : > { %8538 = vmatprep.mubr.msk.f32.mxu0 %vm15088_vm4, %v10795_v7  ;;  %vm15089_vm15 = vmmov %vm15087_vm0 }
 0x211   : > { %v10817_v8 = vsel %vm15089_vm15, %v1004_v10, %v1006_v9  ;;  %vm15090_vm2 = vmmov %vm15087_vm0  ;;  %v780_v10 = vand.u32 15, %v744_v24  ;;  %v15104_v24 = vld [vmem:[#allocation15_spill] sm:$0xff] }
 0x212   : > { %v10820_v3 = vsel %vm15090_vm2, %v1008_v32, %v1010_v53  ;;  %vm15092_vm0 = vmmov %vm15081_vm3  ;;  %vm10832_vm3 = vcmp.eq.s32.totalorder %v778_v38, 15  ;;  %v15097_v32 = vrot.slane %v10699_v22, 1 }
 0x213   : > { %8539 = vmatmul.mubr.msk.f32.gmra.mxu0 %vm15092_vm0, %v10825_v36  ;;  %vm15093_vm4 = vmmov %vm15092_vm0  ;;  %v15095_v63 = vsel %vm10832_vm3, 4294967295, %v15094_v63 }
 0x214   : > { %8644 = vmatmul.mubr.msk.f32.vlgmr.msra.gmra.mxu1 %vm15093_vm4, %v10093_v43  ;;  %15096 = vst [vmem:[#allocation73_spill] sm:$0xff] %v15095_v63  ;;  %vm15098_vm15 = vmmov %vm15090_vm2  ;;  %v15111_v63 = vld [vmem:[#allocation14_spill] sm:$0xff] }
 0x215   : > { %v10839_v9 = vsel %vm15098_vm15, %v15097_v32, %v1010_v53  ;;  %vm15101_vm2 = vmmov %vm15092_vm0  ;;  %8646 = vmatprep.mubr.msk.f32.mxu1 %vm15092_vm0, %v10115_v57  ;;  %8742 = vmatpush3.msra.mxu1 %v10014_v13  ;;  %v1300_v32 = vsel %vm10832_vm3, %v15104_v24, %v10631_v17  ;;  %v782_v13 = vand.u32 15, %v746_v37  ;;  %v15110_v17 = vld [vmem:[#allocation16_spill] sm:$0xff]  ;;  %v15116_v37 = vmov 0  ;;  %v15197_v57 = vld [vmem:[#allocation59_spill] sm:$0xff] }
 0x216   : > { %15099 = vst [vmem:[#allocation74_spill] sm:$0xff] %v10839_v9  ;;  %8593 = vmatprep.mubr.msk.f32.mxu0 %vm15101_vm2, %v10034_v16  ;;  %vm15102_vm4 = vmmov %vm15098_vm15  ;;  %8841 = vmatprep.subr.mxu1 %v10844_v34  ;;  %vm10873_vm2 = vcmp.eq.s32.totalorder %v780_v10, 15 }
 0x217   : > { %v10857_v38 = vsel %vm15102_vm4, %v10687_v4, %v1010_v53  ;;  %vm15105_vm15 = vmmov %vm15092_vm0  ;;  %v15107_v53 = vmov 0  ;;  %v10888_v10 = vsel %vm10873_vm2, %v10093_v43, %v10651_v61  ;;  %vm10894_vm3 = vcmp.eq.s32.totalorder %v782_v13, 15  ;;  %v15121_v61 = vld [vmem:[#allocation32_spill] sm:$0xff] }
 0x218   : > { %15103 = vst [vmem:[#allocation76_spill] sm:$0xff] %v10857_v38  ;;  %8594 = vmatmul.mubr.msk.f32.vlgmr.msra.gmra.mxu0 %vm15105_vm15, %v1300_v32  ;;  %vm15106_vm1 = vmmov %vm15092_vm0  ;;  %v15108_v53 = vsel %vm10873_vm2, 4294967295, %v15107_v53  ;;  %v15117_v37 = vsel %vm10894_vm3, 4294967295, %v15116_v37  ;;  %v784_v32 = vand.u32 15, %v748_v21  ;;  %v10907_v43 = vsel %vm10894_vm3, %v15104_v24, %v10696_v41  ;;  %v15126_v38 = vld [vmem:[#allocation20_spill] sm:$0xff] }
 0x219   : > { %8647 = vmatmul.mubr.msk.f32.gmra.mxu1 %vm15106_vm1, %v15104_v24  ;;  %15109 = vst [vmem:[#allocation77_spill] sm:$0xff] %v15108_v53  ;;  %8692 = vmatpush3.msra.mxu0 %v15110_v17  ;;  %vm15113_vm4 = vmmov %vm15092_vm0  ;;  %v750_v17 = vadd.s32 72, %v9836_v31  ;;  %v15123_v21 = vmov 0  ;;  %v752_v53 = vadd.s32 88, %v9836_v31 }
 0x21a   : > { %8596 = vmatprep.mubr.msk.f32.mxu0 %vm15092_vm0, %v15111_v63  ;;  %8649 = vmatprep.mubr.msk.f32.mxu1 %vm15113_vm4, %v15112_v52  ;;  %vm15114_vm15 = vmmov %vm15092_vm0  ;;  %15118 = vst [vmem:[#allocation16_spill] sm:$0xff] %v15117_v37  ;;  %vm10913_vm2 = vcmp.eq.s32.totalorder %v784_v32, 15  ;;  %v15130_v32 = vld [vmem:[#allocation36_spill] sm:$0xff]  ;;  %v15136_v52 = vld [vmem:[#allocation38_spill] sm:$0xff] }
 0x21b   : > { %8791 = vmatprep.subr.mxu0 %v10867_v45  ;;  %vm15115_vm1 = vmmov %vm15092_vm0  ;;  %v15124_v21 = vsel %vm10913_vm2, 4294967295, %v15123_v21  ;;  %v786_v13 = vand.u32 15, %v750_v17  ;;  %v10926_v41 = vsel %vm10913_vm2, %v10187_v0, %v10709_v18  ;;  %v15132_v17 = vmov 0 }
 0x21c   : > { %8597 = vmatmul.mubr.msk.f32.gmra.mxu0 %vm15114_vm15, %v10888_v10  ;;  %vm15119_vm4 = vmmov %vm15092_vm0  ;;  %15125 = vst [vmem:[#allocation14_spill] sm:$0xff] %v15124_v21  ;;  %v788_v37 = vand.u32 15, %v752_v53  ;;  %v15140_v53 = vmov 0  ;;  %v756_v21 = vadd.s32 120, %v9836_v31 }
 0x21d   : > { %8650 = vmatmul.mubr.msk.f32.gmra.mxu1 %vm15115_vm1, %v10187_v0  ;;  %8599 = vmatprep.mubr.msk.f32.mxu0 %vm15092_vm0, %v10034_v16  ;;  %vm15120_vm15 = vmmov %vm15092_vm0  ;;  %vm10932_vm3 = vcmp.eq.s32.totalorder %v786_v13, 15  ;;  %v15168_v0 = vld [vmem:[#allocation57_spill] sm:$0xff] }
 0x21e   : > { %8652 = vmatprep.mubr.msk.f32.mxu1 %vm15119_vm4, %v10236_v55  ;;  %vm15122_vm1 = vmmov %vm15092_vm0  ;;  %v15133_v17 = vsel %vm10932_vm3, 4294967295, %v15132_v17  ;;  %v754_v55 = vadd.s32 104, %v9836_v31  ;;  %v10945_v18 = vsel %vm10932_vm3, %v15121_v61, %v10726_v14  ;;  %vm10951_vm2 = vcmp.eq.s32.totalorder %v788_v37, 15 }
 0x21f   : > { %vm15128_vm4 = vmmov %vm15092_vm0  ;;  %15134 = vst [vmem:[#allocation20_spill] sm:$0xff] %v15133_v17  ;;  %v15141_v53 = vsel %vm10951_vm2, 4294967295, %v15140_v53  ;;  %v10964_v14 = vsel %vm10951_vm2, %v15130_v32, %v10733_v47  ;;  %v792_v37 = vand.u32 15, %v756_v21  ;;  %v758_v17 = vadd.s32 136, %v9836_v31 }
 0x220   : > { %8600 = vmatmul.mubr.msk.f32.gmra.mxu0 %vm15120_vm15, %v10907_v43  ;;  %vm15129_vm15 = vmmov %vm15092_vm0  ;;  %v790_v13 = vand.u32 15, %v754_v55  ;;  %v15147_v55 = vmov 0  ;;  %v15155_v21 = vmov 0 }
 0x221   : > { %8653 = vmatmul.mubr.msk.f32.gmra.mxu1 %vm15122_vm1, %v15121_v61  ;;  %8602 = vmatprep.mubr.msk.f32.mxu0 %vm15092_vm0, %v15126_v38  ;;  %vm15131_vm1 = vmmov %vm15092_vm0  ;;  %v15151_v61 = vld [vmem:[#allocation48_spill] sm:$0xff]  ;;  %vm10989_vm2 = vcmp.eq.s32.totalorder %v792_v37, 15 }
 0x222   : > { %8655 = vmatprep.mubr.msk.f32.mxu1 %vm15128_vm4, %v15127_v30  ;;  %v15135_v30 = vld [vmem:[#allocation28_spill] sm:$0xff]  ;;  %vm15137_vm4 = vmmov %vm15092_vm0  ;;  %vm10970_vm3 = vcmp.eq.s32.totalorder %v790_v13, 15  ;;  %v15156_v21 = vsel %vm10989_vm2, 4294967295, %v15155_v21  ;;  %v794_v13 = vand.u32 15, %v758_v17  ;;  %v15164_v17 = vmov 0 }
 0x223   : > { %15142 = vst [vmem:[#allocation28_spill] sm:$0xff] %v15141_v53  ;;  %v15148_v55 = vsel %vm10970_vm3, 4294967295, %v15147_v55  ;;  %v10983_v47 = vsel %vm10970_vm3, %v10362_v50, %v10753_v60  ;;  %v760_v53 = vadd.s32 152, %v9836_v31  ;;  %v11002_v60 = vsel %vm10989_vm2, %v10401_v15, %v10760_v27  ;;  %v15162_v37 = vld [vmem:[#allocation56_spill] sm:$0xff] }
 0x224   : > { %8603 = vmatmul.mubr.msk.f32.gmra.mxu0 %vm15129_vm15, %v10926_v41  ;;  %vm15138_vm15 = vmmov %vm15092_vm0  ;;  %vm11008_vm3 = vcmp.eq.s32.totalorder %v794_v13, 15 }
 0x225   : > { %8656 = vmatmul.mubr.msk.f32.gmra.mxu1 %vm15131_vm1, %v15130_v32  ;;  %8605 = vmatprep.mubr.msk.f32.mxu0 %vm15092_vm0, %v15135_v30  ;;  %vm15139_vm1 = vmmov %vm15092_vm0  ;;  %v15159_v32 = vld [vmem:[#allocation53_spill] sm:$0xff]  ;;  %v15165_v17 = vsel %vm11008_vm3, 4294967295, %v15164_v17  ;;  %v11021_v27 = vsel %vm11008_vm3, %v10467_v19, %v10767_v5 }
 0x226   : > { %8658 = vmatprep.mubr.msk.f32.mxu1 %vm15137_vm4, %v15136_v52  ;;  %v15143_v52 = vld [vmem:[#allocation30_spill] sm:$0xff]  ;;  %vm15144_vm4 = vmmov %vm15092_vm0 }
 0x227   : > { %15149 = vst [vmem:[#allocation30_spill] sm:$0xff] %v15148_v55  ;;  %v796_v55 = vand.u32 15, %v760_v53  ;;  %v15173_v53 = vmov 0 }
 0x228   : > { %8606 = vmatmul.mubr.msk.f32.gmra.mxu0 %vm15138_vm15, %v10945_v18  ;;  %vm15145_vm15 = vmmov %vm15092_vm0 }
 0x229   : > { %8659 = vmatmul.mubr.msk.f32.gmra.mxu1 %vm15139_vm1, %v10362_v50  ;;  %8608 = vmatprep.mubr.msk.f32.mxu0 %vm15092_vm0, %v15143_v52  ;;  %vm15146_vm1 = vmmov %vm15092_vm0  ;;  %v762_v50 = vadd.s32 168, %v9836_v31  ;;  %vm11027_vm2 = vcmp.eq.s32.totalorder %v796_v55, 15  ;;  %v15180_v55 = vld [vmem:[#allocation61_spill] sm:$0xff] }
 0x22a   : > { %8661 = vmatprep.mubr.msk.f32.mxu1 %vm15144_vm4, %v10382_v56  ;;  %v15150_v56 = vld [vmem:[#allocation37_spill] sm:$0xff]  ;;  %vm15152_vm4 = vmmov %vm15092_vm0  ;;  %v15174_v53 = vsel %vm11027_vm2, 4294967295, %v15173_v53  ;;  %v11040_v5 = vsel %vm11027_vm2, %v15162_v37, %v10774_v49 }
 0x22b   : > { %15157 = vst [vmem:[#allocation37_spill] sm:$0xff] %v15156_v21  ;;  %15175 = vst [vmem:[#allocation78_spill] sm:$0xff] %v15174_v53  ;;  %v798_v13 = vand.u32 15, %v762_v50  ;;  %v764_v21 = vadd.s32 184, %v9836_v31  ;;  %v15182_v50 = vmov 0 }
 0x22c   : > { %8609 = vmatmul.mubr.msk.f32.gmra.mxu0 %vm15145_vm15, %v10964_v14  ;;  %vm15153_vm15 = vmmov %vm15092_vm0  ;;  %15178 = vst [vmem:[#allocation79_spill] sm:$0xff] %v11040_v5 }
 0x22d   : > { %8662 = vmatmul.mubr.msk.f32.gmra.mxu1 %vm15146_vm1, %v10401_v15  ;;  %8611 = vmatprep.mubr.msk.f32.mxu0 %vm15092_vm0, %v15150_v56  ;;  %vm15154_vm1 = vmmov %vm15092_vm0  ;;  %vm11046_vm3 = vcmp.eq.s32.totalorder %v798_v13, 15  ;;  %v15186_v15 = vld [vmem:[#allocation64_spill] sm:$0xff]  ;;  %v15190_v13 = vld [vmem:[#allocation67_spill] sm:$0xff] }
 0x22e   : > { %8664 = vmatprep.mubr.msk.f32.mxu1 %vm15152_vm4, %v15151_v61  ;;  %v15158_v61 = vld [vmem:[#allocation41_spill] sm:$0xff]  ;;  %vm15160_vm4 = vmmov %vm15092_vm0  ;;  %v15183_v50 = vsel %vm11046_vm3, 4294967295, %v15182_v50  ;;  %v11059_v49 = vsel %vm11046_vm3, %v10540_v54, %v10785_v6 }
 0x22f   : > { %15166 = vst [vmem:[#allocation41_spill] sm:$0xff] %v15165_v17  ;;  %15184 = vst [vmem:[#allocation80_spill] sm:$0xff] %v15183_v50  ;;  %v800_v17 = vand.u32 15, %v764_v21  ;;  %v15192_v21 = vmov 0  ;;  %v15198_v6 = vld [vmem:[#allocation69_spill] sm:$0xff]  ;;  %v773_v50 = vadd.s32 256, %v9836_v31 }
 0x230   : > { %8612 = vmatmul.mubr.msk.f32.gmra.mxu0 %vm15153_vm15, %v10983_v47  ;;  %vm15161_vm15 = vmmov %vm15092_vm0  ;;  %15188 = vst [vmem:[#allocation81_spill] sm:$0xff] %v11059_v49 }
 0x231   : > { %8665 = vmatmul.mubr.msk.f32.gmra.mxu1 %vm15154_vm1, %v10467_v19  ;;  %8614 = vmatprep.mubr.msk.f32.mxu0 %vm15092_vm0, %v15158_v61  ;;  %vm15163_vm1 = vmmov %vm15092_vm0  ;;  %v766_v19 = vadd.s32 200, %v9836_v31  ;;  %vm11065_vm2 = vcmp.eq.s32.totalorder %v800_v17, 15 }
 0x232   : > { %8667 = vmatprep.mubr.msk.f32.mxu1 %vm15160_vm4, %v15159_v32  ;;  %v15167_v32 = vld [vmem:[#allocation46_spill] sm:$0xff]  ;;  %vm15169_vm4 = vmmov %vm15092_vm0  ;;  %v15193_v21 = vsel %vm11065_vm2, 4294967295, %v15192_v21  ;;  %v11082_v17 = vsel %vm11065_vm2, %v15180_v55, %v10802_v40  ;;  %v809_v40 = vand.u32 15, %v773_v50 }
 0x233   : > { %15170 = vst [vmem:[#allocation46_spill] sm:$0xff] %v11021_v27  ;;  %15194 = vst [vmem:[#allocation82_spill] sm:$0xff] %v15193_v21  ;;  %v802_v53 = vand.u32 15, %v766_v19  ;;  %v15203_v19 = vmov 0 }
 0x234   : > { %8615 = vmatmul.mubr.msk.f32.gmra.mxu0 %vm15161_vm15, %v11002_v60  ;;  %vm15171_vm15 = vmmov %vm15092_vm0  ;;  %15200 = vst [vmem:[#allocation83_spill] sm:$0xff] %v11082_v17 }
 0x235   : > { %8668 = vmatmul.mubr.msk.f32.gmra.mxu1 %vm15163_vm1, %v15162_v37  ;;  %8617 = vmatprep.mubr.msk.f32.mxu0 %vm15092_vm0, %v15167_v32  ;;  %vm15172_vm1 = vmmov %vm15092_vm0  ;;  %v768_v37 = vadd.s32 216, %v9836_v31  ;;  %vm11088_vm3 = vcmp.eq.s32.totalorder %v802_v53, 15 }
 0x236   : > { %8670 = vmatprep.mubr.msk.f32.mxu1 %vm15169_vm4, %v15168_v0  ;;  %v15176_v0 = vld [vmem:[#allocation52_spill] sm:$0xff]  ;;  %vm15177_vm4 = vmmov %vm15092_vm0  ;;  %v15204_v19 = vsel %vm11088_vm3, 4294967295, %v15203_v19  ;;  %v11103_v53 = vsel %vm11088_vm3, %v15190_v13, %v10809_v59  ;;  %vm11118_vm3 = vcmp.eq.s32.totalorder %v809_v40, 0  ;;  %v15217_v59 = vmov 0 }
 0x237   : > { %15205 = vst [vmem:[#allocation84_spill] sm:$0xff] %v15204_v19  ;;  %15208 = vst [vmem:[#allocation85_spill] sm:$0xff] %v11103_v53  ;;  %v15218_v59 = vsel %vm11118_vm3, 4294967295, %v15217_v59  ;;  %v15220_v19 = vrot.slane %v10699_v22, 1  ;;  %v15227_v40 = vmov 0 }
 0x238   : > { %8618 = vmatmul.mubr.msk.f32.gmra.mxu0 %vm15171_vm15, %v11021_v27  ;;  %vm15179_vm15 = vmmov %vm15092_vm0  ;;  %15219 = vst [vmem:[#allocation87_spill] sm:$0xff] %v15218_v59  ;;  %v15238_v59 = vmov 0 }
 0x239   : > { %8671 = vmatmul.mubr.msk.f32.gmra.mxu1 %vm15172_vm1, %v10540_v54  ;;  %8620 = vmatprep.mubr.msk.f32.mxu0 %vm15092_vm0, %v15176_v0  ;;  %vm15181_vm1 = vmmov %vm15092_vm0  ;;  %v15206_v54 = vld [vmem:[#allocation62_spill] sm:$0xff] }
 0x23a   : > { %8673 = vmatprep.mubr.msk.f32.mxu1 %vm15177_vm4, %v10559_v11  ;;  %v15185_v11 = vld [vmem:[#allocation55_spill] sm:$0xff]  ;;  %vm15187_vm4 = vmmov %vm15092_vm0 }
 0x23c   : > { %8621 = vmatmul.mubr.msk.f32.gmra.mxu0 %vm15179_vm15, %v11040_v5  ;;  %vm15189_vm15 = vmmov %vm15092_vm0 }
 0x23d   : > { %8674 = vmatmul.mubr.msk.f32.gmra.mxu1 %vm15181_vm1, %v15180_v55  ;;  %8623 = vmatprep.mubr.msk.f32.mxu0 %vm15092_vm0, %v15185_v11  ;;  %vm15191_vm1 = vmmov %vm15092_vm0 }
 0x23e   : > { %8676 = vmatprep.mubr.msk.f32.mxu1 %vm15187_vm4, %v15186_v15  ;;  %v15195_v15 = vld [vmem:[#allocation5_spill] sm:$0xff]  ;;  %vm15199_vm4 = vmmov %vm15092_vm0 }
 0x23f   : > { %v11071_v24 = vmax.f32 %v15195_v15, 0.0  ;;  %v804_v15 = vand.u32 15, %v768_v37  ;;  %v15211_v37 = vmov 0 }
 0x240   : > { %8624 = vmatmul.mubr.msk.f32.gmra.mxu0 %vm15189_vm15, %v11059_v49  ;;  %vm15201_vm15 = vmmov %vm15092_vm0 }
 0x241   : > { %8677 = vmatmul.mubr.msk.f32.gmra.mxu1 %vm15191_vm1, %v15190_v13  ;;  %15196 = vst [vmem:[#allocation5_spill] sm:$0xff] %v11071_v24  ;;  %8626 = vmatprep.mubr.msk.f32.mxu0 %vm15092_vm0, %v15197_v57  ;;  %vm15202_vm1 = vmmov %vm15092_vm0  ;;  %v1014_v21 = vrot.slane %v11071_v24, 1  ;;  %v1116_v55 = vrot.slane %v11071_v24, 7  ;;  %v15214_v24 = vld [vmem:[#allocation68_spill] sm:$0xff]  ;;  %v15223_v13 = vrot.slane %v10642_v20, 7 }
 0x242   : > { %8679 = vmatprep.mubr.msk.f32.mxu1 %vm15199_vm4, %v15198_v6  ;;  %v770_v6 = vadd.s32 232, %v9836_v31  ;;  %vm15207_vm4 = vmmov %vm15092_vm0 }
 0x244   : > { %8627 = vmatmul.mubr.msk.f32.gmra.mxu0 %vm15201_vm15, %v11082_v17  ;;  %vm15209_vm15 = vmmov %vm15092_vm0  ;;  %v806_v50 = vand.u32 15, %v770_v6 }
 0x245   : > { %8680 = vmatmul.mubr.msk.f32.gmra.mxu1 %vm15202_vm1, %v10702_v1  ;;  %8629 = vmatprep.mubr.msk.f32.mxu0 %vm15092_vm0, %v15206_v54  ;;  %vm15210_vm1 = vmmov %vm15092_vm0  ;;  %vm11109_vm0 = vcmp.eq.s32.totalorder %v804_v15, 15 }
 0x246   : > { %8682 = vmatprep.mubr.msk.f32.mxu1 %vm15207_vm4, %v10718_v28  ;;  %v15212_v37 = vsel %vm11109_vm0, 4294967295, %v15211_v37  ;;  %v772_v28 = vadd.s32 248, %v9836_v31  ;;  %vm15215_vm4 = vmmov %vm15210_vm1  ;;  %v11134_v9 = vsel %vm11109_vm0, %v10702_v1, %v10817_v8 }
 0x247   : > { %15213 = vst [vmem:[#allocation86_spill] sm:$0xff] %v15212_v37  ;;  %vm15216_vm2 = vmmov %vm15210_vm1  ;;  %v15301_v37 = vld [vmem:[#allocation63_spill] sm:$0xff] }
 0x248   : > { %8630 = vmatmul.mubr.msk.f32.gmra.mxu0 %vm15209_vm15, %v11103_v53  ;;  %vm15221_vm15 = vcmask 1046528   ;;  %15225 = vst [vmem:[#allocation89_spill] sm:$0xff] %v11134_v9 }
 0x249   : > { %8683 = vmatmul.mubr.msk.f32.gmra.mxu1 %vm15210_vm1, %v10777_v12  ;;  %8632 = vmatprep.mubr.msk.f32.mxu0 %vm15215_vm4, %v15214_v24  ;;  %v11125_v15 = vsel %vm15221_vm15, %v1014_v21, %v15220_v19  ;;  %vm15224_vm1 = vcmask 1040384   ;;  %vm15226_vm4 = vmmov %vm15216_vm2  ;;  %vm11145_vm15 = vcmp.eq.s32.totalorder %v806_v50, 15 }
 0x24a   : > { %8685 = vmatprep.mubr.msk.f32.mxu1 %vm15216_vm2, %v10795_v7  ;;  %15222 = vst [vmem:[#allocation88_spill] sm:$0xff] %v11125_v15  ;;  %v1117_v6 = vsel %vm15224_vm1, %v15223_v13, %v1116_v55  ;;  %v15228_v40 = vsel %vm11145_vm15, 4294967295, %v15227_v40  ;;  %v808_v13 = vand.u32 15, %v772_v28  ;;  %vm15230_vm1 = vmmov %vm15216_vm2  ;;  %v11157_v8 = vsel %vm11145_vm15, %v10777_v12, %v10820_v3 }
 0x24b   : > { %v11143_v19 = vsel %vm11118_vm3, %v11125_v15, %v1117_v6  ;;  %15229 = vst [vmem:[#allocation90_spill] sm:$0xff] %v15228_v40  ;;  %vm15231_vm0 = vmmov %vm15230_vm1  ;;  %v15233_v6 = vrot.slane %v10699_v22, 7  ;;  %v774_v40 = vadd.s32 264, %v9836_v31 }
 0x24c   : > { %8633 = vmatmul.mubr.msk.f32.gmra.mxu0 %vm15216_vm2, %v11134_v9  ;;  %15232 = vst [vmem:[#allocation91_spill] sm:$0xff] %v11157_v8  ;;  %vm15234_vm2 = vcmask 1040384   ;;  %vm15236_vm3 = vmmov %vm15231_vm0 }
 0x24d   : > { %8686 = vmatmul.mubr.msk.f32.gmra.mxu1 %vm15226_vm4, %v10825_v36  ;;  %8635 = vmatprep.mubr.msk.f32.mxu0 %vm15230_vm1, %v10683_v48  ;;  %v11162_v50 = vsel %vm15234_vm2, %v1116_v55, %v15233_v6  ;;  %vm15235_vm4 = vmmov %vm15231_vm0  ;;  %vm15237_vm1 = vcmask 1046528   ;;  %v15248_v55 = vld [vmem:[#allocation11_spill] sm:$0xff]  ;;  %v15268_v6 = vld [vmem:[#allocation25_spill] sm:$0xff] }
 0x24e   : > { %8688 = vmatprep.mubr.msk.f32.mxu1 %vm15231_vm0, %v11143_v19  ;;  %v1015_v28 = vsel %vm15237_vm1, %v10687_v4, %v1014_v21  ;;  %vm11170_vm0 = vcmp.eq.s32.totalorder %v808_v13, 15  ;;  %vm15241_vm15 = vmmov %vm15236_vm3  ;;  %v15245_v4 = vld [vmem:[#allocation10_spill] sm:$0xff]  ;;  %v15266_v13 = vld [vmem:[#allocation24_spill] sm:$0xff] }
 0x24f   : > { %v15239_v59 = vsel %vm11170_vm0, 4294967295, %v15238_v59  ;;  %vm15242_vm14 = vmmov %vm15236_vm3  ;;  %v11181_v3 = vsel %vm11170_vm0, %v10825_v36, %v1015_v28  ;;  %v15263_v21 = vld [vmem:[#allocation22_spill] sm:$0xff]  ;;  %v15271_v28 = vld [vmem:[#allocation29_spill] sm:$0xff] }
 0x250   : > { %8636 = vmatmul.mubr.msk.f32.gmra.mxu0 %vm15235_vm4, %v11157_v8  ;;  %15240 = vst [vmem:[#allocation92_spill] sm:$0xff] %v15239_v59  ;;  %15243 = vst [vmem:[#allocation93_spill] sm:$0xff] %v11181_v3  ;;  %v15284_v59 = vld [vmem:[#allocation44_spill] sm:$0xff] }
 0x251   : > { %8689 = vmatmul.mubr.msk.f32.gmra.mxu1 %vm15236_vm3, %v11162_v50  ;;  %8638 = vmatprep.mubr.msk.f32.mxu0 %vm15241_vm15, %v10745_v42  ;;  %vm15244_vm2 = vmmov %vm15236_vm3 }
 0x252   : > { %8743 = vmatprep.mubr.msk.f32.mxu1 %vm15242_vm14, %v15111_v63  ;;  %vm15246_vm4 = vmmov %vm15244_vm2  ;;  %v11195_v63 = vld [vmem:[%s14560_s3 + $0x40] sm:$0xff] }
 0x253   : > { %vm15247_vm1 = vmmov %vm15244_vm2 }
 0x254   : > { %8639 = vmatmul.mubr.msk.f32.gmra.mxu0 %vm15236_vm3, %v11181_v3  ;;  %vm15249_vm14 = vmmov %vm15247_vm1 }
 0x255   : > { %8744 = vmatmul.mubr.msk.f32.vlgmr.msra.gmra.mxu1 %vm15244_vm2, %v10888_v10  ;;  %8693 = vmatprep.mubr.msk.f32.mxu0 %vm15246_vm4, %v15245_v4  ;;  %vm15250_vm15 = vmmov %vm15247_vm1  ;;  %v15251_v10 = vld [vmem:[#allocation8_spill] sm:$0xff]  ;;  %v15276_v4 = vld [vmem:[#allocation39_spill] sm:$0xff] }
 0x256   : > { %8746 = vmatprep.mubr.msk.f32.mxu1 %vm15247_vm1, %v10034_v16  ;;  %8842 = vmatpush3.msra.mxu1 %v10844_v34  ;;  %vm15252_vm3 = vmmov %vm15247_vm1  ;;  %v15254_v34 = vld [vmem:[#allocation9_spill] sm:$0xff] }
 0x257   : > { %vm15253_vm2 = vmmov %vm15247_vm1 }
 0x258   : > { %8694 = vmatmul.mubr.msk.f32.vlgmr.msra.gmra.mxu0 %vm15249_vm14, %v15248_v55  ;;  %vm15255_vm4 = vmmov %vm15247_vm1  ;;  %v15282_v55 = vld [vmem:[#allocation40_spill] sm:$0xff] }
 0x259   : > { %8747 = vmatmul.mubr.msk.f32.gmra.mxu1 %vm15250_vm15, %v10907_v43  ;;  %8792 = vmatpush3.msra.mxu0 %v10867_v45  ;;  %vm15256_vm14 = vmmov %vm15247_vm1  ;;  %v15260_v45 = vld [vmem:[#allocation21_spill] sm:$0xff] }
 0x25a   : > { %8696 = vmatprep.mubr.msk.f32.mxu0 %vm15252_vm3, %v15251_v10  ;;  %8749 = vmatprep.mubr.msk.f32.mxu1 %vm15253_vm2, %v15126_v38  ;;  %vm15257_vm15 = vmmov %vm15247_vm1 }
 0x25b   : > { %8891 = vmatprep.subr.mxu0 %v11195_v63  ;;  %vm15258_vm0 = vmmov %vm15247_vm1 }
 0x25c   : > { %8697 = vmatmul.mubr.msk.f32.gmra.mxu0 %vm15255_vm4, %v15254_v34  ;;  %vm15259_vm3 = vmmov %vm15258_vm0 }
 0x25d   : > { %8750 = vmatmul.mubr.msk.f32.gmra.mxu1 %vm15247_vm1, %v10926_v41  ;;  %8699 = vmatprep.mubr.msk.f32.mxu0 %vm15256_vm14, %v10037_v33  ;;  %vm15261_vm2 = vmmov %vm15258_vm0 }
 0x25e   : > { %8752 = vmatprep.mubr.msk.f32.mxu1 %vm15257_vm15, %v15135_v30  ;;  %vm15262_vm4 = vmmov %vm15258_vm0 }
 0x25f   : > { %vm15264_vm1 = vmmov %vm15258_vm0 }
 0x260   : > { %8700 = vmatmul.mubr.msk.f32.gmra.mxu0 %vm15258_vm0, %v10074_v26  ;;  %vm15265_vm14 = vmmov %vm15258_vm0 }
 0x261   : > { %8753 = vmatmul.mubr.msk.f32.gmra.mxu1 %vm15259_vm3, %v10945_v18  ;;  %8702 = vmatprep.mubr.msk.f32.mxu0 %vm15261_vm2, %v15260_v45  ;;  %vm15267_vm15 = vmmov %vm15258_vm0 }
 0x262   : > { %8755 = vmatprep.mubr.msk.f32.mxu1 %vm15262_vm4, %v15143_v52  ;;  %vm15269_vm3 = vmmov %vm15258_vm0 }
 0x263   : > { %vm15270_vm2 = vmmov %vm15258_vm0 }
 0x264   : > { %8703 = vmatmul.mubr.msk.f32.gmra.mxu0 %vm15264_vm1, %v15263_v21  ;;  %vm15272_vm4 = vmmov %vm15258_vm0 }
 0x265   : > { %8756 = vmatmul.mubr.msk.f32.gmra.mxu1 %vm15265_vm14, %v10964_v14  ;;  %8705 = vmatprep.mubr.msk.f32.mxu0 %vm15267_vm15, %v15266_v13  ;;  %vm15273_vm1 = vmmov %vm15258_vm0 }
 0x266   : > { %8758 = vmatprep.mubr.msk.f32.mxu1 %vm15258_vm0, %v15150_v56  ;;  %vm15274_vm14 = vmmov %vm15258_vm0 }
 0x267   : > { %vm15275_vm15 = vmmov %vm15258_vm0 }
 0x268   : > { %8706 = vmatmul.mubr.msk.f32.gmra.mxu0 %vm15269_vm3, %v15268_v6  ;;  %vm15277_vm3 = vmmov %vm15258_vm0 }
 0x269   : > { %8759 = vmatmul.mubr.msk.f32.gmra.mxu1 %vm15270_vm2, %v10983_v47  ;;  %8708 = vmatprep.mubr.msk.f32.mxu0 %vm15272_vm4, %v15271_v28  ;;  %vm15278_vm2 = vmmov %vm15258_vm0 }
 0x26a   : > { %8761 = vmatprep.mubr.msk.f32.mxu1 %vm15273_vm1, %v15158_v61  ;;  %vm15279_vm4 = vmmov %vm15258_vm0 }
 0x26b   : > { %vm15280_vm1 = vmmov %vm15258_vm0 }
 0x26c   : > { %8709 = vmatmul.mubr.msk.f32.gmra.mxu0 %vm15274_vm14, %v10241_v2  ;;  %vm15281_vm14 = vmmov %vm15258_vm0 }
 0x26d   : > { %8762 = vmatmul.mubr.msk.f32.gmra.mxu1 %vm15275_vm15, %v11002_v60  ;;  %8711 = vmatprep.mubr.msk.f32.mxu0 %vm15258_vm0, %v15276_v4  ;;  %vm15283_vm15 = vmmov %vm15258_vm0 }
 0x26e   : > { %8764 = vmatprep.mubr.msk.f32.mxu1 %vm15277_vm3, %v15167_v32  ;;  %vm15285_vm3 = vmmov %vm15258_vm0 }
 0x270   : > { %8712 = vmatmul.mubr.msk.f32.gmra.mxu0 %vm15278_vm2, %v10309_v25  ;;  %vm15286_vm2 = vmmov %vm15258_vm0 }
 0x271   : > { %8765 = vmatmul.mubr.msk.f32.gmra.mxu1 %vm15279_vm4, %v11021_v27  ;;  %8714 = vmatprep.mubr.msk.f32.mxu0 %vm15280_vm1, %v10311_v35  ;;  %vm15287_vm4 = vmmov %vm15258_vm0  ;;  %v15336_v27 = vld [vmem:[#allocation32_spill] sm:$0xff] }
 0x272   : > { %8767 = vmatprep.mubr.msk.f32.mxu1 %vm15281_vm14, %v15176_v0  ;;  %vm15288_vm1 = vmmov %vm15258_vm0  ;;  %v15331_v0 = vld [vmem:[#allocation27_spill] sm:$0xff] }
 0x273   : > { %vm15289_vm14 = vmmov %vm15258_vm0 }
 0x274   : > { %8715 = vmatmul.mubr.msk.f32.gmra.mxu0 %vm15283_vm15, %v15282_v55  ;;  %vm15290_vm15 = vmmov %vm15258_vm0 }
 0x275   : > { %8768 = vmatmul.mubr.msk.f32.gmra.mxu1 %vm15258_vm0, %v11040_v5  ;;  %8717 = vmatprep.mubr.msk.f32.mxu0 %vm15285_vm3, %v15284_v59  ;;  %vm15291_vm3 = vmmov %vm15258_vm0 }
 0x276   : > { %8770 = vmatprep.mubr.msk.f32.mxu1 %vm15286_vm2, %v15185_v11  ;;  %vm15292_vm2 = vmmov %vm15258_vm0 }
 0x278   : > { %8718 = vmatmul.mubr.msk.f32.gmra.mxu0 %vm15287_vm4, %v10420_v51  ;;  %vm15293_vm4 = vmmov %vm15258_vm0 }
 0x279   : > { %8771 = vmatmul.mubr.msk.f32.gmra.mxu1 %vm15288_vm1, %v11059_v49  ;;  %8720 = vmatprep.mubr.msk.f32.mxu0 %vm15289_vm14, %v10444_v39  ;;  %vm15294_vm1 = vmmov %vm15258_vm0 }
 0x27a   : > { %8773 = vmatprep.mubr.msk.f32.mxu1 %vm15290_vm15, %v15197_v57  ;;  %vm15295_vm14 = vmmov %vm15258_vm0 }
 0x27b   : > { %vm15296_vm15 = vmmov %vm15258_vm0 }
 0x27c   : > { %8721 = vmatmul.mubr.msk.f32.gmra.mxu0 %vm15258_vm0, %v10460_v29 }
 0x27d   : > { %8774 = vmatmul.mubr.msk.f32.gmra.mxu1 %vm15291_vm3, %v11082_v17  ;;  %8723 = vmatprep.mubr.msk.f32.mxu0 %vm15292_vm2, %v10464_v46  ;;  %vm15297_vm3 = vmmov %vm15258_vm0  ;;  %v15325_v17 = vld [vmem:[#allocation15_spill] sm:$0xff] }
 0x27e   : > { %8776 = vmatprep.mubr.msk.f32.mxu1 %vm15293_vm4, %v15206_v54  ;;  %vm15298_vm2 = vmmov %vm15258_vm0  ;;  %v15312_v54 = vld [vmem:[#allocation65_spill] sm:$0xff] }
 0x27f   : > { %vm15299_vm4 = vmmov %vm15258_vm0 }
 0x280   : > { %8724 = vmatmul.mubr.msk.f32.gmra.mxu0 %vm15294_vm1, %v10494_v58  ;;  %vm15300_vm1 = vmmov %vm15258_vm0 }
 0x281   : > { %8777 = vmatmul.mubr.msk.f32.gmra.mxu1 %vm15295_vm14, %v11103_v53  ;;  %8726 = vmatprep.mubr.msk.f32.mxu0 %vm15296_vm15, %v10498_v44  ;;  %vm15302_vm14 = vmmov %vm15258_vm0  ;;  %v15304_v53 = vld [vmem:[#allocation12_spill] sm:$0xff] }
 0x282   : > { %8779 = vmatprep.mubr.msk.f32.mxu1 %vm15258_vm0, %v15214_v24  ;;  %vm15303_vm15 = vmmov %vm15258_vm0  ;;  %v810_v24 = vand.u32 15, %v774_v40  ;;  %v15315_v40 = vld [vmem:[#allocation74_spill] sm:$0xff] }
 0x284   : > { %8727 = vmatmul.mubr.msk.f32.gmra.mxu0 %vm15297_vm3, %v10561_v62  ;;  %vm15305_vm3 = vmmov %vm15258_vm0 }
 0x285   : > { %8780 = vmatmul.mubr.msk.f32.gmra.mxu1 %vm15298_vm2, %v11134_v9  ;;  %8729 = vmatprep.mubr.msk.f32.mxu0 %vm15299_vm4, %v10564_v23  ;;  %v15306_v9 = vld [vmem:[#allocation66_spill] sm:$0xff]  ;;  %vm15307_vm2 = vmmov %vm15258_vm0 }
 0x286   : > { %8782 = vmatprep.mubr.msk.f32.mxu1 %vm15300_vm1, %v10683_v48  ;;  %vm15308_vm4 = vmmov %vm15258_vm0  ;;  %vm11308_vm1 = vcmp.eq.s32.totalorder %v810_v24, 15  ;;  %v15309_v48 = vmov 0  ;;  %v15318_v24 = vld [vmem:[#allocation5_spill] sm:$0xff] }
 0x287   : > { %v15310_v48 = vsel %vm11308_vm1, 4294967295, %v15309_v48 }
 0x288   : > { %8730 = vmatmul.mubr.msk.f32.gmra.mxu0 %vm15302_vm14, %v15301_v37  ;;  %15311 = vst [vmem:[#allocation10_spill] sm:$0xff] %v15310_v48  ;;  %vm15313_vm14 = vmmov %vm15258_vm0 }
 0x289   : > { %8783 = vmatmul.mubr.msk.f32.gmra.mxu1 %vm15303_vm15, %v11157_v8  ;;  %8732 = vmatprep.mubr.msk.f32.mxu0 %vm15258_vm0, %v15304_v53  ;;  %vm15314_vm15 = vmmov %vm15258_vm0  ;;  %v11320_v8 = vsel %vm11308_vm1, %v11162_v50, %v15315_v40  ;;  %v15323_v40 = vld [vmem:[#allocation18_spill] sm:$0xff] }
 0x28a   : > { %8785 = vmatprep.mubr.msk.f32.mxu1 %vm15305_vm3, %v10745_v42  ;;  %15316 = vst [vmem:[#allocation11_spill] sm:$0xff] %v11320_v8  ;;  %vm15317_vm3 = vmmov %vm15258_vm0 }
 0x28b   : > { %vm15324_vm1 = vmmov %vm15258_vm0 }
 0x28c   : > { %8733 = vmatmul.mubr.msk.f32.gmra.mxu0 %vm15307_vm2, %v15306_v9  ;;  %vm15319_vm2 = vmmov %vm15258_vm0 }
 0x28d   : > { %8786 = vmatmul.mubr.msk.f32.gmra.mxu1 %vm15308_vm4, %v11181_v3  ;;  %8735 = vmatprep.mubr.msk.f32.mxu0 %vm15313_vm14, %v15312_v54  ;;  %vm15320_vm4 = vmmov %vm15258_vm0  ;;  %v8545_v3 = vpop.f32.mrf.mxu1 }
 0x28e   : > { %8788 = vmatprep.mubr.msk.f32.mxu1 %vm15314_vm15, %v11125_v15  ;;  %vm15321_vm14 = vmmov %vm15258_vm0 }
 0x28f   : > { %vm15322_vm15 = vmmov %vm15258_vm0  ;;  %v1792_v48 = vpop.f32.mrf.mxu1 }
 0x290   : > { %8736 = vmatmul.mubr.msk.f32.gmra.mxu0 %vm15258_vm0, %v10642_v20 }
 0x291   : > { %8789 = vmatmul.mubr.msk.f32.gmra.mxu1 %vm15317_vm3, %v11320_v8  ;;  %8738 = vmatprep.mubr.msk.f32.mxu0 %vm15319_vm2, %v15318_v24  ;;  %v11341_v8 = vld [vmem:[%s14561_s4] ss:$0 sm:$0xff]  ;;  %v8548_v15 = vpop.f32.mrf.mxu1  ;;  %vm15326_vm3 = vmmov %vm15258_vm0 }
 0x292   : > { %8843 = vmatprep.mubr.msk.f32.mxu1 %vm15320_vm4, %v15251_v10  ;;  %v8495_v10 = vpop.f32.mrf.mxu0  ;;  %vm15327_vm2 = vmmov %vm15258_vm0 }
 0x293   : > { %vm15330_vm4 = vmmov %vm15258_vm0  ;;  %v1802_v57 = vpop.f32.mrf.mxu1 }
 0x294   : > { %8739 = vmatmul.mubr.msk.f32.gmra.mxu0 %vm15321_vm14, %v10699_v22  ;;  %vm15332_vm14 = vmmov %vm15258_vm0 }
 0x295   : > { %8844 = vmatmul.mubr.msk.f32.vlgmr.msra.gmra.mxu1 %vm15322_vm15, %v15254_v34  ;;  %8793 = vmatprep.mubr.msk.f32.mxu0 %vm15324_vm1, %v15323_v40  ;;  %v1513_v34 = vadd.f32 %v8495_v10, %v11341_v8  ;;  %v15328_v40 = vld [vmem:[#allocation26_spill] sm:$0xff]  ;;  %vm15329_vm1 = vmmov %vm15258_vm0  ;;  %v8551_v5 = vpop.f32.mrf.mxu1 }
 0x296   : > { %8846 = vmatprep.mubr.msk.f32.mxu1 %vm15258_vm0, %v10037_v33  ;;  %v1507_v33 = vpop.f32.mrf.mxu0  ;;  %vm15333_vm15 = vmmov %vm15258_vm0 }
 0x297   : > { %v1508_v49 = vadd.f32 %v11341_v8, %v1507_v33  ;;  %v11354_v11 = vadd.f32 %v8545_v3, %v1513_v34  ;;  %v1812_v10 = vpop.f32.mrf.mxu1 }
 0x298   : > { %8794 = vmatmul.mubr.msk.f32.vlgmr.msra.gmra.mxu0 %vm15326_vm3, %v15325_v17  ;;  %v8498_v17 = vpop.f32.mrf.mxu0  ;;  %vm15335_vm3 = vmmov %vm15258_vm0 }
 0x299   : > { %8847 = vmatmul.mubr.msk.f32.gmra.mxu1 %vm15327_vm2, %v10074_v26  ;;  %8892 = vmatpush3.msra.mxu0 %v11195_v63  ;;  %v1523_v26 = vadd.f32 %v8498_v17, %v11341_v8  ;;  %v15334_v63 = vld [vmem:[#allocation31_spill] sm:$0xff]  ;;  %v8554_v33 = vpop.f32.mrf.mxu1  ;;  %vm15337_vm2 = vmmov %vm15258_vm0  ;;  %v15339_v17 = vld [vmem:[#allocation34_spill] sm:$0xff] }
 0x29a   : > { %8796 = vmatprep.mubr.msk.f32.mxu0 %vm15329_vm1, %v15328_v40  ;;  %8849 = vmatprep.mubr.msk.f32.mxu1 %vm15330_vm4, %v15260_v45  ;;  %v11365_v45 = vadd.f32 %v1792_v48, %v1508_v49  ;;  %v1517_v3 = vpop.f32.mrf.mxu0  ;;  %vm15338_vm1 = vmmov %vm15258_vm0 }
 0x29b   : > { %v1518_v34 = vadd.f32 %v11341_v8, %v1517_v3  ;;  %v11368_v40 = vadd.f32 %v8548_v15, %v1523_v26  ;;  %vm15340_vm4 = vmmov %vm15258_vm0  ;;  %v1822_v15 = vpop.f32.mrf.mxu1  ;;  %v15342_v3 = vld [vmem:[#allocation36_spill] sm:$0xff] }
 0x29c   : > { %8797 = vmatmul.mubr.msk.f32.gmra.mxu0 %vm15332_vm14, %v15331_v0  ;;  %v8501_v0 = vpop.f32.mrf.mxu0  ;;  %vm15341_vm14 = vmmov %vm15258_vm0 }
 0x29d   : > { %8850 = vmatmul.mubr.msk.f32.gmra.mxu1 %vm15333_vm15, %v15263_v21  ;;  %8799 = vmatprep.mubr.msk.f32.mxu0 %vm15258_vm0, %v15334_v63  ;;  %v1533_v21 = vadd.f32 %v8501_v0, %v11341_v8  ;;  %v11379_v48 = vadd.f32 %v1802_v57, %v1518_v34  ;;  %v8557_v63 = vpop.f32.mrf.mxu1  ;;  %vm15343_vm15 = vmmov %vm15258_vm0  ;;  %v15344_v0 = vld [vmem:[#allocation38_spill] sm:$0xff] }
 0x29e   : > { %8852 = vmatprep.mubr.msk.f32.mxu1 %vm15335_vm3, %v15266_v13  ;;  %v1527_v49 = vpop.f32.mrf.mxu0  ;;  %vm15345_vm3 = vmmov %vm15258_vm0 }
 0x29f   : > { %v1528_v13 = vadd.f32 %v11341_v8, %v1527_v49  ;;  %v11382_v26 = vadd.f32 %v8551_v5, %v1533_v21 }
 0x2a0   : > { %8800 = vmatmul.mubr.msk.f32.gmra.mxu0 %vm15337_vm2, %v15336_v27  ;;  %v8504_v27 = vpop.f32.mrf.mxu0  ;;  %vm15346_vm2 = vmmov %vm15258_vm0 }
 0x2a1   : > { %8853 = vmatmul.mubr.msk.f32.gmra.mxu1 %vm15338_vm1, %v15268_v6  ;;  %8802 = vmatprep.mubr.msk.f32.mxu0 %vm15340_vm4, %v15339_v17  ;;  %v1543_v6 = vadd.f32 %v8504_v27, %v11341_v8  ;;  %v11393_v57 = vadd.f32 %v1812_v10, %v1528_v13  ;;  %vm15348_vm1 = vmmov %vm15258_vm0  ;;  %v15350_v27 = vld [vmem:[#allocation45_spill] sm:$0xff] }
 0x2a2   : > { %8855 = vmatprep.mubr.msk.f32.mxu1 %vm15341_vm14, %v15271_v28  ;;  %v1537_v5 = vpop.f32.mrf.mxu0  ;;  %v1832_v28 = vpop.f32.mrf.mxu1  ;;  %vm15349_vm4 = vmmov %vm15258_vm0 }
 0x2a3   : > { %v1538_v34 = vadd.f32 %v11341_v8, %v1537_v5  ;;  %v11396_v21 = vadd.f32 %v8554_v33, %v1543_v6  ;;  %vm15351_vm14 = vmmov %vm15258_vm0 }
 0x2a4   : > { %8803 = vmatmul.mubr.msk.f32.gmra.mxu0 %vm15343_vm15, %v15342_v3  ;;  %v8507_v17 = vpop.f32.mrf.mxu0  ;;  %v8560_v49 = vpop.f32.mrf.mxu1  ;;  %v15347_v3 = vld [vmem:[#allocation43_spill] sm:$0xff]  ;;  %vm15352_vm15 = vmmov %vm15258_vm0 }
 0x2a5   : > { %8856 = vmatmul.mubr.msk.f32.gmra.mxu1 %vm15258_vm0, %v10241_v2  ;;  %8805 = vmatprep.mubr.msk.f32.mxu0 %vm15345_vm3, %v15344_v0  ;;  %v1553_v2 = vadd.f32 %v8507_v17, %v11341_v8  ;;  %vm15354_vm3 = vmmov %vm15258_vm0  ;;  %v15355_v17 = vld [vmem:[#allocation48_spill] sm:$0xff] }
 0x2a6   : > { %8858 = vmatprep.mubr.msk.f32.mxu1 %vm15346_vm2, %v15276_v4  ;;  %v11407_v4 = vadd.f32 %v1822_v15, %v1538_v34  ;;  %v1547_v10 = vpop.f32.mrf.mxu0  ;;  %v1842_v33 = vpop.f32.mrf.mxu1  ;;  %vm15356_vm2 = vmmov %vm15258_vm0 }
 0x2a7   : > { %v1548_v13 = vadd.f32 %v11341_v8, %v1547_v10  ;;  %v11410_v6 = vadd.f32 %v8557_v63, %v1553_v2 }
 0x2a8   : > { %8806 = vmatmul.mubr.msk.f32.gmra.mxu0 %vm15348_vm1, %v15347_v3  ;;  %v8510_v0 = vpop.f32.mrf.mxu0  ;;  %v8563_v5 = vpop.f32.mrf.mxu1  ;;  %v15353_v3 = vld [vmem:[#allocation47_spill] sm:$0xff]  ;;  %vm15357_vm1 = vmmov %vm15258_vm0 }
 0x2a9   : > { %8859 = vmatmul.mubr.msk.f32.gmra.mxu1 %vm15349_vm4, %v10309_v25  ;;  %8808 = vmatprep.mubr.msk.f32.mxu0 %vm15351_vm14, %v15350_v27  ;;  %v1563_v25 = vadd.f32 %v8510_v0, %v11341_v8  ;;  %vm15359_vm4 = vmmov %vm15258_vm0  ;;  %v15361_v0 = vld [vmem:[#allocation53_spill] sm:$0xff] }
 0x2aa   : > { %8861 = vmatprep.mubr.msk.f32.mxu1 %vm15352_vm15, %v10311_v35  ;;  %v11421_v35 = vadd.f32 %v1832_v28, %v1548_v13  ;;  %v1557_v15 = vpop.f32.mrf.mxu0  ;;  %v1852_v63 = vpop.f32.mrf.mxu1  ;;  %vm15360_vm14 = vmmov %vm15258_vm0 }
 0x2ab   : > { %v1558_v34 = vadd.f32 %v11341_v8, %v1557_v15  ;;  %v11424_v2 = vadd.f32 %v8560_v49, %v1563_v25  ;;  %vm15362_vm15 = vmmov %vm15258_vm0 }
 0x2ac   : > { %8809 = vmatmul.mubr.msk.f32.gmra.mxu0 %vm15258_vm0, %v15353_v3  ;;  %v8513_v27 = vpop.f32.mrf.mxu0  ;;  %v8566_v10 = vpop.f32.mrf.mxu1  ;;  %v15358_v3 = vld [vmem:[#allocation51_spill] sm:$0xff] }
 0x2ad   : > { %8862 = vmatmul.mubr.msk.f32.gmra.mxu1 %vm15354_vm3, %v15282_v55  ;;  %8811 = vmatprep.mubr.msk.f32.mxu0 %vm15356_vm2, %v15355_v17  ;;  %v1573_v55 = vadd.f32 %v8513_v27, %v11341_v8  ;;  %vm15364_vm3 = vmmov %vm15258_vm0  ;;  %v15366_v27 = vld [vmem:[#allocation57_spill] sm:$0xff] }
 0x2ae   : > { %8864 = vmatprep.mubr.msk.f32.mxu1 %vm15357_vm1, %v15284_v59  ;;  %v11435_v59 = vadd.f32 %v1842_v33, %v1558_v34  ;;  %v1567_v28 = vpop.f32.mrf.mxu0  ;;  %v1862_v49 = vpop.f32.mrf.mxu1  ;;  %vm15365_vm2 = vmmov %vm15258_vm0 }
 0x2af   : > { %v1568_v13 = vadd.f32 %v11341_v8, %v1567_v28  ;;  %v11438_v25 = vadd.f32 %v8563_v5, %v1573_v55  ;;  %vm15367_vm1 = vmmov %vm15258_vm0 }
 0x2b0   : > { %8812 = vmatmul.mubr.msk.f32.gmra.mxu0 %vm15359_vm4, %v15358_v3  ;;  %v8516_v17 = vpop.f32.mrf.mxu0  ;;  %v8569_v15 = vpop.f32.mrf.mxu1  ;;  %v15363_v3 = vld [vmem:[#allocation56_spill] sm:$0xff]  ;;  %vm15368_vm4 = vmmov %vm15258_vm0 }
 0x2b1   : > { %8865 = vmatmul.mubr.msk.f32.gmra.mxu1 %vm15360_vm14, %v10420_v51  ;;  %8814 = vmatprep.mubr.msk.f32.mxu0 %vm15362_vm15, %v15361_v0  ;;  %v1583_v51 = vadd.f32 %v8516_v17, %v11341_v8  ;;  %vm15370_vm14 = vmmov %vm15258_vm0 }
 0x2b2   : > { %8867 = vmatprep.mubr.msk.f32.mxu1 %vm15258_vm0, %v10444_v39  ;;  %v11449_v39 = vadd.f32 %v1852_v63, %v1568_v13  ;;  %v1577_v33 = vpop.f32.mrf.mxu0  ;;  %v11451_v5 = vpop.f32.mrf.mxu1  ;;  %vm15371_vm15 = vmmov %vm15258_vm0 }
 0x2b3   : > { %v1578_v34 = vadd.f32 %v11341_v8, %v1577_v33  ;;  %v11454_v55 = vadd.f32 %v8566_v10, %v1583_v51  ;;  %v15374_v33 = vld [vmem:[#allocation61_spill] sm:$0xff] }
 0x2b4   : > { %8815 = vmatmul.mubr.msk.f32.gmra.mxu0 %vm15364_vm3, %v15363_v3  ;;  %v8519_v0 = vpop.f32.mrf.mxu0  ;;  %v8572_v28 = vpop.f32.mrf.mxu1  ;;  %vm15373_vm3 = vmmov %vm15258_vm0 }
 0x2b5   : > { %8868 = vmatmul.mubr.msk.f32.gmra.mxu1 %vm15365_vm2, %v10460_v29  ;;  %8817 = vmatprep.mubr.msk.f32.mxu0 %vm15367_vm1, %v15366_v27  ;;  %v15369_v29 = vld [vmem:[#allocation58_spill] sm:$0xff]  ;;  %v1593_v17 = vadd.f32 %v8519_v0, %v11341_v8  ;;  %v11465_v63 = vadd.f32 %v1862_v49, %v1578_v34  ;;  %vm15375_vm2 = vmmov %vm15258_vm0  ;;  %v15377_v0 = vld [vmem:[#allocation64_spill] sm:$0xff] }
 0x2b6   : > { %8870 = vmatprep.mubr.msk.f32.mxu1 %vm15368_vm4, %v10464_v46  ;;  %v15372_v46 = vld [vmem:[#allocation60_spill] sm:$0xff]  ;;  %v11467_v10 = vpop.f32.mrf.mxu0  ;;  %v11469_v13 = vpop.f32.mrf.mxu1  ;;  %vm15376_vm1 = vmmov %vm15258_vm0 }
 0x2b7   : > { %v11471_v3 = vadd.f32 %v8569_v15, %v1593_v17  ;;  %vm15378_vm4 = vmmov %vm15258_vm0  ;;  %v15380_v17 = vld [vmem:[#allocation67_spill] sm:$0xff] }
 0x2b8   : > { %8818 = vmatmul.mubr.msk.f32.gmra.mxu0 %vm15370_vm14, %v15369_v29  ;;  %v8522_v51 = vpop.f32.mrf.mxu0  ;;  %v8575_v27 = vpop.f32.mrf.mxu1  ;;  %vm15379_vm14 = vmmov %vm15258_vm0 }
 0x2b9   : > { %8871 = vmatmul.mubr.msk.f32.gmra.mxu1 %vm15371_vm15, %v10494_v58  ;;  %8820 = vmatprep.mubr.msk.f32.mxu0 %vm15258_vm0, %v15372_v46  ;;  %v1603_v58 = vadd.f32 %v8522_v51, %v11341_v8  ;;  %vm15381_vm15 = vmmov %vm15258_vm0  ;;  %v15382_v46 = vld [vmem:[#allocation69_spill] sm:$0xff] }
 0x2ba   : > { %8873 = vmatprep.mubr.msk.f32.mxu1 %vm15373_vm3, %v10498_v44  ;;  %v11482_v44 = vpop.f32.mrf.mxu0  ;;  %v11484_v49 = vpop.f32.mrf.mxu1  ;;  %vm15383_vm3 = vmmov %vm15258_vm0 }
 0x2bb   : > { %v11486_v15 = vadd.f32 %v8572_v28, %v1603_v58 }
 0x2bc   : > { %8821 = vmatmul.mubr.msk.f32.gmra.mxu0 %vm15375_vm2, %v15374_v33  ;;  %v8525_v34 = vpop.f32.mrf.mxu0  ;;  %v8578_v29 = vpop.f32.mrf.mxu1  ;;  %vm15384_vm2 = vmmov %vm15258_vm0 }
 0x2bd   : > { %8874 = vmatmul.mubr.msk.f32.gmra.mxu1 %vm15376_vm1, %v10561_v62  ;;  %8823 = vmatprep.mubr.msk.f32.mxu0 %vm15378_vm4, %v15377_v0  ;;  %v1613_v62 = vadd.f32 %v8525_v34, %v11341_v8  ;;  %vm15385_vm1 = vmmov %vm15258_vm0  ;;  %v15387_v0 = vld [vmem:[#allocation6_spill] sm:$0xff] }
 0x2be   : > { %8876 = vmatprep.mubr.msk.f32.mxu1 %vm15379_vm14, %v10564_v23  ;;  %v11497_v23 = vpop.f32.mrf.mxu0  ;;  %v11499_v28 = vpop.f32.mrf.mxu1  ;;  %vm15386_vm4 = vmmov %vm15258_vm0 }
 0x2bf   : > { %v11501_v51 = vadd.f32 %v8575_v27, %v1613_v62  ;;  %vm15388_vm14 = vmmov %vm15258_vm0 }
 0x2c0   : > { %8824 = vmatmul.mubr.msk.f32.gmra.mxu0 %vm15381_vm15, %v15380_v17  ;;  %v8528_v33 = vpop.f32.mrf.mxu0  ;;  %v8581_v58 = vpop.f32.mrf.mxu1  ;;  %vm15389_vm15 = vmmov %vm15258_vm0 }
 0x2c1   : > { %8877 = vmatmul.mubr.msk.f32.gmra.mxu1 %vm15258_vm0, %v15301_v37  ;;  %8826 = vmatprep.mubr.msk.f32.mxu0 %vm15383_vm3, %v15382_v46  ;;  %v1623_v37 = vadd.f32 %v8528_v33, %v11341_v8  ;;  %vm15390_vm3 = vmmov %vm15258_vm0 }
 0x2c2   : > { %8879 = vmatprep.mubr.msk.f32.mxu1 %vm15384_vm2, %v15304_v53  ;;  %v775_v53 = vadd.s32 272, %v9836_v31  ;;  %v11513_v27 = vpop.f32.mrf.mxu0  ;;  %v11515_v34 = vpop.f32.mrf.mxu1  ;;  %vm15391_vm2 = vmmov %vm15258_vm0 }
 0x2c3   : > { %v11517_v17 = vadd.f32 %v8578_v29, %v1623_v37 }
 0x2c4   : > { %8827 = vmatmul.mubr.msk.f32.gmra.mxu0 %vm15385_vm1, %v10702_v1  ;;  %v8531_v1 = vpop.f32.mrf.mxu0  ;;  %v8584_v62 = vpop.f32.mrf.mxu1  ;;  %vm15392_vm1 = vmmov %vm15258_vm0  ;;  %v811_v46 = vand.u32 15, %v775_v53 }
 0x2c5   : > { %8880 = vmatmul.mubr.msk.f32.gmra.mxu1 %vm15386_vm4, %v15306_v9  ;;  %8829 = vmatprep.mubr.msk.f32.mxu0 %vm15388_vm14, %v15387_v0  ;;  %v1633_v9 = vadd.f32 %v8531_v1, %v11341_v8  ;;  %vm15394_vm4 = vmmov %vm15258_vm0 }
 0x2c6   : > { %8882 = vmatprep.mubr.msk.f32.mxu1 %vm15389_vm15, %v15312_v54  ;;  %v11528_v33 = vpop.f32.mrf.mxu0  ;;  %v11530_v29 = vpop.f32.mrf.mxu1  ;;  %vm15395_vm14 = vmmov %vm15258_vm0 }
 0x2c7   : > { %15393 = vst [vmem:[#allocation8_spill] sm:$0xff] %v11530_v29  ;;  %v11532_v37 = vadd.f32 %v8581_v58, %v1633_v9  ;;  %vm15396_vm15 = vmmov %vm15258_vm0 }
 0x2c8   : > { %8830 = vmatmul.mubr.msk.f32.gmra.mxu0 %vm15258_vm0, %v10777_v12  ;;  %v8534_v0 = vpop.f32.mrf.mxu0  ;;  %v8587_v12 = vpop.f32.mrf.mxu1 }
 0x2c9   : > { %8883 = vmatmul.mubr.msk.f32.gmra.mxu1 %vm15390_vm3, %v10642_v20  ;;  %8832 = vmatprep.mubr.msk.f32.mxu0 %vm15391_vm2, %v10795_v7  ;;  %v1643_v7 = vadd.f32 %v8534_v0, %v11341_v8  ;;  %vm11543_vm3 = vcmp.eq.s32.totalorder %v811_v46, 0  ;;  %vm15401_vm2 = vmmov %vm15258_vm0 }
 0x2ca   : > { %8885 = vmatprep.mubr.msk.f32.mxu1 %vm15392_vm1, %v15318_v24  ;;  %v15397_v24 = vmov 0  ;;  %v11547_v58 = vpop.f32.mrf.mxu0  ;;  %v11549_v53 = vpop.f32.mrf.mxu1  ;;  %vm15402_vm1 = vmmov %vm15258_vm0 }
 0x2cb   : > { %v15398_v24 = vsel %vm11543_vm3, 4294967295, %v15397_v24  ;;  %15400 = vst [vmem:[#allocation21_spill] sm:$0xff] %v11549_v53  ;;  %v11551_v1 = vadd.f32 %v8584_v62, %v1643_v7 }
 0x2cc   : > { %8833 = vmatmul.mubr.msk.f32.gmra.mxu0 %vm15394_vm4, %v10825_v36  ;;  %15399 = vst [vmem:[#allocation9_spill] sm:$0xff] %v15398_v24  ;;  %vm15404_vm4 = vmmov %vm15258_vm0 }
 0x2cd   : > { %8886 = vmatmul.mubr.msk.f32.gmra.mxu1 %vm15395_vm14, %v10699_v22  ;;  %8835 = vmatprep.mubr.msk.f32.mxu0 %vm15396_vm15, %v11143_v19  ;;  %v8537_v9 = vpop.f32.mrf.mxu0  ;;  %v15403_v19 = vld [vmem:[#allocation75_spill] sm:$0xff]  ;;  %vm15406_vm14 = vmmov %vm15258_vm0 }
 0x2ce   : > { %8888 = vmatprep.mubr.msk.f32.mxu1 %vm15258_vm0, %v15312_v54  ;;  %v8590_v22 = vpop.f32.mrf.mxu1  ;;  %v1189_v54 = vsel %vm11543_vm3, %v10745_v42, %v15403_v19  ;;  %v1653_v46 = vadd.f32 %v8537_v9, %v11341_v8  ;;  %vm15407_vm15 = vmmov %vm15258_vm0 }
 0x2cf   : > { %v11563_v0 = vpop.f32.mrf.mxu0 }
 0x2d0   : > { %8836 = vmatmul.mubr.msk.f32.gmra.mxu0 %vm15401_vm2, %v11162_v50  ;;  %v11565_v62 = vpop.f32.mrf.mxu1  ;;  %v11567_v7 = vadd.f32 %v8587_v12, %v1653_v46  ;;  %vm15408_vm2 = vmmov %vm15258_vm0 }
 0x2d1   : > { %8889 = vmatmul.mubr.msk.f32.gmra.mxu1 %vm15402_vm1, %v10642_v20  ;;  %8838 = vmatprep.mubr.msk.f32.mxu0 %vm15404_vm4, %v1189_v54  ;;  %15405 = vst [vmem:[#allocation22_spill] sm:$0xff] %v11565_v62  ;;  %vm15409_vm1 = vmmov %vm15258_vm0 }
 0x2d2   : > { %vm15410_vm4 = vmmov %vm15258_vm0 }
 0x2d3   : > { %v8540_v53 = vpop.f32.mrf.mxu0 }
 0x2d4   : > { %v8645_v50 = vpop.f32.mrf.mxu1  ;;  %8839 = vmatmul.mubr.msk.f32.gmra.mxu0 %vm15406_vm14, %v10825_v36  ;;  %v1663_v20 = vadd.f32 %v8540_v53, %v11341_v8  ;;  %vm15411_vm14 = vmmov %vm15258_vm0 }
 0x2d5   : > { %8893 = vmatprep.mubr.msk.f32.mxu0 %vm15407_vm15, %v10034_v16  ;;  %v11574_v19 = vpop.f32.mrf.mxu0  ;;  %vm15412_vm15 = vmmov %vm15258_vm0 }
 0x2d6   : > { %v11576_v9 = vpop.f32.mrf.mxu1  ;;  %v11578_v54 = vadd.f32 %v8590_v22, %v1663_v20 }
 0x2d8   : > { %v8595_v24 = vpop.f32.mrf.mxu0  ;;  %8894 = vmatmul.mubr.msk.f32.vlgmr.msra.gmra.mxu0 %vm15258_vm0, %v10907_v43 }
 0x2d9   : > { %v8648_v62 = vpop.f32.mrf.mxu1  ;;  %v2305_v12 = vadd.f32 %v8595_v24, %v11354_v11  ;;  %8896 = vmatprep.mubr.msk.f32.mxu0 %vm15408_vm2, %v15126_v38  ;;  %vm15413_vm2 = vmmov %vm15258_vm0 }
 0x2da   : > { %v2145_v53 = vpop.f32.mrf.mxu0 }
 0x2db   : > { %v11585_v46 = vpop.f32.mrf.mxu1  ;;  %v11588_v16 = vadd.f32 %v2145_v53, %v11365_v45  ;;  %v11590_v29 = vadd.f32 %v8645_v50, %v2305_v12 }
 0x2dc   : > { %v8598_v22 = vpop.f32.mrf.mxu0  ;;  %8897 = vmatmul.mubr.msk.f32.gmra.mxu0 %vm15409_vm1, %v10926_v41  ;;  %vm15414_vm1 = vmmov %vm15258_vm0 }
 0x2dd   : > { %v8651_v20 = vpop.f32.mrf.mxu1  ;;  %v2307_v43 = vadd.f32 %v8598_v22, %v11368_v40  ;;  %8899 = vmatprep.mubr.msk.f32.mxu0 %vm15410_vm4, %v15135_v30  ;;  %vm15415_vm4 = vmmov %vm15258_vm0 }
 0x2de   : > { %v2155_v11 = vpop.f32.mrf.mxu0 }
 0x2df   : > { %v11597_v38 = vpop.f32.mrf.mxu1  ;;  %v11600_v24 = vadd.f32 %v2155_v11, %v11379_v48  ;;  %v11602_v45 = vadd.f32 %v8648_v62, %v2307_v43 }
 0x2e0   : > { %v8601_v50 = vpop.f32.mrf.mxu0  ;;  %8900 = vmatmul.mubr.msk.f32.gmra.mxu0 %vm15411_vm14, %v10945_v18  ;;  %vm15416_vm14 = vmmov %vm15258_vm0 }
 0x2e1   : > { %v8654_v12 = vpop.f32.mrf.mxu1  ;;  %v2309_v41 = vadd.f32 %v8601_v50, %v11382_v26  ;;  %8902 = vmatprep.mubr.msk.f32.mxu0 %vm15412_vm15, %v15143_v52  ;;  %vm15417_vm15 = vmmov %vm15258_vm0 }
 0x2e2   : > { %v2165_v40 = vpop.f32.mrf.mxu0 }
 0x2e3   : > { %v11609_v30 = vpop.f32.mrf.mxu1  ;;  %v11612_v53 = vadd.f32 %v2165_v40, %v11393_v57  ;;  %v11614_v48 = vadd.f32 %v8651_v20, %v2309_v41 }
 0x2e4   : > { %v8604_v62 = vpop.f32.mrf.mxu0  ;;  %8903 = vmatmul.mubr.msk.f32.gmra.mxu0 %vm15258_vm0, %v10964_v14 }
 0x2e5   : > { %v8657_v22 = vpop.f32.mrf.mxu1  ;;  %v2311_v18 = vadd.f32 %v8604_v62, %v11396_v21  ;;  %8905 = vmatprep.mubr.msk.f32.mxu0 %vm15413_vm2, %v15150_v56  ;;  %vm15421_vm2 = vmmov %vm15258_vm0 }
 0x2e6   : > { %v2175_v26 = vpop.f32.mrf.mxu0 }
 0x2e7   : > { %v11621_v52 = vpop.f32.mrf.mxu1  ;;  %v11624_v43 = vadd.f32 %v2175_v26, %v11407_v4  ;;  %v11626_v57 = vadd.f32 %v8654_v12, %v2311_v18  ;;  %v15419_v18 = vld [vmem:[#allocation46_spill] sm:$0xff]  ;;  %v15420_v26 = vld [vmem:[#allocation52_spill] sm:$0xff] }
 0x2e8   : > { %v8607_v20 = vpop.f32.mrf.mxu0  ;;  %8906 = vmatmul.mubr.msk.f32.gmra.mxu0 %vm15414_vm1, %v10983_v47  ;;  %vm15425_vm1 = vmmov %vm15258_vm0 }
 0x2e9   : > { %v8660_v11 = vpop.f32.mrf.mxu1  ;;  %v2313_v14 = vadd.f32 %v8607_v20, %v11410_v6  ;;  %8908 = vmatprep.mubr.msk.f32.mxu0 %vm15415_vm4, %v15158_v61  ;;  %vm15427_vm4 = vmmov %vm15258_vm0 }
 0x2ea   : > { %v2185_v21 = vpop.f32.mrf.mxu0 }
 0x2eb   : > { %v11633_v56 = vpop.f32.mrf.mxu1  ;;  %v11636_v50 = vadd.f32 %v2185_v21, %v11421_v35  ;;  %v11638_v4 = vadd.f32 %v8657_v22, %v2313_v14  ;;  %v15424_v21 = vld [vmem:[#allocation79_spill] sm:$0xff] }
 0x2ec   : > { %v8610_v12 = vpop.f32.mrf.mxu0  ;;  %8909 = vmatmul.mubr.msk.f32.gmra.mxu0 %vm15416_vm14, %v11002_v60  ;;  %vm15431_vm14 = vmmov %vm15258_vm0 }
 0x2ed   : > { %v8663_v41 = vpop.f32.mrf.mxu1  ;;  %v2315_v47 = vadd.f32 %v8610_v12, %v11424_v2  ;;  %8911 = vmatprep.mubr.msk.f32.mxu0 %vm15417_vm15, %v15167_v32  ;;  %vm15433_vm15 = vmmov %vm15258_vm0 }
 0x2ee   : > { %v2195_v6 = vpop.f32.mrf.mxu0 }
 0x2ef   : > { %v11645_v61 = vpop.f32.mrf.mxu1  ;;  %v11648_v40 = vadd.f32 %v2195_v6, %v11435_v59  ;;  %v11650_v35 = vadd.f32 %v8660_v11, %v2315_v47  ;;  %v15426_v47 = vld [vmem:[#allocation55_spill] sm:$0xff] }
 0x2f0   : > { %15418 = vst [vmem:[#allocation24_spill] sm:$0xff] %v11645_v61  ;;  %v8613_v62 = vpop.f32.mrf.mxu0  ;;  %8912 = vmatmul.mubr.msk.f32.gmra.mxu0 %vm15258_vm0, %v15419_v18 }
 0x2f1   : > { %v8666_v22 = vpop.f32.mrf.mxu1  ;;  %v2317_v60 = vadd.f32 %v8613_v62, %v11438_v25  ;;  %8914 = vmatprep.mubr.msk.f32.mxu0 %vm15421_vm2, %v15420_v26  ;;  %vm15437_vm2 = vmmov %vm15258_vm0 }
 0x2f2   : > { %v2205_v2 = vpop.f32.mrf.mxu0 }
 0x2f3   : > { %v11657_v32 = vpop.f32.mrf.mxu1  ;;  %v11660_v20 = vadd.f32 %v2205_v2, %v11449_v39  ;;  %v11662_v59 = vadd.f32 %v8663_v41, %v2317_v60  ;;  %v15430_v60 = vld [vmem:[#allocation81_spill] sm:$0xff]  ;;  %v15432_v2 = vld [vmem:[#allocation59_spill] sm:$0xff] }
 0x2f4   : > { %15422 = vst [vmem:[#allocation25_spill] sm:$0xff] %v11657_v32  ;;  %v8616_v11 = vpop.f32.mrf.mxu0  ;;  %8915 = vmatmul.mubr.msk.f32.gmra.mxu0 %vm15425_vm1, %v15424_v21  ;;  %vm15440_vm1 = vmmov %vm15258_vm0  ;;  %v15446_v32 = vld [vmem:[#allocation71_spill] sm:$0xff] }
 0x2f5   : > { %15423 = vst [vmem:[#allocation29_spill] sm:$0xff] %v11660_v20  ;;  %v8669_v14 = vpop.f32.mrf.mxu1  ;;  %v2319_v12 = vadd.f32 %v8616_v11, %v11454_v55  ;;  %8917 = vmatprep.mubr.msk.f32.mxu0 %vm15427_vm4, %v15426_v47  ;;  %vm15442_vm4 = vmmov %vm15258_vm0  ;;  %v15460_v20 = vmov 0 }
 0x2f6   : > { %v2215_v25 = vpop.f32.mrf.mxu0 }
 0x2f7   : > { %v11669_v6 = vpop.f32.mrf.mxu1  ;;  %v11672_v62 = vadd.f32 %v2215_v25, %v11465_v63  ;;  %v11674_v39 = vadd.f32 %v8666_v22, %v2319_v12  ;;  %v15435_v22 = vld [vmem:[#allocation83_spill] sm:$0xff]  ;;  %v15436_v25 = vld [vmem:[#allocation62_spill] sm:$0xff] }
 0x2f8   : > { %15428 = vst [vmem:[#allocation39_spill] sm:$0xff] %v11669_v6  ;;  %v8619_v41 = vpop.f32.mrf.mxu0  ;;  %8918 = vmatmul.mubr.msk.f32.gmra.mxu0 %vm15431_vm14, %v15430_v60  ;;  %v15441_v6 = vld [vmem:[#allocation68_spill] sm:$0xff]  ;;  %vm15445_vm14 = vmmov %vm15258_vm0 }
 0x2f9   : > { %15429 = vst [vmem:[#allocation40_spill] sm:$0xff] %v11672_v62  ;;  %v8672_v18 = vpop.f32.mrf.mxu1  ;;  %v2321_v26 = vadd.f32 %v8619_v41, %v11471_v3  ;;  %8920 = vmatprep.mubr.msk.f32.mxu0 %vm15433_vm15, %v15432_v2  ;;  %vm15447_vm15 = vmmov %vm15258_vm0 }
 0x2fa   : > { %v11681_v55 = vpop.f32.mrf.mxu0 }
 0x2fb   : > { %v11683_v11 = vpop.f32.mrf.mxu1  ;;  %v11685_v21 = vadd.f32 %v8669_v14, %v2321_v26  ;;  %v15439_v14 = vld [vmem:[#allocation85_spill] sm:$0xff] }
 0x2fc   : > { %15434 = vst [vmem:[#allocation44_spill] sm:$0xff] %v11683_v11  ;;  %v8622_v63 = vpop.f32.mrf.mxu0  ;;  %8921 = vmatmul.mubr.msk.f32.gmra.mxu0 %vm15258_vm0, %v15435_v22 }
 0x2fd   : > { %v8675_v47 = vpop.f32.mrf.mxu1  ;;  %v2323_v12 = vadd.f32 %v8622_v63, %v11486_v15  ;;  %8923 = vmatprep.mubr.msk.f32.mxu0 %vm15437_vm2, %v15436_v25  ;;  %vm15450_vm2 = vmmov %vm15258_vm0 }
 0x2fe   : > { %v11692_v3 = vpop.f32.mrf.mxu0 }
 0x2ff   : > { %v11694_v41 = vpop.f32.mrf.mxu1  ;;  %v11696_v60 = vadd.f32 %v8672_v18, %v2323_v12  ;;  %v15444_v18 = vld [vmem:[#allocation89_spill] sm:$0xff] }
 0x300   : > { %15438 = vst [vmem:[#allocation63_spill] sm:$0xff] %v11694_v41  ;;  %v8625_v2 = vpop.f32.mrf.mxu0  ;;  %8924 = vmatmul.mubr.msk.f32.gmra.mxu0 %vm15440_vm1, %v15439_v14  ;;  %vm15453_vm1 = vmmov %vm15258_vm0 }
 0x301   : > { %v8678_v11 = vpop.f32.mrf.mxu1  ;;  %v2325_v26 = vadd.f32 %v8625_v2, %v11501_v51  ;;  %8926 = vmatprep.mubr.msk.f32.mxu0 %vm15442_vm4, %v15441_v6  ;;  %vm15455_vm4 = vmmov %vm15258_vm0 }
 0x302   : > { %v11703_v15 = vpop.f32.mrf.mxu0 }
 0x303   : > { %v11705_v63 = vpop.f32.mrf.mxu1  ;;  %v11707_v22 = vadd.f32 %v8675_v47, %v2325_v26  ;;  %v15449_v47 = vld [vmem:[#allocation91_spill] sm:$0xff]  ;;  %v776_v26 = vadd.s32 280, %v9836_v31  ;;  %v15454_v31 = vld [vmem:[#allocation88_spill] sm:$0xff] }
 0x304   : > { %15443 = vst [vmem:[#allocation12_spill] sm:$0xff] %v11705_v63  ;;  %v8628_v25 = vpop.f32.mrf.mxu0  ;;  %8927 = vmatmul.mubr.msk.f32.gmra.mxu0 %vm15445_vm14, %v15444_v18  ;;  %vm15459_vm14 = vmmov %vm15258_vm0 }
 0x305   : > { %v8681_v41 = vpop.f32.mrf.mxu1  ;;  %v2327_v12 = vadd.f32 %v8628_v25, %v11517_v17  ;;  %8929 = vmatprep.mubr.msk.f32.mxu0 %vm15447_vm15, %v15446_v32  ;;  %v812_v62 = vand.u32 15, %v776_v26 }
 0x306   : > { %v11714_v51 = vpop.f32.mrf.mxu0 }
 0x307   : > { %v11716_v2 = vpop.f32.mrf.mxu1  ;;  %v11718_v6 = vadd.f32 %v8678_v11, %v2327_v12  ;;  %vm11745_vm15 = vcmp.eq.s32.totalorder %v812_v62, 15 }
 0x308   : > { %15448 = vst [vmem:[#allocation66_spill] sm:$0xff] %v11716_v2  ;;  %v8631_v14 = vpop.f32.mrf.mxu0  ;;  %8930 = vmatmul.mubr.msk.f32.gmra.mxu0 %vm15258_vm0, %v15449_v47  ;;  %v15452_v2 = vld [vmem:[#allocation93_spill] sm:$0xff]  ;;  %v15461_v20 = vsel %vm11745_vm15, 4294967295, %v15460_v20 }
 0x309   : > { %v8684_v63 = vpop.f32.mrf.mxu1  ;;  %v2329_v18 = vadd.f32 %v8631_v14, %v11532_v37  ;;  %8932 = vmatprep.mubr.msk.f32.mxu0 %vm15450_vm2, %v10745_v42  ;;  %15462 = vst [vmem:[#allocation18_spill] sm:$0xff] %v15461_v20  ;;  %vm15466_vm2 = vmmov %vm15258_vm0 }
 0x30a   : > { %v11726_v17 = vpop.f32.mrf.mxu0 }
 0x30b   : > { %v11728_v32 = vpop.f32.mrf.mxu1  ;;  %v11730_v25 = vadd.f32 %v8681_v41, %v2329_v18  ;;  %v15458_v18 = vld [vmem:[#allocation11_spill] sm:$0xff] }
 0x30c   : > { %15451 = vst [vmem:[#allocation65_spill] sm:$0xff] %v11728_v32  ;;  %v8634_v11 = vpop.f32.mrf.mxu0  ;;  %8933 = vmatmul.mubr.msk.f32.gmra.mxu0 %vm15453_vm1, %v15452_v2  ;;  %vm15554_vm1 = vmmov %vm15258_vm0 }
 0x30d   : > { %v8687_v12 = vpop.f32.mrf.mxu1  ;;  %v2331_v47 = vadd.f32 %v8634_v11, %v11551_v1  ;;  %8935 = vmatprep.mubr.msk.f32.mxu0 %vm15455_vm4, %v15454_v31  ;;  %vm15560_vm4 = vmmov %vm15258_vm0 }
 0x30e   : > { %v11737_v37 = vpop.f32.mrf.mxu0 }
 0x30f   : > { %15456 = vst [vmem:[#allocation74_spill] sm:$0xff] %v11737_v37  ;;  %v11739_v14 = vpop.f32.mrf.mxu1  ;;  %v11741_v61 = vadd.f32 %v8684_v63, %v2331_v47  ;;  %v15465_v63 = vld [vmem:[#allocation76_spill] sm:$0xff] }
 0x310   : > { %15457 = vst [vmem:[#allocation5_spill] sm:$0xff] %v11739_v14  ;;  %v8637_v32 = vpop.f32.mrf.mxu0  ;;  %8936 = vmatmul.mubr.msk.f32.gmra.mxu0 %vm15459_vm14, %v15458_v18  ;;  %v1334_v11 = vsel %vm11745_vm15, %v10825_v36, %v15465_v63  ;;  %vm15561_vm14 = vmmov %vm15258_vm0 }
 0x311   : > { %v8690_v41 = vpop.f32.mrf.mxu1  ;;  %v2333_v1 = vadd.f32 %v8637_v32, %v11567_v7  ;;  %8938 = vmatprep.mubr.msk.f32.mxu0 %vm15258_vm0, %v10745_v42 }
 0x312   : > { %v11752_v2 = vpop.f32.mrf.mxu0 }
 0x313   : > { %15463 = vst [vmem:[#allocation15_spill] sm:$0xff] %v11752_v2  ;;  %v11754_v26 = vpop.f32.mrf.mxu1  ;;  %v11760_v47 = vadd.f32 %v8687_v12, %v2333_v1 }
 0x314   : > { %15464 = vst [vmem:[#allocation26_spill] sm:$0xff] %v11754_v26  ;;  %v8640_v62 = vpop.f32.mrf.mxu0  ;;  %8939 = vmatmul.mubr.msk.f32.gmra.mxu0 %vm15466_vm2, %v1334_v11  ;;  %vm15564_vm2 = vmmov %vm15258_vm0 }
 0x315   : > { %v8745_v31 = vpop.f32.mrf.mxu1  ;;  %v2335_v7 = vadd.f32 %v8640_v62, %v11578_v54 }
 0x316   : > { %v11764_v32 = vpop.f32.mrf.mxu0 }
 0x317   : > { %15467 = vst [vmem:[#allocation27_spill] sm:$0xff] %v11764_v32  ;;  %v11766_v42 = vpop.f32.mrf.mxu1  ;;  %v11768_v18 = vadd.f32 %v8690_v41, %v2335_v7 }
 0x318   : > { %15468 = vst [vmem:[#allocation31_spill] sm:$0xff] %v11766_v42  ;;  %v8695_v26 = vpop.f32.mrf.mxu0 }
 0x319   : > { %v8748_v14 = vpop.f32.mrf.mxu1  ;;  %v2833_v2 = vadd.f32 %v8695_v26, %v11590_v29 }
 0x31a   : > { %v11771_v20 = vpop.f32.mrf.mxu0 }
 0x31b   : > { %v11773_v36 = vpop.f32.mrf.mxu1  ;;  %v11775_v12 = vadd.f32 %v8745_v31, %v2833_v2 }
 0x31c   : > { %15469 = vst [vmem:[#allocation32_spill] sm:$0xff] %v11773_v36  ;;  %v8698_v1 = vpop.f32.mrf.mxu0 }
 0x31d   : > { %v8751_v63 = vpop.f32.mrf.mxu1  ;;  %v2835_v54 = vadd.f32 %v8698_v1, %v11602_v45 }
 0x31e   : > { %v11778_v11 = vpop.f32.mrf.mxu0 }
 0x31f   : > { %v11780_v62 = vpop.f32.mrf.mxu1  ;;  %v11782_v41 = vadd.f32 %v8748_v14, %v2835_v54 }
 0x320   : > { %15470 = vst [vmem:[#allocation34_spill] sm:$0xff] %v11780_v62  ;;  %v8701_v7 = vpop.f32.mrf.mxu0 }
 0x321   : > { %v8754_v32 = vpop.f32.mrf.mxu1  ;;  %v2837_v29 = vadd.f32 %v8701_v7, %v11614_v48 }
 0x322   : > { %v11785_v26 = vpop.f32.mrf.mxu0 }
 0x323   : > { %15471 = vst [vmem:[#allocation36_spill] sm:$0xff] %v11785_v26  ;;  %v11787_v37 = vpop.f32.mrf.mxu1  ;;  %v11789_v2 = vadd.f32 %v8751_v63, %v2837_v29 }
 0x324   : > { %15472 = vst [vmem:[#allocation38_spill] sm:$0xff] %v11787_v37  ;;  %v8704_v31 = vpop.f32.mrf.mxu0 }
 0x325   : > { %v8757_v36 = vpop.f32.mrf.mxu1  ;;  %v2839_v45 = vadd.f32 %v8704_v31, %v11626_v57 }
 0x326   : > { %v11792_v1 = vpop.f32.mrf.mxu0 }
 0x327   : > { %15473 = vst [vmem:[#allocation43_spill] sm:$0xff] %v11792_v1  ;;  %v11794_v42 = vpop.f32.mrf.mxu1  ;;  %v11796_v14 = vadd.f32 %v8754_v32, %v2839_v45 }
 0x328   : > { %15474 = vst [vmem:[#allocation45_spill] sm:$0xff] %v11794_v42  ;;  %v8707_v54 = vpop.f32.mrf.mxu0 }
 0x329   : > { %v8760_v62 = vpop.f32.mrf.mxu1  ;;  %v2841_v48 = vadd.f32 %v8707_v54, %v11638_v4 }
 0x32a   : > { %v11799_v7 = vpop.f32.mrf.mxu0 }
 0x32b   : > { %15475 = vst [vmem:[#allocation47_spill] sm:$0xff] %v11799_v7  ;;  %v11801_v26 = vpop.f32.mrf.mxu1  ;;  %v11803_v63 = vadd.f32 %v8757_v36, %v2841_v48 }
 0x32c   : > { %15476 = vst [vmem:[#allocation48_spill] sm:$0xff] %v11801_v26  ;;  %v8710_v29 = vpop.f32.mrf.mxu0 }
 0x32d   : > { %v8763_v37 = vpop.f32.mrf.mxu1  ;;  %v2843_v57 = vadd.f32 %v8710_v29, %v11650_v35 }
 0x32e   : > { %v11806_v31 = vpop.f32.mrf.mxu0 }
 0x32f   : > { %15477 = vst [vmem:[#allocation51_spill] sm:$0xff] %v11806_v31  ;;  %v11808_v1 = vpop.f32.mrf.mxu1  ;;  %v11810_v32 = vadd.f32 %v8760_v62, %v2843_v57 }
 0x330   : > { %15478 = vst [vmem:[#allocation53_spill] sm:$0xff] %v11808_v1  ;;  %v8713_v45 = vpop.f32.mrf.mxu0 }
 0x331   : > { %v8766_v42 = vpop.f32.mrf.mxu1  ;;  %v2845_v4 = vadd.f32 %v8713_v45, %v11662_v59 }
 0x332   : > { %v11813_v54 = vpop.f32.mrf.mxu0 }
 0x333   : > { %15479 = vst [vmem:[#allocation56_spill] sm:$0xff] %v11813_v54  ;;  %v11815_v7 = vpop.f32.mrf.mxu1  ;;  %v11817_v36 = vadd.f32 %v8763_v37, %v2845_v4 }
 0x334   : > { %15480 = vst [vmem:[#allocation57_spill] sm:$0xff] %v11815_v7  ;;  %v8716_v48 = vpop.f32.mrf.mxu0 }
 0x335   : > { %v8769_v26 = vpop.f32.mrf.mxu1  ;;  %v2847_v35 = vadd.f32 %v8716_v48, %v11674_v39 }
 0x336   : > { %v11820_v29 = vpop.f32.mrf.mxu0 }
 0x337   : > { %15481 = vst [vmem:[#allocation58_spill] sm:$0xff] %v11820_v29  ;;  %v11822_v31 = vpop.f32.mrf.mxu1  ;;  %v11824_v62 = vadd.f32 %v8766_v42, %v2847_v35 }
 0x338   : > { %15482 = vst [vmem:[#allocation60_spill] sm:$0xff] %v11822_v31  ;;  %v8719_v57 = vpop.f32.mrf.mxu0 }
 0x339   : > { %v8772_v1 = vpop.f32.mrf.mxu1  ;;  %v2849_v59 = vadd.f32 %v8719_v57, %v11685_v21 }
 0x33a   : > { %v11827_v45 = vpop.f32.mrf.mxu0 }
 0x33b   : > { %15483 = vst [vmem:[#allocation61_spill] sm:$0xff] %v11827_v45  ;;  %v11829_v54 = vpop.f32.mrf.mxu1  ;;  %v11831_v37 = vadd.f32 %v8769_v26, %v2849_v59 }
 0x33c   : > { %15484 = vst [vmem:[#allocation64_spill] sm:$0xff] %v11829_v54  ;;  %v8722_v4 = vpop.f32.mrf.mxu0 }
 0x33d   : > { %v8775_v7 = vpop.f32.mrf.mxu1  ;;  %v2851_v39 = vadd.f32 %v8722_v4, %v11696_v60 }
 0x33e   : > { %v11834_v48 = vpop.f32.mrf.mxu0 }
 0x33f   : > { %15485 = vst [vmem:[#allocation67_spill] sm:$0xff] %v11834_v48  ;;  %v11836_v29 = vpop.f32.mrf.mxu1  ;;  %v11838_v42 = vadd.f32 %v8772_v1, %v2851_v39 }
 0x340   : > { %15486 = vst [vmem:[#allocation69_spill] sm:$0xff] %v11836_v29  ;;  %v8725_v35 = vpop.f32.mrf.mxu0 }
 0x341   : > { %v8778_v31 = vpop.f32.mrf.mxu1  ;;  %v2853_v21 = vadd.f32 %v8725_v35, %v11707_v22 }
 0x342   : > { %v11841_v57 = vpop.f32.mrf.mxu0 }
 0x343   : > { %15487 = vst [vmem:[#allocation6_spill] sm:$0xff] %v11841_v57  ;;  %v11843_v45 = vpop.f32.mrf.mxu1  ;;  %v11845_v26 = vadd.f32 %v8775_v7, %v2853_v21 }
 0x344   : > { %15488 = vst [vmem:[#allocation75_spill] sm:$0xff] %v11843_v45  ;;  %v8728_v59 = vpop.f32.mrf.mxu0 }
 0x345   : > { %v8781_v54 = vpop.f32.mrf.mxu1  ;;  %v2855_v60 = vadd.f32 %v8728_v59, %v11718_v6 }
 0x346   : > { %v11848_v4 = vpop.f32.mrf.mxu0 }
 0x347   : > { %15489 = vst [vmem:[#allocation46_spill] sm:$0xff] %v11848_v4  ;;  %v11850_v48 = vpop.f32.mrf.mxu1  ;;  %v11852_v1 = vadd.f32 %v8778_v31, %v2855_v60 }
 0x348   : > { %15490 = vst [vmem:[#allocation52_spill] sm:$0xff] %v11850_v48  ;;  %v8731_v39 = vpop.f32.mrf.mxu0 }
 0x349   : > { %v8784_v29 = vpop.f32.mrf.mxu1  ;;  %v2857_v22 = vadd.f32 %v8731_v39, %v11730_v25 }
 0x34a   : > { %v11855_v35 = vpop.f32.mrf.mxu0 }
 0x34b   : > { %15491 = vst [vmem:[#allocation79_spill] sm:$0xff] %v11855_v35  ;;  %v11857_v57 = vpop.f32.mrf.mxu1  ;;  %v11859_v7 = vadd.f32 %v8781_v54, %v2857_v22 }
 0x34c   : > { %15492 = vst [vmem:[#allocation55_spill] sm:$0xff] %v11857_v57  ;;  %v8734_v21 = vpop.f32.mrf.mxu0 }
 0x34d   : > { %v8787_v45 = vpop.f32.mrf.mxu1  ;;  %v2859_v6 = vadd.f32 %v8734_v21, %v11741_v61 }
 0x34e   : > { %v11862_v59 = vpop.f32.mrf.mxu0 }
 0x34f   : > { %15493 = vst [vmem:[#allocation81_spill] sm:$0xff] %v11862_v59  ;;  %v11864_v4 = vpop.f32.mrf.mxu1  ;;  %v11866_v31 = vadd.f32 %v8784_v29, %v2859_v6 }
 0x350   : > { %15494 = vst [vmem:[#allocation59_spill] sm:$0xff] %v11864_v4  ;;  %v8737_v60 = vpop.f32.mrf.mxu0 }
 0x351   : > { %v8790_v48 = vpop.f32.mrf.mxu1  ;;  %v2861_v25 = vadd.f32 %v8737_v60, %v11760_v47 }
 0x352   : > { %v11869_v39 = vpop.f32.mrf.mxu0 }
 0x353   : > { %15495 = vst [vmem:[#allocation83_spill] sm:$0xff] %v11869_v39  ;;  %v11871_v35 = vpop.f32.mrf.mxu1  ;;  %v11873_v54 = vadd.f32 %v8787_v45, %v2861_v25 }
 0x354   : > { %15496 = vst [vmem:[#allocation62_spill] sm:$0xff] %v11871_v35  ;;  %v8740_v22 = vpop.f32.mrf.mxu0 }
 0x355   : > { %v2863_v57 = vadd.f32 %v8740_v22, %v11768_v18  ;;  %v11878_v21 = vpop.f32.mrf.mxu1 }
 0x356   : > { %v11876_v61 = vpop.f32.mrf.mxu0 }
 0x357   : > { %15497 = vst [vmem:[#allocation85_spill] sm:$0xff] %v11876_v61  ;;  %v11880_v4 = vadd.f32 %v8790_v48, %v2863_v57  ;;  %v11887_v60 = vpop.f32.mrf.mxu1 }
 0x358   : > { %v8795_v29 = vpop.f32.mrf.mxu0 }
 0x359   : > { %v11883_v6 = vadd.f32 %v8795_v29, %v11775_v12  ;;  %v11894_v18 = vpop.f32.mrf.mxu1 }
 0x35a   : > { %v11885_v47 = vpop.f32.mrf.mxu0  ;;  %15498 = vst [vmem:[#allocation68_spill] sm:$0xff] %v11894_v18 }
 0x35b   : > { %v11901_v12 = vpop.f32.mrf.mxu1 }
 0x35c   : > { %v8798_v35 = vpop.f32.mrf.mxu0  ;;  %15500 = vst [vmem:[#allocation71_spill] sm:$0xff] %v11901_v12 }
 0x35d   : > { %v11890_v45 = vadd.f32 %v8798_v35, %v11782_v41  ;;  %v11908_v41 = vpop.f32.mrf.mxu1 }
 0x35e   : > { %v11892_v25 = vpop.f32.mrf.mxu0 }
 0x360   : > { %v8801_v22 = vpop.f32.mrf.mxu0 }
 0x361   : > { %v11897_v48 = vadd.f32 %v8801_v22, %v11789_v2  ;;  %v11915_v2 = vpop.f32.mrf.mxu1 }
 0x362   : > { %v11899_v57 = vpop.f32.mrf.mxu0 }
 0x363   : > { %15499 = vst [vmem:[#allocation89_spill] sm:$0xff] %v11897_v48 }
 0x364   : > { %v8804_v29 = vpop.f32.mrf.mxu0 }
 0x365   : > { %v11904_v61 = vadd.f32 %v8804_v29, %v11796_v14  ;;  %v11922_v14 = vpop.f32.mrf.mxu1 }
 0x366   : > { %v11906_v39 = vpop.f32.mrf.mxu0 }
 0x367   : > { %15501 = vst [vmem:[#allocation91_spill] sm:$0xff] %v11904_v61  ;;  %15502 = vst [vmem:[#allocation93_spill] sm:$0xff] %v11906_v39 }
 0x368   : > { %v8807_v35 = vpop.f32.mrf.mxu0 }
 0x369   : > { %v11911_v59 = vadd.f32 %v8807_v35, %v11803_v63  ;;  %v11929_v63 = vpop.f32.mrf.mxu1 }
 0x36a   : > { %v11913_v18 = vpop.f32.mrf.mxu0 }
 0x36b   : > { %15503 = vst [vmem:[#allocation88_spill] sm:$0xff] %v11911_v59  ;;  %15504 = vst [vmem:[#allocation11_spill] sm:$0xff] %v11913_v18 }
 0x36c   : > { %v8810_v22 = vpop.f32.mrf.mxu0 }
 0x36d   : > { %v11918_v48 = vadd.f32 %v8810_v22, %v11810_v32  ;;  %v11936_v32 = vpop.f32.mrf.mxu1 }
 0x36e   : > { %v11920_v12 = vpop.f32.mrf.mxu0 }
 0x36f   : > { %15505 = vst [vmem:[#allocation76_spill] sm:$0xff] %v11918_v48  ;;  %15506 = vst [vmem:[#allocation94_spill] sm:$0xff] %v11920_v12 }
 0x370   : > { %v8813_v29 = vpop.f32.mrf.mxu0 }
 0x371   : > { %v11925_v61 = vadd.f32 %v8813_v29, %v11817_v36  ;;  %v11943_v36 = vpop.f32.mrf.mxu1 }
 0x372   : > { %v11927_v39 = vpop.f32.mrf.mxu0 }
 0x373   : > { %15507 = vst [vmem:[#allocation95_spill] sm:$0xff] %v11925_v61  ;;  %15508 = vst [vmem:[#allocation96_spill] sm:$0xff] %v11927_v39 }
 0x374   : > { %v8816_v35 = vpop.f32.mrf.mxu0 }
 0x375   : > { %v11932_v59 = vadd.f32 %v8816_v35, %v11824_v62  ;;  %v11950_v62 = vpop.f32.mrf.mxu1 }
 0x376   : > { %v11934_v18 = vpop.f32.mrf.mxu0 }
 0x377   : > { %15509 = vst [vmem:[#allocation97_spill] sm:$0xff] %v11932_v59  ;;  %15510 = vst [vmem:[#allocation98_spill] sm:$0xff] %v11934_v18 }
 0x378   : > { %v8819_v22 = vpop.f32.mrf.mxu0 }
 0x379   : > { %v11939_v48 = vadd.f32 %v8819_v22, %v11831_v37  ;;  %v11957_v37 = vpop.f32.mrf.mxu1 }
 0x37a   : > { %v11941_v12 = vpop.f32.mrf.mxu0 }
 0x37b   : > { %15511 = vst [vmem:[#allocation99_spill] sm:$0xff] %v11939_v48  ;;  %15512 = vst [vmem:[#allocation100_spill] sm:$0xff] %v11941_v12 }
 0x37c   : > { %v8822_v29 = vpop.f32.mrf.mxu0 }
 0x37d   : > { %v11946_v61 = vadd.f32 %v8822_v29, %v11838_v42  ;;  %v11964_v42 = vpop.f32.mrf.mxu1 }
 0x37e   : > { %v11948_v39 = vpop.f32.mrf.mxu0 }
 0x37f   : > { %15513 = vst [vmem:[#allocation101_spill] sm:$0xff] %v11946_v61 }
 0x380   : > { %v8825_v35 = vpop.f32.mrf.mxu0 }
 0x381   : > { %v11953_v59 = vadd.f32 %v8825_v35, %v11845_v26  ;;  %v1588_v26 = vadd.f32 %v11341_v8, %v11467_v10  ;;  %v1598_v35 = vadd.f32 %v11341_v8, %v11482_v44  ;;  %v1648_v10 = vadd.f32 %v11341_v8, %v11563_v0 }
 0x382   : > { %v11955_v18 = vpop.f32.mrf.mxu0  ;;  %v1658_v44 = vadd.f32 %v11341_v8, %v11574_v19 }
 0x383   : > { %15514 = vst [vmem:[#allocation102_spill] sm:$0xff] %v11953_v59  ;;  %15515 = vst [vmem:[#allocation103_spill] sm:$0xff] %v11955_v18 }
 0x384   : > { %v8828_v22 = vpop.f32.mrf.mxu0 }
 0x385   : > { %v11960_v48 = vadd.f32 %v8828_v22, %v11852_v1  ;;  %v1608_v1 = vadd.f32 %v11341_v8, %v11497_v23  ;;  %v1618_v22 = vadd.f32 %v11341_v8, %v11513_v27  ;;  %v2571_v23 = vadd.f32 %v11576_v9, %v11588_v16  ;;  %v15521_v9 = vld [vmem:[#allocation8_spill] sm:$0xff] }
 0x386   : > { %v11962_v12 = vpop.f32.mrf.mxu0 }
 0x387   : > { %15516 = vst [vmem:[#allocation104_spill] sm:$0xff] %v11960_v48  ;;  %15517 = vst [vmem:[#allocation105_spill] sm:$0xff] %v11962_v12  ;;  %v1628_v48 = vadd.f32 %v11341_v8, %v11528_v33  ;;  %v11981_v12 = vpop.f32.mrf.mxu1  ;;  %v1967_v33 = vadd.f32 %v11451_v5, %v1588_v26  ;;  %v1973_v0 = vadd.f32 %v11499_v28, %v1618_v22  ;;  %v15527_v22 = vld [vmem:[#allocation29_spill] sm:$0xff] }
 0x388   : > { %v8831_v29 = vpop.f32.mrf.mxu0  ;;  %v2575_v28 = vadd.f32 %v11597_v38, %v11612_v53  ;;  %v2579_v38 = vadd.f32 %v11621_v52, %v11636_v50  ;;  %v15524_v53 = vld [vmem:[#allocation31_spill] sm:$0xff] }
 0x389   : > { %v11967_v61 = vadd.f32 %v8831_v29, %v11859_v7  ;;  %v1638_v7 = vadd.f32 %v11341_v8, %v11547_v58  ;;  %v1971_v58 = vadd.f32 %v11484_v49, %v1608_v1  ;;  %v1975_v18 = vadd.f32 %v11515_v34, %v1628_v48  ;;  %v12002_v19 = vpop.f32.mrf.mxu1  ;;  %v15532_v50 = vld [vmem:[#allocation39_spill] sm:$0xff] }
 0x38a   : > { %v11973_v59 = vpop.f32.mrf.mxu0  ;;  %v2832_v8 = vadd.f32 %v11771_v20, %v2571_v23  ;;  %v2320_v49 = vadd.f32 %v11681_v55, %v1967_v33  ;;  %v2577_v34 = vadd.f32 %v11609_v30, %v11624_v43  ;;  %v2326_v1 = vadd.f32 %v11714_v51, %v1973_v0  ;;  %v15531_v23 = vld [vmem:[#allocation36_spill] sm:$0xff]  ;;  %v15534_v0 = vld [vmem:[#allocation63_spill] sm:$0xff] }
 0x38b   : > { %15518 = vst [vmem:[#allocation106_spill] sm:$0xff] %v11967_v61  ;;  %15519 = vst [vmem:[#allocation107_spill] sm:$0xff] %v11973_v59  ;;  %v1969_v61 = vadd.f32 %v11469_v13, %v1598_v35  ;;  %v1977_v16 = vadd.f32 %v15521_v9, %v1638_v7  ;;  %v2573_v13 = vadd.f32 %v11585_v46, %v11600_v24  ;;  %v15529_v7 = vld [vmem:[#allocation40_spill] sm:$0xff] }
 0x38c   : > { %v8834_v29 = vpop.f32.mrf.mxu0  ;;  %v2324_v35 = vadd.f32 %v11703_v15, %v1971_v58  ;;  %v2328_v46 = vadd.f32 %v11726_v17, %v1975_v18  ;;  %v2581_v30 = vadd.f32 %v11633_v56, %v11648_v40  ;;  %v3095_v43 = vadd.f32 %v15524_v53, %v2832_v8  ;;  %v15528_v17 = vld [vmem:[#allocation24_spill] sm:$0xff] }
 0x38d   : > { %v11992_v27 = vadd.f32 %v8834_v29, %v11866_v31  ;;  %v15522_v31 = vld [vmem:[#allocation21_spill] sm:$0xff]  ;;  %v2322_v48 = vadd.f32 %v11692_v3, %v1969_v61  ;;  %v2834_v55 = vadd.f32 %v11778_v11, %v2573_v13  ;;  %v15525_v3 = vld [vmem:[#allocation74_spill] sm:$0xff]  ;;  %v15526_v61 = vld [vmem:[#allocation15_spill] sm:$0xff]  ;;  %v2583_v18 = vadd.f32 %v15528_v17, %v15527_v22 }
 0x38e   : > { %v11996_v59 = vpop.f32.mrf.mxu0  ;;  %v1979_v29 = vadd.f32 %v15522_v31, %v1648_v10  ;;  %v2330_v15 = vadd.f32 %v15525_v3, %v1977_v16  ;;  %v15530_v10 = vld [vmem:[#allocation25_spill] sm:$0xff]  ;;  %v2836_v52 = vadd.f32 %v15531_v23, %v2575_v28  ;;  %v3362_v56 = vadd.f32 %v11885_v47, %v3095_v43  ;;  %v15533_v33 = vld [vmem:[#allocation44_spill] sm:$0xff]  ;;  %v15536_v31 = vld [vmem:[#allocation66_spill] sm:$0xff] }
 0x38f   : > { %15520 = vst [vmem:[#allocation108_spill] sm:$0xff] %v11992_v27  ;;  %v15523_v27 = vld [vmem:[#allocation22_spill] sm:$0xff]  ;;  %v2585_v11 = vadd.f32 %v15530_v10, %v15529_v7  ;;  %v2589_v58 = vadd.f32 %v15533_v33, %v2322_v48  ;;  %v2591_v8 = vadd.f32 %v15534_v0, %v2324_v35  ;;  %v15535_v9 = vld [vmem:[#allocation12_spill] sm:$0xff]  ;;  %v3620_v48 = vadd.f32 %v11878_v21, %v11883_v6  ;;  %v15540_v35 = vld [vmem:[#allocation47_spill] sm:$0xff] }
 0x390   : > { %v1981_v5 = vadd.f32 %v15523_v27, %v1658_v44  ;;  %v8837_v26 = vpop.f32.mrf.mxu0  ;;  %v2332_v51 = vadd.f32 %v15526_v61, %v1979_v29  ;;  %v2587_v27 = vadd.f32 %v15532_v50, %v2320_v49  ;;  %v12046_v16 = vadd.f32 %v15535_v9, %v2326_v1  ;;  %v15538_v49 = vld [vmem:[#allocation43_spill] sm:$0xff]  ;;  %v15539_v47 = vld [vmem:[#allocation32_spill] sm:$0xff]  ;;  %v15542_v22 = vld [vmem:[#allocation65_spill] sm:$0xff] }
 0x391   : > { %v12015_v20 = vadd.f32 %v8837_v26, %v11873_v54  ;;  %v12029_v54 = vpop.f32.mrf.mxu1  ;;  %v12049_v29 = vadd.f32 %v15536_v31, %v2328_v46  ;;  %v15537_v26 = vld [vmem:[#allocation27_spill] sm:$0xff]  ;;  %v2838_v53 = vadd.f32 %v15538_v49, %v2577_v34  ;;  %v3097_v43 = vadd.f32 %v15539_v47, %v2834_v55  ;;  %v15543_v17 = vld [vmem:[#allocation5_spill] sm:$0xff]  ;;  %v15544_v10 = vld [vmem:[#allocation34_spill] sm:$0xff] }
 0x392   : > { %v12021_v24 = vpop.f32.mrf.mxu0  ;;  %v2334_v28 = vadd.f32 %v15537_v26, %v1981_v5  ;;  %v2840_v3 = vadd.f32 %v15540_v35, %v2579_v38  ;;  %v15541_v1 = vld [vmem:[#allocation51_spill] sm:$0xff]  ;;  %v12063_v46 = vadd.f32 %v15542_v22, %v2330_v15  ;;  %v12066_v7 = vadd.f32 %v15543_v17, %v2332_v51  ;;  %v15545_v21 = vld [vmem:[#allocation56_spill] sm:$0xff]  ;;  %v15546_v38 = vld [vmem:[#allocation58_spill] sm:$0xff] }
 0x393   : > { %v2842_v61 = vadd.f32 %v15541_v1, %v2581_v30  ;;  %v3364_v34 = vadd.f32 %v11892_v25, %v3097_v43  ;;  %v3099_v55 = vadd.f32 %v15544_v10, %v2836_v52  ;;  %v3619_v23 = vadd.f32 %v11887_v60, %v3362_v56  ;;  %v15547_v30 = vld [vmem:[#allocation61_spill] sm:$0xff]  ;;  %v15548_v15 = vld [vmem:[#allocation67_spill] sm:$0xff]  ;;  %v15549_v51 = vld [vmem:[#allocation26_spill] sm:$0xff] }
 0x394   : > { %v8840_v44 = vpop.f32.mrf.mxu0  ;;  %v2844_v6 = vadd.f32 %v15545_v21, %v2583_v18  ;;  %v2846_v50 = vadd.f32 %v15546_v38, %v2585_v11  ;;  %v2848_v33 = vadd.f32 %v15547_v30, %v2587_v27  ;;  %v2850_v0 = vadd.f32 %v15548_v15, %v2589_v58  ;;  %v15550_v26 = vld [vmem:[#allocation38_spill] sm:$0xff]  ;;  %v15551_v60 = vld [vmem:[#allocation68_spill] sm:$0xff]  ;;  %v15552_v11 = vld [vmem:[#allocation45_spill] sm:$0xff] }
 0x395   : > { %v12041_v40 = vadd.f32 %v8840_v44, %v11880_v4  ;;  %v12056_v4 = vpop.f32.mrf.mxu1  ;;  %v12078_v31 = vadd.f32 %v15549_v51, %v2334_v28  ;;  %v3101_v25 = vadd.f32 %v15550_v26, %v2838_v53  ;;  %v3622_v56 = vadd.f32 %v15551_v60, %v11890_v45  ;;  %v15553_v27 = vld [vmem:[#allocation48_spill] sm:$0xff]  ;;  %v15555_v1 = vld [vmem:[#allocation71_spill] sm:$0xff]  ;;  %v15556_v22 = vld [vmem:[#allocation53_spill] sm:$0xff] }
 0x396   : > { %v12051_v13 = vpop.f32.mrf.mxu0  ;;  %v3366_v18 = vadd.f32 %v11899_v57, %v3099_v55  ;;  %v3103_v47 = vadd.f32 %v15552_v11, %v2840_v3  ;;  %v3105_v43 = vadd.f32 %v15553_v27, %v2842_v61  ;;  %v3621_v45 = vadd.f32 %v15555_v1, %v3364_v34  ;;  %v15557_v17 = vld [vmem:[#allocation57_spill] sm:$0xff]  ;;  %v15558_v61 = vld [vmem:[#allocation60_spill] sm:$0xff] }
 0x397   : > { %v12081_v49 = vpop.f32.mrf.mxu1  ;;  %v3107_v57 = vadd.f32 %v15556_v22, %v2844_v6  ;;  %v12101_v3 = vadd.f32 %v15557_v17, %v2846_v50  ;;  %v15559_v10 = vld [vmem:[#allocation64_spill] sm:$0xff]  ;;  %v15562_v6 = vld [vmem:[#allocation89_spill] sm:$0xff] }
 0x398   : > { %v8895_v5 = vpop.f32.mrf.mxu0  ;;  %v12107_v55 = vadd.f32 %v15559_v10, %v2850_v0  ;;  %v3624_v50 = vadd.f32 %v11908_v41, %v15562_v6  ;;  %v15563_v15 = vld [vmem:[#allocation93_spill] sm:$0xff]  ;;  %v3623_v26 = vadd.f32 %v11915_v2, %v3366_v18  ;;  %v15565_v41 = vld [vmem:[#allocation6_spill] sm:$0xff]  ;;  %v15567_v2 = vld [vmem:[#allocation11_spill] sm:$0xff] }
 0x399   : > { %v12070_v44 = vadd.f32 %v8895_v5, %v3620_v48  ;;  %v12104_v5 = vadd.f32 %v15558_v61, %v2848_v33  ;;  %v12109_v21 = vpop.f32.mrf.mxu1  ;;  %v3370_v18 = vadd.f32 %v15567_v2, %v3103_v47 }
 0x39a   : > { %v3723_v9 = vpop.f32.mrf.mxu0 }
 0x39b   : > { %v12083_v52 = vadd.f32 %v3723_v9, %v3619_v23  ;;  %v3989_v58 = vmul.f32 %v12070_v44, %v12070_v44  ;;  %v3917_v38 = vsel %vm15560_vm4, %v12070_v44, 0.0  ;;  %v3368_v9 = vadd.f32 %v15563_v15, %v3101_v25  ;;  %vm15569_vm4 = vmmov %vm15258_vm0  ;;  %v15571_v15 = vld [vmem:[#allocation69_spill] sm:$0xff] }
 0x39c   : > { %v8898_v28 = vpop.f32.mrf.mxu0 }
 0x39d   : > { %v3916_v53 = vsel %vm15554_vm1, %v12083_v52, 0.0  ;;  %v3988_v48 = vmul.f32 %v12083_v52, %v12083_v52  ;;  %v12096_v35 = vadd.f32 %v8898_v28, %v3622_v56  ;;  %v4021_v33 = vsel %vm15258_vm0, %v3989_v58, 0.0  ;;  %vm15568_vm1 = vmmov %vm15258_vm0 }
 0x39e   : > { %v3733_v23 = vpop.f32.mrf.mxu0  ;;  %v3918_v51 = vadd.f32 %v3917_v38, %v3916_v53  ;;  %v2852_v28 = vadd.f32 %v15565_v41, %v2591_v8  ;;  %v15566_v53 = vld [vmem:[#allocation91_spill] sm:$0xff] }
 0x39f   : > { %v4020_v30 = vsel %vm15561_vm14, %v3988_v48, 0.0  ;;  %v12114_v34 = vadd.f32 %v3733_v23, %v3621_v45  ;;  %v3991_v60 = vmul.f32 %v12096_v35, %v12096_v35  ;;  %v3626_v1 = vadd.f32 %v11922_v14, %v15566_v53  ;;  %v12133_v45 = vpop.f32.mrf.mxu1  ;;  %vm15570_vm14 = vmmov %vm15258_vm0 }
 0x3a0   : > { %v8901_v0 = vpop.f32.mrf.mxu0  ;;  %v4022_v25 = vadd.f32 %v4021_v33, %v4020_v30  ;;  %v3921_v22 = vsel %vm15568_vm1, %v12096_v35, 0.0  ;;  %v3625_v30 = vadd.f32 %v11929_v63, %v3368_v9  ;;  %v12151_v33 = vadd.f32 %v15571_v15, %v2852_v28  ;;  %vm15574_vm1 = vmmov %vm15258_vm0 }
 0x3a1   : > { %v3919_v56 = vsel %vm15564_vm2, %v12114_v34, 0.0  ;;  %v3990_v11 = vmul.f32 %v12114_v34, %v12114_v34  ;;  %v12127_v27 = vadd.f32 %v8901_v0, %v3624_v50  ;;  %v4025_v14 = vsel %vm15570_vm14, %v3991_v60, 0.0  ;;  %v12155_v63 = vpop.f32.mrf.mxu1  ;;  %vm15573_vm2 = vmmov %vm15258_vm0 }
 0x3a2   : > { %v3920_v48 = vadd.f32 %v3919_v56, %v3918_v51  ;;  %v3743_v58 = vpop.f32.mrf.mxu0  ;;  %v15572_v56 = vld [vmem:[#allocation88_spill] sm:$0xff]  ;;  %vm15577_vm14 = vmmov %vm15258_vm0 }
 0x3a3   : > { %v4023_v17 = vsel %vm15569_vm4, %v3990_v11, 0.0  ;;  %v12138_v61 = vadd.f32 %v3743_v58, %v3623_v26  ;;  %v3993_v8 = vmul.f32 %v12127_v27, %v12127_v27  ;;  %v3628_v11 = vadd.f32 %v11936_v32, %v15572_v56  ;;  %vm15576_vm4 = vmmov %vm15258_vm0 }
 0x3a4   : > { %v4024_v10 = vadd.f32 %v4023_v17, %v4022_v25  ;;  %v3922_v23 = vadd.f32 %v3921_v22, %v3920_v48  ;;  %v8904_v38 = vpop.f32.mrf.mxu0  ;;  %v3925_v9 = vsel %vm15573_vm2, %v12127_v27, 0.0  ;;  %v3627_v25 = vadd.f32 %v11943_v36, %v3370_v18  ;;  %v15575_v48 = vld [vmem:[#allocation94_spill] sm:$0xff]  ;;  %vm15581_vm2 = vmmov %vm15258_vm0 }
 0x3a5   : > { %v3923_v47 = vsel %vm15258_vm0, %v12138_v61, 0.0  ;;  %v3992_v6 = vmul.f32 %v12138_v61, %v12138_v61  ;;  %v12148_v50 = vadd.f32 %v8904_v38, %v3626_v1  ;;  %v3372_v28 = vadd.f32 %v15575_v48, %v3105_v43  ;;  %v15578_v36 = vld [vmem:[#allocation46_spill] sm:$0xff]  ;;  %v15579_v38 = vld [vmem:[#allocation76_spill] sm:$0xff] }
 0x3a6   : > { %v3924_v51 = vadd.f32 %v3923_v47, %v3922_v23  ;;  %v4026_v0 = vadd.f32 %v4025_v14, %v4024_v10  ;;  %v3753_v26 = vpop.f32.mrf.mxu0  ;;  %v4029_v58 = vsel %vm15576_vm4, %v3993_v8, 0.0  ;;  %v2854_v18 = vadd.f32 %v15578_v36, %v12046_v16  ;;  %v15580_v14 = vld [vmem:[#allocation96_spill] sm:$0xff]  ;;  %vm15583_vm4 = vmmov %vm15258_vm0 }
 0x3a7   : > { %v4027_v60 = vsel %vm15574_vm1, %v3992_v6, 0.0  ;;  %v12160_v41 = vadd.f32 %v3753_v26, %v3625_v30  ;;  %v3995_v32 = vmul.f32 %v12148_v50, %v12148_v50  ;;  %v3630_v30 = vadd.f32 %v11950_v62, %v15579_v38  ;;  %v12178_v6 = vpop.f32.mrf.mxu1  ;;  %vm15582_vm1 = vmmov %vm15258_vm0 }
 0x3a8   : > { %v4028_v53 = vadd.f32 %v4027_v60, %v4026_v0  ;;  %v3926_v1 = vadd.f32 %v3925_v9, %v3924_v51  ;;  %v8907_v2 = vpop.f32.mrf.mxu0  ;;  %v3374_v47 = vadd.f32 %v15580_v14, %v3107_v57  ;;  %v3929_v15 = vsel %vm15258_vm0, %v12148_v50, 0.0 }
 0x3a9   : > { %v3927_v22 = vsel %vm15577_vm14, %v12160_v41, 0.0  ;;  %v3994_v17 = vmul.f32 %v12160_v41, %v12160_v41  ;;  %v12171_v10 = vadd.f32 %v8907_v2, %v3628_v11  ;;  %v3629_v9 = vadd.f32 %v11957_v37, %v3372_v28  ;;  %v12200_v37 = vpop.f32.mrf.mxu1  ;;  %vm15586_vm14 = vmmov %vm15258_vm0 }
 0x3aa   : > { %v3928_v43 = vadd.f32 %v3927_v22, %v3926_v1  ;;  %v4030_v23 = vadd.f32 %v4029_v58, %v4028_v53  ;;  %v3763_v8 = vpop.f32.mrf.mxu0  ;;  %v4033_v62 = vsel %vm15582_vm1, %v3995_v32, 0.0  ;;  %v15585_v22 = vld [vmem:[#allocation95_spill] sm:$0xff]  ;;  %vm15589_vm1 = vmmov %vm15258_vm0 }
 0x3ab   : > { %v4031_v51 = vsel %vm15581_vm2, %v3994_v17, 0.0  ;;  %v12183_v0 = vadd.f32 %v3763_v8, %v3627_v25  ;;  %v3997_v16 = vmul.f32 %v12171_v10, %v12171_v10  ;;  %v15584_v25 = vld [vmem:[#allocation75_spill] sm:$0xff]  ;;  %v3632_v17 = vadd.f32 %v11964_v42, %v15585_v22  ;;  %vm15588_vm2 = vmmov %vm15258_vm0 }
 0x3ac   : > { %v4032_v26 = vadd.f32 %v4031_v51, %v4030_v23  ;;  %v3930_v56 = vadd.f32 %v3929_v15, %v3928_v43  ;;  %v8910_v11 = vpop.f32.mrf.mxu0  ;;  %v12196_v58 = vadd.f32 %v15584_v25, %v2854_v18  ;;  %v3933_v28 = vsel %vm15586_vm14, %v12171_v10, 0.0  ;;  %v15587_v18 = vld [vmem:[#allocation98_spill] sm:$0xff]  ;;  %vm15594_vm14 = vmmov %vm15258_vm0 }
 0x3ad   : > { %v3931_v57 = vsel %vm15583_vm4, %v12183_v0, 0.0  ;;  %v3996_v60 = vmul.f32 %v12183_v0, %v12183_v0  ;;  %v12193_v48 = vadd.f32 %v8910_v11, %v3630_v30  ;;  %v3631_v43 = vadd.f32 %v11981_v12, %v3374_v47  ;;  %v15590_v12 = vld [vmem:[#allocation79_spill] sm:$0xff]  ;;  %v15591_v11 = vld [vmem:[#allocation97_spill] sm:$0xff]  ;;  %vm15593_vm4 = vmmov %vm15258_vm0 }
 0x3ae   : > { %v3932_v53 = vadd.f32 %v3931_v57, %v3930_v56  ;;  %v4034_v1 = vadd.f32 %v4033_v62, %v4032_v26  ;;  %v3773_v2 = vpop.f32.mrf.mxu0  ;;  %v3376_v23 = vadd.f32 %v15587_v18, %v12101_v3  ;;  %v4037_v8 = vsel %vm15588_vm2, %v3997_v16, 0.0  ;;  %v15592_v62 = vld [vmem:[#allocation100_spill] sm:$0xff]  ;;  %vm15595_vm2 = vmmov %vm15258_vm0 }
 0x3af   : > { %v4035_v32 = vsel %vm15258_vm0, %v3996_v60, 0.0  ;;  %v12205_v36 = vadd.f32 %v3773_v2, %v3629_v9  ;;  %v3999_v42 = vmul.f32 %v12193_v48, %v12193_v48  ;;  %v2856_v47 = vadd.f32 %v15590_v12, %v12049_v29  ;;  %v12225_v60 = vpop.f32.mrf.mxu1 }
 0x3b0   : > { %v4036_v38 = vadd.f32 %v4035_v32, %v4034_v1  ;;  %v3934_v30 = vadd.f32 %v3933_v28, %v3932_v53  ;;  %v8913_v14 = vpop.f32.mrf.mxu0  ;;  %v3634_v9 = vadd.f32 %v12002_v19, %v15591_v11  ;;  %v3378_v57 = vadd.f32 %v15592_v62, %v12104_v5 }
 0x3b1   : > { %v3935_v15 = vsel %vm15589_vm1, %v12205_v36, 0.0  ;;  %v3998_v51 = vmul.f32 %v12205_v36, %v12205_v36  ;;  %v12217_v26 = vadd.f32 %v8913_v14, %v3632_v17  ;;  %v3937_v25 = vsel %vm15593_vm4, %v12193_v48, 0.0  ;;  %v12245_v12 = vpop.f32.mrf.mxu1  ;;  %vm15598_vm1 = vmmov %vm15258_vm0 }
 0x3b2   : > { %v3936_v3 = vadd.f32 %v3935_v15, %v3934_v30  ;;  %v4038_v56 = vadd.f32 %v4037_v8, %v4036_v38  ;;  %v3783_v16 = vpop.f32.mrf.mxu0  ;;  %v3633_v19 = vadd.f32 %v12029_v54, %v3376_v23  ;;  %v4041_v28 = vsel %vm15258_vm0, %v3999_v42, 0.0  ;;  %v15597_v15 = vld [vmem:[#allocation99_spill] sm:$0xff]  ;;  %vm15599_vm4 = vmmov %vm15258_vm0 }
 0x3b3   : > { %v4039_v53 = vsel %vm15594_vm14, %v3998_v51, 0.0  ;;  %v12230_v1 = vadd.f32 %v3783_v16, %v3631_v43  ;;  %v4001_v29 = vmul.f32 %v12217_v26, %v12217_v26  ;;  %v15596_v43 = vld [vmem:[#allocation52_spill] sm:$0xff]  ;;  %v3636_v51 = vadd.f32 %v12056_v4, %v15597_v15  ;;  %vm15600_vm14 = vmmov %vm15258_vm0 }
 0x3b4   : > { %v4040_v2 = vadd.f32 %v4039_v53, %v4038_v56  ;;  %v3938_v22 = vadd.f32 %v3937_v25, %v3936_v3  ;;  %v8916_v17 = vpop.f32.mrf.mxu0  ;;  %v3119_v8 = vadd.f32 %v15596_v43, %v2856_v47  ;;  %v3941_v54 = vsel %vm15598_vm1, %v12217_v26, 0.0  ;;  %vm15605_vm1 = vmmov %vm15258_vm0 }
 0x3b5   : > { %v3939_v5 = vsel %vm15595_vm2, %v12230_v1, 0.0  ;;  %v4000_v32 = vmul.f32 %v12230_v1, %v12230_v1  ;;  %v12240_v18 = vadd.f32 %v8916_v17, %v3634_v9  ;;  %v3635_v3 = vadd.f32 %v12081_v49, %v3378_v57  ;;  %v15601_v49 = vld [vmem:[#allocation81_spill] sm:$0xff]  ;;  %v15603_v17 = vld [vmem:[#allocation103_spill] sm:$0xff]  ;;  %vm15604_vm2 = vmmov %vm15258_vm0 }
 0x3b6   : > { %v3940_v38 = vadd.f32 %v3939_v5, %v3938_v22  ;;  %v4042_v30 = vadd.f32 %v4041_v28, %v4040_v2  ;;  %v3793_v14 = vpop.f32.mrf.mxu0  ;;  %v3380_v47 = vadd.f32 %v11948_v39, %v12107_v55  ;;  %v4045_v56 = vsel %vm15600_vm14, %v4001_v29, 0.0  ;;  %v15602_v29 = vld [vmem:[#allocation101_spill] sm:$0xff]  ;;  %v3580_v28 = vpop.f32.mrf.mxu1  ;;  %vm15607_vm14 = vmmov %vm15258_vm0 }
 0x3b7   : > { %v4043_v23 = vsel %vm15599_vm4, %v4000_v32, 0.0  ;;  %v12250_v42 = vadd.f32 %v3793_v14, %v3633_v19  ;;  %v4003_v4 = vmul.f32 %v12240_v18, %v12240_v18  ;;  %v2858_v57 = vadd.f32 %v15601_v49, %v12063_v46  ;;  %vm15606_vm4 = vmmov %vm15258_vm0 }
 0x3b8   : > { %v4044_v16 = vadd.f32 %v4043_v23, %v4042_v30  ;;  %v3942_v11 = vadd.f32 %v3941_v54, %v3940_v38  ;;  %v8919_v9 = vpop.f32.mrf.mxu0  ;;  %v3638_v22 = vadd.f32 %v12109_v21, %v15602_v29  ;;  %v3382_v19 = vadd.f32 %v15603_v17, %v12151_v33  ;;  %v15608_v23 = vld [vmem:[#allocation55_spill] sm:$0xff] }
 0x3b9   : > { %v3943_v62 = vsel %vm15258_vm0, %v12250_v42, 0.0  ;;  %v4002_v25 = vmul.f32 %v12250_v42, %v12250_v42  ;;  %v12262_v53 = vadd.f32 %v8919_v9, %v3636_v51  ;;  %v3945_v5 = vsel %vm15604_vm2, %v12240_v18, 0.0  ;;  %v15609_v9 = vld [vmem:[#allocation102_spill] sm:$0xff]  ;;  %vm15610_vm2 = vmmov %vm15258_vm0 }
 0x3ba   : > { %v3944_v39 = vadd.f32 %v3943_v62, %v3942_v11  ;;  %v4046_v55 = vadd.f32 %v4045_v56, %v4044_v16  ;;  %v3803_v2 = vpop.f32.mrf.mxu0  ;;  %v3637_v15 = vadd.f32 %v12133_v45, %v3380_v47  ;;  %v4049_v21 = vsel %vm15606_vm4, %v4003_v4, 0.0  ;;  %vm15613_vm4 = vmmov %vm15258_vm0 }
 0x3bb   : > { %v4047_v32 = vsel %vm15605_vm1, %v4002_v25, 0.0  ;;  %v12273_v43 = vadd.f32 %v3803_v2, %v3635_v3  ;;  %v4005_v46 = vmul.f32 %v12262_v53, %v12262_v53  ;;  %v3121_v3 = vadd.f32 %v15608_v23, %v2858_v57  ;;  %v8884_v25 = vpop.f32.mrf.mxu1  ;;  %vm15612_vm1 = vmmov %vm15258_vm0 }
 0x3bc   : > { %v4048_v38 = vadd.f32 %v4047_v32, %v4046_v55  ;;  %v3946_v30 = vadd.f32 %v3945_v5, %v3944_v39  ;;  %v8922_v14 = vpop.f32.mrf.mxu0  ;;  %v3640_v62 = vadd.f32 %v12155_v63, %v15609_v9  ;;  %v3949_v45 = vsel %vm15258_vm0, %v12262_v53, 0.0  ;;  %v15611_v39 = vld [vmem:[#allocation105_spill] sm:$0xff] }
 0x3bd   : > { %v3947_v33 = vsel %vm15607_vm14, %v12273_v43, 0.0  ;;  %v4004_v51 = vmul.f32 %v12273_v43, %v12273_v43  ;;  %v12283_v54 = vadd.f32 %v8922_v14, %v3638_v22  ;;  %v3639_v49 = vadd.f32 %v12178_v6, %v3382_v19  ;;  %v15614_v6 = vld [vmem:[#allocation83_spill] sm:$0xff]  ;;  %vm15617_vm14 = vmmov %vm15258_vm0 }
 0x3be   : > { %v3948_v56 = vadd.f32 %v3947_v33, %v3946_v30  ;;  %v4050_v16 = vadd.f32 %v4049_v21, %v4048_v38  ;;  %v3813_v11 = vpop.f32.mrf.mxu0  ;;  %v3384_v55 = vadd.f32 %v15611_v39, %v12196_v58  ;;  %v4053_v57 = vsel %vm15612_vm1, %v4005_v46, 0.0  ;;  %v15615_v30 = vld [vmem:[#allocation104_spill] sm:$0xff]  ;;  %v3590_v33 = vpop.f32.mrf.mxu1  ;;  %vm15619_vm1 = vmmov %vm15258_vm0 }
 0x3bf   : > { %v4051_v47 = vsel %vm15610_vm2, %v4004_v51, 0.0  ;;  %v12291_v4 = vadd.f32 %v3813_v11, %v3637_v15  ;;  %v4007_v63 = vmul.f32 %v12283_v54, %v12283_v54  ;;  %v2860_v19 = vadd.f32 %v15614_v6, %v12066_v7  ;;  %v15616_v15 = vld [vmem:[#allocation107_spill] sm:$0xff]  ;;  %vm15618_vm2 = vmmov %vm15258_vm0 }
 0x3c0   : > { %v4052_v2 = vadd.f32 %v4051_v47, %v4050_v16  ;;  %v3950_v29 = vadd.f32 %v3949_v45, %v3948_v56  ;;  %v8925_v22 = vpop.f32.mrf.mxu0  ;;  %v3642_v14 = vadd.f32 %v12200_v37, %v15615_v30  ;;  %v3386_v21 = vadd.f32 %v15616_v15, %v3119_v8 }
 0x3c1   : > { %v3951_v17 = vsel %vm15613_vm4, %v12291_v4, 0.0  ;;  %v4006_v5 = vmul.f32 %v12291_v4, %v12291_v4  ;;  %v12303_v32 = vadd.f32 %v8925_v22, %v3640_v62  ;;  %v3953_v51 = vsel %vm15617_vm14, %v12283_v54, 0.0  ;;  %v15621_v22 = vld [vmem:[#allocation106_spill] sm:$0xff]  ;;  %vm15622_vm4 = vmmov %vm15258_vm0 }
 0x3c2   : > { %v3952_v58 = vadd.f32 %v3951_v17, %v3950_v29  ;;  %v4054_v38 = vadd.f32 %v4053_v57, %v4052_v2  ;;  %v3823_v46 = vpop.f32.mrf.mxu0  ;;  %v3641_v62 = vadd.f32 %v12225_v60, %v3384_v55  ;;  %v4057_v37 = vsel %vm15618_vm2, %v4007_v63, 0.0  ;;  %vm15623_vm14 = vmmov %vm15258_vm0 }
 0x3c3   : > { %v4055_v23 = vsel %vm15258_vm0, %v4006_v5, 0.0  ;;  %v12313_v56 = vadd.f32 %v3823_v46, %v3639_v49  ;;  %v4009_v7 = vmul.f32 %v12303_v32, %v12303_v32  ;;  %v15620_v49 = vld [vmem:[#allocation59_spill] sm:$0xff]  ;;  %v3644_v17 = vadd.f32 %v12245_v12, %v15621_v22  ;;  %v8887_v5 = vpop.f32.mrf.mxu1  ;;  %vm15624_vm2 = vmmov %vm15258_vm0  ;;  %v15630_v22 = vld [vmem:[#allocation62_spill] sm:$0xff] }
 0x3c4   : > { %v4056_v16 = vadd.f32 %v4055_v23, %v4054_v38  ;;  %v3954_v11 = vadd.f32 %v3953_v51, %v3952_v58  ;;  %v8928_v9 = vpop.f32.mrf.mxu0  ;;  %v3123_v39 = vadd.f32 %v15620_v49, %v2860_v19  ;;  %v3957_v60 = vsel %vm15622_vm4, %v12303_v32, 0.0  ;;  %vm15628_vm4 = vmmov %vm15258_vm0 }
 0x3c5   : > { %v3955_v8 = vsel %vm15619_vm1, %v12313_v56, 0.0  ;;  %v4008_v45 = vmul.f32 %v12313_v56, %v12313_v56  ;;  %v12323_v47 = vadd.f32 %v8928_v9, %v3642_v14  ;;  %v3643_v6 = vadd.f32 %v3580_v28, %v3386_v21  ;;  %v15625_v28 = vld [vmem:[#allocation85_spill] sm:$0xff]  ;;  %vm15627_vm1 = vmmov %vm15258_vm0 }
 0x3c6   : > { %v3956_v57 = vadd.f32 %v3955_v8, %v3954_v11  ;;  %v4058_v2 = vadd.f32 %v4057_v37, %v4056_v16  ;;  %v3833_v29 = vpop.f32.mrf.mxu0  ;;  %v3388_v58 = vadd.f32 %v11996_v59, %v3121_v3  ;;  %v4061_v38 = vsel %vm15258_vm0, %v4009_v7, 0.0  ;;  %v15626_v16 = vld [vmem:[#allocation108_spill] sm:$0xff]  ;;  %v3600_v11 = vpop.f32.mrf.mxu1 }
 0x3c7   : > { %v4059_v55 = vsel %vm15623_vm14, %v4008_v45, 0.0  ;;  %v12331_v63 = vadd.f32 %v3833_v29, %v3641_v62  ;;  %v4011_v14 = vmul.f32 %v12323_v47, %v12323_v47  ;;  %v2862_v21 = vadd.f32 %v15625_v28, %v12078_v31  ;;  %vm15629_vm14 = vmmov %vm15258_vm0 }
 0x3c8   : > { %v4060_v19 = vadd.f32 %v4059_v55, %v4058_v2  ;;  %v3958_v46 = vadd.f32 %v3957_v60, %v3956_v57  ;;  %v8931_v30 = vpop.f32.mrf.mxu0  ;;  %v3646_v7 = vadd.f32 %v8884_v25, %v15626_v16  ;;  %v3390_v9 = vadd.f32 %v12021_v24, %v3123_v39 }
 0x3c9   : > { %v3959_v12 = vsel %vm15624_vm2, %v12331_v63, 0.0  ;;  %v4010_v15 = vmul.f32 %v12331_v63, %v12331_v63  ;;  %v12341_v51 = vadd.f32 %v8931_v30, %v3644_v17  ;;  %v3961_v62 = vsel %vm15627_vm1, %v12323_v47, 0.0  ;;  %vm15631_vm2 = vmmov %vm15258_vm0 }
 0x3ca   : > { %v3960_v59 = vadd.f32 %v3959_v12, %v3958_v46  ;;  %v4062_v3 = vadd.f32 %v4061_v38, %v4060_v19  ;;  %v3843_v23 = vpop.f32.mrf.mxu0  ;;  %v3645_v2 = vadd.f32 %v3590_v33, %v3388_v58  ;;  %v4065_v29 = vsel %vm15629_vm14, %v4011_v14, 0.0  ;;  %v8890_v19 = vpop.f32.mrf.mxu1  ;;  %vm15632_vm1 = vmmov %vm15258_vm0 }
 0x3cb   : > { %v4063_v37 = vsel %vm15628_vm4, %v4010_v15, 0.0  ;;  %v12350_v8 = vadd.f32 %v3843_v23, %v3643_v6  ;;  %v4013_v49 = vmul.f32 %v12341_v51, %v12341_v51  ;;  %v3125_v17 = vadd.f32 %v15630_v22, %v2862_v21  ;;  %vm15633_vm4 = vmmov %vm15258_vm0 }
 0x3cc   : > { %v4064_v45 = vadd.f32 %v4063_v37, %v4062_v3  ;;  %v3962_v31 = vadd.f32 %v3961_v62, %v3960_v59  ;;  %v8934_v57 = vpop.f32.mrf.mxu0  ;;  %v3648_v38 = vadd.f32 %v8887_v5, %v12015_v20  ;;  %v3965_v33 = vsel %vm15631_vm2, %v12341_v51, 0.0  ;;  %vm15634_vm14 = vmmov %vm15258_vm0 }
 0x3cd   : > { %v3963_v25 = vsel %vm15258_vm0, %v12350_v8, 0.0  ;;  %v4012_v24 = vmul.f32 %v12350_v8, %v12350_v8  ;;  %v12359_v39 = vadd.f32 %v8934_v57, %v3646_v7  ;;  %v3647_v30 = vadd.f32 %v3600_v11, %v3390_v9  ;;  %vm15635_vm2 = vmmov %vm15258_vm0 }
 0x3ce   : > { %v3964_v60 = vadd.f32 %v3963_v25, %v3962_v31  ;;  %v4066_v55 = vadd.f32 %v4065_v29, %v4064_v45  ;;  %v3853_v6 = vpop.f32.mrf.mxu0  ;;  %v3392_v14 = vadd.f32 %v12051_v13, %v3125_v17  ;;  %v4069_v12 = vsel %vm15633_vm4, %v4013_v49, 0.0  ;;  %v3610_v13 = vpop.f32.mrf.mxu1  ;;  %vm15637_vm4 = vmmov %vm15258_vm0 }
 0x3cf   : > { %v4067_v58 = vsel %vm15632_vm1, %v4012_v24, 0.0  ;;  %v12366_v46 = vadd.f32 %v3853_v6, %v3645_v2  ;;  %v4015_v59 = vmul.f32 %v12359_v39, %v12359_v39  ;;  %v3969_v11 = vsel %vm15258_vm0, %v12359_v39, 0.0  ;;  %vm15636_vm1 = vmmov %vm15258_vm0 }
 0x3d0   : > { %v4068_v15 = vadd.f32 %v4067_v58, %v4066_v55  ;;  %v3966_v28 = vadd.f32 %v3965_v33, %v3964_v60  ;;  %v8937_v21 = vpop.f32.mrf.mxu0  ;;  %v3650_v45 = vadd.f32 %v8890_v19, %v12041_v40  ;;  %v3649_v31 = vadd.f32 %v3610_v13, %v3392_v14 }
 0x3d1   : > { %v3967_v20 = vsel %vm15634_vm14, %v12366_v46, 0.0  ;;  %v4014_v5 = vmul.f32 %v12366_v46, %v12366_v46  ;;  %v12376_v3 = vadd.f32 %v8937_v21, %v3648_v38  ;;  %v4073_v2 = vsel %vm15636_vm1, %v4015_v59, 0.0  ;;  %vm15638_vm14 = vmmov %vm15258_vm0 }
 0x3d2   : > { %v3968_v23 = vadd.f32 %v3967_v20, %v3966_v28  ;;  %v4070_v16 = vadd.f32 %v4069_v12, %v4068_v15  ;;  %v3863_v7 = vpop.f32.mrf.mxu0  ;;  %vm15640_vm1 = vmmov %vm15258_vm0 }
 0x3d3   : > { %v4071_v9 = vsel %vm15635_vm2, %v4014_v5, 0.0  ;;  %v12381_v62 = vadd.f32 %v3863_v7, %v3647_v30  ;;  %v4017_v29 = vmul.f32 %v12376_v3, %v12376_v3  ;;  %v3973_v38 = vsel %vm15258_vm0, %v12376_v3, 0.0  ;;  %vm15639_vm2 = vmmov %vm15258_vm0 }
 0x3d4   : > { %v4072_v37 = vadd.f32 %v4071_v9, %v4070_v16  ;;  %v8940_v49 = vpop.f32.mrf.mxu0  ;;  %v3970_v57 = vadd.f32 %v3969_v11, %v3968_v23 }
 0x3d5   : > { %v3971_v25 = vsel %vm15637_vm4, %v12381_v62, 0.0  ;;  %v4016_v24 = vmul.f32 %v12381_v62, %v12381_v62  ;;  %v12392_v40 = vadd.f32 %v8940_v49, %v3650_v45  ;;  %v4077_v14 = vsel %vm15640_vm1, %v4017_v29, 0.0  ;;  %vm15641_vm4 = vmmov %vm15258_vm0 }
 0x3d6   : > { %v3873_v22 = vpop.f32.mrf.mxu0  ;;  %v3972_v17 = vadd.f32 %v3971_v25, %v3970_v57  ;;  %v4074_v60 = vadd.f32 %v4073_v2, %v4072_v37 }
 0x3d7   : > { %v4075_v55 = vsel %vm15638_vm14, %v4016_v24, 0.0  ;;  %v12394_v6 = vadd.f32 %v3873_v22, %v3649_v31  ;;  %v3977_v28 = vsel %vm15641_vm4, %v12392_v40, 0.0  ;;  %v4019_v21 = vmul.f32 %v12392_v40, %v12392_v40  ;;  %vm15642_vm14 = vmmov %vm15258_vm0 }
 0x3d8   : > { %v3974_v19 = vadd.f32 %v3973_v38, %v3972_v17  ;;  %v4076_v33 = vadd.f32 %v4075_v55, %v4074_v60  ;;  %v4592_v17 = vld [vmem:[%s14564_s7] sm:$0xff]  ;;  %vm15646_vm4 = vmmov %vm15258_vm0 }
 0x3d9   : > { %v4018_v58 = vmul.f32 %v12394_v6, %v12394_v6  ;;  %v3975_v30 = vsel %vm15639_vm2, %v12394_v6, 0.0  ;;  %v4081_v23 = vsel %vm15258_vm0, %v4019_v21, 0.0  ;;  %8941 = vmatprep.subr.mxu1 %v4592_v17 }
 0x3da   : > { %v3976_v12 = vadd.f32 %v3975_v30, %v3974_v19  ;;  %v4078_v15 = vadd.f32 %v4077_v14, %v4076_v33  ;;  %8942 = vmatpush3.msra.mxu1 %v4592_v17  ;;  %v4593_v33 = vld [vmem:[%s14564_s7 + $0x8] sm:$0xff]  ;;  %v12423_v14 = vld [vmem:[%s14564_s7 + $0x10] sm:$0xff] }
 0x3db   : > { %v4079_v59 = vsel %vm15642_vm14, %v4018_v58, 0.0  ;;  %8991 = vmatprep.subr.mxu0 %v4593_v33  ;;  %9041 = vmatprep.subr.mxu1 %v12423_v14  ;;  %vm15647_vm14 = vmmov %vm15258_vm0  ;;  %vm15649_vm0 = vcmask 1046528  }
 0x3dc   : > { %v3978_v20 = vadd.f32 %v3977_v28, %v3976_v12  ;;  %v4080_v5 = vadd.f32 %v4079_v59, %v4078_v15  ;;  %8992 = vmatpush3.msra.mxu0 %v4593_v33  ;;  %v12429_v28 = vld [vmem:[%s14564_s7 + $0x18] sm:$0xff] }
 0x3dd   : > { %9091 = vmatprep.subr.mxu0 %v12429_v28 }
 0x3de   : > { %3979 = vadd.xlane.f32.xlu1 %v3978_v20  ;;  %v4082_v16 = vadd.f32 %v4081_v23, %v4080_v5 }
 0x3e2   : > { %4083 = vadd.xlane.f32.xlu1 %v4082_v16 }
 0x467   : > { %v3980_v7 = vpop.xlane.xlu1 %3979 }
 0x468   : > { %v3981_v13 = vrot.slane %v3980_v7, 4 }
 0x46a   : > { %v3982_v11 = vadd.f32 %v3981_v13, %v3980_v7 }
 0x46b   : > { %v4084_v9 = vpop.xlane.xlu1 %4083 }
 0x46c   : > { %v3983_v37 = vrot.slane %v3982_v11, 2  ;;  %v4085_v45 = vrot.slane %v4084_v9, 4 }
 0x46e   : > { %v4086_v49 = vadd.f32 %v4085_v45, %v4084_v9  ;;  %v3984_v31 = vadd.f32 %v3983_v37, %v3982_v11 }
 0x470   : > { %v4087_v57 = vrot.slane %v4086_v49, 2  ;;  %v3985_v2 = vrot.slane %v3984_v31, 1 }
 0x472   : > { %v4088_v29 = vadd.f32 %v4087_v57, %v4086_v49  ;;  %v3986_v25 = vadd.f32 %v3985_v2, %v3984_v31 }
 0x474   : > { %9399 = vpush %v3986_v25  ;;  %v4089_v24 = vrot.slane %v4088_v29, 1 }
 0x476   : > { %v4090_v22 = vadd.f32 %v4089_v24, %v4088_v29 }
 0x478   : > { %9401 = vpush %v4090_v22 }
 0x4a5   : > { %s12412_s19 = spop %9399 }
 0x4a6   : > { %s4094_s20 = smul.f32 0.00048828125, %s12412_s19 }
 0x4a8   : > { %s4095_s22 = smul.f32 %s12412_s19, %s4094_s20  ;;  %v12432_v21 = vstv %s4094_s20  ;;  %s14338_s19 = scalar_lea.vmem %s14566_s9, %s7895_s11 }
 0x4a9   : > { %s9402_s23 = spop %9401  ;;  %v4102_v59 = vsub.f32 %v12083_v52, %v12432_v21  ;;  %v4103_v20 = vsub.f32 %v12070_v44, %v12432_v21  ;;  %v4104_v5 = vsub.f32 %v12114_v34, %v12432_v21  ;;  %v4105_v23 = vsub.f32 %v12096_v35, %v12432_v21 }
 0x4aa   : > { %s4096_s24 = ssub.f32 %s9402_s23, %s4095_s22  ;;  %v4106_v16 = vsub.f32 %v12138_v61, %v12432_v21  ;;  %v4107_v7 = vsub.f32 %v12127_v27, %v12432_v21  ;;  %v4108_v52 = vsub.f32 %v12160_v41, %v12432_v21  ;;  %v4109_v44 = vsub.f32 %v12148_v50, %v12432_v21 }
 0x4ab   : > { %v4132_v34 = vsub.f32 %v12394_v6, %v12432_v21  ;;  %v4133_v35 = vsub.f32 %v12392_v40, %v12432_v21  ;;  %v4110_v61 = vsub.f32 %v12183_v0, %v12432_v21  ;;  %v4111_v27 = vsub.f32 %v12171_v10, %v12432_v21 }
 0x4ac   : > { %s4099_s25 = smul.f32 0.0004885198, %s4096_s24  ;;  %v4112_v11 = vsub.f32 %v12205_v36, %v12432_v21  ;;  %v4113_v41 = vsub.f32 %v12193_v48, %v12432_v21  ;;  %v4114_v50 = vsub.f32 %v12230_v1, %v12432_v21  ;;  %v4115_v6 = vsub.f32 %v12217_v26, %v12432_v21 }
 0x4ad   : > { %v4116_v0 = vsub.f32 %v12250_v42, %v12432_v21  ;;  %v4117_v10 = vsub.f32 %v12240_v18, %v12432_v21  ;;  %v4118_v36 = vsub.f32 %v12273_v43, %v12432_v21  ;;  %v4119_v48 = vsub.f32 %v12262_v53, %v12432_v21 }
 0x4ae   : > { %s4100_s26 = smax.f32 %s9464_s21, %s4099_s25  ;;  %v4120_v1 = vsub.f32 %v12291_v4, %v12432_v21  ;;  %v4121_v26 = vsub.f32 %v12283_v54, %v12432_v21  ;;  %v4122_v37 = vsub.f32 %v12313_v56, %v12432_v21  ;;  %v4123_v42 = vsub.f32 %v12303_v32, %v12432_v21 }
 0x4af   : > { %v4134_v60 = vstv %s4100_s26  ;;  %v4124_v18 = vsub.f32 %v12331_v63, %v12432_v21  ;;  %v4125_v43 = vsub.f32 %v12323_v47, %v12432_v21  ;;  %v4126_v53 = vsub.f32 %v12350_v8, %v12432_v21  ;;  %v12504_v47 = vld [vmem:[%s14562_s5] ss:$0 sm:$0xff] }
 0x4b0   : > { %9420 = vrsqrt.f32 %v4134_v60  ;;  %vm4137_vm2 = vcmp.eq.f32.partialorder %v4134_v60, inf  ;;  %v4140_v19 = vand.u32 2147483648, %v4134_v60  ;;  %vm4139_vm1 = vcmp.eq.f32.partialorder %v4134_v60, 0.0 }
 0x4b1   : > { %v4127_v4 = vsub.f32 %v12341_v51, %v12432_v21  ;;  %v4128_v54 = vsub.f32 %v12366_v46, %v12432_v21  ;;  %v4129_v56 = vsub.f32 %v12359_v39, %v12432_v21  ;;  %v4130_v32 = vsub.f32 %v12381_v62, %v12432_v21 }
 0x4b2   : > { %v4131_v8 = vsub.f32 %v12376_v3, %v12432_v21 }
 0x4bd   : > { %v9421_v55 = vpop.eup %9420 }
 0x4be   : > { %v4136_v38 = vmul.f32 %v9421_v55, %v4134_v60 }
 0x4c0   : > { %v4138_v58 = vsel %vm4137_vm2, %v4134_v60, %v4136_v38  ;;  %v12528_v60 = vld [vmem:[%s14563_s6] ss:$0 sm:$0xff]  ;;  %vm15651_vm2 = vcmask 1040384  }
 0x4c1   : > { %v4141_v30 = vsel %vm4139_vm1, %v4140_v19, %v4138_v58  ;;  %vm15654_vm1 = vmmov %vm15646_vm4 }
 0x4c2   : > { %9403 = vpush %v4141_v30 }
 0x4f3   : > { %s9404_s21 = spop %9403 }
 0x4f4   : > { %s4143_s13 = sadd.f32 1e-05, %s9404_s21 }
 0x4f6   : > { %v4144_v12 = vstv %s4143_s13 }
 0x4f7   : > { %9422 = vrcp.f32 %v4144_v12 }
 0x504   : > { %v9423_v15 = vpop.eup %9422 }
 0x505   : > { %9405 = vpush %v9423_v15 }
 0x536   : > { %s9406_s16 = spop %9405 }
 0x537   : > { %v12446_v13 = vstv %s9406_s16 }
 0x538   : > { %v4178_v40 = vmul.f32 %v12446_v13, %v4132_v34  ;;  %v4179_v9 = vmul.f32 %v12446_v13, %v4133_v35  ;;  %v4150_v63 = vmul.f32 %v12446_v13, %v4104_v5  ;;  %v12509_v51 = vmul.f32 %v12446_v13, %v4102_v59 }
 0x539   : > { %v4149_v46 = vmul.f32 %v12446_v13, %v4103_v20  ;;  %v4151_v39 = vmul.f32 %v12446_v13, %v4105_v23  ;;  %v4152_v45 = vmul.f32 %v12446_v13, %v4106_v16  ;;  %v4153_v62 = vmul.f32 %v12446_v13, %v4107_v7 }
 0x53a   : > { %v4154_v49 = vmul.f32 %v12446_v13, %v4108_v52  ;;  %v4155_v31 = vmul.f32 %v12446_v13, %v4109_v44  ;;  %v4156_v57 = vmul.f32 %v12446_v13, %v4110_v61  ;;  %v4157_v2 = vmul.f32 %v12446_v13, %v4111_v27 }
 0x53b   : > { %v4158_v3 = vmul.f32 %v12446_v13, %v4112_v11  ;;  %v4159_v29 = vmul.f32 %v12446_v13, %v4113_v41  ;;  %v4160_v25 = vmul.f32 %v12446_v13, %v4114_v50  ;;  %v4188_v24 = vmul.f32 %v12504_v47, %v4150_v63 }
 0x53c   : > { %v4216_v22 = vmul.f32 %v12504_v47, %v4178_v40  ;;  %v4217_v17 = vmul.f32 %v12504_v47, %v4179_v9  ;;  %v4161_v55 = vmul.f32 %v12446_v13, %v4115_v6  ;;  %v4162_v38 = vmul.f32 %v12446_v13, %v4116_v0 }
 0x53d   : > { %v4163_v19 = vmul.f32 %v12446_v13, %v4117_v10  ;;  %v4189_v33 = vmul.f32 %v12504_v47, %v4151_v39  ;;  %v4164_v58 = vmul.f32 %v12446_v13, %v4118_v36  ;;  %v4165_v30 = vmul.f32 %v12446_v13, %v4119_v48 }
 0x53e   : > { %v4166_v12 = vmul.f32 %v12446_v13, %v4120_v1  ;;  %v4167_v15 = vmul.f32 %v12446_v13, %v4121_v26  ;;  %v4168_v21 = vmul.f32 %v12446_v13, %v4122_v37  ;;  %v4169_v59 = vmul.f32 %v12446_v13, %v4123_v42 }
 0x53f   : > { %v4170_v20 = vmul.f32 %v12446_v13, %v4124_v18  ;;  %v4171_v5 = vmul.f32 %v12446_v13, %v4125_v43  ;;  %v4172_v23 = vmul.f32 %v12446_v13, %v4126_v53  ;;  %v4173_v16 = vmul.f32 %v12446_v13, %v4127_v4 }
 0x540   : > { %v4187_v7 = vmul.f32 %v12504_v47, %v4149_v46  ;;  %v4226_v52 = vadd.f32 %v12528_v60, %v4188_v24  ;;  %v4174_v44 = vmul.f32 %v12446_v13, %v4128_v54  ;;  %v4175_v34 = vmul.f32 %v12446_v13, %v4129_v56 }
 0x541   : > { %v4176_v35 = vmul.f32 %v12446_v13, %v4130_v32  ;;  %v4227_v61 = vadd.f32 %v12528_v60, %v4189_v33  ;;  %v4177_v27 = vmul.f32 %v12446_v13, %v4131_v8  ;;  %v4190_v11 = vmul.f32 %v12504_v47, %v4152_v45 }
 0x542   : > { %v4191_v41 = vmul.f32 %v12504_v47, %v4153_v62  ;;  %v4192_v50 = vmul.f32 %v12504_v47, %v4154_v49  ;;  %v4193_v6 = vmul.f32 %v12504_v47, %v4155_v31  ;;  %v4194_v40 = vmul.f32 %v12504_v47, %v4156_v57 }
 0x543   : > { %v4195_v9 = vmul.f32 %v12504_v47, %v4157_v2  ;;  %v12558_v0 = vmul.f32 %v12504_v47, %v4158_v3  ;;  %v4225_v10 = vadd.f32 %v12528_v60, %v4187_v7  ;;  %v12562_v36 = vadd.f32 %v12528_v60, %v4216_v22  ;;  %v12628_v2 = vld [vmem:[%s14564_s7 + $0x28] sm:$0xff] }
 0x544   : > { %v12565_v13 = vadd.f32 %v12528_v60, %v4217_v17  ;;  %v12567_v48 = vmax.f32 %v4226_v52, 0.0  ;;  %v12570_v1 = vmul.f32 %v12504_v47, %v4159_v29  ;;  %v12573_v26 = vmul.f32 %v12504_v47, %v4160_v25 }
 0x545   : > { %15643 = vst [vmem:[#allocation8_spill] sm:$0xff] %v12562_v36  ;;  %v12576_v37 = vmul.f32 %v12504_v47, %v4161_v55  ;;  %v12578_v42 = vmax.f32 %v4227_v61, 0.0  ;;  %v12581_v18 = vmul.f32 %v12504_v47, %v4162_v38  ;;  %v12584_v43 = vmul.f32 %v12504_v47, %v4163_v19 }
 0x546   : > { %15644 = vst [vmem:[#allocation21_spill] sm:$0xff] %v12567_v48  ;;  %v12587_v53 = vmul.f32 %v12504_v47, %v4164_v58  ;;  %v12590_v4 = vmul.f32 %v12504_v47, %v4165_v30  ;;  %8993 = vmatprep.mubr.msk.f32.mxu0 %vm15646_vm4, %v12567_v48  ;;  %v12595_v54 = vmul.f32 %v12504_v47, %v4166_v12  ;;  %v12615_v45 = vmax.f32 %v4225_v10, 0.0  ;;  %vm15655_vm4 = vmmov %vm15651_vm2 }
 0x547   : > { %15645 = vst [vmem:[#allocation22_spill] sm:$0xff] %v12578_v42  ;;  %v12598_v56 = vmul.f32 %v12504_v47, %v4167_v15  ;;  %v12601_v32 = vmul.f32 %v12504_v47, %v4168_v21  ;;  %v12604_v63 = vmul.f32 %v12504_v47, %v4169_v59  ;;  %8994 = vmatmul.mubr.msk.f32.vlgmr.msra.gmra.mxu0 %vm15647_vm14, %v12578_v42  ;;  %v14771_v31 = vrot.slane %v12567_v48, 1  ;;  %vm15657_vm14 = vmmov %vm15654_vm1 }
 0x548   : > { %v12609_v8 = vmul.f32 %v12504_v47, %v4170_v20  ;;  %v12612_v46 = vmul.f32 %v12504_v47, %v4171_v5  ;;  %v4229_v39 = vadd.f32 %v12528_v60, %v4191_v41  ;;  %15648 = vst [vmem:[#allocation31_spill] sm:$0xff] %v12615_v45  ;;  %9092 = vmatpush3.msra.mxu0 %v12429_v28  ;;  %v12623_v57 = vrot.slane %v12578_v42, 1 }
 0x549   : > { %v4228_v62 = vadd.f32 %v12528_v60, %v4190_v11  ;;  %v4186_v49 = vmul.f32 %v12504_v47, %v12509_v51  ;;  %v12631_v3 = vmul.f32 %v12504_v47, %v4172_v23  ;;  %v12634_v28 = vmul.f32 %v12504_v47, %v4173_v16  ;;  %9191 = vmatprep.subr.mxu0 %v12628_v2 }
 0x54a   : > { %v4420_v29 = vrot.slane %v12578_v42, 7  ;;  %v4421_v51 = vrot.slane %v12567_v48, 7  ;;  %v12640_v25 = vmul.f32 %v12504_v47, %v4174_v44  ;;  %v4230_v24 = vadd.f32 %v12528_v60, %v4192_v50  ;;  %v12687_v44 = vld [vmem:[%s14564_s7 + $0x20] sm:$0xff] }
 0x54b   : > { %v4224_v22 = vadd.f32 %v12528_v60, %v4186_v49  ;;  %v12648_v17 = vsel %vm15649_vm0, %v14771_v31, %v12623_v57  ;;  %v4231_v55 = vadd.f32 %v12528_v60, %v4193_v6  ;;  %v12651_v38 = vmax.f32 %v4229_v39, 0.0  ;;  %vm15659_vm0 = vmmov %vm15654_vm1 }
 0x54c   : > { %v4422_v19 = vsel %vm15651_vm2, %v4420_v29, %v4421_v51  ;;  %v4426_v33 = vrot.slane %v12615_v45, 7  ;;  %v14770_v15 = vrot.slane %v12615_v45, 1  ;;  %v12661_v21 = vmax.f32 %v4228_v62, 0.0 }
 0x54d   : > { %15650 = vst [vmem:[#allocation74_spill] sm:$0xff] %v12651_v38  ;;  %v12655_v58 = vmax.f32 %v4224_v22, 0.0  ;;  %v4520_v12 = vsel %vm9938_vm5, %v12648_v17, %v4422_v19  ;;  %v12664_v59 = vmul.f32 %v12504_v47, %v4175_v34  ;;  %v12667_v20 = vmul.f32 %v12504_v47, %v4176_v35  ;;  %vm15656_vm5 = vmmov %vm15654_vm1 }
 0x54e   : > { %15653 = vst [vmem:[#allocation15_spill] sm:$0xff] %v12661_v21  ;;  %v12670_v5 = vmul.f32 %v12504_v47, %v4177_v27  ;;  %8943 = vmatprep.mubr.msk.f32.mxu1 %vm15654_vm1, %v4520_v12  ;;  %v12674_v23 = vsel %vm15655_vm4, %v4421_v51, %v4420_v29  ;;  %v4232_v16 = vadd.f32 %v12528_v60, %v4194_v40  ;;  %v12689_v34 = vmax.f32 %v4231_v55, 0.0  ;;  %vm15662_vm4 = vmmov %vm15651_vm2 }
 0x54f   : > { %v4233_v7 = vadd.f32 %v12528_v60, %v4195_v9  ;;  %8996 = vmatprep.mubr.msk.f32.mxu0 %vm15656_vm5, %v12655_v58  ;;  %8944 = vmatmul.mubr.msk.f32.vlgmr.msra.gmra.mxu1 %vm15657_vm14, %v12674_v23  ;;  %v14765_v52 = vrot.slane %v12655_v58, 1  ;;  %v4424_v47 = vrot.slane %v12655_v58, 7  ;;  %v4428_v35 = vsel %vm15651_vm2, %v4426_v33, %v4421_v51  ;;  %vm15663_vm5 = vmmov %vm15659_vm0 }
 0x550   : > { %15658 = vst [vmem:[#allocation29_spill] sm:$0xff] %v12689_v34  ;;  %8997 = vmatmul.mubr.msk.f32.gmra.mxu0 %vm15659_vm0, %v12615_v45  ;;  %9042 = vmatpush3.msra.mxu1 %v12423_v14  ;;  %v14767_v61 = vrot.slane %v12651_v38, 1  ;;  %v12696_v27 = vmax.f32 %v4230_v24, 0.0  ;;  %vm15661_vm1 = vcmask 1046528   ;;  %v14769_v14 = vrot.slane %v12661_v21, 1  ;;  %vm15665_vm14 = vmmov %vm15659_vm0 }
 0x551   : > { %v12703_v11 = vsel %vm15661_vm1, %v14765_v52, %v14770_v15  ;;  %v4425_v41 = vsel %vm15662_vm4, %v4420_v29, %v4424_v47  ;;  %8999 = vmatprep.mubr.msk.f32.mxu0 %vm15663_vm5, %v12567_v48  ;;  %v4429_v50 = vrot.slane %v12661_v21, 7  ;;  %v4234_v6 = vadd.f32 %v12528_v60, %v12558_v0  ;;  %9141 = vmatprep.subr.mxu1 %v12687_v44  ;;  %vm15666_vm0 = vmmov %vm15651_vm2 }
 0x552   : > { %15660 = vst [vmem:[#allocation24_spill] sm:$0xff] %v12696_v27  ;;  %v4235_v40 = vadd.f32 %v12528_v60, %v12570_v1  ;;  %v4236_v9 = vadd.f32 %v12528_v60, %v12573_v26  ;;  %v12719_v39 = vsel %vm9945_vm6, %v12703_v11, %v4425_v41  ;;  %v4237_v62 = vadd.f32 %v12528_v60, %v12576_v37  ;;  %vm15668_vm6 = vmmov %vm15663_vm5 }
 0x553   : > { %v4238_v49 = vadd.f32 %v12528_v60, %v12581_v18  ;;  %8946 = vmatprep.mubr.msk.f32.mxu1 %vm15665_vm14, %v12719_v39  ;;  %v12729_v0 = vsel %vm15666_vm0, %v4424_v47, %v4426_v33  ;;  %v12734_v26 = vsel %vm9973_vm7, %v12648_v17, %v4428_v35  ;;  %vm15669_vm2 = vmmov %vm15663_vm5  ;;  %v4431_v37 = vrot.slane %v12651_v38, 7 }
 0x554   : > { %8947 = vmatmul.mubr.msk.f32.gmra.mxu1 %vm15668_vm6, %v12729_v0  ;;  %9000 = vmatmul.mubr.msk.f32.gmra.mxu0 %vm15669_vm2, %v12578_v42  ;;  %v14768_v18 = vrot.slane %v12696_v27, 1  ;;  %v14766_v51 = vrot.slane %v12689_v34, 1  ;;  %v4433_v24 = vrot.slane %v12696_v27, 7  ;;  %v12744_v22 = vmax.f32 %v4233_v7, 0.0  ;;  %vm15671_vm1 = vmmov %vm15669_vm2 }
 0x555   : > { %8949 = vmatprep.mubr.msk.f32.mxu1 %vm15671_vm1, %v12734_v26  ;;  %vm15672_vm7 = vmmov %vm15671_vm1  ;;  %vm15673_vm4 = vcmask 1046528   ;;  %v12758_v33 = vmax.f32 %v4232_v16, 0.0  ;;  %v4239_v30 = vadd.f32 %v12528_v60, %v12584_v43  ;;  %v4240_v12 = vadd.f32 %v12528_v60, %v12587_v53 }
 0x556   : > { %15670 = vst [vmem:[#allocation40_spill] sm:$0xff] %v12744_v22  ;;  %9002 = vmatprep.mubr.msk.f32.mxu0 %vm15672_vm7, %v12661_v21  ;;  %v12755_v55 = vsel %vm15673_vm4, %v14769_v14, %v14767_v61  ;;  %vm15675_vm5 = vmmov %vm15666_vm0  ;;  %v4241_v7 = vadd.f32 %v12528_v60, %v12590_v4  ;;  %v12768_v47 = vadd.f32 %v12528_v60, %v12595_v54  ;;  %v12780_v16 = vmax.f32 %v4235_v40, 0.0 }
 0x557   : > { %15674 = vst [vmem:[#allocation25_spill] sm:$0xff] %v12755_v55  ;;  %v4430_v19 = vsel %vm15675_vm5, %v4420_v29, %v4429_v50  ;;  %15676 = vst [vmem:[#allocation36_spill] sm:$0xff] %v12758_v33  ;;  %v4243_v35 = vadd.f32 %v12528_v60, %v12598_v56  ;;  %v12774_v29 = vadd.f32 %v12528_v60, %v12601_v32  ;;  %v12799_v32 = vmax.f32 %v4234_v6, 0.0 }
 0x558   : > { %v12778_v43 = vadd.f32 %v12528_v60, %v12604_v63  ;;  %15677 = vst [vmem:[#allocation39_spill] sm:$0xff] %v12780_v16  ;;  %vm15678_vm14 = vmmov %vm15671_vm1  ;;  %v12789_v4 = vsel %vm10041_vm8, %v12755_v55, %v4430_v19  ;;  %v4435_v63 = vrot.slane %v12689_v34, 7  ;;  %v14773_v41 = vrot.slane %v12758_v33, 1 }
 0x559   : > { %8950 = vmatmul.mubr.msk.f32.gmra.mxu1 %vm15678_vm14, %v12674_v23  ;;  %vm15679_vm0 = vmmov %vm15671_vm1  ;;  %15681 = vst [vmem:[#allocation44_spill] sm:$0xff] %v12789_v4  ;;  %v14772_v40 = vrot.slane %v12744_v22, 1  ;;  %v4437_v10 = vrot.slane %v12758_v33, 7  ;;  %v12811_v1 = vadd.f32 %v12528_v60, %v12609_v8  ;;  %v4247_v6 = vadd.f32 %v12528_v60, %v12612_v46 }
 0x55a   : > { %9003 = vmatmul.mubr.msk.f32.gmra.mxu0 %vm15679_vm0, %v12651_v38  ;;  %vm15682_vm6 = vmmov %vm15673_vm4  ;;  %15685 = vst [vmem:[#allocation12_spill] sm:$0xff] %v12799_v32  ;;  %v12817_v19 = vadd.f32 %v12528_v60, %v12631_v3  ;;  %v4249_v53 = vadd.f32 %v12528_v60, %v12634_v28  ;;  %v12821_v52 = vmax.f32 %v4237_v62, 0.0  ;;  %v4439_v46 = vrot.slane %v12744_v22, 7 }
 0x55b   : > { %v12796_v54 = vsel %vm15682_vm6, %v14768_v18, %v14766_v51  ;;  %vm15684_vm2 = vmmov %vm15675_vm5  ;;  %v12831_v18 = vmax.f32 %v4236_v9, 0.0  ;;  %v14774_v28 = vrot.slane %v12780_v16, 1  ;;  %v12843_v61 = vadd.f32 %v12528_v60, %v12640_v25 }
 0x55c   : > { %15683 = vst [vmem:[#allocation63_spill] sm:$0xff] %v12796_v54  ;;  %v4434_v56 = vsel %vm15684_vm2, %v4431_v37, %v4433_v24  ;;  %vm15686_vm1 = vmmov %vm15679_vm0  ;;  %v12862_v25 = vsel %vm15684_vm2, %v4433_v24, %v4435_v63  ;;  %v12864_v14 = vmax.f32 %v4238_v49, 0.0  ;;  %v4443_v15 = vrot.slane %v12780_v16, 7 }
 0x55d   : > { %8952 = vmatprep.mubr.msk.f32.mxu1 %vm15686_vm1, %v12789_v4  ;;  %vm15687_vm7 = vmmov %vm15679_vm0  ;;  %15688 = vst [vmem:[#allocation66_spill] sm:$0xff] %v12821_v52  ;;  %v12829_v8 = vsel %vm10098_vm9, %v12796_v54, %v4434_v56  ;;  %v12859_v56 = vmax.f32 %v4241_v7, 0.0  ;;  %v15708_v49 = vrot.slane %v12799_v32, 1  ;;  %v4251_v31 = vadd.f32 %v12528_v60, %v12664_v59 }
 0x55e   : > { %9005 = vmatprep.mubr.msk.f32.mxu0 %vm15687_vm7, %v12696_v27  ;;  %vm15689_vm8 = vmmov %vm15684_vm2  ;;  %15692 = vst [vmem:[#allocation43_spill] sm:$0xff] %v12829_v8  ;;  %v4252_v3 = vadd.f32 %v12528_v60, %v12667_v20  ;;  %v15721_v42 = vrot.slane %v12831_v18, 1  ;;  %v12930_v59 = vmax.f32 %v12778_v43, 0.0  ;;  %v15779_v55 = vrot.slane %v12864_v14, 1 }
 0x55f   : > { %v12824_v51 = vsel %vm15689_vm8, %v4429_v50, %v4431_v37  ;;  %15693 = vst [vmem:[#allocation32_spill] sm:$0xff] %v12831_v18  ;;  %vm15694_vm4 = vmmov %vm15679_vm0  ;;  %v4441_v50 = vrot.slane %v12799_v32, 7  ;;  %v12857_v37 = vmax.f32 %v4239_v30, 0.0  ;;  %v12895_v30 = vmax.f32 %v4243_v35, 0.0 }
 0x560   : > { %15690 = vst [vmem:[#allocation27_spill] sm:$0xff] %v12824_v51  ;;  %8953 = vmatmul.mubr.msk.f32.gmra.mxu1 %vm15694_vm4, %v12824_v51  ;;  %vm15695_vm5 = vmmov %vm15679_vm0  ;;  %v15720_v35 = vrot.slane %v12821_v52, 1 }
 0x561   : > { %9006 = vmatmul.mubr.msk.f32.gmra.mxu0 %vm15695_vm5, %v12689_v34  ;;  %vm15696_vm9 = vmmov %vm15679_vm0  ;;  %15701 = vst [vmem:[#allocation51_spill] sm:$0xff] %v12857_v37  ;;  %v15729_v54 = vrot.slane %v12857_v37, 1 }
 0x562   : > { %8955 = vmatprep.mubr.msk.f32.mxu1 %vm15696_vm9, %v12829_v8  ;;  %vm15697_vm14 = vmmov %vm15679_vm0  ;;  %15702 = vst [vmem:[#allocation65_spill] sm:$0xff] %v12859_v56 }
 0x563   : > { %9008 = vmatprep.mubr.msk.f32.mxu0 %vm15697_vm14, %v12758_v33  ;;  %vm15698_vm0 = vmmov %vm15682_vm6  ;;  %15703 = vst [vmem:[#allocation5_spill] sm:$0xff] %v12862_v25 }
 0x564   : > { %v12854_v9 = vsel %vm15698_vm0, %v14773_v41, %v14772_v40  ;;  %vm15700_vm6 = vmmov %vm15684_vm2  ;;  %15704 = vst [vmem:[#allocation34_spill] sm:$0xff] %v12864_v14  ;;  %v4445_v40 = vrot.slane %v12831_v18, 7  ;;  %8956 = vmatmul.mubr.msk.f32.gmra.mxu1 %vm15686_vm1, %v12862_v25  ;;  %v12887_v41 = vmax.f32 %v4240_v12, 0.0  ;;  %v4447_v12 = vrot.slane %v12821_v52, 7 }
 0x565   : > { %15699 = vst [vmem:[#allocation47_spill] sm:$0xff] %v12854_v9  ;;  %v4438_v62 = vsel %vm15700_vm6, %v4435_v63, %v4437_v10  ;;  %vm15705_vm7 = vmmov %vm15686_vm1  ;;  %v15771_v25 = vrot.slane %v12799_v32, 1 }
 0x566   : > { %9009 = vmatmul.mubr.msk.f32.gmra.mxu0 %vm15705_vm7, %v12744_v22  ;;  %v12877_v24 = vsel %vm10129_vm10, %v12854_v9, %v4438_v62  ;;  %vm15709_vm8 = vmmov %vm15698_vm0  ;;  %15712 = vst [vmem:[#allocation61_spill] sm:$0xff] %v12887_v41  ;;  %v4253_v62 = vadd.f32 %v12528_v60, %v12670_v5  ;;  %v12942_v9 = vmax.f32 %v4252_v3, 0.0  ;;  %v15730_v60 = vrot.slane %v12864_v14, 1 }
 0x567   : > { %15707 = vst [vmem:[#allocation56_spill] sm:$0xff] %v12877_v24  ;;  %v12884_v7 = vsel %vm15709_vm8, %v15708_v49, %v14774_v28  ;;  %vm15711_vm4 = vmmov %vm15684_vm2  ;;  %v4449_v28 = vrot.slane %v12864_v14, 7 }
 0x568   : > { %15710 = vst [vmem:[#allocation58_spill] sm:$0xff] %v12884_v7  ;;  %v4442_v63 = vsel %vm15711_vm4, %v4439_v46, %v4441_v50  ;;  %15713 = vst [vmem:[#allocation67_spill] sm:$0xff] %v12895_v30 }
 0x569   : > { %vm15714_vm10 = vmmov %vm15686_vm1  ;;  %v12911_v5 = vsel %vm10167_vm11, %v12884_v7, %v4442_v63  ;;  %v4354_v63 = vrot.slane %v12859_v56, 1  ;;  %v12936_v7 = vmax.f32 %v4251_v31, 0.0  ;;  %v12953_v31 = vmax.f32 %v12768_v47, 0.0 }
 0x56a   : > { %8958 = vmatprep.mubr.msk.f32.mxu1 %vm15714_vm10, %v12877_v24  ;;  %vm15715_vm5 = vmmov %vm15686_vm1  ;;  %15719 = vst [vmem:[#allocation38_spill] sm:$0xff] %v12911_v5 }
 0x56b   : > { %9011 = vmatprep.mubr.msk.f32.mxu0 %vm15715_vm5, %v12799_v32  ;;  %vm15716_vm9 = vmmov %vm15684_vm2  ;;  %15734 = vst [vmem:[#allocation71_spill] sm:$0xff] %v12953_v31  ;;  %v15780_v32 = vrot.slane %v12821_v52, 1 }
 0x56c   : > { %v12906_v20 = vsel %vm15716_vm9, %v4437_v10, %v4439_v46  ;;  %vm15722_vm14 = vmmov %vm15698_vm0  ;;  %v4451_v10 = vrot.slane %v12857_v37, 7  ;;  %v4352_v46 = vrot.slane %v12887_v41, 1 }
 0x56d   : > { %15717 = vst [vmem:[#allocation26_spill] sm:$0xff] %v12906_v20  ;;  %v12918_v36 = vsel %vm15722_vm14, %v15721_v42, %v15720_v35  ;;  %vm15724_vm0 = vmmov %vm15684_vm2  ;;  %v12932_v42 = vmax.f32 %v4247_v6, 0.0  ;;  %v12934_v35 = vmax.f32 %v4249_v53, 0.0  ;;  %v12955_v53 = vmax.f32 %v4253_v62, 0.0 }
 0x56e   : > { %15723 = vst [vmem:[#allocation68_spill] sm:$0xff] %v12918_v36  ;;  %v4446_v49 = vsel %vm15724_vm0, %v4443_v15, %v4445_v40  ;;  %vm15725_vm6 = vmmov %vm15686_vm1 }
 0x56f   : > { %8959 = vmatmul.mubr.msk.f32.gmra.mxu1 %vm15725_vm6, %v12906_v20  ;;  %vm15726_vm2 = vmmov %vm15686_vm1  ;;  %15727 = vst [vmem:[#allocation45_spill] sm:$0xff] %v12934_v35  ;;  %v12966_v24 = vsel %vm10253_vm12, %v12918_v36, %v4446_v49  ;;  %v4358_v36 = vrot.slane %v12895_v30, 1  ;;  %v4457_v49 = vrot.slane %v12953_v31, 7 }
 0x570   : > { %9012 = vmatmul.mubr.msk.f32.gmra.mxu0 %vm15726_vm2, %v12780_v16  ;;  %vm15728_vm11 = vmmov %vm15686_vm1  ;;  %15738 = vst [vmem:[#allocation57_spill] sm:$0xff] %v12966_v24 }
 0x571   : > { %8961 = vmatprep.mubr.msk.f32.mxu1 %vm15728_vm11, %v12911_v5  ;;  %9014 = vmatprep.mubr.msk.f32.mxu0 %vm15686_vm1, %v12831_v18  ;;  %vm15731_vm7 = vmmov %vm15709_vm8  ;;  %v12958_v5 = vmax.f32 %v12565_v13, 0.0  ;;  %v15743_v13 = vrot.slane %v12887_v41, 7 }
 0x572   : > { %v12949_v43 = vsel %vm15731_vm7, %v15730_v60, %v15729_v54  ;;  %vm15733_vm8 = vmmov %vm15724_vm0  ;;  %v12998_v60 = vmax.f32 %v12817_v19, 0.0  ;;  %v4459_v19 = vrot.slane %v12895_v30, 7 }
 0x573   : > { %15732 = vst [vmem:[#allocation48_spill] sm:$0xff] %v12949_v43  ;;  %v4450_v6 = vsel %vm15733_vm8, %v4447_v12, %v4449_v28  ;;  %vm15735_vm4 = vmmov %vm15724_vm0 }
 0x574   : > { %v12961_v3 = vsel %vm15735_vm4, %v4441_v50, %v4443_v15  ;;  %vm15739_vm10 = vmmov %vm15686_vm1  ;;  %v12979_v15 = vmax.f32 %v12774_v29, 0.0  ;;  %v12982_v50 = vmax.f32 %v12811_v1, 0.0  ;;  %v12994_v20 = vsel %vm10270_vm13, %v12949_v43, %v4450_v6 }
 0x575   : > { %15736 = vst [vmem:[#allocation53_spill] sm:$0xff] %v12961_v3  ;;  %8962 = vmatmul.mubr.msk.f32.gmra.mxu1 %vm15739_vm10, %v12961_v3  ;;  %vm15740_vm5 = vmmov %vm15686_vm1  ;;  %v4455_v29 = vrot.slane %v12859_v56, 7  ;;  %v15756_v43 = vrot.slane %v12567_v48, 1  ;;  %v4370_v3 = vrot.slane %v12934_v35, 1 }
 0x576   : > { %9015 = vmatmul.mubr.msk.f32.gmra.mxu0 %vm15740_vm5, %v12821_v52  ;;  %vm15741_vm9 = vmmov %vm15731_vm7  ;;  %15745 = vst [vmem:[#allocation64_spill] sm:$0xff] %v12979_v15 }
 0x577   : > { %v12973_v47 = vsel %vm15741_vm9, %v4352_v46, %v4354_v63  ;;  %vm15744_vm14 = vmmov %vm15724_vm0  ;;  %15751 = vst [vmem:[#allocation93_spill] sm:$0xff] %v12994_v20 }
 0x578   : > { %15742 = vst [vmem:[#allocation60_spill] sm:$0xff] %v12973_v47  ;;  %v4454_v54 = vsel %vm15744_vm14, %v4451_v10, %v15743_v13  ;;  %vm15746_vm12 = vmmov %vm15686_vm1  ;;  %v4356_v13 = vrot.slane %v12953_v31, 1 }
 0x579   : > { %8964 = vmatprep.mubr.msk.f32.mxu1 %vm15746_vm12, %v12966_v24  ;;  %vm15747_vm0 = vmmov %vm15686_vm1  ;;  %v15769_v24 = vrot.slane %v12689_v34, 1 }
 0x57a   : > { %9017 = vmatprep.mubr.msk.f32.mxu0 %vm15747_vm0, %v12864_v14  ;;  %vm15748_vm6 = vmmov %vm15735_vm4  ;;  %v4376_v14 = vrot.slane %v12942_v9, 1 }
 0x57b   : > { %v12989_v62 = vsel %vm15748_vm6, %v4445_v40, %v4447_v12  ;;  %vm15752_vm2 = vmmov %vm15735_vm4  ;;  %v13006_v40 = vmax.f32 %v12843_v61, 0.0  ;;  %v15753_v12 = vld [vmem:[#allocation42_spill] sm:$0xff]  ;;  %v4360_v61 = vrot.slane %v12979_v15, 1 }
 0x57c   : > { %15749 = vst [vmem:[#allocation89_spill] sm:$0xff] %v12989_v62  ;;  %v13001_v1 = vsel %vm15752_vm2, %v4449_v28, %v4451_v10  ;;  %vm15754_vm11 = vnez %v15753_v12  ;;  %v15757_v28 = vrot.slane %v12615_v45, 1  ;;  %vm15758_vm13 = vmmov %vm15731_vm7  ;;  %v4364_v12 = vrot.slane %v12982_v50, 1 }
 0x57d   : > { %v13011_v6 = vsel %vm15754_vm11, %v12973_v47, %v4454_v54  ;;  %vm15759_vm1 = vmmov %vm15747_vm0  ;;  %v4362_v54 = vrot.slane %v12930_v59, 1  ;;  %v15761_v47 = vrot.slane %v12661_v21, 1  ;;  %v15765_v45 = vrot.slane %v12696_v27, 1 }
 0x57e   : > { %15755 = vst [vmem:[#allocation6_spill] sm:$0xff] %v13011_v6  ;;  %v13020_v10 = vsel %vm15758_vm13, %v15757_v28, %v15756_v43  ;;  %8965 = vmatmul.mubr.msk.f32.gmra.mxu1 %vm15759_vm1, %v12989_v62  ;;  %vm15760_vm7 = vmmov %vm15747_vm0  ;;  %v4366_v43 = vrot.slane %v12932_v42, 1  ;;  %v4368_v28 = vrot.slane %v12998_v60, 1  ;;  %v15766_v62 = vrot.slane %v12651_v38, 1 }
 0x57f   : > { %9018 = vmatmul.mubr.msk.f32.gmra.mxu0 %vm15760_vm7, %v12857_v37  ;;  %vm15762_vm8 = vmmov %vm15741_vm9  ;;  %v15772_v27 = vrot.slane %v12744_v22, 1 }
 0x580   : > { %v13033_v48 = vsel %vm15762_vm8, %v12623_v57, %v15761_v47  ;;  %vm15763_vm4 = vmmov %vm15747_vm0  ;;  %v15768_v47 = vrot.slane %v12758_v33, 1 }
 0x581   : > { %8967 = vmatprep.mubr.msk.f32.mxu1 %vm15763_vm4, %v12994_v20  ;;  %vm15764_vm10 = vmmov %vm15747_vm0 }
 0x582   : > { %9020 = vmatprep.mubr.msk.f32.mxu0 %vm15764_vm10, %v12887_v41  ;;  %vm15767_vm5 = vmmov %vm15762_vm8 }
 0x583   : > { %v13046_v21 = vsel %vm15767_vm5, %v15766_v62, %v15765_v45  ;;  %vm15770_vm9 = vmmov %vm15767_vm5  ;;  %v15774_v45 = vrot.slane %v12831_v18, 1  ;;  %v15775_v62 = vrot.slane %v12780_v16, 1  ;;  %9021 = vmatmul.mubr.msk.f32.gmra.mxu0 %vm15759_vm1, %v12859_v56  ;;  %v15797_v56 = vld [vmem:[#allocation49_spill] sm:$0xff] }
 0x584   : > { %v13053_v20 = vsel %vm15770_vm9, %v15769_v24, %v15768_v47  ;;  %vm15773_vm14 = vmmov %vm15767_vm5 }
 0x585   : > { %v13062_v38 = vsel %vm15773_vm14, %v15772_v27, %v15771_v25  ;;  %vm15776_vm12 = vmmov %vm15767_vm5  ;;  %v15782_v27 = vrot.slane %v12857_v37, 1  ;;  %v15791_v37 = vrot.slane %v13006_v40, 1 }
 0x586   : > { %v13069_v33 = vsel %vm15776_vm12, %v15775_v62, %v15774_v45  ;;  %vm15777_vm0 = vmmov %vm15767_vm5  ;;  %v4461_v45 = vrot.slane %v12979_v15, 7  ;;  %v4374_v62 = vrot.slane %v12936_v7, 1 }
 0x587   : > { %v13072_v24 = vsel %vm15777_vm0, %v4356_v13, %v4358_v36  ;;  %vm15778_vm6 = vmmov %vm15752_vm2 }
 0x588   : > { %v4458_v47 = vsel %vm15778_vm6, %v4455_v29, %v4457_v49  ;;  %vm15781_vm2 = vmmov %vm15777_vm0 }
 0x589   : > { %v13080_v22 = vsel %vm15781_vm2, %v15780_v32, %v15779_v55  ;;  %vm15783_vm11 = vmmov %vm15777_vm0  ;;  %v13102_v32 = vrot.slane %v12955_v53, 1  ;;  %vm15798_vm2 = vnez %v15797_v56  ;;  %v4465_v56 = vrot.slane %v12982_v50, 7 }
 0x58a   : > { %v13085_v25 = vsel %vm15783_vm11, %v15782_v27, %v4352_v46  ;;  %vm15784_vm13 = vmmov %vm15759_vm1  ;;  %v13135_v16 = vsel %vm15798_vm2, %v13072_v24, %v4458_v47  ;;  %v15806_v47 = vrot.slane %v12958_v5, 1 }
 0x58b   : > { %8968 = vmatmul.mubr.msk.f32.gmra.mxu1 %vm15784_vm13, %v13001_v1  ;;  %vm15785_vm7 = vmmov %vm15777_vm0  ;;  %15799 = vst [vmem:[#allocation91_spill] sm:$0xff] %v13135_v16 }
 0x58c   : > { %v13095_v55 = vsel %vm15785_vm7, %v4354_v63, %v4356_v13  ;;  %vm15786_vm8 = vmmov %vm15759_vm1  ;;  %v13112_v63 = vrot.slane %v12942_v9, 7 }
 0x58d   : > { %8970 = vmatprep.mubr.msk.f32.mxu1 %vm15786_vm8, %v13011_v6  ;;  %vm15787_vm4 = vmmov %vm15759_vm1 }
 0x58e   : > { %9023 = vmatprep.mubr.msk.f32.mxu0 %vm15787_vm4, %v12953_v31  ;;  %vm15788_vm10 = vmmov %vm15777_vm0 }
 0x58f   : > { %v13105_v46 = vsel %vm15788_vm10, %v4358_v36, %v4360_v61  ;;  %vm15789_vm5 = vmmov %vm15777_vm0  ;;  %v15793_v36 = vrot.slane %v12887_v41, 7  ;;  %v15809_v41 = vrot.slane %v12958_v5, 7 }
 0x590   : > { %v13108_v27 = vsel %vm15789_vm5, %v4362_v54, %v4364_v12  ;;  %vm15790_vm9 = vmmov %vm15777_vm0 }
 0x591   : > { %v13115_v13 = vsel %vm15790_vm9, %v4366_v43, %v4368_v28  ;;  %vm15792_vm14 = vmmov %vm15777_vm0 }
 0x592   : > { %v13120_v31 = vsel %vm15792_vm14, %v4370_v3, %v15791_v37  ;;  %vm15794_vm12 = vmmov %vm15778_vm6  ;;  %v4463_v37 = vrot.slane %v12930_v59, 7 }
 0x593   : > { %v13126_v18 = vsel %vm15794_vm12, %v15793_v36, %v4455_v29  ;;  %vm15795_vm0 = vmmov %vm15759_vm1 }
 0x594   : > { %8971 = vmatmul.mubr.msk.f32.gmra.mxu1 %vm15795_vm0, %v13126_v18  ;;  %vm15796_vm6 = vmmov %vm15795_vm0 }
 0x595   : > { %9024 = vmatmul.mubr.msk.f32.gmra.mxu0 %vm15796_vm6, %v12895_v30  ;;  %vm15800_vm11 = vmmov %vm15789_vm5 }
 0x596   : > { %v13139_v52 = vsel %vm15800_vm11, %v4374_v62, %v4376_v14  ;;  %vm15801_vm13 = vmmov %vm15795_vm0 }
 0x597   : > { %8973 = vmatprep.mubr.msk.f32.mxu1 %vm15801_vm13, %v13135_v16  ;;  %vm15802_vm1 = vmmov %vm15795_vm0 }
 0x598   : > { %9026 = vmatprep.mubr.msk.f32.mxu0 %vm15802_vm1, %v12979_v15  ;;  %vm15803_vm7 = vmmov %vm15789_vm5 }
 0x599   : > { %v13146_v29 = vsel %vm15803_vm7, %v4360_v61, %v4362_v54  ;;  %vm15805_vm8 = vmmov %vm15794_vm12  ;;  %v15817_v54 = vld [vmem:[#allocation50_spill] sm:$0xff] }
 0x59a   : > { %15804 = vst [vmem:[#allocation11_spill] sm:$0xff] %v13146_v29  ;;  %v4462_v36 = vsel %vm15805_vm8, %v4459_v19, %v4461_v45  ;;  %vm15807_vm4 = vmmov %vm15789_vm5 }
 0x59b   : > { %v13153_v30 = vsel %vm15807_vm4, %v15806_v47, %v4376_v14  ;;  %vm15810_vm10 = vmmov %vm15805_vm8 }
 0x59c   : > { %15808 = vst [vmem:[#allocation69_spill] sm:$0xff] %v13153_v30  ;;  %v13159_v34 = vsel %vm15810_vm10, %v15809_v41, %v13112_v63  ;;  %vm15812_vm5 = vmmov %vm15807_vm4 }
 0x59d   : > { %15811 = vst [vmem:[#allocation88_spill] sm:$0xff] %v13159_v34  ;;  %v13163_v15 = vsel %vm15812_vm5, %v13102_v32, %v4376_v14  ;;  %vm15814_vm9 = vmmov %vm15805_vm8 }
 0x59e   : > { %15813 = vst [vmem:[#allocation94_spill] sm:$0xff] %v13163_v15  ;;  %v13166_v61 = vsel %vm15814_vm9, %v4457_v49, %v4459_v19  ;;  %vm15815_vm14 = vmmov %vm15795_vm0  ;;  %v4467_v19 = vrot.slane %v12932_v42, 7  ;;  %v4469_v15 = vrot.slane %v12998_v60, 7 }
 0x59f   : > { %8974 = vmatmul.mubr.msk.f32.gmra.mxu1 %vm15815_vm14, %v13166_v61  ;;  %vm15816_vm12 = vmmov %vm15795_vm0  ;;  %vm15818_vm0 = vnez %v15817_v54  ;;  %v4473_v54 = vrot.slane %v13006_v40, 7 }
 0x5a0   : > { %9027 = vmatmul.mubr.msk.f32.gmra.mxu0 %vm15816_vm12, %v12930_v59  ;;  %v13175_v47 = vsel %vm15818_vm0, %v13146_v29, %v4462_v36  ;;  %vm15819_vm6 = vmmov %vm15802_vm1  ;;  %v15828_v36 = vld [vmem:[#allocation54_spill] sm:$0xff] }
 0x5a1   : > { %8976 = vmatprep.mubr.msk.f32.mxu1 %vm15819_vm6, %v13175_v47  ;;  %vm15820_vm2 = vmmov %vm15802_vm1 }
 0x5a2   : > { %9029 = vmatprep.mubr.msk.f32.mxu0 %vm15820_vm2, %v12982_v50  ;;  %vm15821_vm11 = vmmov %vm15807_vm4  ;;  %vm15829_vm4 = vnez %v15828_v36  ;;  %v4475_v36 = vrot.slane %v12936_v7, 7 }
 0x5a3   : > { %v13182_v41 = vsel %vm15821_vm11, %v4364_v12, %v4366_v43  ;;  %vm15823_vm13 = vmmov %vm15805_vm8 }
 0x5a4   : > { %15822 = vst [vmem:[#allocation46_spill] sm:$0xff] %v13182_v41  ;;  %v4466_v49 = vsel %vm15823_vm13, %v4463_v37, %v4465_v56  ;;  %vm15824_vm1 = vmmov %vm15805_vm8 }
 0x5a5   : > { %v13188_v34 = vsel %vm15824_vm1, %v4461_v45, %v4463_v37  ;;  %vm15826_vm7 = vmmov %vm15820_vm2  ;;  %v13197_v12 = vsel %vm15829_vm4, %v13182_v41, %v4466_v49  ;;  %v4471_v37 = vrot.slane %v12934_v35, 7  ;;  %v15840_v49 = vld [vmem:[#allocation2_spill] sm:$0xff] }
 0x5a6   : > { %15825 = vst [vmem:[#allocation76_spill] sm:$0xff] %v13188_v34  ;;  %8977 = vmatmul.mubr.msk.f32.gmra.mxu1 %vm15826_vm7, %v13188_v34  ;;  %vm15827_vm8 = vmmov %vm15820_vm2 }
 0x5a7   : > { %9030 = vmatmul.mubr.msk.f32.gmra.mxu0 %vm15827_vm8, %v12932_v42  ;;  %15830 = vst [vmem:[#allocation96_spill] sm:$0xff] %v13197_v12  ;;  %vm15831_vm10 = vmmov %vm15820_vm2 }
 0x5a8   : > { %8979 = vmatprep.mubr.msk.f32.mxu1 %vm15831_vm10, %v13197_v12  ;;  %vm15832_vm5 = vmmov %vm15820_vm2 }
 0x5a9   : > { %9032 = vmatprep.mubr.msk.f32.mxu0 %vm15832_vm5, %v12998_v60  ;;  %vm15833_vm9 = vmmov %vm15821_vm11 }
 0x5aa   : > { %v13204_v43 = vsel %vm15833_vm9, %v4368_v28, %v4370_v3  ;;  %vm15835_vm14 = vmmov %vm15824_vm1  ;;  %v15845_v28 = vrot.slane %v13006_v40, 1 }
 0x5ab   : > { %15834 = vst [vmem:[#allocation75_spill] sm:$0xff] %v13204_v43  ;;  %v4470_v45 = vsel %vm15835_vm14, %v4467_v19, %v4469_v15  ;;  %vm15836_vm12 = vmmov %vm15824_vm1 }
 0x5ac   : > { %v13210_v30 = vsel %vm15836_vm12, %v4465_v56, %v4467_v19  ;;  %vm15838_vm0 = vmmov %vm15820_vm2  ;;  %vm15841_vm2 = vnez %v15840_v49 }
 0x5ad   : > { %15837 = vst [vmem:[#allocation95_spill] sm:$0xff] %v13210_v30  ;;  %8980 = vmatmul.mubr.msk.f32.gmra.mxu1 %vm15838_vm0, %v13210_v30  ;;  %vm15839_vm6 = vmmov %vm15838_vm0  ;;  %v13219_v3 = vsel %vm15841_vm2, %v13204_v43, %v4470_v45  ;;  %v15853_v45 = vld [vmem:[#allocation70_spill] sm:$0xff] }
 0x5ae   : > { %9033 = vmatmul.mubr.msk.f32.gmra.mxu0 %vm15839_vm6, %v12934_v35  ;;  %15842 = vst [vmem:[#allocation98_spill] sm:$0xff] %v13219_v3  ;;  %vm15843_vm11 = vmmov %vm15838_vm0  ;;  %vm15854_vm5 = vnez %v15853_v45 }
 0x5af   : > { %8982 = vmatprep.mubr.msk.f32.mxu1 %vm15843_vm11, %v13219_v3  ;;  %vm15844_vm13 = vmmov %vm15838_vm0 }
 0x5b0   : > { %9035 = vmatprep.mubr.msk.f32.mxu0 %vm15844_vm13, %v13006_v40  ;;  %vm15846_vm1 = vmmov %vm15833_vm9 }
 0x5b1   : > { %v13228_v56 = vsel %vm15846_vm1, %v15845_v28, %v4374_v62  ;;  %vm15848_vm7 = vmmov %vm15836_vm12  ;;  %v14846_v28 = vrot.slane %v12955_v53, 7 }
 0x5b2   : > { %15847 = vst [vmem:[#allocation79_spill] sm:$0xff] %v13228_v56  ;;  %v4474_v19 = vsel %vm15848_vm7, %v4471_v37, %v4473_v54  ;;  %vm15849_vm8 = vmmov %vm15848_vm7 }
 0x5b3   : > { %v13233_v35 = vsel %vm15849_vm8, %v4469_v15, %v4471_v37  ;;  %vm15851_vm4 = vmmov %vm15838_vm0  ;;  %v13242_v49 = vsel %vm15854_vm5, %v13228_v56, %v4474_v19  ;;  %v15863_v19 = vld [vmem:[#allocation72_spill] sm:$0xff] }
 0x5b4   : > { %15850 = vst [vmem:[#allocation97_spill] sm:$0xff] %v13233_v35  ;;  %8983 = vmatmul.mubr.msk.f32.gmra.mxu1 %vm15851_vm4, %v13233_v35  ;;  %vm15852_vm10 = vmmov %vm15838_vm0  ;;  %vm15864_vm13 = vnez %v15863_v19 }
 0x5b5   : > { %9036 = vmatmul.mubr.msk.f32.gmra.mxu0 %vm15852_vm10, %v12936_v7  ;;  %15855 = vst [vmem:[#allocation100_spill] sm:$0xff] %v13242_v49  ;;  %vm15856_vm9 = vmmov %vm15838_vm0 }
 0x5b6   : > { %8985 = vmatprep.mubr.msk.f32.mxu1 %vm15856_vm9, %v13242_v49  ;;  %vm15857_vm14 = vmmov %vm15838_vm0 }
 0x5b7   : > { %9038 = vmatprep.mubr.msk.f32.mxu0 %vm15857_vm14, %v12942_v9  ;;  %vm15858_vm12 = vmmov %vm15846_vm1 }
 0x5b8   : > { %v13250_v15 = vsel %vm15858_vm12, %v4376_v14, %v13102_v32  ;;  %vm15859_vm0 = vmmov %vm15848_vm7 }
 0x5b9   : > { %v4478_v62 = vsel %vm15859_vm0, %v4475_v36, %v13112_v63  ;;  %vm15860_vm6 = vmmov %vm15859_vm0 }
 0x5ba   : > { %v13255_v37 = vsel %vm15860_vm6, %v4473_v54, %v4475_v36  ;;  %vm15861_vm2 = vmmov %vm15851_vm4  ;;  %v13265_v45 = vsel %vm15864_vm13, %v13250_v15, %v4478_v62  ;;  %v15871_v54 = vrot.slane %v12655_v58, 1 }
 0x5bb   : > { %8986 = vmatmul.mubr.msk.f32.gmra.mxu1 %vm15861_vm2, %v13255_v37  ;;  %vm15862_vm11 = vmmov %vm15861_vm2  ;;  %15865 = vst [vmem:[#allocation52_spill] sm:$0xff] %v13265_v45 }
 0x5bc   : > { %9039 = vmatmul.mubr.msk.f32.gmra.mxu0 %vm15862_vm11, %v12955_v53  ;;  %vm15866_vm1 = vmmov %vm15861_vm2 }
 0x5bd   : > { %8988 = vmatprep.mubr.msk.f32.mxu1 %vm15866_vm1, %v13265_v45  ;;  %vm15867_vm7 = vmmov %vm15866_vm1 }
 0x5be   : > { %9093 = vmatprep.mubr.msk.f32.mxu0 %vm15867_vm7, %v12719_v39  ;;  %vm15868_vm8 = vmmov %vm15859_vm0  ;;  %v13288_v39 = vld [vmem:[%s14564_s7 + $0x38] sm:$0xff] }
 0x5bf   : > { %v13275_v14 = vsel %vm15868_vm8, %v13112_v63, %v14846_v28  ;;  %vm15869_vm4 = vmmov %vm15866_vm1  ;;  %v15875_v63 = vld [vmem:[#allocation73_spill] sm:$0xff]  ;;  %v15905_v28 = vld [vmem:[#allocation20_spill] sm:$0xff] }
 0x5c0   : > { %8989 = vmatmul.mubr.msk.f32.gmra.mxu1 %vm15869_vm4, %v13275_v14  ;;  %vm15870_vm10 = vmmov %vm15866_vm1 }
 0x5c1   : > { %9094 = vmatmul.mubr.msk.f32.vlgmr.msra.gmra.mxu0 %vm15870_vm10, %v12729_v0  ;;  %vm15872_vm5 = vmmov %vm15858_vm12  ;;  %vm15876_vm12 = vnez %v15875_v63  ;;  %v15896_v63 = vld [vmem:[#allocation14_spill] sm:$0xff] }
 0x5c2   : > { %v4324_v36 = vsel %vm15872_vm5, %v12623_v57, %v15871_v54  ;;  %vm15873_vm9 = vmmov %vm15866_vm1  ;;  %9192 = vmatpush3.msra.mxu0 %v12628_v2  ;;  %v13301_v57 = vld [vmem:[%s14564_s7 + $0x30] sm:$0xff]  ;;  %v15881_v2 = vld [vmem:[#allocation77_spill] sm:$0xff] }
 0x5c3   : > { %9043 = vmatprep.mubr.msk.f32.mxu1 %vm15873_vm9, %v12648_v17  ;;  %vm15874_vm14 = vmmov %vm15866_vm1  ;;  %v4557_v62 = vsel %vm15876_vm12, %v12674_v23, %v4324_v36  ;;  %9291 = vmatprep.subr.mxu0 %v13288_v39  ;;  %vm15882_vm13 = vnez %v15881_v2  ;;  %v15894_v36 = vld [vmem:[#allocation56_spill] sm:$0xff]  ;;  %v15901_v2 = vld [vmem:[#allocation63_spill] sm:$0xff] }
 0x5c4   : > { %9096 = vmatprep.mubr.msk.f32.mxu0 %vm15874_vm14, %v12734_v26  ;;  %vm15877_vm0 = vmmov %vm15866_vm1  ;;  %v13317_v19 = vsel %vm15882_vm13, %v12729_v0, %v13020_v10  ;;  %v15890_v0 = vld [vmem:[#allocation5_spill] sm:$0xff] }
 0x5c5   : > { %9044 = vmatmul.mubr.msk.f32.vlgmr.msra.gmra.mxu1 %vm15877_vm0, %v4557_v62  ;;  %vm15878_vm6 = vmmov %vm15877_vm0  ;;  %v15892_v10 = vld [vmem:[#allocation25_spill] sm:$0xff] }
 0x5c6   : > { %9097 = vmatmul.mubr.msk.f32.gmra.mxu0 %vm15878_vm6, %v12674_v23  ;;  %9142 = vmatpush3.msra.mxu1 %v12687_v44  ;;  %vm15879_vm2 = vmmov %vm15877_vm0  ;;  %v15887_v44 = vld [vmem:[#allocation16_spill] sm:$0xff] }
 0x5c7   : > { %9046 = vmatprep.mubr.msk.f32.mxu1 %vm15879_vm2, %v12703_v11  ;;  %vm15880_vm11 = vmmov %vm15877_vm0  ;;  %9241 = vmatprep.subr.mxu1 %v13301_v57  ;;  %vm15888_vm10 = vnez %v15887_v44  ;;  %v15903_v44 = vld [vmem:[#allocation38_spill] sm:$0xff] }
 0x5c8   : > { %9099 = vmatprep.mubr.msk.f32.mxu0 %vm15880_vm11, %v12789_v4  ;;  %vm15883_vm1 = vmmov %vm15877_vm0  ;;  %v13331_v54 = vsel %vm15888_vm10, %v12674_v23, %v13033_v48  ;;  %v15899_v48 = vld [vmem:[#allocation26_spill] sm:$0xff] }
 0x5c9   : > { %9047 = vmatmul.mubr.msk.f32.gmra.mxu1 %vm15883_vm1, %v13317_v19  ;;  %vm15884_vm7 = vmmov %vm15877_vm0 }
 0x5ca   : > { %9100 = vmatmul.mubr.msk.f32.gmra.mxu0 %vm15884_vm7, %v12824_v51  ;;  %vm15885_vm8 = vmmov %vm15877_vm0 }
 0x5cb   : > { %9049 = vmatprep.mubr.msk.f32.mxu1 %vm15885_vm8, %v12648_v17  ;;  %vm15886_vm4 = vmmov %vm15877_vm0 }
 0x5cc   : > { %9102 = vmatprep.mubr.msk.f32.mxu0 %vm15886_vm4, %v12829_v8  ;;  %vm15889_vm5 = vmmov %vm15877_vm0  ;;  %v15912_v8 = vld [vmem:[#allocation57_spill] sm:$0xff] }
 0x5cd   : > { %9050 = vmatmul.mubr.msk.f32.gmra.mxu1 %vm15889_vm5, %v13331_v54  ;;  %vm15891_vm9 = vmmov %vm15877_vm0 }
 0x5ce   : > { %9103 = vmatmul.mubr.msk.f32.gmra.mxu0 %vm15891_vm9, %v15890_v0  ;;  %vm15893_vm14 = vmmov %vm15877_vm0 }
 0x5cf   : > { %9052 = vmatprep.mubr.msk.f32.mxu1 %vm15893_vm14, %v15892_v10  ;;  %vm15895_vm12 = vmmov %vm15877_vm0  ;;  %vm15897_vm0 = vnez %v15896_v63  ;;  %v15910_v63 = vld [vmem:[#allocation47_spill] sm:$0xff] }
 0x5d0   : > { %9105 = vmatprep.mubr.msk.f32.mxu0 %vm15895_vm12, %v15894_v36  ;;  %v13345_v62 = vsel %vm15897_vm0, %v12824_v51, %v13046_v21  ;;  %vm15898_vm6 = vmmov %vm15883_vm1  ;;  %v15908_v21 = vld [vmem:[#allocation53_spill] sm:$0xff] }
 0x5d1   : > { %9053 = vmatmul.mubr.msk.f32.gmra.mxu1 %vm15898_vm6, %v13345_v62  ;;  %vm15900_vm2 = vmmov %vm15883_vm1 }
 0x5d2   : > { %9106 = vmatmul.mubr.msk.f32.gmra.mxu0 %vm15900_vm2, %v15899_v48  ;;  %vm15902_vm11 = vmmov %vm15883_vm1 }
 0x5d3   : > { %9055 = vmatprep.mubr.msk.f32.mxu1 %vm15902_vm11, %v15901_v2  ;;  %vm15904_vm13 = vmmov %vm15883_vm1  ;;  %vm15906_vm1 = vnez %v15905_v28  ;;  %v15919_v28 = vld [vmem:[#allocation58_spill] sm:$0xff] }
 0x5d4   : > { %9108 = vmatprep.mubr.msk.f32.mxu0 %vm15904_vm13, %v15903_v44  ;;  %v13359_v36 = vsel %vm15906_vm1, %v15890_v0, %v13053_v20  ;;  %vm15907_vm7 = vmmov %vm15900_vm2  ;;  %v15914_v44 = vld [vmem:[#allocation28_spill] sm:$0xff]  ;;  %v15917_v20 = vld [vmem:[#allocation89_spill] sm:$0xff] }
 0x5d5   : > { %9056 = vmatmul.mubr.msk.f32.gmra.mxu1 %vm15907_vm7, %v13359_v36  ;;  %vm15909_vm8 = vmmov %vm15900_vm2  ;;  %vm15915_vm5 = vnez %v15914_v44  ;;  %v15921_v0 = vld [vmem:[#allocation93_spill] sm:$0xff] }
 0x5d6   : > { %9109 = vmatmul.mubr.msk.f32.gmra.mxu0 %vm15909_vm8, %v15908_v21  ;;  %vm15911_vm4 = vmmov %vm15900_vm2  ;;  %v13373_v51 = vsel %vm15915_vm5, %v15899_v48, %v13062_v38  ;;  %v15928_v38 = vld [vmem:[#allocation68_spill] sm:$0xff]  ;;  %v15931_v44 = vld [vmem:[#allocation37_spill] sm:$0xff] }
 0x5d7   : > { %9058 = vmatprep.mubr.msk.f32.mxu1 %vm15911_vm4, %v15910_v63  ;;  %vm15913_vm10 = vmmov %vm15900_vm2  ;;  %vm15932_vm7 = vnez %v15931_v44  ;;  %v15946_v44 = vld [vmem:[#allocation78_spill] sm:$0xff] }
 0x5d8   : > { %9111 = vmatprep.mubr.msk.f32.mxu0 %vm15913_vm10, %v15912_v8  ;;  %vm15916_vm9 = vmmov %vm15900_vm2  ;;  %v15923_v8 = vld [vmem:[#allocation30_spill] sm:$0xff] }
 0x5d9   : > { %9059 = vmatmul.mubr.msk.f32.gmra.mxu1 %vm15916_vm9, %v13373_v51  ;;  %vm15918_vm14 = vmmov %vm15900_vm2  ;;  %vm15924_vm6 = vnez %v15923_v8  ;;  %v15939_v8 = vld [vmem:[#allocation41_spill] sm:$0xff] }
 0x5da   : > { %9112 = vmatmul.mubr.msk.f32.gmra.mxu0 %vm15918_vm14, %v15917_v20  ;;  %vm15920_vm12 = vmmov %vm15900_vm2  ;;  %v13387_v4 = vsel %vm15924_vm6, %v15908_v21, %v13069_v33  ;;  %v15936_v33 = vld [vmem:[#allocation48_spill] sm:$0xff]  ;;  %vm15940_vm9 = vnez %v15939_v8 }
 0x5db   : > { %9061 = vmatprep.mubr.msk.f32.mxu1 %vm15920_vm12, %v15919_v28  ;;  %vm15922_vm0 = vmmov %vm15900_vm2  ;;  %15925 = vst [vmem:[#allocation99_spill] sm:$0xff] %v13387_v4 }
 0x5dc   : > { %9114 = vmatprep.mubr.msk.f32.mxu0 %vm15922_vm0, %v15921_v0  ;;  %vm15926_vm2 = vmmov %vm15922_vm0  ;;  %v13401_v0 = vsel %vm15932_vm7, %v15917_v20, %v13080_v22  ;;  %v15944_v22 = vld [vmem:[#allocation60_spill] sm:$0xff] }
 0x5dd   : > { %9062 = vmatmul.mubr.msk.f32.gmra.mxu1 %vm15926_vm2, %v13387_v4  ;;  %vm15927_vm11 = vmmov %vm15922_vm0  ;;  %15933 = vst [vmem:[#allocation81_spill] sm:$0xff] %v13401_v0  ;;  %vm15947_vm2 = vnez %v15946_v44 }
 0x5de   : > { %9115 = vmatmul.mubr.msk.f32.gmra.mxu0 %vm15927_vm11, %v13001_v1  ;;  %vm15929_vm13 = vmmov %vm15922_vm0 }
 0x5df   : > { %9064 = vmatprep.mubr.msk.f32.mxu1 %vm15929_vm13, %v15928_v38  ;;  %vm15930_vm1 = vmmov %vm15922_vm0 }
 0x5e0   : > { %9117 = vmatprep.mubr.msk.f32.mxu0 %vm15930_vm1, %v13011_v6  ;;  %vm15934_vm8 = vmmov %vm15922_vm0  ;;  %v13415_v6 = vsel %vm15940_vm9, %v13001_v1, %v13085_v25  ;;  %v15953_v25 = vld [vmem:[#allocation80_spill] sm:$0xff] }
 0x5e1   : > { %9065 = vmatmul.mubr.msk.f32.gmra.mxu1 %vm15934_vm8, %v13401_v0  ;;  %vm15935_vm4 = vmmov %vm15922_vm0  ;;  %15941 = vst [vmem:[#allocation101_spill] sm:$0xff] %v13415_v6  ;;  %vm15954_vm8 = vnez %v15953_v25  ;;  %v15961_v25 = vld [vmem:[#allocation82_spill] sm:$0xff] }
 0x5e2   : > { %9118 = vmatmul.mubr.msk.f32.gmra.mxu0 %vm15935_vm4, %v13126_v18  ;;  %vm15937_vm10 = vmmov %vm15922_vm0  ;;  %v13443_v8 = vsel %vm15954_vm8, %v13166_v61, %v13105_v46 }
 0x5e3   : > { %9067 = vmatprep.mubr.msk.f32.mxu1 %vm15937_vm10, %v15936_v33  ;;  %vm15938_vm5 = vmmov %vm15922_vm0  ;;  %15955 = vst [vmem:[#allocation55_spill] sm:$0xff] %v13443_v8 }
 0x5e4   : > { %9120 = vmatprep.mubr.msk.f32.mxu0 %vm15938_vm5, %v13135_v16  ;;  %vm15942_vm14 = vmmov %vm15922_vm0  ;;  %v13429_v16 = vsel %vm15947_vm2, %v13126_v18, %v13095_v55  ;;  %v15958_v55 = vld [vmem:[#allocation8_spill] sm:$0xff] }
 0x5e5   : > { %9068 = vmatmul.mubr.msk.f32.gmra.mxu1 %vm15942_vm14, %v13415_v6  ;;  %vm15943_vm12 = vmmov %vm15922_vm0  ;;  %15948 = vst [vmem:[#allocation103_spill] sm:$0xff] %v13429_v16  ;;  %v13450_v44 = vmax.f32 %v15958_v55, 0.0  ;;  %vm15962_vm14 = vnez %v15961_v25 }
 0x5e6   : > { %9121 = vmatmul.mubr.msk.f32.gmra.mxu0 %vm15943_vm12, %v13166_v61  ;;  %9070 = vmatprep.mubr.msk.f32.mxu1 %vm15922_vm0, %v15944_v22  ;;  %vm15945_vm6 = vmmov %vm15922_vm0  ;;  %v13460_v46 = vsel %vm15962_vm14, %v13188_v34, %v13108_v27  ;;  %v15967_v27 = vld [vmem:[#allocation84_spill] sm:$0xff] }
 0x5e7   : > { %9123 = vmatprep.mubr.msk.f32.mxu0 %vm15945_vm6, %v13175_v47  ;;  %vm15949_vm11 = vmmov %vm15922_vm0  ;;  %15963 = vst [vmem:[#allocation102_spill] sm:$0xff] %v13460_v46  ;;  %v4380_v55 = vrot.slane %v13450_v44, 1 }
 0x5e8   : > { %vm15950_vm13 = vmmov %vm15922_vm0 }
 0x5e9   : > { %9071 = vmatmul.mubr.msk.f32.gmra.mxu1 %vm15949_vm11, %v13429_v16  ;;  %vm15951_vm1 = vmmov %vm15922_vm0  ;;  %vm15968_vm11 = vnez %v15967_v27 }
 0x5ea   : > { %9124 = vmatmul.mubr.msk.f32.gmra.mxu0 %vm15950_vm13, %v13188_v34  ;;  %9073 = vmatprep.mubr.msk.f32.mxu1 %vm15951_vm1, %v13072_v24  ;;  %vm15952_vm7 = vmmov %vm15922_vm0  ;;  %v13476_v25 = vsel %vm15968_vm11, %v13210_v30, %v13115_v13  ;;  %v15977_v13 = vrot.slane %v12955_v53, 7 }
 0x5eb   : > { %9126 = vmatprep.mubr.msk.f32.mxu0 %vm15952_vm7, %v13197_v12  ;;  %vm15956_vm4 = vmmov %vm15922_vm0  ;;  %15969 = vst [vmem:[#allocation105_spill] sm:$0xff] %v13476_v25 }
 0x5ec   : > { %vm15957_vm10 = vmmov %vm15922_vm0 }
 0x5ed   : > { %9074 = vmatmul.mubr.msk.f32.gmra.mxu1 %vm15956_vm4, %v13443_v8  ;;  %vm15959_vm5 = vmmov %vm15922_vm0  ;;  %vm15975_vm4 = vcmask 1046528  }
 0x5ee   : > { %9127 = vmatmul.mubr.msk.f32.gmra.mxu0 %vm15957_vm10, %v13210_v30  ;;  %9076 = vmatprep.mubr.msk.f32.mxu1 %vm15959_vm5, %v13146_v29  ;;  %vm15960_vm9 = vmmov %vm15922_vm0  ;;  %vm15978_vm10 = vcmask 1040384   ;;  %v15979_v30 = vld [vmem:[#allocation86_spill] sm:$0xff] }
 0x5ef   : > { %9129 = vmatprep.mubr.msk.f32.mxu0 %vm15960_vm9, %v13219_v3  ;;  %vm15964_vm12 = vmmov %vm15922_vm0  ;;  %v4481_v3 = vrot.slane %v13450_v44, 7  ;;  %vm15980_vm5 = vnez %v15979_v30  ;;  %v15987_v30 = vld [vmem:[#allocation90_spill] sm:$0xff] }
 0x5f0   : > { %vm15965_vm6 = vmmov %vm15922_vm0  ;;  %v13498_v34 = vsel %vm15980_vm5, %v13233_v35, %v13120_v31 }
 0x5f1   : > { %9077 = vmatmul.mubr.msk.f32.gmra.mxu1 %vm15964_vm12, %v13460_v46  ;;  %vm15966_vm2 = vmmov %vm15922_vm0  ;;  %v4482_v27 = vsel %vm15978_vm10, %v15977_v13, %v4481_v3  ;;  %15981 = vst [vmem:[#allocation104_spill] sm:$0xff] %v13498_v34  ;;  %v15990_v13 = vrot.slane %v12958_v5, 7 }
 0x5f2   : > { %9130 = vmatmul.mubr.msk.f32.gmra.mxu0 %vm15922_vm0, %v13233_v35  ;;  %9079 = vmatprep.mubr.msk.f32.mxu1 %vm15965_vm6, %v13182_v41  ;;  %vm15970_vm13 = vmmov %vm15922_vm0 }
 0x5f3   : > { %9132 = vmatprep.mubr.msk.f32.mxu0 %vm15966_vm2, %v13242_v49  ;;  %vm15971_vm1 = vmmov %vm15922_vm0  ;;  %v15974_v49 = vrot.slane %v12958_v5, 1  ;;  %vm15988_vm2 = vnez %v15987_v30  ;;  %v16024_v30 = vld [vmem:[#allocation36_spill] sm:$0xff] }
 0x5f4   : > { %vm15972_vm7 = vmmov %vm15922_vm0  ;;  %v13517_v31 = vsel %vm15988_vm2, %v13255_v37, %v13139_v52  ;;  %v15997_v52 = vld [vmem:[#allocation92_spill] sm:$0xff] }
 0x5f5   : > { %9080 = vmatmul.mubr.msk.f32.gmra.mxu1 %vm15970_vm13, %v13476_v25  ;;  %vm15973_vm8 = vmmov %vm15922_vm0  ;;  %v13489_v12 = vsel %vm15975_vm4, %v4380_v55, %v15974_v49  ;;  %15989 = vst [vmem:[#allocation107_spill] sm:$0xff] %v13517_v31 }
 0x5f6   : > { %9133 = vmatmul.mubr.msk.f32.gmra.mxu0 %vm15971_vm1, %v13255_v37  ;;  %9082 = vmatprep.mubr.msk.f32.mxu1 %vm15972_vm7, %v13204_v43  ;;  %15976 = vst [vmem:[#allocation83_spill] sm:$0xff] %v13489_v12  ;;  %vm15982_vm9 = vmmov %vm15922_vm0 }
 0x5f7   : > { %9135 = vmatprep.mubr.msk.f32.mxu0 %vm15973_vm8, %v13265_v45  ;;  %vm15983_vm14 = vmmov %vm15922_vm0  ;;  %v15984_v45 = vld [vmem:[#allocation87_spill] sm:$0xff] }
 0x5f8   : > { %vm15985_vm12 = vnez %v15984_v45  ;;  %vm15986_vm6 = vmmov %vm15922_vm0 }
 0x5f9   : > { %9083 = vmatmul.mubr.msk.f32.gmra.mxu1 %vm15982_vm9, %v13498_v34  ;;  %v13507_v49 = vsel %vm15985_vm12, %v13489_v12, %v4482_v27  ;;  %vm15991_vm11 = vmmov %vm15978_vm10  ;;  %vm15998_vm10 = vnez %v15997_v52  ;;  %v16021_v27 = vld [vmem:[#allocation29_spill] sm:$0xff]  ;;  %v16032_v52 = vld [vmem:[#allocation39_spill] sm:$0xff] }
 0x5fa   : > { %9136 = vmatmul.mubr.msk.f32.gmra.mxu0 %vm15983_vm14, %v13275_v14  ;;  %9085 = vmatprep.mubr.msk.f32.mxu1 %vm15922_vm0, %v13228_v56  ;;  %v13522_v35 = vsel %vm15991_vm11, %v4481_v3, %v15990_v13  ;;  %vm15992_vm13 = vmmov %vm15922_vm0  ;;  %v16026_v13 = vld [vmem:[#allocation40_spill] sm:$0xff] }
 0x5fb   : > { %9138 = vmatprep.mubr.msk.f32.mxu0 %vm15986_vm6, %v13507_v49  ;;  %vm15993_vm1 = vmmov %vm15922_vm0 }
 0x5fc   : > { %vm15994_vm7 = vmmov %vm15975_vm4 }
 0x5fd   : > { %9086 = vmatmul.mubr.msk.f32.gmra.mxu1 %vm15992_vm13, %v13517_v31  ;;  %v4381_v45 = vsel %vm15994_vm7, %v13102_v32, %v4380_v55  ;;  %vm15995_vm8 = vmmov %vm15922_vm0  ;;  %v16004_v32 = vld [vmem:[#allocation31_spill] sm:$0xff]  ;;  %v16018_v55 = vld [vmem:[#allocation24_spill] sm:$0xff] }
 0x5fe   : > { %9139 = vmatmul.mubr.msk.f32.gmra.mxu0 %vm15993_vm1, %v13522_v35  ;;  %9088 = vmatprep.mubr.msk.f32.mxu1 %vm15995_vm8, %v13250_v15  ;;  %vm15996_vm4 = vmmov %vm15922_vm0  ;;  %v13537_v3 = vsel %vm15998_vm10, %v13275_v14, %v4381_v45  ;;  %v16029_v45 = vld [vmem:[#allocation12_spill] sm:$0xff] }
 0x5ff   : > { %9193 = vmatprep.mubr.msk.f32.mxu0 %vm15996_vm4, %v12703_v11  ;;  %15999 = vst [vmem:[#allocation59_spill] sm:$0xff] %v13537_v3  ;;  %vm16000_vm5 = vmmov %vm15922_vm0  ;;  %v13551_v11 = vld [vmem:[%s14564_s7 + $0x40] sm:$0xff] }
 0x600   : > { %vm16001_vm9 = vmmov %vm15922_vm0 }
 0x601   : > { %9089 = vmatmul.mubr.msk.f32.gmra.mxu1 %vm16000_vm5, %v13537_v3  ;;  %vm16002_vm14 = vmmov %vm15922_vm0 }
 0x602   : > { %9194 = vmatmul.mubr.msk.f32.vlgmr.msra.gmra.mxu0 %vm16001_vm9, %v13317_v19  ;;  %9143 = vmatprep.mubr.msk.f32.mxu1 %vm16002_vm14, %v12655_v58  ;;  %vm16003_vm12 = vmmov %vm15922_vm0  ;;  %v16006_v19 = vld [vmem:[#allocation21_spill] sm:$0xff]  ;;  %v16009_v58 = vld [vmem:[#allocation22_spill] sm:$0xff] }
 0x603   : > { %9196 = vmatprep.mubr.msk.f32.mxu0 %vm16003_vm12, %v12648_v17  ;;  %9292 = vmatpush3.msra.mxu0 %v13288_v39  ;;  %vm16005_vm6 = vmmov %vm15922_vm0  ;;  %v16012_v39 = vld [vmem:[#allocation15_spill] sm:$0xff] }
 0x604   : > { %vm16007_vm2 = vmmov %vm15922_vm0 }
 0x605   : > { %9144 = vmatmul.mubr.msk.f32.vlgmr.msra.gmra.mxu1 %vm15922_vm0, %v16004_v32  ;;  %vm16008_vm11 = vmmov %vm15922_vm0  ;;  %v16035_v32 = vld [vmem:[#allocation32_spill] sm:$0xff] }
 0x606   : > { %9197 = vmatmul.mubr.msk.f32.gmra.mxu0 %vm16005_vm6, %v13331_v54  ;;  %9242 = vmatpush3.msra.mxu1 %v13301_v57  ;;  %vm16010_vm13 = vmmov %vm15922_vm0  ;;  %v16015_v57 = vld [vmem:[#allocation74_spill] sm:$0xff] }
 0x607   : > { %9146 = vmatprep.mubr.msk.f32.mxu1 %vm16007_vm2, %v16006_v19  ;;  %9199 = vmatprep.mubr.msk.f32.mxu0 %vm16008_vm11, %v15892_v10  ;;  %vm16011_vm1 = vmmov %vm15922_vm0 }
 0x608   : > { %9341 = vmatprep.subr.mxu1 %v13551_v11  ;;  %vm16013_vm7 = vmmov %vm15922_vm0 }
 0x609   : > { %9147 = vmatmul.mubr.msk.f32.gmra.mxu1 %vm16010_vm13, %v16009_v58  ;;  %vm16014_vm8 = vmmov %vm15922_vm0 }
 0x60a   : > { %9200 = vmatmul.mubr.msk.f32.gmra.mxu0 %vm16011_vm1, %v13345_v62  ;;  %9149 = vmatprep.mubr.msk.f32.mxu1 %vm16013_vm7, %v16012_v39  ;;  %vm16016_vm4 = vmmov %vm15922_vm0 }
 0x60b   : > { %9202 = vmatprep.mubr.msk.f32.mxu0 %vm16014_vm8, %v15901_v2  ;;  %vm16017_vm10 = vmmov %vm15922_vm0 }
 0x60c   : > { %vm16019_vm5 = vmmov %vm15922_vm0 }
 0x60d   : > { %9150 = vmatmul.mubr.msk.f32.gmra.mxu1 %vm16016_vm4, %v16015_v57  ;;  %vm16020_vm9 = vmmov %vm15922_vm0 }
 0x60e   : > { %9203 = vmatmul.mubr.msk.f32.gmra.mxu0 %vm16017_vm10, %v13359_v36  ;;  %9152 = vmatprep.mubr.msk.f32.mxu1 %vm16019_vm5, %v16018_v55  ;;  %vm16022_vm14 = vmmov %vm15922_vm0 }
 0x60f   : > { %9205 = vmatprep.mubr.msk.f32.mxu0 %vm16020_vm9, %v15910_v63  ;;  %vm16023_vm12 = vmmov %vm15922_vm0 }
 0x610   : > { %vm16025_vm6 = vmmov %vm15922_vm0 }
 0x611   : > { %9153 = vmatmul.mubr.msk.f32.gmra.mxu1 %vm16022_vm14, %v16021_v27  ;;  %vm16027_vm2 = vmmov %vm15922_vm0 }
 0x612   : > { %9206 = vmatmul.mubr.msk.f32.gmra.mxu0 %vm16023_vm12, %v13373_v51  ;;  %9155 = vmatprep.mubr.msk.f32.mxu1 %vm15922_vm0, %v16024_v30  ;;  %vm16028_vm11 = vmmov %vm15922_vm0 }
 0x613   : > { %9208 = vmatprep.mubr.msk.f32.mxu0 %vm16025_vm6, %v15919_v28  ;;  %vm16030_vm13 = vmmov %vm15922_vm0  ;;  %v16038_v28 = vld [vmem:[#allocation66_spill] sm:$0xff] }
 0x614   : > { %vm16031_vm1 = vmmov %vm15922_vm0 }
 0x615   : > { %9156 = vmatmul.mubr.msk.f32.gmra.mxu1 %vm16027_vm2, %v16026_v13  ;;  %vm16033_vm7 = vmmov %vm15922_vm0 }
 0x616   : > { %9209 = vmatmul.mubr.msk.f32.gmra.mxu0 %vm16028_vm11, %v13387_v4  ;;  %9158 = vmatprep.mubr.msk.f32.mxu1 %vm16030_vm13, %v16029_v45  ;;  %vm16034_vm8 = vmmov %vm15922_vm0  ;;  %v16041_v4 = vld [vmem:[#allocation34_spill] sm:$0xff] }
 0x617   : > { %9211 = vmatprep.mubr.msk.f32.mxu0 %vm16031_vm1, %v15928_v38  ;;  %vm16036_vm4 = vmmov %vm15922_vm0  ;;  %v16044_v38 = vld [vmem:[#allocation51_spill] sm:$0xff] }
 0x618   : > { %vm16037_vm10 = vmmov %vm15922_vm0 }
 0x619   : > { %9159 = vmatmul.mubr.msk.f32.gmra.mxu1 %vm16033_vm7, %v16032_v52  ;;  %vm16039_vm5 = vmmov %vm15922_vm0 }
 0x61a   : > { %9212 = vmatmul.mubr.msk.f32.gmra.mxu0 %vm16034_vm8, %v13401_v0  ;;  %9161 = vmatprep.mubr.msk.f32.mxu1 %vm16036_vm4, %v16035_v32  ;;  %vm16040_vm9 = vmmov %vm15922_vm0  ;;  %v16046_v0 = vld [vmem:[#allocation61_spill] sm:$0xff] }
 0x61b   : > { %9214 = vmatprep.mubr.msk.f32.mxu0 %vm16037_vm10, %v15936_v33  ;;  %vm16042_vm14 = vmmov %vm15922_vm0  ;;  %v16049_v33 = vld [vmem:[#allocation65_spill] sm:$0xff] }
 0x61c   : > { %vm16043_vm12 = vmmov %vm15922_vm0 }
 0x61d   : > { %9162 = vmatmul.mubr.msk.f32.gmra.mxu1 %vm16039_vm5, %v16038_v28  ;;  %vm16045_vm6 = vmmov %vm15922_vm0 }
 0x61e   : > { %9215 = vmatmul.mubr.msk.f32.gmra.mxu0 %vm16040_vm9, %v13415_v6  ;;  %9164 = vmatprep.mubr.msk.f32.mxu1 %vm16042_vm14, %v16041_v4  ;;  %vm16047_vm2 = vmmov %vm15922_vm0  ;;  %v16052_v6 = vld [vmem:[#allocation71_spill] sm:$0xff] }
 0x61f   : > { %9217 = vmatprep.mubr.msk.f32.mxu0 %vm16043_vm12, %v15944_v22  ;;  %vm16048_vm11 = vmmov %vm15922_vm0  ;;  %v16055_v22 = vld [vmem:[#allocation67_spill] sm:$0xff] }
 0x620   : > { %vm16050_vm13 = vmmov %vm15922_vm0 }
 0x621   : > { %9165 = vmatmul.mubr.msk.f32.gmra.mxu1 %vm15922_vm0, %v16044_v38  ;;  %vm16051_vm1 = vmmov %vm15922_vm0 }
 0x622   : > { %9218 = vmatmul.mubr.msk.f32.gmra.mxu0 %vm16045_vm6, %v13429_v16  ;;  %9167 = vmatprep.mubr.msk.f32.mxu1 %vm16047_vm2, %v16046_v0  ;;  %vm16053_vm7 = vmmov %vm15922_vm0  ;;  %v16058_v16 = vld [vmem:[#allocation64_spill] sm:$0xff] }
 0x623   : > { %9220 = vmatprep.mubr.msk.f32.mxu0 %vm16048_vm11, %v13072_v24  ;;  %vm16054_vm8 = vmmov %vm15922_vm0 }
 0x624   : > { %vm16056_vm4 = vmmov %vm15922_vm0 }
 0x625   : > { %9168 = vmatmul.mubr.msk.f32.gmra.mxu1 %vm16050_vm13, %v16049_v33  ;;  %vm16057_vm10 = vmmov %vm15922_vm0 }
 0x626   : > { %9221 = vmatmul.mubr.msk.f32.gmra.mxu0 %vm16051_vm1, %v13443_v8  ;;  %9170 = vmatprep.mubr.msk.f32.mxu1 %vm16053_vm7, %v16052_v6  ;;  %vm16059_vm5 = vmmov %vm15922_vm0  ;;  %v16099_v8 = vld [vmem:[#allocation5_spill] sm:$0xff] }
 0x627   : > { %9223 = vmatprep.mubr.msk.f32.mxu0 %vm16054_vm8, %v13146_v29  ;;  %vm16060_vm9 = vmmov %vm15922_vm0 }
 0x628   : > { %vm16061_vm14 = vmmov %vm15922_vm0 }
 0x629   : > { %9171 = vmatmul.mubr.msk.f32.gmra.mxu1 %vm16056_vm4, %v16055_v22  ;;  %vm16062_vm12 = vmmov %vm15922_vm0 }
 0x62a   : > { %9224 = vmatmul.mubr.msk.f32.gmra.mxu0 %vm16057_vm10, %v13460_v46  ;;  %9173 = vmatprep.mubr.msk.f32.mxu1 %vm16059_vm5, %v16058_v16  ;;  %vm16063_vm6 = vmmov %vm15922_vm0 }
 0x62b   : > { %9226 = vmatprep.mubr.msk.f32.mxu0 %vm16060_vm9, %v13182_v41  ;;  %vm16064_vm2 = vmmov %vm15922_vm0  ;;  %v16068_v41 = vld [vmem:[#allocation45_spill] sm:$0xff] }
 0x62c   : > { %vm16065_vm11 = vmmov %vm15922_vm0 }
 0x62d   : > { %9174 = vmatmul.mubr.msk.f32.gmra.mxu1 %vm16061_vm14, %v12930_v59  ;;  %vm16066_vm13 = vmmov %vm15922_vm0 }
 0x62e   : > { %9227 = vmatmul.mubr.msk.f32.gmra.mxu0 %vm16062_vm12, %v13476_v25  ;;  %9176 = vmatprep.mubr.msk.f32.mxu1 %vm15922_vm0, %v12982_v50  ;;  %vm16067_vm1 = vmmov %vm15922_vm0 }
 0x62f   : > { %9229 = vmatprep.mubr.msk.f32.mxu0 %vm16063_vm6, %v13204_v43  ;;  %vm16069_vm7 = vmmov %vm15922_vm0  ;;  %v8995_v43 = vpop.f32.mrf.mxu0 }
 0x630   : > { %vm16070_vm8 = vmmov %vm15922_vm0 }
 0x631   : > { %9177 = vmatmul.mubr.msk.f32.gmra.mxu1 %vm16064_vm2, %v12932_v42  ;;  %vm16071_vm4 = vmmov %vm15922_vm0 }
 0x632   : > { %9230 = vmatmul.mubr.msk.f32.gmra.mxu0 %vm16065_vm11, %v13498_v34  ;;  %9179 = vmatprep.mubr.msk.f32.mxu1 %vm16066_vm13, %v12998_v60  ;;  %vm16072_vm10 = vmmov %vm15922_vm0 }
 0x633   : > { %9232 = vmatprep.mubr.msk.f32.mxu0 %vm16067_vm1, %v13228_v56  ;;  %vm16073_vm5 = vmmov %vm15922_vm0  ;;  %v16077_v56 = vld [vmem:[#allocation69_spill] sm:$0xff] }
 0x634   : > { %vm16074_vm9 = vmmov %vm15922_vm0 }
 0x635   : > { %9180 = vmatmul.mubr.msk.f32.gmra.mxu1 %vm16069_vm7, %v16068_v41  ;;  %vm16075_vm14 = vmmov %vm15922_vm0 }
 0x636   : > { %9233 = vmatmul.mubr.msk.f32.gmra.mxu0 %vm16070_vm8, %v13517_v31  ;;  %9182 = vmatprep.mubr.msk.f32.mxu1 %vm16071_vm4, %v13006_v40  ;;  %vm16076_vm12 = vmmov %vm15922_vm0  ;;  %v16078_v31 = vld [vmem:[#allocation10_spill] sm:$0xff] }
 0x637   : > { %9235 = vmatprep.mubr.msk.f32.mxu0 %vm16072_vm10, %v13250_v15  ;;  %vm16079_vm0 = vnez %v16078_v31  ;;  %vm16081_vm6 = vmmov %vm16067_vm1  ;;  %v13692_v31 = vld [vmem:[%s14565_s8] ss:$0 sm:$0xff] }
 0x638   : > { %v13671_v34 = vsel %vm16079_vm0, %v13522_v35, %v16077_v56  ;;  %vm16082_vm2 = vmmov %vm16067_vm1  ;;  %v5049_v56 = vpop.f32.mrf.mxu0 }
 0x639   : > { %9183 = vmatmul.mubr.msk.f32.gmra.mxu1 %vm16073_vm5, %v12936_v7  ;;  %16080 = vst [vmem:[#allocation106_spill] sm:$0xff] %v13671_v34  ;;  %vm16083_vm11 = vmmov %vm16067_vm1 }
 0x63a   : > { %9236 = vmatmul.mubr.msk.f32.gmra.mxu0 %vm16074_vm9, %v13537_v3  ;;  %9185 = vmatprep.mubr.msk.f32.mxu1 %vm16075_vm14, %v12942_v9  ;;  %vm16084_vm13 = vmmov %vm16067_vm1 }
 0x63b   : > { %9238 = vmatprep.mubr.msk.f32.mxu0 %vm16076_vm12, %v13489_v12  ;;  %vm16085_vm7 = vmmov %vm16067_vm1  ;;  %v8998_v12 = vpop.f32.mrf.mxu0 }
 0x63c   : > { %vm16086_vm8 = vmmov %vm16067_vm1 }
 0x63d   : > { %9186 = vmatmul.mubr.msk.f32.gmra.mxu1 %vm16081_vm6, %v12955_v53  ;;  %vm16087_vm4 = vmmov %vm16067_vm1  ;;  %v5059_v3 = vpop.f32.mrf.mxu0 }
 0x63e   : > { %9239 = vmatmul.mubr.msk.f32.gmra.mxu0 %vm16082_vm2, %v13671_v34  ;;  %9188 = vmatprep.mubr.msk.f32.mxu1 %vm16083_vm11, %v13450_v44  ;;  %v8945_v34 = vpop.f32.mrf.mxu1  ;;  %vm16088_vm10 = vmmov %vm16067_vm1 }
 0x63f   : > { %9293 = vmatprep.mubr.msk.f32.mxu0 %vm16084_vm13, %v16006_v19  ;;  %v4770_v19 = vadd.f32 %v8945_v34, %v13692_v31  ;;  %vm16089_vm5 = vmmov %vm16067_vm1  ;;  %v9001_v46 = vpop.f32.mrf.mxu0 }
 0x640   : > { %vm16091_vm9 = vmmov %vm16067_vm1 }
 0x641   : > { %9189 = vmatmul.mubr.msk.f32.gmra.mxu1 %vm16067_vm1, %v12958_v5  ;;  %vm16092_vm14 = vmmov %vm16067_vm1  ;;  %v13705_v34 = vadd.f32 %v8995_v43, %v4770_v19 }
 0x642   : > { %9294 = vmatmul.mubr.msk.f32.vlgmr.msra.gmra.mxu0 %vm16085_vm7, %v16009_v58  ;;  %9243 = vmatprep.mubr.msk.f32.mxu1 %vm16086_vm8, %v12734_v26  ;;  %v16090_v26 = vld [vmem:[#allocation44_spill] sm:$0xff]  ;;  %v4764_v58 = vpop.f32.mrf.mxu1  ;;  %vm16094_vm12 = vmmov %vm16067_vm1 }
 0x643   : > { %9296 = vmatprep.mubr.msk.f32.mxu0 %vm16087_vm4, %v16012_v39  ;;  %v4765_v39 = vadd.f32 %v13692_v31, %v4764_v58  ;;  %vm16095_vm0 = vmmov %vm16067_vm1 }
 0x644   : > { %v8948_v25 = vpop.f32.mrf.mxu1  ;;  %vm16097_vm6 = vmmov %vm16095_vm0 }
 0x645   : > { %9244 = vmatmul.mubr.msk.f32.vlgmr.msra.gmra.mxu1 %vm16088_vm10, %v12674_v23  ;;  %v16093_v23 = vld [vmem:[#allocation27_spill] sm:$0xff]  ;;  %vm16098_vm2 = vmmov %vm16095_vm0 }
 0x646   : > { %9297 = vmatmul.mubr.msk.f32.gmra.mxu0 %vm16089_vm5, %v16015_v57  ;;  %9342 = vmatpush3.msra.mxu1 %v13551_v11  ;;  %v13711_v11 = vadd.f32 %v5049_v56, %v4765_v39  ;;  %v4780_v57 = vadd.f32 %v8948_v25, %v13692_v31  ;;  %v4774_v43 = vpop.f32.mrf.mxu1  ;;  %vm16100_vm11 = vmmov %vm16095_vm0 }
 0x647   : > { %9246 = vmatprep.mubr.msk.f32.mxu1 %vm16091_vm9, %v16090_v26  ;;  %9299 = vmatprep.mubr.msk.f32.mxu0 %vm16092_vm14, %v16018_v55  ;;  %v16096_v26 = vld [vmem:[#allocation43_spill] sm:$0xff]  ;;  %v5069_v55 = vpop.f32.mrf.mxu0  ;;  %v4775_v19 = vadd.f32 %v13692_v31, %v4774_v43  ;;  %vm16101_vm13 = vmmov %vm16095_vm0  ;;  %v16107_v43 = vld [vmem:[#allocation38_spill] sm:$0xff] }
 0x648   : > { %v13719_v58 = vadd.f32 %v8998_v12, %v4780_v57  ;;  %vm16103_vm1 = vmmov %vm16095_vm0 }
 0x649   : > { %9247 = vmatmul.mubr.msk.f32.gmra.mxu1 %vm16094_vm12, %v16093_v23  ;;  %v8951_v23 = vpop.f32.mrf.mxu1  ;;  %v9004_v29 = vpop.f32.mrf.mxu0  ;;  %vm16104_vm7 = vmmov %vm16095_vm0 }
 0x64a   : > { %9300 = vmatmul.mubr.msk.f32.gmra.mxu0 %vm16095_vm0, %v16021_v27  ;;  %9249 = vmatprep.mubr.msk.f32.mxu1 %vm16097_vm6, %v16096_v26  ;;  %v4790_v25 = vadd.f32 %v8951_v23, %v13692_v31  ;;  %v16102_v27 = vld [vmem:[#allocation56_spill] sm:$0xff]  ;;  %vm16105_vm8 = vmmov %vm16095_vm0 }
 0x64b   : > { %9302 = vmatprep.mubr.msk.f32.mxu0 %vm16098_vm2, %v16024_v30  ;;  %v13730_v30 = vadd.f32 %v5059_v3, %v4775_v19  ;;  %v4784_v12 = vpop.f32.mrf.mxu1  ;;  %v5079_v56 = vpop.f32.mrf.mxu0  ;;  %vm16106_vm4 = vmmov %vm16095_vm0 }
 0x64c   : > { %v4785_v39 = vadd.f32 %v13692_v31, %v4784_v12  ;;  %v13733_v57 = vadd.f32 %v9001_v46, %v4790_v25  ;;  %vm16108_vm10 = vmmov %vm16095_vm0 }
 0x64d   : > { %9250 = vmatmul.mubr.msk.f32.gmra.mxu1 %vm16100_vm11, %v16099_v8  ;;  %v8954_v8 = vpop.f32.mrf.mxu1  ;;  %v9007_v26 = vpop.f32.mrf.mxu0  ;;  %vm16109_vm5 = vmmov %vm16095_vm0 }
 0x64e   : > { %9303 = vmatmul.mubr.msk.f32.gmra.mxu0 %vm16101_vm13, %v16026_v13  ;;  %9252 = vmatprep.mubr.msk.f32.mxu1 %vm16103_vm1, %v16102_v27  ;;  %v4800_v13 = vadd.f32 %v8954_v8, %v13692_v31  ;;  %v13744_v3 = vadd.f32 %v5069_v55, %v4785_v39  ;;  %vm16110_vm9 = vmmov %vm16095_vm0  ;;  %v16112_v27 = vld [vmem:[#allocation57_spill] sm:$0xff] }
 0x64f   : > { %9305 = vmatprep.mubr.msk.f32.mxu0 %vm16104_vm7, %v16029_v45  ;;  %v4794_v46 = vpop.f32.mrf.mxu1  ;;  %v5089_v45 = vpop.f32.mrf.mxu0  ;;  %vm16111_vm14 = vmmov %vm16095_vm0 }
 0x650   : > { %v4795_v19 = vadd.f32 %v13692_v31, %v4794_v46  ;;  %v13747_v23 = vadd.f32 %v9004_v29, %v4800_v13  ;;  %vm16113_vm12 = vmmov %vm16095_vm0  ;;  %v16116_v13 = vld [vmem:[#allocation93_spill] sm:$0xff] }
 0x651   : > { %9253 = vmatmul.mubr.msk.f32.gmra.mxu1 %vm16105_vm8, %v15899_v48  ;;  %v8957_v48 = vpop.f32.mrf.mxu1  ;;  %v9010_v25 = vpop.f32.mrf.mxu0  ;;  %vm16114_vm6 = vmmov %vm16095_vm0 }
 0x652   : > { %9306 = vmatmul.mubr.msk.f32.gmra.mxu0 %vm16106_vm4, %v16032_v52  ;;  %9255 = vmatprep.mubr.msk.f32.mxu1 %vm16108_vm10, %v16107_v43  ;;  %v4810_v52 = vadd.f32 %v8957_v48, %v13692_v31  ;;  %vm16115_vm2 = vmmov %vm16095_vm0  ;;  %v16121_v48 = vld [vmem:[#allocation6_spill] sm:$0xff] }
 0x653   : > { %9308 = vmatprep.mubr.msk.f32.mxu0 %vm16109_vm5, %v16035_v32  ;;  %v13758_v32 = vadd.f32 %v5079_v56, %v4795_v19  ;;  %v4804_v29 = vpop.f32.mrf.mxu1  ;;  %v5099_v55 = vpop.f32.mrf.mxu0  ;;  %vm16117_vm11 = vmmov %vm16095_vm0 }
 0x654   : > { %v4805_v12 = vadd.f32 %v13692_v31, %v4804_v29  ;;  %v13761_v39 = vadd.f32 %v9007_v26, %v4810_v52  ;;  %vm16118_vm13 = vmmov %vm16095_vm0 }
 0x655   : > { %9256 = vmatmul.mubr.msk.f32.gmra.mxu1 %vm16110_vm9, %v15908_v21  ;;  %v8960_v21 = vpop.f32.mrf.mxu1  ;;  %v9013_v8 = vpop.f32.mrf.mxu0  ;;  %vm16119_vm1 = vmmov %vm16095_vm0 }
 0x656   : > { %9309 = vmatmul.mubr.msk.f32.gmra.mxu0 %vm16111_vm14, %v16038_v28  ;;  %9258 = vmatprep.mubr.msk.f32.mxu1 %vm16113_vm12, %v16112_v27  ;;  %v4820_v28 = vadd.f32 %v8960_v21, %v13692_v31  ;;  %vm16120_vm7 = vmmov %vm16095_vm0 }
 0x657   : > { %9311 = vmatprep.mubr.msk.f32.mxu0 %vm16095_vm0, %v16041_v4  ;;  %v13772_v4 = vadd.f32 %v5089_v45, %v4805_v12  ;;  %v4814_v56 = vpop.f32.mrf.mxu1  ;;  %v5109_v26 = vpop.f32.mrf.mxu0  ;;  %vm16122_vm8 = vmmov %vm16095_vm0  ;;  %v16126_v12 = vld [vmem:[#allocation91_spill] sm:$0xff] }
 0x658   : > { %v4815_v43 = vadd.f32 %v13692_v31, %v4814_v56  ;;  %v13775_v46 = vadd.f32 %v9010_v25, %v4820_v28  ;;  %vm16123_vm4 = vmmov %vm16095_vm0 }
 0x659   : > { %9259 = vmatmul.mubr.msk.f32.gmra.mxu1 %vm16114_vm6, %v15917_v20  ;;  %v8963_v20 = vpop.f32.mrf.mxu1  ;;  %v9016_v19 = vpop.f32.mrf.mxu0  ;;  %vm16124_vm10 = vmmov %vm16095_vm0 }
 0x65a   : > { %9312 = vmatmul.mubr.msk.f32.gmra.mxu0 %vm16115_vm2, %v16044_v38  ;;  %9261 = vmatprep.mubr.msk.f32.mxu1 %vm16117_vm11, %v16116_v13  ;;  %v4830_v38 = vadd.f32 %v8963_v20, %v13692_v31  ;;  %vm16125_vm5 = vmmov %vm16095_vm0 }
 0x65b   : > { %9314 = vmatprep.mubr.msk.f32.mxu0 %vm16118_vm13, %v16046_v0  ;;  %v13786_v0 = vadd.f32 %v5099_v55, %v4815_v43  ;;  %v4824_v45 = vpop.f32.mrf.mxu1  ;;  %v5119_v25 = vpop.f32.mrf.mxu0  ;;  %vm16127_vm9 = vmmov %vm16095_vm0 }
 0x65c   : > { %v4825_v52 = vadd.f32 %v13692_v31, %v4824_v45  ;;  %v13789_v27 = vadd.f32 %v9013_v8, %v4830_v38  ;;  %vm16128_vm14 = vmmov %vm16095_vm0  ;;  %v16132_v38 = vld [vmem:[#allocation76_spill] sm:$0xff] }
 0x65d   : > { %9262 = vmatmul.mubr.msk.f32.gmra.mxu1 %vm16119_vm1, %v13001_v1  ;;  %v8966_v1 = vpop.f32.mrf.mxu1  ;;  %v9019_v29 = vpop.f32.mrf.mxu0  ;;  %vm16129_vm12 = vmmov %vm16095_vm0 }
 0x65e   : > { %9315 = vmatmul.mubr.msk.f32.gmra.mxu0 %vm16120_vm7, %v16049_v33  ;;  %9264 = vmatprep.mubr.msk.f32.mxu1 %vm16122_vm8, %v16121_v48  ;;  %v4840_v33 = vadd.f32 %v8966_v1, %v13692_v31  ;;  %vm16130_vm6 = vmmov %vm16095_vm0 }
 0x65f   : > { %9317 = vmatprep.mubr.msk.f32.mxu0 %vm16123_vm4, %v16052_v6  ;;  %v13800_v6 = vadd.f32 %v5109_v26, %v4825_v52  ;;  %v4834_v55 = vpop.f32.mrf.mxu1  ;;  %v5129_v21 = vpop.f32.mrf.mxu0  ;;  %vm16131_vm2 = vmmov %vm16095_vm0 }
 0x660   : > { %v4835_v8 = vadd.f32 %v13692_v31, %v4834_v55  ;;  %v13803_v28 = vadd.f32 %v9016_v19, %v4840_v33  ;;  %vm16133_vm11 = vmmov %vm16095_vm0  ;;  %v16138_v33 = vld [vmem:[#allocation95_spill] sm:$0xff] }
 0x661   : > { %9265 = vmatmul.mubr.msk.f32.gmra.mxu1 %vm16124_vm10, %v13126_v18  ;;  %v8969_v18 = vpop.f32.mrf.mxu1  ;;  %v9022_v13 = vpop.f32.mrf.mxu0  ;;  %vm16134_vm13 = vmmov %vm16095_vm0 }
 0x662   : > { %9318 = vmatmul.mubr.msk.f32.gmra.mxu0 %vm16125_vm5, %v16055_v22  ;;  %9267 = vmatprep.mubr.msk.f32.mxu1 %vm16127_vm9, %v16126_v12  ;;  %v4850_v22 = vadd.f32 %v8969_v18, %v13692_v31  ;;  %vm16136_vm1 = vmmov %vm16095_vm0  ;;  %v16141_v12 = vld [vmem:[#allocation98_spill] sm:$0xff] }
 0x663   : > { %9320 = vmatprep.mubr.msk.f32.mxu0 %vm16128_vm14, %v16058_v16  ;;  %v13814_v16 = vadd.f32 %v5119_v25, %v4835_v8  ;;  %v4844_v56 = vpop.f32.mrf.mxu1  ;;  %v5139_v26 = vpop.f32.mrf.mxu0  ;;  %vm16137_vm7 = vmmov %vm16095_vm0 }
 0x664   : > { %v4845_v43 = vadd.f32 %v13692_v31, %v4844_v56  ;;  %v13817_v20 = vadd.f32 %v9019_v29, %v4850_v22  ;;  %vm16139_vm8 = vmmov %vm16095_vm0  ;;  %v16144_v56 = vld [vmem:[#allocation97_spill] sm:$0xff] }
 0x665   : > { %9268 = vmatmul.mubr.msk.f32.gmra.mxu1 %vm16129_vm12, %v13166_v61  ;;  %v8972_v61 = vpop.f32.mrf.mxu1  ;;  %v9025_v19 = vpop.f32.mrf.mxu0  ;;  %vm16140_vm4 = vmmov %vm16095_vm0 }
 0x666   : > { %9321 = vmatmul.mubr.msk.f32.gmra.mxu0 %vm16095_vm0, %v12930_v59  ;;  %9270 = vmatprep.mubr.msk.f32.mxu1 %vm16130_vm6, %v13175_v47  ;;  %v4860_v59 = vadd.f32 %v8972_v61, %v13692_v31  ;;  %v16135_v47 = vld [vmem:[#allocation96_spill] sm:$0xff]  ;;  %vm16142_vm10 = vmmov %vm16095_vm0 }
 0x667   : > { %9323 = vmatprep.mubr.msk.f32.mxu0 %vm16131_vm2, %v12982_v50  ;;  %v13828_v50 = vadd.f32 %v5129_v21, %v4845_v43  ;;  %v4854_v48 = vpop.f32.mrf.mxu1  ;;  %v5149_v45 = vpop.f32.mrf.mxu0  ;;  %vm16143_vm5 = vmmov %vm16095_vm0  ;;  %v16147_v43 = vld [vmem:[#allocation100_spill] sm:$0xff] }
 0x668   : > { %v4855_v25 = vadd.f32 %v13692_v31, %v4854_v48  ;;  %v13831_v52 = vadd.f32 %v9022_v13, %v4860_v59  ;;  %vm16145_vm9 = vmmov %vm16095_vm0  ;;  %v16151_v48 = vld [vmem:[#allocation52_spill] sm:$0xff] }
 0x669   : > { %9271 = vmatmul.mubr.msk.f32.gmra.mxu1 %vm16133_vm11, %v16132_v38  ;;  %v8975_v1 = vpop.f32.mrf.mxu1  ;;  %v9028_v29 = vpop.f32.mrf.mxu0  ;;  %vm16146_vm14 = vmmov %vm16095_vm0 }
 0x66a   : > { %9324 = vmatmul.mubr.msk.f32.gmra.mxu0 %vm16134_vm13, %v12932_v42  ;;  %9273 = vmatprep.mubr.msk.f32.mxu1 %vm16136_vm1, %v16135_v47  ;;  %v4870_v42 = vadd.f32 %v8975_v1, %v13692_v31  ;;  %vm16148_vm12 = vmmov %vm16095_vm0 }
 0x66b   : > { %9326 = vmatprep.mubr.msk.f32.mxu0 %vm16137_vm7, %v12998_v60  ;;  %v13842_v60 = vadd.f32 %v5139_v26, %v4855_v25  ;;  %v4864_v55 = vpop.f32.mrf.mxu1  ;;  %v5159_v21 = vpop.f32.mrf.mxu0  ;;  %vm16149_vm6 = vmmov %vm16095_vm0 }
 0x66c   : > { %v4865_v8 = vadd.f32 %v13692_v31, %v4864_v55  ;;  %v13845_v18 = vadd.f32 %v9025_v19, %v4870_v42  ;;  %vm16150_vm2 = vmmov %vm16095_vm0 }
 0x66d   : > { %9274 = vmatmul.mubr.msk.f32.gmra.mxu1 %vm16139_vm8, %v16138_v33  ;;  %v8978_v13 = vpop.f32.mrf.mxu1  ;;  %v9031_v22 = vpop.f32.mrf.mxu0  ;;  %vm16152_vm11 = vmmov %vm16095_vm0 }
 0x66e   : > { %9327 = vmatmul.mubr.msk.f32.gmra.mxu0 %vm16140_vm4, %v16068_v41  ;;  %9276 = vmatprep.mubr.msk.f32.mxu1 %vm16142_vm10, %v16141_v12  ;;  %v4880_v41 = vadd.f32 %v8978_v13, %v13692_v31  ;;  %vm16153_vm13 = vmmov %vm16095_vm0 }
 0x66f   : > { %9329 = vmatprep.mubr.msk.f32.mxu0 %vm16143_vm5, %v13006_v40  ;;  %v13856_v40 = vadd.f32 %v5149_v45, %v4865_v8  ;;  %v4874_v26 = vpop.f32.mrf.mxu1  ;;  %v5169_v61 = vpop.f32.mrf.mxu0  ;;  %vm16154_vm1 = vmmov %vm16095_vm0 }
 0x670   : > { %v4875_v19 = vadd.f32 %v13692_v31, %v4874_v26  ;;  %v13859_v38 = vadd.f32 %v9028_v29, %v4880_v41  ;;  %vm16155_vm7 = vmmov %vm16095_vm0 }
 0x671   : > { %9277 = vmatmul.mubr.msk.f32.gmra.mxu1 %vm16145_vm9, %v16144_v56  ;;  %v8981_v59 = vpop.f32.mrf.mxu1  ;;  %v9034_v47 = vpop.f32.mrf.mxu0  ;;  %vm16156_vm8 = vmmov %vm16095_vm0 }
 0x672   : > { %9330 = vmatmul.mubr.msk.f32.gmra.mxu0 %vm16146_vm14, %v12936_v7  ;;  %9279 = vmatprep.mubr.msk.f32.mxu1 %vm16148_vm12, %v16147_v43  ;;  %v4890_v7 = vadd.f32 %v8981_v59, %v13692_v31  ;;  %v13870_v45 = vadd.f32 %v5159_v21, %v4875_v19  ;;  %vm16157_vm4 = vmmov %vm16095_vm0 }
 0x673   : > { %9332 = vmatprep.mubr.msk.f32.mxu0 %vm16095_vm0, %v12942_v9  ;;  %v4884_v25 = vpop.f32.mrf.mxu1  ;;  %v5179_v1 = vpop.f32.mrf.mxu0  ;;  %vm16158_vm10 = vmmov %vm16095_vm0 }
 0x674   : > { %v4885_v29 = vadd.f32 %v13692_v31, %v4884_v25  ;;  %v13873_v33 = vadd.f32 %v9031_v22, %v4890_v7  ;;  %vm16159_vm5 = vmmov %vm16095_vm0 }
 0x675   : > { %9280 = vmatmul.mubr.msk.f32.gmra.mxu1 %vm16149_vm6, %v13255_v37  ;;  %v8984_v37 = vpop.f32.mrf.mxu1  ;;  %v9037_v42 = vpop.f32.mrf.mxu0  ;;  %vm16162_vm9 = vmmov %vm16095_vm0 }
 0x676   : > { %9333 = vmatmul.mubr.msk.f32.gmra.mxu0 %vm16150_vm2, %v12955_v53  ;;  %9282 = vmatprep.mubr.msk.f32.mxu1 %vm16152_vm11, %v16151_v48  ;;  %v4900_v12 = vadd.f32 %v8984_v37, %v13692_v31  ;;  %vm16163_vm14 = vmmov %vm16095_vm0 }
 0x677   : > { %9335 = vmatprep.mubr.msk.f32.mxu0 %vm16153_vm13, %v13450_v44  ;;  %v13884_v44 = vadd.f32 %v5169_v61, %v4885_v29  ;;  %v4894_v55 = vpop.f32.mrf.mxu1  ;;  %v5189_v21 = vpop.f32.mrf.mxu0  ;;  %vm16165_vm12 = vmmov %vm16095_vm0 }
 0x678   : > { %v4895_v8 = vadd.f32 %v13692_v31, %v4894_v55  ;;  %v13887_v13 = vadd.f32 %v9034_v47, %v4900_v12  ;;  %vm16166_vm6 = vmmov %vm16095_vm0 }
 0x679   : > { %9283 = vmatmul.mubr.msk.f32.gmra.mxu1 %vm16154_vm1, %v13275_v14  ;;  %vm16167_vm2 = vmmov %vm16095_vm0 }
 0x67a   : > { %9336 = vmatmul.mubr.msk.f32.gmra.mxu0 %vm16155_vm7, %v12958_v5  ;;  %9285 = vmatprep.mubr.msk.f32.mxu1 %vm16156_vm8, %v13507_v49  ;;  %v16160_v5 = vld [vmem:[#allocation88_spill] sm:$0xff]  ;;  %v13899_v43 = vadd.f32 %v5179_v1, %v4895_v8  ;;  %vm16168_vm11 = vmmov %vm16095_vm0 }
 0x67b   : > { %9338 = vmatprep.mubr.msk.f32.mxu0 %vm16157_vm4, %v12942_v9  ;;  %v8987_v22 = vpop.f32.mrf.mxu1  ;;  %v4554_v9 = vsel %vm11543_vm3, %v13250_v15, %v16160_v5  ;;  %vm16164_vm3 = vmmov %vm16095_vm0 }
 0x67c   : > { %v9040_v56 = vpop.f32.mrf.mxu0  ;;  %v4910_v41 = vadd.f32 %v8987_v22, %v13692_v31  ;;  %vm16169_vm13 = vmmov %vm16095_vm0 }
 0x67d   : > { %9286 = vmatmul.mubr.msk.f32.gmra.mxu1 %vm16158_vm10, %v13522_v35  ;;  %v4904_v26 = vpop.f32.mrf.mxu1  ;;  %vm16170_vm1 = vmmov %vm16095_vm0 }
 0x67e   : > { %9339 = vmatmul.mubr.msk.f32.gmra.mxu0 %vm16159_vm5, %v12955_v53  ;;  %9288 = vmatprep.mubr.msk.f32.mxu1 %vm16162_vm9, %v4554_v9  ;;  %v5199_v61 = vpop.f32.mrf.mxu0  ;;  %v4905_v19 = vadd.f32 %v13692_v31, %v4904_v26  ;;  %v13902_v59 = vadd.f32 %v9037_v42, %v4910_v41  ;;  %vm16172_vm7 = vmmov %vm16095_vm0 }
 0x67f   : > { %vm16174_vm8 = vmmov %vm16095_vm0 }
 0x680   : > { %v8990_v35 = vpop.f32.mrf.mxu1  ;;  %v13909_v7 = vadd.f32 %v5189_v21, %v4905_v19  ;;  %vm16176_vm4 = vmmov %vm16095_vm0 }
 0x681   : > { %v9095_v47 = vpop.f32.mrf.mxu0  ;;  %9289 = vmatmul.mubr.msk.f32.gmra.mxu1 %vm16163_vm14, %v13275_v14  ;;  %v4920_v53 = vadd.f32 %v8990_v35, %v13692_v31  ;;  %vm16178_vm10 = vmmov %vm16095_vm0 }
 0x682   : > { %9343 = vmatprep.mubr.msk.f32.mxu1 %vm16164_vm3, %v12648_v17  ;;  %v4914_v48 = vpop.f32.mrf.mxu1  ;;  %vm16180_vm5 = vmmov %vm16095_vm0 }
 0x683   : > { %v5669_v25 = vpop.f32.mrf.mxu0  ;;  %v4915_v1 = vadd.f32 %v13692_v31, %v4914_v48  ;;  %v13912_v29 = vadd.f32 %v9040_v56, %v4920_v53  ;;  %vm16182_vm9 = vmmov %vm16095_vm0 }
 0x684   : > { %vm16184_vm14 = vmmov %vm16095_vm0 }
 0x685   : > { %v9045_v37 = vpop.f32.mrf.mxu1  ;;  %9344 = vmatmul.mubr.msk.f32.vlgmr.msra.gmra.mxu1 %vm16165_vm12, %v13331_v54  ;;  %v13919_v55 = vadd.f32 %v5199_v61, %v4915_v1  ;;  %vm16186_vm3 = vmmov %vm16095_vm0 }
 0x686   : > { %v9098_v42 = vpop.f32.mrf.mxu0  ;;  %v5562_v12 = vadd.f32 %v9045_v37, %v13705_v34  ;;  %9346 = vmatprep.mubr.msk.f32.mxu1 %vm16095_vm0, %v15892_v10  ;;  %v16173_v37 = vld [vmem:[#allocation99_spill] sm:$0xff]  ;;  %vm16187_vm12 = vmmov %vm16095_vm0 }
 0x687   : > { %v5402_v17 = vpop.f32.mrf.mxu1 }
 0x688   : > { %v5679_v21 = vpop.f32.mrf.mxu0  ;;  %v5561_v8 = vadd.f32 %v5402_v17, %v13711_v11  ;;  %v13922_v22 = vadd.f32 %v9095_v47, %v5562_v12  ;;  %v16171_v47 = vld [vmem:[#allocation58_spill] sm:$0xff] }
 0x689   : > { %v9048_v31 = vpop.f32.mrf.mxu1  ;;  %9347 = vmatmul.mubr.msk.f32.gmra.mxu1 %vm16166_vm6, %v13345_v62  ;;  %vm16190_vm6 = vmmov %vm16095_vm0 }
 0x68a   : > { %v9101_v56 = vpop.f32.mrf.mxu0  ;;  %v5564_v54 = vadd.f32 %v9048_v31, %v13719_v58  ;;  %9349 = vmatprep.mubr.msk.f32.mxu1 %vm16167_vm2, %v15901_v2  ;;  %v13929_v34 = vadd.f32 %v5669_v25, %v5561_v8  ;;  %vm16192_vm2 = vmmov %vm16095_vm0 }
 0x68b   : > { %v5412_v10 = vpop.f32.mrf.mxu1 }
 0x68c   : > { %v5689_v5 = vpop.f32.mrf.mxu0  ;;  %v5563_v49 = vadd.f32 %v5412_v10, %v13730_v30  ;;  %v13932_v9 = vadd.f32 %v9098_v42, %v5564_v54  ;;  %v16175_v42 = vld [vmem:[#allocation68_spill] sm:$0xff] }
 0x68d   : > { %v9051_v11 = vpop.f32.mrf.mxu1  ;;  %9350 = vmatmul.mubr.msk.f32.gmra.mxu1 %vm16168_vm11, %v13359_v36  ;;  %v16179_v10 = vld [vmem:[#allocation48_spill] sm:$0xff]  ;;  %vm16194_vm11 = vmmov %vm16095_vm0 }
 0x68e   : > { %v9104_v41 = vpop.f32.mrf.mxu0  ;;  %v5566_v62 = vadd.f32 %v9051_v11, %v13733_v57  ;;  %9352 = vmatprep.mubr.msk.f32.mxu1 %vm16169_vm13, %v15910_v63  ;;  %v13939_v58 = vadd.f32 %v5679_v21, %v5563_v49  ;;  %vm16196_vm13 = vmmov %vm16095_vm0 }
 0x68f   : > { %v5422_v2 = vpop.f32.mrf.mxu1 }
 0x690   : > { %v5699_v26 = vpop.f32.mrf.mxu0  ;;  %v5565_v61 = vadd.f32 %v5422_v2, %v13744_v3  ;;  %v13942_v19 = vadd.f32 %v9101_v56, %v5566_v62  ;;  %v16177_v56 = vld [vmem:[#allocation81_spill] sm:$0xff] }
 0x691   : > { %v9054_v30 = vpop.f32.mrf.mxu1  ;;  %9353 = vmatmul.mubr.msk.f32.gmra.mxu1 %vm16170_vm1, %v13373_v51  ;;  %v16181_v2 = vld [vmem:[#allocation101_spill] sm:$0xff]  ;;  %vm16198_vm1 = vmmov %vm16095_vm0 }
 0x692   : > { %v9107_v35 = vpop.f32.mrf.mxu0  ;;  %v5568_v36 = vadd.f32 %v9054_v30, %v13747_v23  ;;  %9355 = vmatprep.mubr.msk.f32.mxu1 %vm16172_vm7, %v16171_v47  ;;  %v13949_v57 = vadd.f32 %v5689_v5, %v5565_v61  ;;  %v16183_v61 = vld [vmem:[#allocation60_spill] sm:$0xff]  ;;  %vm16200_vm7 = vmmov %vm16095_vm0 }
 0x693   : > { %v5432_v63 = vpop.f32.mrf.mxu1 }
 0x694   : > { %v5709_v53 = vpop.f32.mrf.mxu0  ;;  %v5567_v48 = vadd.f32 %v5432_v63, %v13758_v32  ;;  %v13952_v25 = vadd.f32 %v9104_v41, %v5568_v36 }
 0x695   : > { %v9057_v3 = vpop.f32.mrf.mxu1  ;;  %9356 = vmatmul.mubr.msk.f32.gmra.mxu1 %vm16174_vm8, %v16173_v37  ;;  %vm16202_vm8 = vmmov %vm16095_vm0 }
 0x696   : > { %v9110_v1 = vpop.f32.mrf.mxu0  ;;  %v5570_v51 = vadd.f32 %v9057_v3, %v13761_v39  ;;  %9358 = vmatprep.mubr.msk.f32.mxu1 %vm16176_vm4, %v16175_v42  ;;  %v13959_v23 = vadd.f32 %v5699_v26, %v5567_v48  ;;  %vm16204_vm4 = vmmov %vm16095_vm0 }
 0x697   : > { %v5442_v12 = vpop.f32.mrf.mxu1 }
 0x698   : > { %v5719_v17 = vpop.f32.mrf.mxu0  ;;  %v5569_v21 = vadd.f32 %v5442_v12, %v13772_v4  ;;  %v13962_v8 = vadd.f32 %v9107_v35, %v5570_v51  ;;  %v16188_v12 = vld [vmem:[#allocation55_spill] sm:$0xff] }
 0x699   : > { %v9060_v32 = vpop.f32.mrf.mxu1  ;;  %9359 = vmatmul.mubr.msk.f32.gmra.mxu1 %vm16178_vm10, %v16177_v56  ;;  %vm16205_vm10 = vmmov %vm16095_vm0 }
 0x69a   : > { %v9113_v31 = vpop.f32.mrf.mxu0  ;;  %v5572_v54 = vadd.f32 %v9060_v32, %v13775_v46  ;;  %9361 = vmatprep.mubr.msk.f32.mxu1 %vm16180_vm5, %v16179_v10  ;;  %v13969_v39 = vadd.f32 %v5709_v53, %v5569_v21  ;;  %v16185_v53 = vld [vmem:[#allocation103_spill] sm:$0xff]  ;;  %v16191_v10 = vld [vmem:[#allocation102_spill] sm:$0xff]  ;;  %vm16207_vm5 = vmmov %vm16095_vm0 }
 0x69b   : > { %v5452_v5 = vpop.f32.mrf.mxu1  ;;  %v16189_v21 = vld [vmem:[#allocation11_spill] sm:$0xff] }
 0x69c   : > { %v5729_v49 = vpop.f32.mrf.mxu0  ;;  %v5571_v11 = vadd.f32 %v5452_v5, %v13786_v0  ;;  %v13972_v41 = vadd.f32 %v9110_v1, %v5572_v54 }
 0x69d   : > { %v9063_v4 = vpop.f32.mrf.mxu1  ;;  %9362 = vmatmul.mubr.msk.f32.gmra.mxu1 %vm16182_vm9, %v16181_v2  ;;  %vm16209_vm9 = vmmov %vm16095_vm0 }
 0x69e   : > { %v9116_v62 = vpop.f32.mrf.mxu0  ;;  %v5574_v26 = vadd.f32 %v9063_v4, %v13789_v27  ;;  %9364 = vmatprep.mubr.msk.f32.mxu1 %vm16184_vm14, %v16183_v61  ;;  %v13979_v46 = vadd.f32 %v5719_v17, %v5571_v11  ;;  %v16195_v61 = vld [vmem:[#allocation105_spill] sm:$0xff]  ;;  %vm16211_vm14 = vmmov %vm16095_vm0 }
 0x69f   : > { %v5462_v30 = vpop.f32.mrf.mxu1 }
 0x6a0   : > { %v5739_v35 = vpop.f32.mrf.mxu0  ;;  %v5573_v36 = vadd.f32 %v5462_v30, %v13800_v6  ;;  %v13982_v47 = vadd.f32 %v9113_v31, %v5574_v26 }
 0x6a1   : > { %v9066_v0 = vpop.f32.mrf.mxu1  ;;  %9365 = vmatmul.mubr.msk.f32.gmra.mxu1 %vm16186_vm3, %v16185_v53  ;;  %vm16212_vm3 = vmmov %vm16095_vm0 }
 0x6a2   : > { %v9119_v63 = vpop.f32.mrf.mxu0  ;;  %v5576_v48 = vadd.f32 %v9066_v0, %v13803_v28  ;;  %9367 = vmatprep.mubr.msk.f32.mxu1 %vm16187_vm12, %v13072_v24  ;;  %v13989_v27 = vadd.f32 %v5729_v49, %v5573_v36  ;;  %v16193_v49 = vld [vmem:[#allocation46_spill] sm:$0xff]  ;;  %vm16215_vm12 = vmmov %vm16095_vm0 }
 0x6a3   : > { %v5472_v3 = vpop.f32.mrf.mxu1 }
 0x6a4   : > { %v5749_v1 = vpop.f32.mrf.mxu0  ;;  %v5575_v37 = vadd.f32 %v5472_v3, %v13814_v16  ;;  %v13992_v51 = vadd.f32 %v9116_v62, %v5576_v48  ;;  %v16199_v3 = vld [vmem:[#allocation104_spill] sm:$0xff] }
 0x6a5   : > { %v9069_v6 = vpop.f32.mrf.mxu1  ;;  %9368 = vmatmul.mubr.msk.f32.gmra.mxu1 %vm16095_vm0, %v16188_v12 }
 0x6a6   : > { %v9122_v42 = vpop.f32.mrf.mxu0  ;;  %v5578_v17 = vadd.f32 %v9069_v6, %v13817_v20  ;;  %9370 = vmatprep.mubr.msk.f32.mxu1 %vm16190_vm6, %v16189_v21  ;;  %v13999_v28 = vadd.f32 %v5739_v35, %v5575_v37  ;;  %v16197_v35 = vld [vmem:[#allocation75_spill] sm:$0xff]  ;;  %vm16271_vm6 = vmmov %vm16095_vm0 }
 0x6a7   : > { %v5482_v24 = vpop.f32.mrf.mxu1  ;;  %v16201_v37 = vld [vmem:[#allocation79_spill] sm:$0xff] }
 0x6a8   : > { %v5759_v32 = vpop.f32.mrf.mxu0  ;;  %v5577_v31 = vadd.f32 %v5482_v24, %v13828_v50  ;;  %v14002_v56 = vadd.f32 %v9119_v63, %v5578_v17  ;;  %v16203_v24 = vld [vmem:[#allocation107_spill] sm:$0xff] }
 0x6a9   : > { %v9072_v16 = vpop.f32.mrf.mxu1  ;;  %9371 = vmatmul.mubr.msk.f32.gmra.mxu1 %vm16192_vm2, %v16191_v10  ;;  %vm16272_vm2 = vmmov %vm16095_vm0 }
 0x6aa   : > { %v9125_v54 = vpop.f32.mrf.mxu0  ;;  %v5580_v5 = vadd.f32 %v9072_v16, %v13831_v52  ;;  %9373 = vmatprep.mubr.msk.f32.mxu1 %vm16194_vm11, %v16193_v49  ;;  %v14009_v20 = vadd.f32 %v5749_v1, %v5577_v31  ;;  %v16206_v49 = vld [vmem:[#allocation59_spill] sm:$0xff]  ;;  %vm16273_vm11 = vmmov %vm16095_vm0 }
 0x6ab   : > { %v5492_v11 = vpop.f32.mrf.mxu1 }
 0x6ac   : > { %v5769_v4 = vpop.f32.mrf.mxu0  ;;  %v5579_v62 = vadd.f32 %v5492_v11, %v13842_v60  ;;  %v14012_v2 = vadd.f32 %v9122_v42, %v5580_v5 }
 0x6ad   : > { %v9075_v50 = vpop.f32.mrf.mxu1  ;;  %9374 = vmatmul.mubr.msk.f32.gmra.mxu1 %vm16196_vm13, %v16195_v61  ;;  %vm16274_vm13 = vmmov %vm16095_vm0 }
 0x6ae   : > { %v9128_v26 = vpop.f32.mrf.mxu0  ;;  %v5582_v30 = vadd.f32 %v9075_v50, %v13845_v18  ;;  %9376 = vmatprep.mubr.msk.f32.mxu1 %vm16198_vm1, %v16197_v35  ;;  %v14019_v52 = vadd.f32 %v5759_v32, %v5579_v62  ;;  %v16210_v35 = vld [vmem:[#allocation106_spill] sm:$0xff]  ;;  %vm16275_vm1 = vmmov %vm16095_vm0 }
 0x6af   : > { %v5502_v36 = vpop.f32.mrf.mxu1 }
 0x6b0   : > { %v5779_v0 = vpop.f32.mrf.mxu0  ;;  %v5581_v63 = vadd.f32 %v5502_v36, %v13856_v40  ;;  %v14022_v53 = vadd.f32 %v9125_v54, %v5582_v30 }
 0x6b1   : > { %v9078_v60 = vpop.f32.mrf.mxu1  ;;  %9377 = vmatmul.mubr.msk.f32.gmra.mxu1 %vm16200_vm7, %v16199_v3  ;;  %vm16276_vm7 = vmmov %vm16095_vm0 }
 0x6b2   : > { %v9131_v48 = vpop.f32.mrf.mxu0  ;;  %v5584_v1 = vadd.f32 %v9078_v60, %v13859_v38  ;;  %9379 = vmatprep.mubr.msk.f32.mxu1 %vm16202_vm8, %v16201_v37  ;;  %v14029_v18 = vadd.f32 %v5769_v4, %v5581_v63  ;;  %v16208_v4 = vld [vmem:[#allocation83_spill] sm:$0xff]  ;;  %vm16279_vm8 = vmmov %vm16095_vm0 }
 0x6b3   : > { %v5512_v6 = vpop.f32.mrf.mxu1 }
 0x6b4   : > { %v5789_v42 = vpop.f32.mrf.mxu0  ;;  %v5583_v12 = vadd.f32 %v5512_v6, %v13870_v45  ;;  %v14032_v17 = vadd.f32 %v9128_v26, %v5584_v1 }
 0x6b5   : > { %v9081_v40 = vpop.f32.mrf.mxu1  ;;  %9380 = vmatmul.mubr.msk.f32.gmra.mxu1 %vm16204_vm4, %v16203_v24  ;;  %vm16283_vm4 = vmmov %vm16095_vm0 }
 0x6b6   : > { %v9134_v21 = vpop.f32.mrf.mxu0  ;;  %v5586_v32 = vadd.f32 %v9081_v40, %v13873_v33  ;;  %9382 = vmatprep.mubr.msk.f32.mxu1 %vm16205_vm10, %v13250_v15  ;;  %v14039_v38 = vadd.f32 %v5779_v0, %v5583_v12  ;;  %vm16288_vm10 = vmmov %vm16095_vm0 }
 0x6b7   : > { %v5522_v31 = vpop.f32.mrf.mxu1 }
 0x6b8   : > { %v5799_v16 = vpop.f32.mrf.mxu0  ;;  %v5585_v54 = vadd.f32 %v5522_v31, %v13884_v44  ;;  %v14042_v10 = vadd.f32 %v9131_v48, %v5586_v32  ;;  %v16213_v48 = vld [vmem:[#allocation94_spill] sm:$0xff] }
 0x6b9   : > { %v9084_v45 = vpop.f32.mrf.mxu1  ;;  %9383 = vmatmul.mubr.msk.f32.gmra.mxu1 %vm16207_vm5, %v16206_v49  ;;  %v4591_v3 = vsel %vm11745_vm15, %v13275_v14, %v16213_v48  ;;  %vm16270_vm15 = vmmov %vm16095_vm0 }
 0x6ba   : > { %v9137_v5 = vpop.f32.mrf.mxu0  ;;  %v5588_v11 = vadd.f32 %v9084_v45, %v13887_v13  ;;  %9385 = vmatprep.mubr.msk.f32.mxu1 %vm16209_vm9, %v16208_v4  ;;  %v14049_v33 = vadd.f32 %v5789_v42, %v5585_v54  ;;  %vm16293_vm5 = vmmov %vm16095_vm0 }
 0x6bb   : > { %v5532_v62 = vpop.f32.mrf.mxu1  ;;  %vm16298_vm9 = vmmov %vm16095_vm0 }
 0x6bc   : > { %v5809_v50 = vpop.f32.mrf.mxu0  ;;  %v5587_v26 = vadd.f32 %v5532_v62, %v13899_v43  ;;  %v14052_v61 = vadd.f32 %v9134_v21, %v5588_v11 }
 0x6bd   : > { %v9087_v44 = vpop.f32.mrf.mxu1  ;;  %9386 = vmatmul.mubr.msk.f32.gmra.mxu1 %vm16211_vm14, %v16210_v35  ;;  %vm16302_vm14 = vmmov %vm16095_vm0 }
 0x6be   : > { %v9140_v30 = vpop.f32.mrf.mxu0  ;;  %v5590_v36 = vadd.f32 %v9087_v44, %v13902_v59  ;;  %9388 = vmatprep.mubr.msk.f32.mxu1 %vm16212_vm3, %v13250_v15  ;;  %v14059_v13 = vadd.f32 %v5799_v16, %v5587_v26  ;;  %vm16306_vm3 = vmmov %vm16095_vm0 }
 0x6bf   : > { %v5542_v0 = vpop.f32.mrf.mxu1 }
 0x6c0   : > { %v5819_v63 = vpop.f32.mrf.mxu0  ;;  %v5589_v60 = vadd.f32 %v5542_v0, %v13909_v7  ;;  %v14066_v1 = vadd.f32 %v9137_v5, %v5590_v36 }
 0x6c1   : > { %v9090_v37 = vpop.f32.mrf.mxu1  ;;  %9389 = vmatmul.mubr.msk.f32.gmra.mxu1 %vm16215_vm12, %v4591_v3  ;;  %vm16310_vm12 = vmmov %vm16095_vm0 }
 0x6c2   : > { %v14068_v6 = vpop.f32.mrf.mxu0  ;;  %v5592_v15 = vadd.f32 %v9090_v37, %v13912_v29  ;;  %v14072_v59 = vadd.f32 %v5809_v50, %v5589_v60 }
 0x6c3   : > { %v5552_v42 = vpop.f32.mrf.mxu1 }
 0x6c4   : > { %v14074_v12 = vpop.f32.mrf.mxu0  ;;  %v5591_v7 = vadd.f32 %v5552_v42, %v13919_v55  ;;  %v14077_v40 = vadd.f32 %v9140_v30, %v5592_v15 }
 0x6c5   : > { %v9145_v21 = vpop.f32.mrf.mxu1 }
 0x6c6   : > { %v14079_v14 = vpop.f32.mrf.mxu0  ;;  %v14082_v24 = vadd.f32 %v9145_v21, %v13922_v22  ;;  %v14084_v32 = vadd.f32 %v5819_v63, %v5591_v7 }
 0x6c7   : > { %v5930_v31 = vpop.f32.mrf.mxu1 }
 0x6c8   : > { %v14086_v16 = vpop.f32.mrf.mxu0  ;;  %v14089_v29 = vadd.f32 %v5930_v31, %v13929_v34 }
 0x6c9   : > { %v9148_v54 = vpop.f32.mrf.mxu1 }
 0x6ca   : > { %v14091_v45 = vpop.f32.mrf.mxu0  ;;  %v14094_v55 = vadd.f32 %v9148_v54, %v13932_v9 }
 0x6cb   : > { %v5940_v5 = vpop.f32.mrf.mxu1 }
 0x6cc   : > { %v14096_v49 = vpop.f32.mrf.mxu0  ;;  %v14099_v22 = vadd.f32 %v5940_v5, %v13939_v58 }
 0x6cd   : > { %v9151_v11 = vpop.f32.mrf.mxu1 }
 0x6ce   : > { %v14101_v4 = vpop.f32.mrf.mxu0  ;;  %v14104_v62 = vadd.f32 %v9151_v11, %v13942_v19 }
 0x6cf   : > { %v5950_v34 = vpop.f32.mrf.mxu1 }
 0x6d0   : > { %v14106_v50 = vpop.f32.mrf.mxu0  ;;  %v14109_v26 = vadd.f32 %v5950_v34, %v13949_v57 }
 0x6d1   : > { %v9154_v9 = vpop.f32.mrf.mxu1 }
 0x6d2   : > { %v14111_v44 = vpop.f32.mrf.mxu0  ;;  %v14114_v30 = vadd.f32 %v9154_v9, %v13952_v25 }
 0x6d3   : > { %v5960_v58 = vpop.f32.mrf.mxu1 }
 0x6d4   : > { %v14116_v35 = vpop.f32.mrf.mxu0  ;;  %v14119_v36 = vadd.f32 %v5960_v58, %v13959_v23 }
 0x6d5   : > { %v9157_v19 = vpop.f32.mrf.mxu1 }
 0x6d6   : > { %v14121_v0 = vpop.f32.mrf.mxu0  ;;  %v14124_v63 = vadd.f32 %v9157_v19, %v13962_v8 }
 0x6d7   : > { %v5970_v57 = vpop.f32.mrf.mxu1 }
 0x6d8   : > { %v14126_v60 = vpop.f32.mrf.mxu0  ;;  %v14129_v48 = vadd.f32 %v5970_v57, %v13969_v39 }
 0x6d9   : > { %v9160_v25 = vpop.f32.mrf.mxu1 }
 0x6da   : > { %v14131_v43 = vpop.f32.mrf.mxu0  ;;  %v14134_v3 = vadd.f32 %v9160_v25, %v13972_v41 }
 0x6db   : > { %v5980_v23 = vpop.f32.mrf.mxu1 }
 0x6dc   : > { %v14136_v37 = vpop.f32.mrf.mxu0  ;;  %v14139_v15 = vadd.f32 %v5980_v23, %v13979_v46 }
 0x6dd   : > { %v9163_v8 = vpop.f32.mrf.mxu1 }
 0x6de   : > { %v14141_v42 = vpop.f32.mrf.mxu0  ;;  %v14144_v7 = vadd.f32 %v9163_v8, %v13982_v47 }
 0x6df   : > { %16216 = vst [vmem:[#allocation85_spill] sm:$0xff] %v14141_v42  ;;  %v5990_v39 = vpop.f32.mrf.mxu1 }
 0x6e0   : > { %v14146_v21 = vpop.f32.mrf.mxu0  ;;  %v14149_v31 = vadd.f32 %v5990_v39, %v13989_v27 }
 0x6e1   : > { %16217 = vst [vmem:[#allocation108_spill] sm:$0xff] %v14146_v21  ;;  %v9166_v41 = vpop.f32.mrf.mxu1 }
 0x6e2   : > { %v14151_v54 = vpop.f32.mrf.mxu0  ;;  %v14154_v5 = vadd.f32 %v9166_v41, %v13992_v51 }
 0x6e3   : > { %16218 = vst [vmem:[#allocation62_spill] sm:$0xff] %v14151_v54  ;;  %v6000_v46 = vpop.f32.mrf.mxu1 }
 0x6e4   : > { %v14156_v11 = vpop.f32.mrf.mxu0  ;;  %v14159_v34 = vadd.f32 %v6000_v46, %v13999_v28 }
 0x6e5   : > { %16219 = vst [vmem:[#allocation3_spill] sm:$0xff] %v14156_v11  ;;  %v9169_v47 = vpop.f32.mrf.mxu1 }
 0x6e6   : > { %16220 = vst [vmem:[#allocation4_spill] sm:$0xff] %v14159_v34  ;;  %v14161_v9 = vpop.f32.mrf.mxu0  ;;  %v14164_v58 = vadd.f32 %v9169_v47, %v14002_v56 }
 0x6e7   : > { %16221 = vst [vmem:[#allocation7_spill] sm:$0xff] %v14161_v9  ;;  %v6010_v27 = vpop.f32.mrf.mxu1 }
 0x6e8   : > { %16222 = vst [vmem:[#allocation13_spill] sm:$0xff] %v14164_v58  ;;  %v14166_v19 = vpop.f32.mrf.mxu0  ;;  %v14169_v57 = vadd.f32 %v6010_v27, %v14009_v20 }
 0x6e9   : > { %16223 = vst [vmem:[#allocation17_spill] sm:$0xff] %v14166_v19  ;;  %v9172_v51 = vpop.f32.mrf.mxu1 }
 0x6ea   : > { %16224 = vst [vmem:[#allocation19_spill] sm:$0xff] %v14169_v57  ;;  %v14171_v25 = vpop.f32.mrf.mxu0  ;;  %v14174_v23 = vadd.f32 %v9172_v51, %v14012_v2 }
 0x6eb   : > { %16225 = vst [vmem:[#allocation23_spill] sm:$0xff] %v14171_v25  ;;  %v6020_v28 = vpop.f32.mrf.mxu1 }
 0x6ec   : > { %16226 = vst [vmem:[#allocation33_spill] sm:$0xff] %v14174_v23  ;;  %v14176_v8 = vpop.f32.mrf.mxu0  ;;  %v14179_v39 = vadd.f32 %v6020_v28, %v14019_v52 }
 0x6ed   : > { %16227 = vst [vmem:[#allocation35_spill] sm:$0xff] %v14176_v8  ;;  %v9175_v56 = vpop.f32.mrf.mxu1 }
 0x6ee   : > { %16228 = vst [vmem:[#allocation42_spill] sm:$0xff] %v14179_v39  ;;  %v14181_v41 = vpop.f32.mrf.mxu0  ;;  %v14184_v46 = vadd.f32 %v9175_v56, %v14022_v53 }
 0x6ef   : > { %16229 = vst [vmem:[#allocation49_spill] sm:$0xff] %v14181_v41  ;;  %v6030_v20 = vpop.f32.mrf.mxu1 }
 0x6f0   : > { %16230 = vst [vmem:[#allocation50_spill] sm:$0xff] %v14184_v46  ;;  %v14186_v47 = vpop.f32.mrf.mxu0  ;;  %v14189_v27 = vadd.f32 %v6030_v20, %v14029_v18 }
 0x6f1   : > { %16231 = vst [vmem:[#allocation54_spill] sm:$0xff] %v14186_v47  ;;  %v9178_v2 = vpop.f32.mrf.mxu1 }
 0x6f2   : > { %16232 = vst [vmem:[#allocation2_spill] sm:$0xff] %v14189_v27  ;;  %v14191_v51 = vpop.f32.mrf.mxu0  ;;  %v14194_v8 = vadd.f32 %v9178_v2, %v14032_v17 }
 0x6f3   : > { %16233 = vst [vmem:[#allocation70_spill] sm:$0xff] %v14191_v51  ;;  %v6040_v52 = vpop.f32.mrf.mxu1 }
 0x6f4   : > { %16234 = vst [vmem:[#allocation72_spill] sm:$0xff] %v14194_v8  ;;  %v14196_v28 = vpop.f32.mrf.mxu0  ;;  %v14199_v41 = vadd.f32 %v6040_v52, %v14039_v38 }
 0x6f5   : > { %16235 = vst [vmem:[#allocation73_spill] sm:$0xff] %v14196_v28  ;;  %v9181_v53 = vpop.f32.mrf.mxu1 }
 0x6f6   : > { %16236 = vst [vmem:[#allocation77_spill] sm:$0xff] %v14199_v41  ;;  %v14201_v56 = vpop.f32.mrf.mxu0  ;;  %v14204_v47 = vadd.f32 %v9181_v53, %v14042_v10 }
 0x6f7   : > { %16237 = vst [vmem:[#allocation16_spill] sm:$0xff] %v14201_v56  ;;  %v6050_v18 = vpop.f32.mrf.mxu1 }
 0x6f8   : > { %16238 = vst [vmem:[#allocation25_spill] sm:$0xff] %v14204_v47  ;;  %v14206_v20 = vpop.f32.mrf.mxu0  ;;  %v14209_v51 = vadd.f32 %v6050_v18, %v14049_v33 }
 0x6f9   : > { %16239 = vst [vmem:[#allocation14_spill] sm:$0xff] %v14206_v20  ;;  %v9184_v17 = vpop.f32.mrf.mxu1 }
 0x6fa   : > { %16240 = vst [vmem:[#allocation26_spill] sm:$0xff] %v14209_v51  ;;  %v14211_v2 = vpop.f32.mrf.mxu0  ;;  %v14214_v28 = vadd.f32 %v9184_v17, %v14052_v61 }
 0x6fb   : > { %16241 = vst [vmem:[#allocation63_spill] sm:$0xff] %v14211_v2  ;;  %v6060_v38 = vpop.f32.mrf.mxu1 }
 0x6fc   : > { %16242 = vst [vmem:[#allocation20_spill] sm:$0xff] %v14214_v28  ;;  %v14216_v52 = vpop.f32.mrf.mxu0  ;;  %v14219_v56 = vadd.f32 %v6060_v38, %v14059_v13 }
 0x6fd   : > { %16243 = vst [vmem:[#allocation53_spill] sm:$0xff] %v14216_v52  ;;  %v9187_v10 = vpop.f32.mrf.mxu1 }
 0x6fe   : > { %16244 = vst [vmem:[#allocation47_spill] sm:$0xff] %v14219_v56  ;;  %v14221_v53 = vpop.f32.mrf.mxu0  ;;  %v14224_v20 = vadd.f32 %v9187_v10, %v14066_v1 }
 0x6ff   : > { %16245 = vst [vmem:[#allocation28_spill] sm:$0xff] %v14221_v53  ;;  %v6070_v33 = vpop.f32.mrf.mxu1 }
 0x700   : > { %16246 = vst [vmem:[#allocation89_spill] sm:$0xff] %v14224_v20  ;;  %v14227_v18 = vadd.f32 %v6070_v33, %v14072_v59  ;;  %v14229_v2 = vpop.f32.mrf.mxu0 }
 0x701   : > { %16248 = vst [vmem:[#allocation37_spill] sm:$0xff] %v14229_v2  ;;  %v9190_v61 = vpop.f32.mrf.mxu1 }
 0x702   : > { %16247 = vst [vmem:[#allocation30_spill] sm:$0xff] %v14227_v18  ;;  %v14232_v17 = vadd.f32 %v9190_v61, %v14077_v40  ;;  %v9295_v38 = vpop.f32.mrf.mxu0 }
 0x703   : > { %v6080_v52 = vpop.f32.mrf.mxu1 }
 0x704   : > { %16249 = vst [vmem:[#allocation41_spill] sm:$0xff] %v14232_v17  ;;  %v14235_v13 = vadd.f32 %v6080_v52, %v14084_v32  ;;  %v6717_v28 = vpop.f32.mrf.mxu0 }
 0x705   : > { %v9245_v56 = vpop.f32.mrf.mxu1 }
 0x706   : > { %16250 = vst [vmem:[#allocation78_spill] sm:$0xff] %v14235_v13  ;;  %v14237_v20 = vpop.f32.mrf.mxu0 }
 0x707   : > { %v6460_v53 = vpop.f32.mrf.mxu1 }
 0x708   : > { %v14241_v2 = vpop.f32.mrf.mxu0 }
 0x709   : > { %v9248_v1 = vpop.f32.mrf.mxu1 }
 0x70a   : > { %v14247_v61 = vpop.f32.mrf.mxu0 }
 0x70b   : > { %v6470_v10 = vpop.f32.mrf.mxu1 }
 0x70c   : > { %v14253_v13 = vpop.f32.mrf.mxu0 }
 0x70d   : > { %v9251_v59 = vpop.f32.mrf.mxu1 }
 0x70e   : > { %v14259_v47 = vpop.f32.mrf.mxu0 }
 0x70f   : > { %v14239_v33 = vpop.f32.mrf.mxu1 }
 0x710   : > { %v14265_v27 = vpop.f32.mrf.mxu0 }
 0x711   : > { %v14243_v18 = vpop.f32.mrf.mxu1 }
 0x712   : > { %v14271_v19 = vpop.f32.mrf.mxu0 }
 0x713   : > { %v14245_v40 = vpop.f32.mrf.mxu1 }
 0x714   : > { %v14277_v23 = vpop.f32.mrf.mxu0 }
 0x715   : > { %v14249_v32 = vpop.f32.mrf.mxu1 }
 0x716   : > { %v14283_v54 = vpop.f32.mrf.mxu0 }
 0x717   : > { %v14251_v52 = vpop.f32.mrf.mxu1 }
 0x719   : > { %v14255_v17 = vpop.f32.mrf.mxu1 }
 0x71b   : > { %v14257_v51 = vpop.f32.mrf.mxu1 }
 0x71d   : > { %v14261_v41 = vpop.f32.mrf.mxu1 }
 0x71f   : > { %v14263_v8 = vpop.f32.mrf.mxu1 }
 0x720   : > { %16251 = vst [vmem:[#allocation80_spill] sm:$0xff] %v14263_v8 }
 0x721   : > { %v14267_v25 = vpop.f32.mrf.mxu1 }
 0x722   : > { %16252 = vst [vmem:[#allocation8_spill] sm:$0xff] %v14267_v25  ;;  %v14289_v25 = vpop.f32.mrf.mxu0 }
 0x723   : > { %v14269_v46 = vpop.f32.mrf.mxu1 }
 0x724   : > { %16253 = vst [vmem:[#allocation82_spill] sm:$0xff] %v14269_v46 }
 0x725   : > { %v14273_v39 = vpop.f32.mrf.mxu1 }
 0x726   : > { %16254 = vst [vmem:[#allocation84_spill] sm:$0xff] %v14273_v39  ;;  %v14295_v39 = vpop.f32.mrf.mxu0 }
 0x727   : > { %v14275_v9 = vpop.f32.mrf.mxu1  ;;  %16262 = vst [vmem:[#allocation15_spill] sm:$0xff] %v14295_v39 }
 0x728   : > { %16255 = vst [vmem:[#allocation86_spill] sm:$0xff] %v14275_v9 }
 0x729   : > { %v14279_v11 = vpop.f32.mrf.mxu1 }
 0x72a   : > { %16256 = vst [vmem:[#allocation87_spill] sm:$0xff] %v14279_v11  ;;  %v14301_v11 = vpop.f32.mrf.mxu0 }
 0x72b   : > { %v14281_v57 = vpop.f32.mrf.mxu1  ;;  %16265 = vst [vmem:[#allocation29_spill] sm:$0xff] %v14301_v11 }
 0x72c   : > { %16257 = vst [vmem:[#allocation90_spill] sm:$0xff] %v14281_v57 }
 0x72d   : > { %v14285_v58 = vpop.f32.mrf.mxu1 }
 0x72e   : > { %16258 = vst [vmem:[#allocation92_spill] sm:$0xff] %v14285_v58  ;;  %v14307_v58 = vpop.f32.mrf.mxu0 }
 0x72f   : > { %v14287_v21 = vpop.f32.mrf.mxu1  ;;  %16268 = vst [vmem:[#allocation12_spill] sm:$0xff] %v14307_v58 }
 0x730   : > { %16259 = vst [vmem:[#allocation31_spill] sm:$0xff] %v14287_v21 }
 0x731   : > { %v14291_v46 = vpop.f32.mrf.mxu1 }
 0x732   : > { %16260 = vst [vmem:[#allocation21_spill] sm:$0xff] %v14291_v46  ;;  %v6353_v46 = vadd.f32 %v14068_v6, %v14082_v24  ;;  %v6354_v6 = vadd.f32 %v14086_v16, %v14099_v22  ;;  %v9424_v22 = vld [vmem:[%s9531_s14 + $0x8] sm:$0xff] }
 0x733   : > { %v14293_v34 = vpop.f32.mrf.mxu1 }
 0x734   : > { %16261 = vst [vmem:[#allocation22_spill] sm:$0xff] %v14293_v34  ;;  %v6620_v39 = vadd.f32 %v9245_v56, %v6353_v46  ;;  %v6357_v56 = vadd.f32 %v14091_v45, %v14104_v62 }
 0x735   : > { %v14297_v9 = vpop.f32.mrf.mxu1 }
 0x736   : > { %16263 = vst [vmem:[#allocation74_spill] sm:$0xff] %v14297_v9  ;;  %v6352_v9 = vadd.f32 %v14074_v12, %v14089_v29  ;;  %v6877_v24 = vadd.f32 %v9295_v38, %v6620_v39  ;;  %v6621_v29 = vadd.f32 %v6470_v10, %v6354_v6 }
 0x737   : > { %v14299_v8 = vpop.f32.mrf.mxu1 }
 0x738   : > { %16264 = vst [vmem:[#allocation24_spill] sm:$0xff] %v14299_v8  ;;  %v14317_v8 = vpop.f32.mrf.mxu0  ;;  %v6878_v10 = vadd.f32 %v14241_v2, %v6621_v29 }
 0x739   : > { %v14303_v57 = vpop.f32.mrf.mxu1 }
 0x73a   : > { %16266 = vst [vmem:[#allocation36_spill] sm:$0xff] %v14303_v57  ;;  %v6619_v57 = vadd.f32 %v6460_v53, %v6352_v9  ;;  %v14327_v46 = vpop.f32.mrf.mxu0 }
 0x73b   : > { %v14305_v42 = vpop.f32.mrf.mxu1 }
 0x73c   : > { %16267 = vst [vmem:[#allocation40_spill] sm:$0xff] %v14305_v42  ;;  %v6355_v42 = vadd.f32 %v14079_v14, %v14094_v55  ;;  %v6876_v53 = vadd.f32 %v6717_v28, %v6619_v57  ;;  %v6356_v14 = vadd.f32 %v14096_v49, %v14109_v26  ;;  %v6624_v55 = vadd.f32 %v9251_v59, %v6357_v56  ;;  %v14344_v49 = vpop.f32.mrf.mxu0  ;;  %v9425_v28 = vld [vmem:[%s9531_s14] sm:$0xff] }
 0x73d   : > { %v14309_v21 = vpop.f32.mrf.mxu1  ;;  %v6359_v57 = vadd.f32 %v14101_v4, %v14114_v30  ;;  %v9426_v30 = vld [vmem:[%s9531_s14 + $0x18] sm:$0xff] }
 0x73e   : > { %16269 = vst [vmem:[#allocation39_spill] sm:$0xff] %v14309_v21  ;;  %v6622_v58 = vadd.f32 %v9248_v1, %v6355_v42  ;;  %v6623_v39 = vadd.f32 %v14239_v33, %v6356_v14  ;;  %v6881_v6 = vadd.f32 %v14247_v61, %v6624_v55  ;;  %v6360_v61 = vadd.f32 %v14116_v35, %v14129_v48  ;;  %v9429_v48 = vld [vmem:[%s9531_s14 + $0x20] sm:$0xff] }
 0x73f   : > { %v14313_v34 = vpop.f32.mrf.mxu1  ;;  %v6626_v4 = vadd.f32 %v14243_v18, %v6359_v57 }
 0x740   : > { %v6879_v62 = vadd.f32 %v14237_v20, %v6622_v58  ;;  %v6358_v58 = vadd.f32 %v14106_v50, %v14119_v36  ;;  %v9427_v36 = vld [vmem:[%s9531_s14 + $0x10] sm:$0xff]  ;;  %v6880_v56 = vadd.f32 %v14253_v13, %v6623_v39  ;;  %v6627_v35 = vadd.f32 %v14251_v52, %v6360_v61  ;;  %v16284_v61 = vld [vmem:[#allocation15_spill] sm:$0xff] }
 0x741   : > { %v14319_v11 = vpop.f32.mrf.mxu1  ;;  %v6883_v14 = vadd.f32 %v14259_v47, %v6626_v4  ;;  %v6362_v47 = vadd.f32 %v14126_v60, %v14139_v15  ;;  %v9431_v15 = vld [vmem:[%s9531_s14 + $0x30] sm:$0xff] }
 0x742   : > { %v6625_v50 = vadd.f32 %v14245_v40, %v6358_v58 }
 0x743   : > { %v14323_v21 = vpop.f32.mrf.mxu1  ;;  %v6629_v60 = vadd.f32 %v14257_v51, %v6362_v47  ;;  %v16291_v47 = vld [vmem:[#allocation3_spill] sm:$0xff] }
 0x745   : > { %v9345_v12 = vpop.f32.mrf.mxu1 }
 0x746   : > { %v7140_v9 = vadd.f32 %v9345_v12, %v6877_v24  ;;  %v6361_v24 = vadd.f32 %v14111_v44, %v14124_v63  ;;  %v14360_v12 = vpop.f32.mrf.mxu0  ;;  %v9428_v63 = vld [vmem:[%s9531_s14 + $0x28] sm:$0xff] }
 0x747   : > { %v6980_v16 = vpop.f32.mrf.mxu1 }
 0x748   : > { %v7172_v42 = vadd.f32 %v9424_v22, %v7140_v9  ;;  %v7139_v45 = vadd.f32 %v6980_v16, %v6876_v53  ;;  %v6628_v44 = vadd.f32 %v14249_v32, %v6361_v24  ;;  %v6363_v16 = vadd.f32 %v14121_v0, %v14134_v3  ;;  %v14376_v55 = vpop.f32.mrf.mxu0  ;;  %v9430_v3 = vld [vmem:[%s9531_s14 + $0x38] sm:$0xff]  ;;  %v16280_v24 = vld [vmem:[#allocation4_spill] sm:$0xff] }
 0x749   : > { %v9348_v26 = vpop.f32.mrf.mxu1 }
 0x74a   : > { %7204 = vst.msk [vmem:[%s14338_s19 + $0x8] sm:$0xff] %vm16270_vm15, %v7172_v42  ;;  %v7171_v38 = vadd.f32 %v9425_v28, %v7139_v45  ;;  %v7142_v1 = vadd.f32 %v9348_v26, %v6879_v62  ;;  %v6882_v42 = vadd.f32 %v14265_v27, %v6625_v50  ;;  %v6630_v0 = vadd.f32 %v14255_v17, %v6363_v16  ;;  %v14392_v39 = vpop.f32.mrf.mxu0  ;;  %vm16314_vm15 = vmmov %vm16095_vm0 }
 0x74b   : > { %v6990_v20 = vpop.f32.mrf.mxu1  ;;  %v6885_v57 = vadd.f32 %v14271_v19, %v6628_v44  ;;  %v6365_v26 = vadd.f32 %v14131_v43, %v14144_v7  ;;  %v6364_v19 = vadd.f32 %v14136_v37, %v14149_v31  ;;  %v9432_v7 = vld [vmem:[%s9531_s14 + $0x48] sm:$0xff]  ;;  %v9433_v31 = vld [vmem:[%s9531_s14 + $0x40] sm:$0xff]  ;;  %v16285_v44 = vld [vmem:[#allocation13_spill] sm:$0xff] }
 0x74c   : > { %7203 = vst.msk [vmem:[%s14338_s19] sm:$0xff] %vm16095_vm0, %v7171_v38  ;;  %v7174_v59 = vadd.f32 %v9426_v30, %v7142_v1  ;;  %v7141_v33 = vadd.f32 %v6990_v20, %v6878_v10  ;;  %v6884_v38 = vadd.f32 %v14277_v23, %v6627_v35  ;;  %v6887_v58 = vadd.f32 %v14283_v54, %v6630_v0  ;;  %v16277_v20 = vld [vmem:[#allocation85_spill] sm:$0xff]  ;;  %v14408_v30 = vpop.f32.mrf.mxu0 }
 0x74d   : > { %v9351_v2 = vpop.f32.mrf.mxu1  ;;  %v6632_v43 = vadd.f32 %v14261_v41, %v6365_v26  ;;  %v6367_v4 = vadd.f32 %v16277_v20, %v14154_v5  ;;  %v16299_v20 = vld [vmem:[#allocation42_spill] sm:$0xff] }
 0x74e   : > { %7206 = vst.msk [vmem:[%s14338_s19 + $0x18] sm:$0xff] %vm16271_vm6, %v7174_v59  ;;  %v7173_v18 = vadd.f32 %v9427_v36, %v7141_v33  ;;  %v7144_v29 = vadd.f32 %v9351_v2, %v6881_v6  ;;  %v16278_v59 = vld [vmem:[#allocation80_spill] sm:$0xff]  ;;  %v6886_v6 = vadd.f32 %v14289_v25, %v6629_v60  ;;  %vm16321_vm6 = vmmov %vm16095_vm0 }
 0x74f   : > { %v7000_v9 = vpop.f32.mrf.mxu1  ;;  %v6631_v37 = vadd.f32 %v16278_v59, %v6364_v19  ;;  %v16281_v2 = vld [vmem:[#allocation108_spill] sm:$0xff] }
 0x750   : > { %7205 = vst.msk [vmem:[%s14338_s19 + $0x10] sm:$0xff] %vm16272_vm2, %v7173_v18  ;;  %v7176_v40 = vadd.f32 %v9428_v63, %v7144_v29  ;;  %v7143_v53 = vadd.f32 %v7000_v9, %v6880_v56  ;;  %v6366_v54 = vadd.f32 %v16281_v2, %v16280_v24  ;;  %v16282_v36 = vld [vmem:[#allocation8_spill] sm:$0xff]  ;;  %v9434_v18 = vld [vmem:[%s9531_s14 + $0x58] sm:$0xff]  ;;  %v6889_v9 = vadd.f32 %v16284_v61, %v6632_v43  ;;  %v16286_v63 = vld [vmem:[#allocation62_spill] sm:$0xff] }
 0x751   : > { %v9354_v13 = vpop.f32.mrf.mxu1  ;;  %v6634_v5 = vadd.f32 %v16282_v36, %v6367_v4  ;;  %v16300_v4 = vld [vmem:[#allocation17_spill] sm:$0xff]  ;;  %v16303_v2 = vld [vmem:[#allocation50_spill] sm:$0xff]  ;;  %vm16325_vm2 = vmmov %vm16095_vm0 }
 0x752   : > { %7208 = vst.msk [vmem:[%s14338_s19 + $0x28] sm:$0xff] %vm16273_vm11, %v7176_v40  ;;  %v7175_v32 = vadd.f32 %v9429_v48, %v7143_v53  ;;  %v7146_v22 = vadd.f32 %v9354_v13, %v6883_v14  ;;  %v6369_v40 = vadd.f32 %v16286_v63, %v16285_v44  ;;  %v14424_v53 = vpop.f32.mrf.mxu0  ;;  %v16287_v14 = vld [vmem:[#allocation82_spill] sm:$0xff]  ;;  %v9435_v13 = vld [vmem:[%s9531_s14 + $0x50] sm:$0xff]  ;;  %v16308_v63 = vld [vmem:[#allocation35_spill] sm:$0xff] }
 0x753   : > { %v7010_v45 = vpop.f32.mrf.mxu1  ;;  %v6633_v16 = vadd.f32 %v16287_v14, %v6366_v54  ;;  %v16304_v54 = vld [vmem:[#allocation23_spill] sm:$0xff]  ;;  %v16307_v44 = vld [vmem:[#allocation2_spill] sm:$0xff]  ;;  %vm16329_vm11 = vmmov %vm16095_vm0 }
 0x754   : > { %7207 = vst.msk [vmem:[%s14338_s19 + $0x20] sm:$0xff] %vm16274_vm13, %v7175_v32  ;;  %v7178_v52 = vadd.f32 %v9430_v3, %v7146_v22  ;;  %v7145_v62 = vadd.f32 %v7010_v45, %v6882_v42  ;;  %v16289_v32 = vld [vmem:[#allocation29_spill] sm:$0xff]  ;;  %v16290_v42 = vld [vmem:[#allocation19_spill] sm:$0xff]  ;;  %v16292_v3 = vld [vmem:[#allocation84_spill] sm:$0xff] }
 0x755   : > { %v9357_v27 = vpop.f32.mrf.mxu1  ;;  %v6888_v22 = vadd.f32 %v16289_v32, %v6631_v37  ;;  %v6368_v45 = vadd.f32 %v16291_v47, %v16290_v42  ;;  %v16301_v37 = vld [vmem:[#allocation87_spill] sm:$0xff]  ;;  %v16311_v32 = vld [vmem:[#allocation72_spill] sm:$0xff]  ;;  %vm16333_vm13 = vmmov %vm16095_vm0 }
 0x756   : > { %7210 = vst.msk [vmem:[%s14338_s19 + $0x38] sm:$0xff] %vm16275_vm1, %v7178_v52  ;;  %v7177_v17 = vadd.f32 %v9431_v15, %v7145_v62  ;;  %v7148_v28 = vadd.f32 %v9357_v27, %v6885_v57  ;;  %v6636_v52 = vadd.f32 %v16292_v3, %v6369_v40  ;;  %v9436_v62 = vld [vmem:[%s9531_s14 + $0x68] sm:$0xff]  ;;  %v16294_v27 = vld [vmem:[#allocation12_spill] sm:$0xff]  ;;  %v16295_v15 = vld [vmem:[#allocation33_spill] sm:$0xff] }
 0x757   : > { %v7020_v1 = vpop.f32.mrf.mxu1  ;;  %v6891_v60 = vadd.f32 %v16294_v27, %v6634_v5  ;;  %v16305_v5 = vld [vmem:[#allocation90_spill] sm:$0xff]  ;;  %vm16337_vm1 = vmmov %vm16095_vm0 }
 0x758   : > { %7209 = vst.msk [vmem:[%s14338_s19 + $0x30] sm:$0xff] %vm16276_vm7, %v7177_v17  ;;  %v7180_v51 = vadd.f32 %v9432_v7, %v7148_v28  ;;  %v7147_v10 = vadd.f32 %v7020_v1, %v6884_v38  ;;  %v16296_v17 = vld [vmem:[#allocation7_spill] sm:$0xff]  ;;  %v14440_v38 = vpop.f32.mrf.mxu0  ;;  %v16297_v1 = vld [vmem:[#allocation86_spill] sm:$0xff]  ;;  %v6893_v24 = vadd.f32 %v14327_v46, %v6636_v52  ;;  %v6372_v46 = vadd.f32 %v16308_v63, %v16307_v44  ;;  %vm16341_vm7 = vmmov %vm16095_vm0 }
 0x759   : > { %v9360_v23 = vpop.f32.mrf.mxu1  ;;  %v6371_v28 = vadd.f32 %v16296_v17, %v16295_v15  ;;  %v6635_v43 = vadd.f32 %v16297_v1, %v6368_v45  ;;  %v9437_v7 = vld [vmem:[%s9531_s14 + $0x60] sm:$0xff]  ;;  %v16313_v45 = vld [vmem:[#allocation31_spill] sm:$0xff]  ;;  %v16317_v15 = vld [vmem:[#allocation21_spill] sm:$0xff] }
 0x75a   : > { %7212 = vst.msk [vmem:[%s14338_s19 + $0x48] sm:$0xff] %vm16279_vm8, %v7180_v51  ;;  %v7179_v41 = vadd.f32 %v9433_v31, %v7147_v10  ;;  %v7150_v33 = vadd.f32 %v9360_v23, %v6887_v58  ;;  %v6890_v58 = vadd.f32 %v14317_v8, %v6633_v16  ;;  %v6370_v23 = vadd.f32 %v16300_v4, %v16299_v20  ;;  %v14456_v36 = vpop.f32.mrf.mxu0  ;;  %v9440_v16 = vld [vmem:[%s9531_s14 + $0x88] sm:$0xff]  ;;  %v9441_v3 = vld [vmem:[%s9531_s14 + $0x80] sm:$0xff]  ;;  %vm16344_vm8 = vmmov %vm16095_vm0 }
 0x75b   : > { %v7030_v50 = vpop.f32.mrf.mxu1  ;;  %v6638_v31 = vadd.f32 %v16301_v37, %v6371_v28  ;;  %v16316_v27 = vld [vmem:[#allocation54_spill] sm:$0xff]  ;;  %v9442_v28 = vld [vmem:[%s9531_s14 + $0x98] sm:$0xff] }
 0x75c   : > { %7211 = vst.msk [vmem:[%s14338_s19 + $0x40] sm:$0xff] %vm16283_vm4, %v7179_v41  ;;  %v7182_v29 = vadd.f32 %v9434_v18, %v7150_v33  ;;  %v7149_v56 = vadd.f32 %v7030_v50, %v6886_v6  ;;  %v9438_v41 = vld [vmem:[%s9531_s14 + $0x78] sm:$0xff]  ;;  %v6373_v50 = vadd.f32 %v16304_v54, %v16303_v2  ;;  %v6637_v18 = vadd.f32 %v16305_v5, %v6370_v23  ;;  %v6837_v47 = vpop.f32.mrf.mxu0  ;;  %v16320_v20 = vld [vmem:[#allocation22_spill] sm:$0xff]  ;;  %v9443_v23 = vld [vmem:[%s9531_s14 + $0x90] sm:$0xff] }
 0x75d   : > { %v9363_v25 = vpop.f32.mrf.mxu1  ;;  %v9444_v54 = vld [vmem:[%s9531_s14 + $0xa8] sm:$0xff]  ;;  %v9445_v63 = vld [vmem:[%s9531_s14 + $0xa0] sm:$0xff]  ;;  %vm16347_vm4 = vmmov %vm16095_vm0 }
 0x75e   : > { %7214 = vst.msk [vmem:[%s14338_s19 + $0x58] sm:$0xff] %vm16288_vm10, %v7182_v29  ;;  %v7181_v35 = vadd.f32 %v9435_v13, %v7149_v56  ;;  %v7152_v48 = vadd.f32 %v9363_v25, %v6889_v9  ;;  %v9439_v29 = vld [vmem:[%s9531_s14 + $0x70] sm:$0xff]  ;;  %v6892_v9 = vadd.f32 %v14344_v49, %v6635_v43  ;;  %vm16348_vm10 = vmmov %vm16095_vm0 }
 0x75f   : > { %v7040_v0 = vpop.f32.mrf.mxu1  ;;  %v16309_v25 = vld [vmem:[#allocation92_spill] sm:$0xff] }
 0x760   : > { %7213 = vst.msk [vmem:[%s14338_s19 + $0x50] sm:$0xff] %vm16293_vm5, %v7181_v35  ;;  %v7184_v57 = vadd.f32 %v9436_v62, %v7152_v48  ;;  %v7151_v26 = vadd.f32 %v7040_v0, %v6888_v22  ;;  %v6640_v14 = vadd.f32 %v16309_v25, %v6373_v50  ;;  %v6895_v48 = vadd.f32 %v14360_v12, %v6638_v31  ;;  %v16312_v22 = vld [vmem:[#allocation49_spill] sm:$0xff]  ;;  %vm16349_vm5 = vmmov %vm16095_vm0 }
 0x761   : > { %v9366_v19 = vpop.f32.mrf.mxu1  ;;  %v6375_v42 = vadd.f32 %v16312_v22, %v16311_v32  ;;  %v6639_v0 = vadd.f32 %v16313_v45, %v6372_v46  ;;  %v9446_v32 = vld [vmem:[%s9531_s14 + $0xb8] sm:$0xff] }
 0x762   : > { %7216 = vst.msk [vmem:[%s14338_s19 + $0x68] sm:$0xff] %vm16298_vm9, %v7184_v57  ;;  %v7183_v51 = vadd.f32 %v9437_v7, %v7151_v26  ;;  %v7154_v10 = vadd.f32 %v9366_v19, %v6891_v60  ;;  %v6894_v57 = vadd.f32 %v14376_v55, %v6637_v18  ;;  %v16315_v26 = vld [vmem:[#allocation77_spill] sm:$0xff]  ;;  %v6897_v43 = vadd.f32 %v14392_v39, %v6640_v14  ;;  %v16330_v14 = vld [vmem:[#allocation47_spill] sm:$0xff]  ;;  %vm16350_vm9 = vmmov %vm16095_vm0 }
 0x763   : > { %v7050_v59 = vpop.f32.mrf.mxu1  ;;  %v6374_v60 = vadd.f32 %v16316_v27, %v16315_v26  ;;  %v6642_v17 = vadd.f32 %v16317_v15, %v6375_v42  ;;  %v16318_v7 = vld [vmem:[#allocation25_spill] sm:$0xff]  ;;  %v6896_v31 = vadd.f32 %v14408_v30, %v6639_v0  ;;  %v9447_v26 = vld [vmem:[%s9531_s14 + $0xb0] sm:$0xff]  ;;  %v16338_v15 = vld [vmem:[#allocation30_spill] sm:$0xff] }
 0x764   : > { %7215 = vst.msk [vmem:[%s14338_s19 + $0x60] sm:$0xff] %vm16302_vm14, %v7183_v51  ;;  %v7186_v33 = vadd.f32 %v9438_v41, %v7154_v10  ;;  %v7153_v6 = vadd.f32 %v7050_v59, %v6890_v58  ;;  %v16319_v51 = vld [vmem:[#allocation70_spill] sm:$0xff]  ;;  %v9334_v58 = vpop.f32.mrf.mxu0  ;;  %v16334_v0 = vld [vmem:[#allocation89_spill] sm:$0xff]  ;;  %vm16351_vm14 = vmmov %vm16095_vm0 }
 0x765   : > { %v9369_v8 = vpop.f32.mrf.mxu1  ;;  %v6377_v10 = vadd.f32 %v16319_v51, %v16318_v7  ;;  %v6641_v4 = vadd.f32 %v16320_v20, %v6374_v60  ;;  %v16322_v41 = vld [vmem:[#allocation26_spill] sm:$0xff]  ;;  %v6899_v5 = vadd.f32 %v14424_v53, %v6642_v17  ;;  %v16339_v17 = vld [vmem:[#allocation53_spill] sm:$0xff] }
 0x766   : > { %7218 = vst.msk [vmem:[%s14338_s19 + $0x78] sm:$0xff] %vm16306_vm3, %v7186_v33  ;;  %v7185_v56 = vadd.f32 %v9439_v29, %v7153_v6  ;;  %v7156_v61 = vadd.f32 %v9369_v8, %v6893_v24  ;;  %v16323_v33 = vld [vmem:[#allocation73_spill] sm:$0xff]  ;;  %v16324_v24 = vld [vmem:[#allocation74_spill] sm:$0xff]  ;;  %v6847_v18 = vpop.f32.mrf.mxu0  ;;  %v16326_v29 = vld [vmem:[#allocation20_spill] sm:$0xff] }
 0x767   : > { %v7060_v40 = vpop.f32.mrf.mxu1  ;;  %v6376_v6 = vadd.f32 %v16323_v33, %v16322_v41  ;;  %v6644_v2 = vadd.f32 %v16324_v24, %v6377_v10  ;;  %v6898_v25 = vadd.f32 %v14440_v38, %v6641_v4  ;;  %v16342_v20 = vld [vmem:[#allocation41_spill] sm:$0xff]  ;;  %v16343_v4 = vld [vmem:[#allocation28_spill] sm:$0xff]  ;;  %vm16352_vm3 = vmmov %vm16095_vm0 }
 0x768   : > { %7217 = vst.msk [vmem:[%s14338_s19 + $0x70] sm:$0xff] %vm16310_vm12, %v7185_v56  ;;  %v7188_v13 = vadd.f32 %v9440_v16, %v7156_v61  ;;  %v7155_v35 = vadd.f32 %v7060_v40, %v6892_v9  ;;  %v16327_v56 = vld [vmem:[#allocation16_spill] sm:$0xff]  ;;  %v16331_v16 = vld [vmem:[#allocation14_spill] sm:$0xff]  ;;  %v9337_v45 = vpop.f32.mrf.mxu0  ;;  %vm16353_vm12 = vmmov %vm16095_vm0 }
 0x769   : > { %v9372_v49 = vpop.f32.mrf.mxu1  ;;  %v6379_v61 = vadd.f32 %v16327_v56, %v16326_v29  ;;  %v16328_v9 = vld [vmem:[#allocation24_spill] sm:$0xff] }
 0x76a   : > { %7220 = vst.msk [vmem:[%s14338_s19 + $0x88] sm:$0xff] %vm16314_vm15, %v7188_v13  ;;  %v7187_v52 = vadd.f32 %v9441_v3, %v7155_v35  ;;  %v7158_v62 = vadd.f32 %v9372_v49, %v6895_v48  ;;  %v6643_v44 = vadd.f32 %v16328_v9, %v6376_v6  ;;  %v6378_v13 = vadd.f32 %v16331_v16, %v16330_v14  ;;  %v16332_v35 = vld [vmem:[#allocation36_spill] sm:$0xff]  ;;  %v16335_v3 = vld [vmem:[#allocation63_spill] sm:$0xff]  ;;  %v16345_v6 = vld [vmem:[#allocation78_spill] sm:$0xff] }
 0x76b   : > { %v7070_v12 = vpop.f32.mrf.mxu1  ;;  %v6646_v48 = vadd.f32 %v16332_v35, %v6379_v61  ;;  %v6901_v49 = vadd.f32 %v14456_v36, %v6644_v2  ;;  %v16340_v36 = vld [vmem:[#allocation39_spill] sm:$0xff]  ;;  %v9451_v56 = vld [vmem:[%s9531_s14 + $0xd0] sm:$0xff]  ;;  %v9453_v14 = vld [vmem:[%s9531_s14 + $0xe0] sm:$0xff] }
 0x76c   : > { %7219 = vst.msk [vmem:[%s14338_s19 + $0x80] sm:$0xff] %vm16095_vm0, %v7187_v52  ;;  %v7190_v19 = vadd.f32 %v9442_v28, %v7158_v62  ;;  %v7157_v1 = vadd.f32 %v7070_v12, %v6894_v57  ;;  %v6381_v52 = vadd.f32 %v16335_v3, %v16334_v0  ;;  %v16336_v62 = vld [vmem:[#allocation40_spill] sm:$0xff]  ;;  %v6900_v12 = vadd.f32 %v6837_v47, %v6643_v44  ;;  %v9452_v44 = vld [vmem:[%s9531_s14 + $0xe8] sm:$0xff] }
 0x76d   : > { %v9375_v55 = vpop.f32.mrf.mxu1  ;;  %v6645_v57 = vadd.f32 %v16336_v62, %v6378_v13  ;;  %v6380_v28 = vadd.f32 %v16339_v17, %v16338_v15  ;;  %v6903_v10 = vadd.f32 %v9334_v58, %v6646_v48  ;;  %v9454_v48 = vld [vmem:[%s9531_s14 + $0xf8] sm:$0xff] }
 0x76e   : > { %7222 = vst.msk [vmem:[%s14338_s19 + $0x98] sm:$0xff] %vm16321_vm6, %v7190_v19  ;;  %v7189_v59 = vadd.f32 %v9443_v23, %v7157_v1  ;;  %v7160_v37 = vadd.f32 %v9375_v55, %v6897_v43  ;;  %v6648_v1 = vadd.f32 %v16340_v36, %v6381_v52  ;;  %v9448_v43 = vld [vmem:[%s9531_s14 + $0xc8] sm:$0xff]  ;;  %v6857_v55 = vpop.f32.mrf.mxu0  ;;  %v6383_v23 = vadd.f32 %v16343_v4, %v16342_v20 }
 0x76f   : > { %v7080_v39 = vpop.f32.mrf.mxu1  ;;  %v6647_v47 = vadd.f32 %v14313_v34, %v6380_v28  ;;  %v6902_v33 = vadd.f32 %v6847_v18, %v6645_v57 }
 0x770   : > { %7221 = vst.msk [vmem:[%s14338_s19 + $0x90] sm:$0xff] %vm16325_vm2, %v7189_v59  ;;  %v7192_v50 = vadd.f32 %v9444_v54, %v7160_v37  ;;  %v7159_v8 = vadd.f32 %v7080_v39, %v6896_v31  ;;  %v9449_v37 = vld [vmem:[%s9531_s14 + $0xc0] sm:$0xff]  ;;  %v16346_v39 = vld [vmem:[#allocation37_spill] sm:$0xff]  ;;  %v6650_v58 = vadd.f32 %v14319_v11, %v6383_v23 }
 0x771   : > { %v9378_v30 = vpop.f32.mrf.mxu1  ;;  %v6382_v24 = vadd.f32 %v16346_v39, %v16345_v6  ;;  %v9450_v54 = vld [vmem:[%s9531_s14 + $0xd8] sm:$0xff]  ;;  %v6904_v11 = vadd.f32 %v6857_v55, %v6647_v47 }
 0x772   : > { %7224 = vst.msk [vmem:[%s14338_s19 + $0xa8] sm:$0xff] %vm16329_vm11, %v7192_v50  ;;  %v7191_v46 = vadd.f32 %v9445_v63, %v7159_v8  ;;  %v7162_v40 = vadd.f32 %v9378_v30, %v6899_v5  ;;  %v6905_v8 = vadd.f32 %v9337_v45, %v6648_v1  ;;  %v9340_v5 = vpop.f32.mrf.mxu0 }
 0x773   : > { %v7090_v53 = vpop.f32.mrf.mxu1  ;;  %v6649_v18 = vadd.f32 %v14323_v21, %v6382_v24 }
 0x774   : > { %7223 = vst.msk [vmem:[%s14338_s19 + $0xa0] sm:$0xff] %vm16333_vm13, %v7191_v46  ;;  %v7194_v22 = vadd.f32 %v9446_v32, %v7162_v40  ;;  %v7161_v42 = vadd.f32 %v7090_v53, %v6898_v25  ;;  %v6907_v40 = vadd.f32 %v9340_v5, %v6650_v58  ;;  %v6867_v25 = vpop.f32.mrf.mxu0 }
 0x775   : > { %v9381_v38 = vpop.f32.mrf.mxu1  ;;  %v6906_v53 = vadd.f32 %v6867_v25, %v6649_v18 }
 0x776   : > { %7226 = vst.msk [vmem:[%s14338_s19 + $0xb8] sm:$0xff] %vm16337_vm1, %v7194_v22  ;;  %v7193_v27 = vadd.f32 %v9447_v26, %v7161_v42  ;;  %v7164_v60 = vadd.f32 %v9381_v38, %v6901_v49  ;;  %v9455_v42 = vld [vmem:[%s9531_s14 + $0xf0] sm:$0xff] }
 0x777   : > { %v7100_v19 = vpop.f32.mrf.mxu1 }
 0x778   : > { %7225 = vst.msk [vmem:[%s14338_s19 + $0xb0] sm:$0xff] %vm16341_vm7, %v7193_v27  ;;  %v7196_v7 = vadd.f32 %v9448_v43, %v7164_v60  ;;  %v7163_v51 = vadd.f32 %v7100_v19, %v6900_v12 }
 0x779   : > { %v9384_v59 = vpop.f32.mrf.mxu1 }
 0x77a   : > { %7228 = vst.msk [vmem:[%s14338_s19 + $0xc8] sm:$0xff] %vm16344_vm8, %v7196_v7  ;;  %v7195_v31 = vadd.f32 %v9449_v37, %v7163_v51  ;;  %v7166_v41 = vadd.f32 %v9384_v59, %v6903_v10 }
 0x77b   : > { %v7110_v2 = vpop.f32.mrf.mxu1 }
 0x77c   : > { %7227 = vst.msk [vmem:[%s14338_s19 + $0xc0] sm:$0xff] %vm16347_vm4, %v7195_v31  ;;  %v7198_v34 = vadd.f32 %v9450_v54, %v7166_v41  ;;  %v7165_v50 = vadd.f32 %v7110_v2, %v6902_v33 }
 0x77d   : > { %v9387_v29 = vpop.f32.mrf.mxu1 }
 0x77e   : > { %7230 = vst.msk [vmem:[%s14338_s19 + $0xd8] sm:$0xff] %vm16348_vm10, %v7198_v34  ;;  %v7197_v61 = vadd.f32 %v9451_v56, %v7165_v50  ;;  %v7168_v30 = vadd.f32 %v9387_v29, %v6905_v8 }
 0x77f   : > { %v7120_v9 = vpop.f32.mrf.mxu1 }
 0x780   : > { %7229 = vst.msk [vmem:[%s14338_s19 + $0xd0] sm:$0xff] %vm16349_vm5, %v7197_v61  ;;  %v7200_v63 = vadd.f32 %v9452_v44, %v7168_v30  ;;  %v7167_v46 = vadd.f32 %v7120_v9, %v6904_v11 }
 0x781   : > { %v9390_v21 = vpop.f32.mrf.mxu1 }
 0x782   : > { %7232 = vst.msk [vmem:[%s14338_s19 + $0xe8] sm:$0xff] %vm16350_vm9, %v7200_v63  ;;  %v7199_v16 = vadd.f32 %v9453_v14, %v7167_v46  ;;  %v7170_v13 = vadd.f32 %v9390_v21, %v6907_v40 }
 0x783   : > { %v7130_v35 = vpop.f32.mrf.mxu1 }
 0x784   : > { %7231 = vst.msk [vmem:[%s14338_s19 + $0xe0] sm:$0xff] %vm16351_vm14, %v7199_v16  ;;  %v7202_v32 = vadd.f32 %v9454_v48, %v7170_v13  ;;  %v7169_v22 = vadd.f32 %v7130_v35, %v6906_v53 }
 0x786   : > { %7234 = vst.msk [vmem:[%s14338_s19 + $0xf8] sm:$0xff] %vm16352_vm3, %v7202_v32  ;;  %v7201_v49 = vadd.f32 %v9455_v42, %v7169_v22 }
 0x788   : > { %7233 = vst.msk [vmem:[%s14338_s19 + $0xf0] sm:$0xff] %vm16353_vm12, %v7201_v49 }
 0x789 PF: > { %s19_s30 = sadd.s32 1, %s9462_s30  }
 0x78a   : > { %p16_p4 = scmp.ge.s32.totalorder %s19_s30, 4  }
 0x78c   :  { %18 = sbr.rel (!%p16_p4) target bundleno = 1 (0x1), region = 90 }

</bundles_post_ra>
